<compile_context>
chip_gen: v7x
topology: tpu7x:2x2x1
jax: 0.10.0
libtpu: 0.0.40
codegen_flags: <defaults>
</compile_context>

<pallas_src>
import functools

import numpy as np
import jax
import jax.numpy as jnp
from jax.experimental import pallas as pl
from jax.experimental.pallas import tpu as pltpu


# ----------------------------------------------------------------------------
# helpers
# ----------------------------------------------------------------------------
def _round_up(x, m):
    return ((x + m - 1) // m) * m


def _choose_tiles(M, Kp, Np):
    Mp = _round_up(M, 8)
    if Mp <= 256:
        tm = Mp
    else:
        tm = 256
        Mp = _round_up(Mp, tm)
    tk = next(t for t in (512, 256, 128) if Kp % t == 0)
    tn = next(t for t in (512, 256, 128) if Np % t == 0)
    return Mp, tm, tk, tn


def _im2col(x, kh, kw, stride, padding):
    """x: NHWC (bf16) -> (N*OH*OW, kh*kw*C) patches, column order (kh, kw, cin)."""
    N, H, W, C = x.shape
    x_p = jnp.pad(x, ((0, 0), (padding, padding), (padding, padding), (0, 0)))
    OH = (H + 2 * padding - kh) // stride + 1
    OW = (W + 2 * padding - kw) // stride + 1
    taps = []
    for i in range(kh):
        for j in range(kw):
            taps.append(
                jax.lax.slice(
                    x_p,
                    (0, i, j, 0),
                    (N, i + stride * (OH - 1) + 1, j + stride * (OW - 1) + 1, C),
                    (1, stride, stride, 1),
                )
            )
    patches = jnp.concatenate(taps, axis=-1)  # (N, OH, OW, kh*kw*C)
    return patches.reshape(N * OH * OW, kh * kw * C), OH, OW


# ----------------------------------------------------------------------------
# Pallas kernels
# ----------------------------------------------------------------------------
def _gemm_affine_kernel(a_ref, w_ref, s_ref, b_ref, o_ref, acc_ref, *, apply_relu):
    @pl.when(pl.program_id(2) == 0)
    def _():
        acc_ref[...] = jnp.zeros_like(acc_ref)

    acc_ref[...] += jnp.dot(a_ref[...], w_ref[...],
                            preferred_element_type=jnp.float32)

    @pl.when(pl.program_id(2) == pl.num_programs(2) - 1)
    def _():
        out = acc_ref[...] * s_ref[...] + b_ref[...]
        if apply_relu:
            out = jnp.maximum(out, 0.0)
        o_ref[...] = out.astype(o_ref.dtype)


def _gemm_affine_res_kernel(a_ref, w_ref, s_ref, b_ref, r_ref, o_ref, acc_ref, *,
                            apply_relu):
    @pl.when(pl.program_id(2) == 0)
    def _():
        acc_ref[...] = jnp.zeros_like(acc_ref)

    acc_ref[...] += jnp.dot(a_ref[...], w_ref[...],
                            preferred_element_type=jnp.float32)

    @pl.when(pl.program_id(2) == pl.num_programs(2) - 1)
    def _():
        out = acc_ref[...] * s_ref[...] + b_ref[...] + r_ref[...]
        if apply_relu:
            out = jnp.maximum(out, 0.0)
        o_ref[...] = out.astype(o_ref.dtype)


def _maxpool_kernel(ee_ref, eo_ref, oe_ref, oo_ref, o_ref):
    """9-tap max (3x3, stride 2, pad 1). Inputs are the 4 row/col parity phases
    of the -inf-padded tensor, so only stride-1 static slices are needed."""
    _, OH, OW, _ = o_ref.shape
    phase = {(0, 0): ee_ref, (0, 1): eo_ref, (1, 0): oe_ref, (1, 1): oo_ref}
    out = None
    for i in range(3):
        for j in range(3):
            ref = phase[(i % 2, j % 2)]
            tap = ref[0, i // 2:i // 2 + OH, j // 2:j // 2 + OW, :]
            out = tap if out is None else jnp.maximum(out, tap)
    o_ref[0] = out


def _head_kernel(x_ref, w1_ref, b1_ref, w2_ref, o_ref):
    # backbone.fc (512->128, bias) then self.fc (128->class_num, no bias)
    h = jnp.dot(x_ref[...], w1_ref[...], preferred_element_type=jnp.float32)
    h = h + b1_ref[...]
    o_ref[...] = jnp.dot(h.astype(jnp.bfloat16), w2_ref[...],
                         preferred_element_type=jnp.float32)


# ----------------------------------------------------------------------------
# Pallas wrappers
# ----------------------------------------------------------------------------
def gemm_affine(a, w_p, scale_p, bias_p, n_out, residual=None, apply_relu=False,
                out_dtype=jnp.bfloat16):
    """relu?((a @ w_p) * scale + bias [+ residual]).
    a: (M, K) unpadded; w_p/scale_p/bias_p pre-padded at init (bf16 / f32)."""
    M, K = a.shape
    Kp, Np = w_p.shape
    Mp, tm, tk, tn = _choose_tiles(M, Kp, Np)

    a_p = jnp.pad(a.astype(jnp.bfloat16), ((0, Mp - M), (0, Kp - K)))

    in_specs = [
        pl.BlockSpec((tm, tk), lambda i, j, k: (i, k)),
        pl.BlockSpec((tk, tn), lambda i, j, k: (k, j)),
        pl.BlockSpec((1, tn), lambda i, j, k: (0, j)),
        pl.BlockSpec((1, tn), lambda i, j, k: (0, j)),
    ]
    args = [a_p, w_p, scale_p, bias_p]

    if residual is not None:
        r_p = jnp.pad(residual.astype(jnp.float32),
                      ((0, Mp - M), (0, Np - residual.shape[1])))
        in_specs.append(pl.BlockSpec((tm, tn), lambda i, j, k: (i, j)))
        args.append(r_p)
        kernel = functools.partial(_gemm_affine_res_kernel, apply_relu=apply_relu)
    else:
        kernel = functools.partial(_gemm_affine_kernel, apply_relu=apply_relu)

    out = pl.pallas_call(
        kernel,
        grid=(Mp // tm, Np // tn, Kp // tk),
        in_specs=in_specs,
        out_specs=pl.BlockSpec((tm, tn), lambda i, j, k: (i, j)),
        out_shape=jax.ShapeDtypeStruct((Mp, Np), out_dtype),
        scratch_shapes=[pltpu.VMEM((tm, tn), jnp.float32)],
        compiler_params=pltpu.CompilerParams(
            dimension_semantics=("parallel", "parallel", "arbitrary")),
    )(*args)
    return out[:M, :n_out]


def maxpool2d_3x3_s2_p1(x):
    """PyTorch MaxPool2d(kernel_size=3, stride=2, padding=1) on NHWC input."""
    N, H, W, C = x.shape
    assert H % 2 == 0 and W % 2 == 0
    OH, OW = H // 2, W // 2
    neg = jnp.array(jnp.finfo(x.dtype).min, x.dtype)
    x_p = jnp.pad(x, ((0, 0), (1, 1), (1, 1), (0, 0)), constant_values=neg)
    # 4 parity-phase views, each (N, OH+1, OW+1, C): the stride-2 decimation is
    # done once here (~1x copy) so the kernel only uses stride-1 slices.
    ee = x_p[:, 0::2, 0::2, :]
    eo = x_p[:, 0::2, 1::2, :]
    oe = x_p[:, 1::2, 0::2, :]
    oo = x_p[:, 1::2, 1::2, :]
    in_spec = pl.BlockSpec((1, OH + 1, OW + 1, C), lambda n: (n, 0, 0, 0))
    return pl.pallas_call(
        _maxpool_kernel,
        grid=(N,),
        in_specs=[in_spec] * 4,
        out_specs=pl.BlockSpec((1, OH, OW, C), lambda n: (n, 0, 0, 0)),
        out_shape=jax.ShapeDtypeStruct((N, OH, OW, C), x.dtype),
        compiler_params=pltpu.CompilerParams(dimension_semantics=("parallel",)),
    )(ee, eo, oe, oo)


def head_forward(params, feat):
    """Fused backbone.fc (512->128 + bias) and self.fc (128->class_num)."""
    N = feat.shape[0]
    Mp = _round_up(N, 8)
    x_p = jnp.pad(feat, ((0, Mp - N), (0, 0))).astype(jnp.bfloat16)
    Np = params["fc2_w"].shape[1]
    out = pl.pallas_call(
        _head_kernel,
        out_shape=jax.ShapeDtypeStruct((Mp, Np), jnp.float32),
    )(x_p, params["fc1_w"], params["fc1_b"], params["fc2_w"])
    return out[:N, :params["class_num"]]


# ----------------------------------------------------------------------------
# ResNet-18 building blocks
# ----------------------------------------------------------------------------
def conv_bn(x, cp, relu, residual=None):
    N = x.shape[0]
    patches, OH, OW = _im2col(x.astype(jnp.bfloat16), cp["kh"], cp["kw"],
                              cp["stride"], cp["padding"])
    res = None if residual is None else residual.reshape(N * OH * OW, -1)
    out = gemm_affine(patches, cp["w"], cp["s"], cp["b"], cp["cout"],
                      residual=res, apply_relu=relu, out_dtype=jnp.bfloat16)
    return out.reshape(N, OH, OW, cp["cout"])


def basic_block(x, blk):
    out = conv_bn(x, blk["conv1"], relu=True)
    if "down" in blk:
        identity = conv_bn(x, blk["down"], relu=False)
    else:
        identity = x
    # second conv + BN + residual add + ReLU fused in one Pallas GEMM kernel
    return conv_bn(out, blk["conv2"], relu=True, residual=identity)


def init_resnet18_params(key, class_num=14, num_features=128):
    keys = iter(jax.random.split(key, 512))

    def nk():
        return next(keys)

    def bn_fold(c):
        gamma = 1.0 + 0.1 * jax.random.normal(nk(), (c,), jnp.float32)
        beta = 0.1 * jax.random.normal(nk(), (c,), jnp.float32)
        mean = 0.1 * jax.random.normal(nk(), (c,), jnp.float32)
        var = 1.0 + 0.1 * jnp.abs(jax.random.normal(nk(), (c,), jnp.float32))
        scale = gamma / jnp.sqrt(var + 1e-5)
        bias = beta - mean * scale
        return scale, bias

    def conv_bn_p(kh, kw, cin, cout, stride, padding):
        fan_in = kh * kw * cin
        w = jax.random.normal(nk(), (kh, kw, cin, cout), jnp.float32) / np.sqrt(fan_in)
        scale, bias = bn_fold(cout)
        K = kh * kw * cin
        Kp = _round_up(K, 128)
        Np = _round_up(cout, 128)
        # pre-fold + pre-pad once at init: weight (Kp, Np) bf16, scale/bias (1, Np) f32
        w_p = jnp.pad(w.reshape(K, cout), ((0, Kp - K), (0, Np - cout))).astype(jnp.bfloat16)
        s_p = jnp.pad(scale.reshape(1, cout), ((0, 0), (0, Np - cout)))
        b_p = jnp.pad(bias.reshape(1, cout), ((0, 0), (0, Np - cout)))
        return {"w": w_p, "s": s_p, "b": b_p, "kh": kh, "kw": kw, "cin": cin,
                "cout": cout, "stride": stride, "padding": padding}

    p = {"class_num": class_num}
    p["conv1"] = conv_bn_p(7, 7, 3, 64, stride=2, padding=3)

    stage_cfg = [(64, 64, 1), (64, 128, 2), (128, 256, 2), (256, 512, 2)]
    p["layers"] = []
    for cin, cout, stride in stage_cfg:
        blocks = []
        for b in range(2):
            s = stride if b == 0 else 1
            bcin = cin if b == 0 else cout
            blk = {
                "conv1": conv_bn_p(3, 3, bcin, cout, stride=s, padding=1),
                "conv2": conv_bn_p(3, 3, cout, cout, stride=1, padding=1),
            }
            if s != 1 or bcin != cout:
                blk["down"] = conv_bn_p(1, 1, bcin, cout, stride=s, padding=0)
            blocks.append(blk)
        p["layers"].append(blocks)

    # backbone.fc replaced by Linear(512, 128) with bias; head Linear(128, class_num) no bias
    fc1_w = jax.random.normal(nk(), (512, num_features), jnp.float32) / np.sqrt(512)
    fc1_b = 0.01 * jax.random.normal(nk(), (num_features,), jnp.float32)
    fc2_w = jax.random.normal(nk(), (num_features, class_num), jnp.float32) / np.sqrt(num_features)
    Np2 = _round_up(class_num, 128)
    p["fc1_w"] = fc1_w.astype(jnp.bfloat16)
    p["fc1_b"] = fc1_b.reshape(1, num_features)
    p["fc2_w"] = jnp.pad(fc2_w, ((0, 0), (0, Np2 - class_num))).astype(jnp.bfloat16)
    return p


def model_forward(params, x_nchw):
    x = jnp.transpose(x_nchw, (0, 2, 3, 1)).astype(jnp.bfloat16)  # NCHW -> NHWC
    x = conv_bn(x, params["conv1"], relu=True)
    x = maxpool2d_3x3_s2_p1(x)
    for blocks in params["layers"]:
        for blk in blocks:
            x = basic_block(x, blk)
    # adaptive avg pool to 1x1 (spatial reduce) — trivial glue reduce in f32
    x = jnp.mean(x.astype(jnp.float32), axis=(1, 2))  # (N, 512)
    return head_forward(params, x)


if __name__ == "__main__":
    key = jax.random.PRNGKey(0)
    pkey, xkey = jax.random.split(key)
    params = init_resnet18_params(pkey, class_num=14, num_features=128)
    # NCHW input, like PyTorch: batch=2, 3 channels, 32x32 spatial
    x = jax.random.normal(xkey, (2, 3, 32, 32), jnp.float32)

    fwd = jax.jit(lambda inp: model_forward(params, inp))
    logits = jax.block_until_ready(fwd(x))
    assert logits.shape == (2, 14), logits.shape
    assert bool(jnp.all(jnp.isfinite(logits)))
    print("KERNEL_OK")
</pallas_src>

<mosaic_0001>
module attributes {stable_mosaic.version = 11 : i64} {
  func.func @_gemm_affine_kernel(%arg0: i32, %arg1: i32, %arg2: i32, %arg3: memref<256x256xbf16, #tpu.memory_space<vmem>>, %arg4: memref<256x128xbf16, #tpu.memory_space<vmem>>, %arg5: memref<1x128xf32, #tpu.memory_space<vmem>>, %arg6: memref<1x128xf32, #tpu.memory_space<vmem>>, %arg7: memref<256x128xbf16, #tpu.memory_space<vmem>>, %arg8: memref<256x128xf32, #tpu.memory_space<vmem>>) attributes {dimension_semantics = [#tpu.dimension_semantics<parallel>, #tpu.dimension_semantics<parallel>, #tpu.dimension_semantics<arbitrary>], iteration_bounds = array<i64: 2, 1, 1>, scalar_prefetch = 0 : i64, scratch_operands = 1 : i64, tpu.core_type = #tpu.core_type<tc>, window_params = [{transform_indices = @transform_0, window_bounds = array<i64: 256, 256>}, {transform_indices = @transform_1, window_bounds = array<i64: 256, 128>}, {transform_indices = @transform_2, window_bounds = array<i64: 1, 128>}, {transform_indices = @transform_3, window_bounds = array<i64: 1, 128>}, {transform_indices = @transform_4, window_bounds = array<i64: 256, 128>}]} {
    %c0_i32 = arith.constant 0 : i32
    %0 = arith.cmpi eq, %arg2, %c0_i32 : i32
    %1 = arith.extui %0 : i1 to i32
    %c0_i32_0 = arith.constant 0 : i32
    %2 = arith.cmpi ne, %1, %c0_i32_0 : i32
    scf.if %2 {
      %cst_10 = arith.constant 0.000000e+00 : f32
      %12 = vector.broadcast %cst_10 : f32 to vector<256x128xf32>
      %c0_11 = arith.constant 0 : index
      %c0_12 = arith.constant 0 : index
      %13 = vector.load %arg8[%c0_11, %c0_12] : memref<256x128xf32, #tpu.memory_space<vmem>>, vector<256x128xf32>
      tpu.vector_store %arg8[%c0_11, %c0_12], %12 {strides = array<i32>} : memref<256x128xf32, #tpu.memory_space<vmem>>, vector<256x128xf32>,
    } else {
    }
    %c0 = arith.constant 0 : index
    %c0_1 = arith.constant 0 : index
    %3 = vector.load %arg8[%c0, %c0_1] : memref<256x128xf32, #tpu.memory_space<vmem>>, vector<256x128xf32>
    %c0_2 = arith.constant 0 : index
    %c0_3 = arith.constant 0 : index
    %4 = vector.load %arg3[%c0_2, %c0_3] : memref<256x256xbf16, #tpu.memory_space<vmem>>, vector<256x256xbf16>
    %c0_4 = arith.constant 0 : index
    %c0_5 = arith.constant 0 : index
    %5 = vector.load %arg4[%c0_4, %c0_5] : memref<256x128xbf16, #tpu.memory_space<vmem>>, vector<256x128xbf16>
    %cst = arith.constant dense<0.000000e+00> : vector<256x128xf32>
    %6 = tpu.matmul %4, %5, %cst {dimension_numbers = #tpu.dot_dimension_numbers<[1], [0], [0], [1], [0, 0, 1, 1], [], []>} : vector<256x256xbf16>, vector<256x128xbf16>, vector<256x128xf32> -> vector<256x128xf32>
    %7 = arith.addf %3, %6 : vector<256x128xf32>
    %c0_6 = arith.constant 0 : index
    %c0_7 = arith.constant 0 : index
    %8 = vector.load %arg8[%c0_6, %c0_7] : memref<256x128xf32, #tpu.memory_space<vmem>>, vector<256x128xf32>
    tpu.vector_store %arg8[%c0_6, %c0_7], %7 {strides = array<i32>} : memref<256x128xf32, #tpu.memory_space<vmem>>, vector<256x128xf32>,
    %c0_i32_8 = arith.constant 0 : i32
    %9 = arith.cmpi eq, %arg2, %c0_i32_8 : i32
    %10 = arith.extui %9 : i1 to i32
    %c0_i32_9 = arith.constant 0 : i32
    %11 = arith.cmpi ne, %10, %c0_i32_9 : i32
    scf.if %11 {
      %c0_10 = arith.constant 0 : index
      %c0_11 = arith.constant 0 : index
      %12 = vector.load %arg8[%c0_10, %c0_11] : memref<256x128xf32, #tpu.memory_space<vmem>>, vector<256x128xf32>
      %c0_12 = arith.constant 0 : index
      %c0_13 = arith.constant 0 : index
      %13 = vector.load %arg5[%c0_12, %c0_13] : memref<1x128xf32, #tpu.memory_space<vmem>>, vector<1x128xf32>
      %14 = vector.broadcast %13 : vector<1x128xf32> to vector<256x128xf32>
      %15 = arith.mulf %12, %14 : vector<256x128xf32>
      %c0_14 = arith.constant 0 : index
      %c0_15 = arith.constant 0 : index
      %16 = vector.load %arg6[%c0_14, %c0_15] : memref<1x128xf32, #tpu.memory_space<vmem>>, vector<1x128xf32>
      %17 = vector.broadcast %16 : vector<1x128xf32> to vector<256x128xf32>
      %18 = arith.addf %15, %17 : vector<256x128xf32>
      %cst_16 = arith.constant 0.000000e+00 : f32
      %19 = vector.broadcast %cst_16 : f32 to vector<256x128xf32>
      %20 = arith.maximumf %18, %19 : vector<256x128xf32>
      %21 = arith.truncf %20 : vector<256x128xf32> to vector<256x128xbf16>
      %c0_17 = arith.constant 0 : index
      %c0_18 = arith.constant 0 : index
      %22 = vector.load %arg7[%c0_17, %c0_18] : memref<256x128xbf16, #tpu.memory_space<vmem>>, vector<256x128xbf16>
      tpu.vector_store %arg7[%c0_17, %c0_18], %21 {strides = array<i32>} : memref<256x128xbf16, #tpu.memory_space<vmem>>, vector<256x128xbf16>,
    } else {
    }
    return
  }
  func.func @transform_0(%arg0: i32, %arg1: i32, %arg2: i32) -> (i32, i32) {
    %c0_i32 = arith.constant 0 : i32
    return %arg0, %arg2 : i32, i32
  }
  func.func @transform_1(%arg0: i32, %arg1: i32, %arg2: i32) -> (i32, i32) {
    %c0_i32 = arith.constant 0 : i32
    return %arg2, %arg1 : i32, i32
  }
  func.func @transform_2(%arg0: i32, %arg1: i32, %arg2: i32) -> (i32, i32) {
    %c0_i32 = arith.constant 0 : i32
    %c0_i32_0 = arith.constant 0 : i32
    return %c0_i32, %arg1 : i32, i32
  }
  func.func @transform_3(%arg0: i32, %arg1: i32, %arg2: i32) -> (i32, i32) {
    %c0_i32 = arith.constant 0 : i32
    %c0_i32_0 = arith.constant 0 : i32
    return %c0_i32, %arg1 : i32, i32
  }
  func.func @transform_4(%arg0: i32, %arg1: i32, %arg2: i32) -> (i32, i32) {
    %c0_i32 = arith.constant 0 : i32
    return %arg0, %arg1 : i32, i32
  }
}

module attributes {stable_mosaic.version = 11 : i64} {
  func.func @_maxpool_kernel(%arg0: i32, %arg1: memref<1x9x9x64xbf16, #tpu.memory_space<vmem>>, %arg2: memref<1x9x9x64xbf16, #tpu.memory_space<vmem>>, %arg3: memref<1x9x9x64xbf16, #tpu.memory_space<vmem>>, %arg4: memref<1x9x9x64xbf16, #tpu.memory_space<vmem>>, %arg5: memref<1x8x8x64xbf16, #tpu.memory_space<vmem>>) attributes {dimension_semantics = [#tpu.dimension_semantics<parallel>], iteration_bounds = array<i64: 2>, scalar_prefetch = 0 : i64, scratch_operands = 0 : i64, tpu.core_type = #tpu.core_type<tc>, window_params = [{transform_indices = @transform_0, window_bounds = array<i64: 1, 9, 9, 64>}, {transform_indices = @transform_1, window_bounds = array<i64: 1, 9, 9, 64>}, {transform_indices = @transform_2, window_bounds = array<i64: 1, 9, 9, 64>}, {transform_indices = @transform_3, window_bounds = array<i64: 1, 9, 9, 64>}, {transform_indices = @transform_4, window_bounds = array<i64: 1, 8, 8, 64>}]} {
    %c0 = arith.constant 0 : index
    %c0_0 = arith.constant 0 : index
    %c0_1 = arith.constant 0 : index
    %c0_2 = arith.constant 0 : index
    %0 = vector.load %arg1[%c0, %c0_0, %c0_1, %c0_2] : memref<1x9x9x64xbf16, #tpu.memory_space<vmem>>, vector<1x8x8x64xbf16>
    %1 = vector.shape_cast %0 : vector<1x8x8x64xbf16> to vector<8x8x64xbf16>
    %c0_3 = arith.constant 0 : index
    %c0_4 = arith.constant 0 : index
    %c0_5 = arith.constant 0 : index
    %c0_6 = arith.constant 0 : index
    %2 = vector.load %arg2[%c0_3, %c0_4, %c0_5, %c0_6] : memref<1x9x9x64xbf16, #tpu.memory_space<vmem>>, vector<1x8x8x64xbf16>
    %3 = vector.shape_cast %2 : vector<1x8x8x64xbf16> to vector<8x8x64xbf16>
    %4 = arith.maximumf %1, %3 : vector<8x8x64xbf16>
    %c0_7 = arith.constant 0 : index
    %c0_8 = arith.constant 0 : index
    %c1 = arith.constant 1 : index
    %c0_9 = arith.constant 0 : index
    %5 = vector.load %arg1[%c0_7, %c0_8, %c1, %c0_9] : memref<1x9x9x64xbf16, #tpu.memory_space<vmem>>, vector<1x8x8x64xbf16>
    %6 = vector.shape_cast %5 : vector<1x8x8x64xbf16> to vector<8x8x64xbf16>
    %7 = arith.maximumf %4, %6 : vector<8x8x64xbf16>
    %c0_10 = arith.constant 0 : index
    %c0_11 = arith.constant 0 : index
    %c0_12 = arith.constant 0 : index
    %c0_13 = arith.constant 0 : index
    %8 = vector.load %arg3[%c0_10, %c0_11, %c0_12, %c0_13] : memref<1x9x9x64xbf16, #tpu.memory_space<vmem>>, vector<1x8x8x64xbf16>
    %9 = vector.shape_cast %8 : vector<1x8x8x64xbf16> to vector<8x8x64xbf16>
    %10 = arith.maximumf %7, %9 : vector<8x8x64xbf16>
    %c0_14 = arith.constant 0 : index
    %c0_15 = arith.constant 0 : index
    %c0_16 = arith.constant 0 : index
    %c0_17 = arith.constant 0 : index
    %11 = vector.load %arg4[%c0_14, %c0_15, %c0_16, %c0_17] : memref<1x9x9x64xbf16, #tpu.memory_space<vmem>>, vector<1x8x8x64xbf16>
    %12 = vector.shape_cast %11 : vector<1x8x8x64xbf16> to vector<8x8x64xbf16>
    %13 = arith.maximumf %10, %12 : vector<8x8x64xbf16>
    %c0_18 = arith.constant 0 : index
    %c0_19 = arith.constant 0 : index
    %c1_20 = arith.constant 1 : index
    %c0_21 = arith.constant 0 : index
    %14 = vector.load %arg3[%c0_18, %c0_19, %c1_20, %c0_21] : memref<1x9x9x64xbf16, #tpu.memory_space<vmem>>, vector<1x8x8x64xbf16>
    %15 = vector.shape_cast %14 : vector<1x8x8x64xbf16> to vector<8x8x64xbf16>
    %16 = arith.maximumf %13, %15 : vector<8x8x64xbf16>
    %c0_22 = arith.constant 0 : index
    %c1_23 = arith.constant 1 : index
    %c0_24 = arith.constant 0 : index
    %c0_25 = arith.constant 0 : index
    %17 = vector.load %arg1[%c0_22, %c1_23, %c0_24, %c0_25] : memref<1x9x9x64xbf16, #tpu.memory_space<vmem>>, vector<1x8x8x64xbf16>
    %18 = vector.shape_cast %17 : vector<1x8x8x64xbf16> to vector<8x8x64xbf16>
    %19 = arith.maximumf %16, %18 : vector<8x8x64xbf16>
    %c0_26 = arith.constant 0 : index
    %c1_27 = arith.constant 1 : index
    %c0_28 = arith.constant 0 : index
    %c0_29 = arith.constant 0 : index
    %20 = vector.load %arg2[%c0_26, %c1_27, %c0_28, %c0_29] : memref<1x9x9x64xbf16, #tpu.memory_space<vmem>>, vector<1x8x8x64xbf16>
    %21 = vector.shape_cast %20 : vector<1x8x8x64xbf16> to vector<8x8x64xbf16>
    %22 = arith.maximumf %19, %21 : vector<8x8x64xbf16>
    %c0_30 = arith.constant 0 : index
    %c1_31 = arith.constant 1 : index
    %c1_32 = arith.constant 1 : index
    %c0_33 = arith.constant 0 : index
    %23 = vector.load %arg1[%c0_30, %c1_31, %c1_32, %c0_33] : memref<1x9x9x64xbf16, #tpu.memory_space<vmem>>, vector<1x8x8x64xbf16>
    %24 = vector.shape_cast %23 : vector<1x8x8x64xbf16> to vector<8x8x64xbf16>
    %25 = arith.maximumf %22, %24 : vector<8x8x64xbf16>
    %c0_34 = arith.constant 0 : index
    %c0_35 = arith.constant 0 : index
    %c0_36 = arith.constant 0 : index
    %c0_37 = arith.constant 0 : index
    %26 = vector.load %arg5[%c0_34, %c0_35, %c0_36, %c0_37] : memref<1x8x8x64xbf16, #tpu.memory_space<vmem>>, vector<1x8x8x64xbf16>
    %27 = vector.shape_cast %26 : vector<1x8x8x64xbf16> to vector<8x8x64xbf16>
    %28 = vector.shape_cast %25 : vector<8x8x64xbf16> to vector<1x8x8x64xbf16>
    tpu.vector_store %arg5[%c0_34, %c0_35, %c0_36, %c0_37], %28 {strides = array<i32>} : memref<1x8x8x64xbf16, #tpu.memory_space<vmem>>, vector<1x8x8x64xbf16>,
    return
  }
  func.func @transform_0(%arg0: i32) -> (i32, i32, i32, i32) {
    %c0_i32 = arith.constant 0 : i32
    %c0_i32_0 = arith.constant 0 : i32
    %c0_i32_1 = arith.constant 0 : i32
    %c0_i32_2 = arith.constant 0 : i32
    return %arg0, %c0_i32, %c0_i32_0, %c0_i32_1 : i32, i32, i32, i32
  }
  func.func @transform_1(%arg0: i32) -> (i32, i32, i32, i32) {
    %c0_i32 = arith.constant 0 : i32
    %c0_i32_0 = arith.constant 0 : i32
    %c0_i32_1 = arith.constant 0 : i32
    %c0_i32_2 = arith.constant 0 : i32
    return %arg0, %c0_i32, %c0_i32_0, %c0_i32_1 : i32, i32, i32, i32
  }
  func.func @transform_2(%arg0: i32) -> (i32, i32, i32, i32) {
    %c0_i32 = arith.constant 0 : i32
    %c0_i32_0 = arith.constant 0 : i32
    %c0_i32_1 = arith.constant 0 : i32
    %c0_i32_2 = arith.constant 0 : i32
    return %arg0, %c0_i32, %c0_i32_0, %c0_i32_1 : i32, i32, i32, i32
  }
  func.func @transform_3(%arg0: i32) -> (i32, i32, i32, i32) {
    %c0_i32 = arith.constant 0 : i32
    %c0_i32_0 = arith.constant 0 : i32
    %c0_i32_1 = arith.constant 0 : i32
    %c0_i32_2 = arith.constant 0 : i32
    return %arg0, %c0_i32, %c0_i32_0, %c0_i32_1 : i32, i32, i32, i32
  }
  func.func @transform_4(%arg0: i32) -> (i32, i32, i32, i32) {
    %c0_i32 = arith.constant 0 : i32
    %c0_i32_0 = arith.constant 0 : i32
    %c0_i32_1 = arith.constant 0 : i32
    %c0_i32_2 = arith.constant 0 : i32
    return %arg0, %c0_i32, %c0_i32_0, %c0_i32_1 : i32, i32, i32, i32
  }
}

module attributes {stable_mosaic.version = 11 : i64} {
  func.func @_gemm_affine_kernel(%arg0: i32, %arg1: i32, %arg2: i32, %arg3: memref<128x128xbf16, #tpu.memory_space<vmem>>, %arg4: memref<128x128xbf16, #tpu.memory_space<vmem>>, %arg5: memref<1x128xf32, #tpu.memory_space<vmem>>, %arg6: memref<1x128xf32, #tpu.memory_space<vmem>>, %arg7: memref<128x128xbf16, #tpu.memory_space<vmem>>, %arg8: memref<128x128xf32, #tpu.memory_space<vmem>>) attributes {dimension_semantics = [#tpu.dimension_semantics<parallel>, #tpu.dimension_semantics<parallel>, #tpu.dimension_semantics<arbitrary>], iteration_bounds = array<i64: 1, 1, 5>, scalar_prefetch = 0 : i64, scratch_operands = 1 : i64, tpu.core_type = #tpu.core_type<tc>, window_params = [{transform_indices = @transform_0, window_bounds = array<i64: 128, 128>}, {transform_indices = @transform_1, window_bounds = array<i64: 128, 128>}, {transform_indices = @transform_2, window_bounds = array<i64: 1, 128>}, {transform_indices = @transform_3, window_bounds = array<i64: 1, 128>}, {transform_indices = @transform_4, window_bounds = array<i64: 128, 128>}]} {
    %c0_i32 = arith.constant 0 : i32
    %0 = arith.cmpi eq, %arg2, %c0_i32 : i32
    %1 = arith.extui %0 : i1 to i32
    %c0_i32_0 = arith.constant 0 : i32
    %2 = arith.cmpi ne, %1, %c0_i32_0 : i32
    scf.if %2 {
      %cst_9 = arith.constant 0.000000e+00 : f32
      %12 = vector.broadcast %cst_9 : f32 to vector<128x128xf32>
      %c0_10 = arith.constant 0 : index
      %c0_11 = arith.constant 0 : index
      %13 = vector.load %arg8[%c0_10, %c0_11] : memref<128x128xf32, #tpu.memory_space<vmem>>, vector<128x128xf32>
      tpu.vector_store %arg8[%c0_10, %c0_11], %12 {strides = array<i32>} : memref<128x128xf32, #tpu.memory_space<vmem>>, vector<128x128xf32>,
    } else {
    }
    %c0 = arith.constant 0 : index
    %c0_1 = arith.constant 0 : index
    %3 = vector.load %arg8[%c0, %c0_1] : memref<128x128xf32, #tpu.memory_space<vmem>>, vector<128x128xf32>
    %c0_2 = arith.constant 0 : index
    %c0_3 = arith.constant 0 : index
    %4 = vector.load %arg3[%c0_2, %c0_3] : memref<128x128xbf16, #tpu.memory_space<vmem>>, vector<128x128xbf16>
    %c0_4 = arith.constant 0 : index
    %c0_5 = arith.constant 0 : index
    %5 = vector.load %arg4[%c0_4, %c0_5] : memref<128x128xbf16, #tpu.memory_space<vmem>>, vector<128x128xbf16>
    %cst = arith.constant dense<0.000000e+00> : vector<128x128xf32>
    %6 = tpu.matmul %4, %5, %cst {dimension_numbers = #tpu.dot_dimension_numbers<[1], [0], [0], [1], [0, 0, 1, 1], [], []>} : vector<128x128xbf16>, vector<128x128xbf16>, vector<128x128xf32> -> vector<128x128xf32>
    %7 = arith.addf %3, %6 : vector<128x128xf32>
    %c0_6 = arith.constant 0 : index
    %c0_7 = arith.constant 0 : index
    %8 = vector.load %arg8[%c0_6, %c0_7] : memref<128x128xf32, #tpu.memory_space<vmem>>, vector<128x128xf32>
    tpu.vector_store %arg8[%c0_6, %c0_7], %7 {strides = array<i32>} : memref<128x128xf32, #tpu.memory_space<vmem>>, vector<128x128xf32>,
    %c4_i32 = arith.constant 4 : i32
    %9 = arith.cmpi eq, %arg2, %c4_i32 : i32
    %10 = arith.extui %9 : i1 to i32
    %c0_i32_8 = arith.constant 0 : i32
    %11 = arith.cmpi ne, %10, %c0_i32_8 : i32
    scf.if %11 {
      %c0_9 = arith.constant 0 : index
      %c0_10 = arith.constant 0 : index
      %12 = vector.load %arg8[%c0_9, %c0_10] : memref<128x128xf32, #tpu.memory_space<vmem>>, vector<128x128xf32>
      %c0_11 = arith.constant 0 : index
      %c0_12 = arith.constant 0 : index
      %13 = vector.load %arg5[%c0_11, %c0_12] : memref<1x128xf32, #tpu.memory_space<vmem>>, vector<1x128xf32>
      %14 = vector.broadcast %13 : vector<1x128xf32> to vector<128x128xf32>
      %15 = arith.mulf %12, %14 : vector<128x128xf32>
      %c0_13 = arith.constant 0 : index
      %c0_14 = arith.constant 0 : index
      %16 = vector.load %arg6[%c0_13, %c0_14] : memref<1x128xf32, #tpu.memory_space<vmem>>, vector<1x128xf32>
      %17 = vector.broadcast %16 : vector<1x128xf32> to vector<128x128xf32>
      %18 = arith.addf %15, %17 : vector<128x128xf32>
      %cst_15 = arith.constant 0.000000e+00 : f32
      %19 = vector.broadcast %cst_15 : f32 to vector<128x128xf32>
      %20 = arith.maximumf %18, %19 : vector<128x128xf32>
      %21 = arith.truncf %20 : vector<128x128xf32> to vector<128x128xbf16>
      %c0_16 = arith.constant 0 : index
      %c0_17 = arith.constant 0 : index
      %22 = vector.load %arg7[%c0_16, %c0_17] : memref<128x128xbf16, #tpu.memory_space<vmem>>, vector<128x128xbf16>
      tpu.vector_store %arg7[%c0_16, %c0_17], %21 {strides = array<i32>} : memref<128x128xbf16, #tpu.memory_space<vmem>>, vector<128x128xbf16>,
    } else {
    }
    return
  }
  func.func @transform_0(%arg0: i32, %arg1: i32, %arg2: i32) -> (i32, i32) {
    %c0_i32 = arith.constant 0 : i32
    return %arg0, %arg2 : i32, i32
  }
  func.func @transform_1(%arg0: i32, %arg1: i32, %arg2: i32) -> (i32, i32) {
    %c0_i32 = arith.constant 0 : i32
    return %arg2, %arg1 : i32, i32
  }
  func.func @transform_2(%arg0: i32, %arg1: i32, %arg2: i32) -> (i32, i32) {
    %c0_i32 = arith.constant 0 : i32
    %c0_i32_0 = arith.constant 0 : i32
    return %c0_i32, %arg1 : i32, i32
  }
  func.func @transform_3(%arg0: i32, %arg1: i32, %arg2: i32) -> (i32, i32) {
    %c0_i32 = arith.constant 0 : i32
    %c0_i32_0 = arith.constant 0 : i32
    return %c0_i32, %arg1 : i32, i32
  }
  func.func @transform_4(%arg0: i32, %arg1: i32, %arg2: i32) -> (i32, i32) {
    %c0_i32 = arith.constant 0 : i32
    return %arg0, %arg1 : i32, i32
  }
}

module attributes {stable_mosaic.version = 11 : i64} {
  func.func @_gemm_affine_res_kernel(%arg0: i32, %arg1: i32, %arg2: i32, %arg3: memref<128x128xbf16, #tpu.memory_space<vmem>>, %arg4: memref<128x128xbf16, #tpu.memory_space<vmem>>, %arg5: memref<1x128xf32, #tpu.memory_space<vmem>>, %arg6: memref<1x128xf32, #tpu.memory_space<vmem>>, %arg7: memref<128x128xf32, #tpu.memory_space<vmem>>, %arg8: memref<128x128xbf16, #tpu.memory_space<vmem>>, %arg9: memref<128x128xf32, #tpu.memory_space<vmem>>) attributes {dimension_semantics = [#tpu.dimension_semantics<parallel>, #tpu.dimension_semantics<parallel>, #tpu.dimension_semantics<arbitrary>], iteration_bounds = array<i64: 1, 1, 5>, scalar_prefetch = 0 : i64, scratch_operands = 1 : i64, tpu.core_type = #tpu.core_type<tc>, window_params = [{transform_indices = @transform_0, window_bounds = array<i64: 128, 128>}, {transform_indices = @transform_1, window_bounds = array<i64: 128, 128>}, {transform_indices = @transform_2, window_bounds = array<i64: 1, 128>}, {transform_indices = @transform_3, window_bounds = array<i64: 1, 128>}, {transform_indices = @transform_4, window_bounds = array<i64: 128, 128>}, {transform_indices = @transform_5, window_bounds = array<i64: 128, 128>}]} {
    %c0_i32 = arith.constant 0 : i32
    %0 = arith.cmpi eq, %arg2, %c0_i32 : i32
    %1 = arith.extui %0 : i1 to i32
    %c0_i32_0 = arith.constant 0 : i32
    %2 = arith.cmpi ne, %1, %c0_i32_0 : i32
    scf.if %2 {
      %cst_9 = arith.constant 0.000000e+00 : f32
      %12 = vector.broadcast %cst_9 : f32 to vector<128x128xf32>
      %c0_10 = arith.constant 0 : index
      %c0_11 = arith.constant 0 : index
      %13 = vector.load %arg9[%c0_10, %c0_11] : memref<128x128xf32, #tpu.memory_space<vmem>>, vector<128x128xf32>
      tpu.vector_store %arg9[%c0_10, %c0_11], %12 {strides = array<i32>} : memref<128x128xf32, #tpu.memory_space<vmem>>, vector<128x128xf32>,
    } else {
    }
    %c0 = arith.constant 0 : index
    %c0_1 = arith.constant 0 : index
    %3 = vector.load %arg9[%c0, %c0_1] : memref<128x128xf32, #tpu.memory_space<vmem>>, vector<128x128xf32>
    %c0_2 = arith.constant 0 : index
    %c0_3 = arith.constant 0 : index
    %4 = vector.load %arg3[%c0_2, %c0_3] : memref<128x128xbf16, #tpu.memory_space<vmem>>, vector<128x128xbf16>
    %c0_4 = arith.constant 0 : index
    %c0_5 = arith.constant 0 : index
    %5 = vector.load %arg4[%c0_4, %c0_5] : memref<128x128xbf16, #tpu.memory_space<vmem>>, vector<128x128xbf16>
    %cst = arith.constant dense<0.000000e+00> : vector<128x128xf32>
    %6 = tpu.matmul %4, %5, %cst {dimension_numbers = #tpu.dot_dimension_numbers<[1], [0], [0], [1], [0, 0, 1, 1], [], []>} : vector<128x128xbf16>, vector<128x128xbf16>, vector<128x128xf32> -> vector<128x128xf32>
    %7 = arith.addf %3, %6 : vector<128x128xf32>
    %c0_6 = arith.constant 0 : index
    %c0_7 = arith.constant 0 : index
    %8 = vector.load %arg9[%c0_6, %c0_7] : memref<128x128xf32, #tpu.memory_space<vmem>>, vector<128x128xf32>
    tpu.vector_store %arg9[%c0_6, %c0_7], %7 {strides = array<i32>} : memref<128x128xf32, #tpu.memory_space<vmem>>, vector<128x128xf32>,
    %c4_i32 = arith.constant 4 : i32
    %9 = arith.cmpi eq, %arg2, %c4_i32 : i32
    %10 = arith.extui %9 : i1 to i32
    %c0_i32_8 = arith.constant 0 : i32
    %11 = arith.cmpi ne, %10, %c0_i32_8 : i32
    scf.if %11 {
      %c0_9 = arith.constant 0 : index
      %c0_10 = arith.constant 0 : index
      %12 = vector.load %arg9[%c0_9, %c0_10] : memref<128x128xf32, #tpu.memory_space<vmem>>, vector<128x128xf32>
      %c0_11 = arith.constant 0 : index
      %c0_12 = arith.constant 0 : index
      %13 = vector.load %arg5[%c0_11, %c0_12] : memref<1x128xf32, #tpu.memory_space<vmem>>, vector<1x128xf32>
      %14 = vector.broadcast %13 : vector<1x128xf32> to vector<128x128xf32>
      %15 = arith.mulf %12, %14 : vector<128x128xf32>
      %c0_13 = arith.constant 0 : index
      %c0_14 = arith.constant 0 : index
      %16 = vector.load %arg6[%c0_13, %c0_14] : memref<1x128xf32, #tpu.memory_space<vmem>>, vector<1x128xf32>
      %17 = vector.broadcast %16 : vector<1x128xf32> to vector<128x128xf32>
      %18 = arith.addf %15, %17 : vector<128x128xf32>
      %c0_15 = arith.constant 0 : index
      %c0_16 = arith.constant 0 : index
      %19 = vector.load %arg7[%c0_15, %c0_16] : memref<128x128xf32, #tpu.memory_space<vmem>>, vector<128x128xf32>
      %20 = arith.addf %18, %19 : vector<128x128xf32>
      %cst_17 = arith.constant 0.000000e+00 : f32
      %21 = vector.broadcast %cst_17 : f32 to vector<128x128xf32>
      %22 = arith.maximumf %20, %21 : vector<128x128xf32>
      %23 = arith.truncf %22 : vector<128x128xf32> to vector<128x128xbf16>
      %c0_18 = arith.constant 0 : index
      %c0_19 = arith.constant 0 : index
      %24 = vector.load %arg8[%c0_18, %c0_19] : memref<128x128xbf16, #tpu.memory_space<vmem>>, vector<128x128xbf16>
      tpu.vector_store %arg8[%c0_18, %c0_19], %23 {strides = array<i32>} : memref<128x128xbf16, #tpu.memory_space<vmem>>, vector<128x128xbf16>,
    } else {
    }
    return
  }
  func.func @transform_0(%arg0: i32, %arg1: i32, %arg2: i32) -> (i32, i32) {
    %c0_i32 = arith.constant 0 : i32
    return %arg0, %arg2 : i32, i32
  }
  func.func @transform_1(%arg0: i32, %arg1: i32, %arg2: i32) -> (i32, i32) {
    %c0_i32 = arith.constant 0 : i32
    return %arg2, %arg1 : i32, i32
  }
  func.func @transform_2(%arg0: i32, %arg1: i32, %arg2: i32) -> (i32, i32) {
    %c0_i32 = arith.constant 0 : i32
    %c0_i32_0 = arith.constant 0 : i32
    return %c0_i32, %arg1 : i32, i32
  }
  func.func @transform_3(%arg0: i32, %arg1: i32, %arg2: i32) -> (i32, i32) {
    %c0_i32 = arith.constant 0 : i32
    %c0_i32_0 = arith.constant 0 : i32
    return %c0_i32, %arg1 : i32, i32
  }
  func.func @transform_4(%arg0: i32, %arg1: i32, %arg2: i32) -> (i32, i32) {
    %c0_i32 = arith.constant 0 : i32
    return %arg0, %arg1 : i32, i32
  }
  func.func @transform_5(%arg0: i32, %arg1: i32, %arg2: i32) -> (i32, i32) {
    %c0_i32 = arith.constant 0 : i32
    return %arg0, %arg1 : i32, i32
  }
}

module attributes {stable_mosaic.version = 11 : i64} {
  func.func @_gemm_affine_kernel(%arg0: i32, %arg1: i32, %arg2: i32, %arg3: memref<32x128xbf16, #tpu.memory_space<vmem>>, %arg4: memref<128x128xbf16, #tpu.memory_space<vmem>>, %arg5: memref<1x128xf32, #tpu.memory_space<vmem>>, %arg6: memref<1x128xf32, #tpu.memory_space<vmem>>, %arg7: memref<32x128xbf16, #tpu.memory_space<vmem>>, %arg8: memref<32x128xf32, #tpu.memory_space<vmem>>) attributes {dimension_semantics = [#tpu.dimension_semantics<parallel>, #tpu.dimension_semantics<parallel>, #tpu.dimension_semantics<arbitrary>], iteration_bounds = array<i64: 1, 1, 5>, scalar_prefetch = 0 : i64, scratch_operands = 1 : i64, tpu.core_type = #tpu.core_type<tc>, window_params = [{transform_indices = @transform_0, window_bounds = array<i64: 32, 128>}, {transform_indices = @transform_1, window_bounds = array<i64: 128, 128>}, {transform_indices = @transform_2, window_bounds = array<i64: 1, 128>}, {transform_indices = @transform_3, window_bounds = array<i64: 1, 128>}, {transform_indices = @transform_4, window_bounds = array<i64: 32, 128>}]} {
    %c0_i32 = arith.constant 0 : i32
    %0 = arith.cmpi eq, %arg2, %c0_i32 : i32
    %1 = arith.extui %0 : i1 to i32
    %c0_i32_0 = arith.constant 0 : i32
    %2 = arith.cmpi ne, %1, %c0_i32_0 : i32
    scf.if %2 {
      %cst_9 = arith.constant 0.000000e+00 : f32
      %12 = vector.broadcast %cst_9 : f32 to vector<32x128xf32>
      %c0_10 = arith.constant 0 : index
      %c0_11 = arith.constant 0 : index
      %13 = vector.load %arg8[%c0_10, %c0_11] : memref<32x128xf32, #tpu.memory_space<vmem>>, vector<32x128xf32>
      tpu.vector_store %arg8[%c0_10, %c0_11], %12 {strides = array<i32>} : memref<32x128xf32, #tpu.memory_space<vmem>>, vector<32x128xf32>,
    } else {
    }
    %c0 = arith.constant 0 : index
    %c0_1 = arith.constant 0 : index
    %3 = vector.load %arg8[%c0, %c0_1] : memref<32x128xf32, #tpu.memory_space<vmem>>, vector<32x128xf32>
    %c0_2 = arith.constant 0 : index
    %c0_3 = arith.constant 0 : index
    %4 = vector.load %arg3[%c0_2, %c0_3] : memref<32x128xbf16, #tpu.memory_space<vmem>>, vector<32x128xbf16>
    %c0_4 = arith.constant 0 : index
    %c0_5 = arith.constant 0 : index
    %5 = vector.load %arg4[%c0_4, %c0_5] : memref<128x128xbf16, #tpu.memory_space<vmem>>, vector<128x128xbf16>
    %cst = arith.constant dense<0.000000e+00> : vector<32x128xf32>
    %6 = tpu.matmul %4, %5, %cst {dimension_numbers = #tpu.dot_dimension_numbers<[1], [0], [0], [1], [0, 0, 1, 1], [], []>} : vector<32x128xbf16>, vector<128x128xbf16>, vector<32x128xf32> -> vector<32x128xf32>
    %7 = arith.addf %3, %6 : vector<32x128xf32>
    %c0_6 = arith.constant 0 : index
    %c0_7 = arith.constant 0 : index
    %8 = vector.load %arg8[%c0_6, %c0_7] : memref<32x128xf32, #tpu.memory_space<vmem>>, vector<32x128xf32>
    tpu.vector_store %arg8[%c0_6, %c0_7], %7 {strides = array<i32>} : memref<32x128xf32, #tpu.memory_space<vmem>>, vector<32x128xf32>,
    %c4_i32 = arith.constant 4 : i32
    %9 = arith.cmpi eq, %arg2, %c4_i32 : i32
    %10 = arith.extui %9 : i1 to i32
    %c0_i32_8 = arith.constant 0 : i32
    %11 = arith.cmpi ne, %10, %c0_i32_8 : i32
    scf.if %11 {
      %c0_9 = arith.constant 0 : index
      %c0_10 = arith.constant 0 : index
      %12 = vector.load %arg8[%c0_9, %c0_10] : memref<32x128xf32, #tpu.memory_space<vmem>>, vector<32x128xf32>
      %c0_11 = arith.constant 0 : index
      %c0_12 = arith.constant 0 : index
      %13 = vector.load %arg5[%c0_11, %c0_12] : memref<1x128xf32, #tpu.memory_space<vmem>>, vector<1x128xf32>
      %14 = vector.broadcast %13 : vector<1x128xf32> to vector<32x128xf32>
      %15 = arith.mulf %12, %14 : vector<32x128xf32>
      %c0_13 = arith.constant 0 : index
      %c0_14 = arith.constant 0 : index
      %16 = vector.load %arg6[%c0_13, %c0_14] : memref<1x128xf32, #tpu.memory_space<vmem>>, vector<1x128xf32>
      %17 = vector.broadcast %16 : vector<1x128xf32> to vector<32x128xf32>
      %18 = arith.addf %15, %17 : vector<32x128xf32>
      %cst_15 = arith.constant 0.000000e+00 : f32
      %19 = vector.broadcast %cst_15 : f32 to vector<32x128xf32>
      %20 = arith.maximumf %18, %19 : vector<32x128xf32>
      %21 = arith.truncf %20 : vector<32x128xf32> to vector<32x128xbf16>
      %c0_16 = arith.constant 0 : index
      %c0_17 = arith.constant 0 : index
      %22 = vector.load %arg7[%c0_16, %c0_17] : memref<32x128xbf16, #tpu.memory_space<vmem>>, vector<32x128xbf16>
      tpu.vector_store %arg7[%c0_16, %c0_17], %21 {strides = array<i32>} : memref<32x128xbf16, #tpu.memory_space<vmem>>, vector<32x128xbf16>,
    } else {
    }
    return
  }
  func.func @transform_0(%arg0: i32, %arg1: i32, %arg2: i32) -> (i32, i32) {
    %c0_i32 = arith.constant 0 : i32
    return %arg0, %arg2 : i32, i32
  }
  func.func @transform_1(%arg0: i32, %arg1: i32, %arg2: i32) -> (i32, i32) {
    %c0_i32 = arith.constant 0 : i32
    return %arg2, %arg1 : i32, i32
  }
  func.func @transform_2(%arg0: i32, %arg1: i32, %arg2: i32) -> (i32, i32) {
    %c0_i32 = arith.constant 0 : i32
    %c0_i32_0 = arith.constant 0 : i32
    return %c0_i32, %arg1 : i32, i32
  }
  func.func @transform_3(%arg0: i32, %arg1: i32, %arg2: i32) -> (i32, i32) {
    %c0_i32 = arith.constant 0 : i32
    %c0_i32_0 = arith.constant 0 : i32
    return %c0_i32, %arg1 : i32, i32
  }
  func.func @transform_4(%arg0: i32, %arg1: i32, %arg2: i32) -> (i32, i32) {
    %c0_i32 = arith.constant 0 : i32
    return %arg0, %arg1 : i32, i32
  }
}

module attributes {stable_mosaic.version = 11 : i64} {
  func.func @_gemm_affine_kernel(%arg0: i32, %arg1: i32, %arg2: i32, %arg3: memref<32x128xbf16, #tpu.memory_space<vmem>>, %arg4: memref<128x128xbf16, #tpu.memory_space<vmem>>, %arg5: memref<1x128xf32, #tpu.memory_space<vmem>>, %arg6: memref<1x128xf32, #tpu.memory_space<vmem>>, %arg7: memref<32x128xbf16, #tpu.memory_space<vmem>>, %arg8: memref<32x128xf32, #tpu.memory_space<vmem>>) attributes {dimension_semantics = [#tpu.dimension_semantics<parallel>, #tpu.dimension_semantics<parallel>, #tpu.dimension_semantics<arbitrary>], iteration_bounds = array<i64: 1, 1, 1>, scalar_prefetch = 0 : i64, scratch_operands = 1 : i64, tpu.core_type = #tpu.core_type<tc>, window_params = [{transform_indices = @transform_0, window_bounds = array<i64: 32, 128>}, {transform_indices = @transform_1, window_bounds = array<i64: 128, 128>}, {transform_indices = @transform_2, window_bounds = array<i64: 1, 128>}, {transform_indices = @transform_3, window_bounds = array<i64: 1, 128>}, {transform_indices = @transform_4, window_bounds = array<i64: 32, 128>}]} {
    %c0_i32 = arith.constant 0 : i32
    %0 = arith.cmpi eq, %arg2, %c0_i32 : i32
    %1 = arith.extui %0 : i1 to i32
    %c0_i32_0 = arith.constant 0 : i32
    %2 = arith.cmpi ne, %1, %c0_i32_0 : i32
    scf.if %2 {
      %cst_10 = arith.constant 0.000000e+00 : f32
      %12 = vector.broadcast %cst_10 : f32 to vector<32x128xf32>
      %c0_11 = arith.constant 0 : index
      %c0_12 = arith.constant 0 : index
      %13 = vector.load %arg8[%c0_11, %c0_12] : memref<32x128xf32, #tpu.memory_space<vmem>>, vector<32x128xf32>
      tpu.vector_store %arg8[%c0_11, %c0_12], %12 {strides = array<i32>} : memref<32x128xf32, #tpu.memory_space<vmem>>, vector<32x128xf32>,
    } else {
    }
    %c0 = arith.constant 0 : index
    %c0_1 = arith.constant 0 : index
    %3 = vector.load %arg8[%c0, %c0_1] : memref<32x128xf32, #tpu.memory_space<vmem>>, vector<32x128xf32>
    %c0_2 = arith.constant 0 : index
    %c0_3 = arith.constant 0 : index
    %4 = vector.load %arg3[%c0_2, %c0_3] : memref<32x128xbf16, #tpu.memory_space<vmem>>, vector<32x128xbf16>
    %c0_4 = arith.constant 0 : index
    %c0_5 = arith.constant 0 : index
    %5 = vector.load %arg4[%c0_4, %c0_5] : memref<128x128xbf16, #tpu.memory_space<vmem>>, vector<128x128xbf16>
    %cst = arith.constant dense<0.000000e+00> : vector<32x128xf32>
    %6 = tpu.matmul %4, %5, %cst {dimension_numbers = #tpu.dot_dimension_numbers<[1], [0], [0], [1], [0, 0, 1, 1], [], []>} : vector<32x128xbf16>, vector<128x128xbf16>, vector<32x128xf32> -> vector<32x128xf32>
    %7 = arith.addf %3, %6 : vector<32x128xf32>
    %c0_6 = arith.constant 0 : index
    %c0_7 = arith.constant 0 : index
    %8 = vector.load %arg8[%c0_6, %c0_7] : memref<32x128xf32, #tpu.memory_space<vmem>>, vector<32x128xf32>
    tpu.vector_store %arg8[%c0_6, %c0_7], %7 {strides = array<i32>} : memref<32x128xf32, #tpu.memory_space<vmem>>, vector<32x128xf32>,
    %c0_i32_8 = arith.constant 0 : i32
    %9 = arith.cmpi eq, %arg2, %c0_i32_8 : i32
    %10 = arith.extui %9 : i1 to i32
    %c0_i32_9 = arith.constant 0 : i32
    %11 = arith.cmpi ne, %10, %c0_i32_9 : i32
    scf.if %11 {
      %c0_10 = arith.constant 0 : index
      %c0_11 = arith.constant 0 : index
      %12 = vector.load %arg8[%c0_10, %c0_11] : memref<32x128xf32, #tpu.memory_space<vmem>>, vector<32x128xf32>
      %c0_12 = arith.constant 0 : index
      %c0_13 = arith.constant 0 : index
      %13 = vector.load %arg5[%c0_12, %c0_13] : memref<1x128xf32, #tpu.memory_space<vmem>>, vector<1x128xf32>
      %14 = vector.broadcast %13 : vector<1x128xf32> to vector<32x128xf32>
      %15 = arith.mulf %12, %14 : vector<32x128xf32>
      %c0_14 = arith.constant 0 : index
      %c0_15 = arith.constant 0 : index
      %16 = vector.load %arg6[%c0_14, %c0_15] : memref<1x128xf32, #tpu.memory_space<vmem>>, vector<1x128xf32>
      %17 = vector.broadcast %16 : vector<1x128xf32> to vector<32x128xf32>
      %18 = arith.addf %15, %17 : vector<32x128xf32>
      %19 = arith.truncf %18 : vector<32x128xf32> to vector<32x128xbf16>
      %c0_16 = arith.constant 0 : index
      %c0_17 = arith.constant 0 : index
      %20 = vector.load %arg7[%c0_16, %c0_17] : memref<32x128xbf16, #tpu.memory_space<vmem>>, vector<32x128xbf16>
      tpu.vector_store %arg7[%c0_16, %c0_17], %19 {strides = array<i32>} : memref<32x128xbf16, #tpu.memory_space<vmem>>, vector<32x128xbf16>,
    } else {
    }
    return
  }
  func.func @transform_0(%arg0: i32, %arg1: i32, %arg2: i32) -> (i32, i32) {
    %c0_i32 = arith.constant 0 : i32
    return %arg0, %arg2 : i32, i32
  }
  func.func @transform_1(%arg0: i32, %arg1: i32, %arg2: i32) -> (i32, i32) {
    %c0_i32 = arith.constant 0 : i32
    return %arg2, %arg1 : i32, i32
  }
  func.func @transform_2(%arg0: i32, %arg1: i32, %arg2: i32) -> (i32, i32) {
    %c0_i32 = arith.constant 0 : i32
    %c0_i32_0 = arith.constant 0 : i32
    return %c0_i32, %arg1 : i32, i32
  }
  func.func @transform_3(%arg0: i32, %arg1: i32, %arg2: i32) -> (i32, i32) {
    %c0_i32 = arith.constant 0 : i32
    %c0_i32_0 = arith.constant 0 : i32
    return %c0_i32, %arg1 : i32, i32
  }
  func.func @transform_4(%arg0: i32, %arg1: i32, %arg2: i32) -> (i32, i32) {
    %c0_i32 = arith.constant 0 : i32
    return %arg0, %arg1 : i32, i32
  }
}

module attributes {stable_mosaic.version = 11 : i64} {
  func.func @_gemm_affine_res_kernel(%arg0: i32, %arg1: i32, %arg2: i32, %arg3: memref<32x128xbf16, #tpu.memory_space<vmem>>, %arg4: memref<128x128xbf16, #tpu.memory_space<vmem>>, %arg5: memref<1x128xf32, #tpu.memory_space<vmem>>, %arg6: memref<1x128xf32, #tpu.memory_space<vmem>>, %arg7: memref<32x128xf32, #tpu.memory_space<vmem>>, %arg8: memref<32x128xbf16, #tpu.memory_space<vmem>>, %arg9: memref<32x128xf32, #tpu.memory_space<vmem>>) attributes {dimension_semantics = [#tpu.dimension_semantics<parallel>, #tpu.dimension_semantics<parallel>, #tpu.dimension_semantics<arbitrary>], iteration_bounds = array<i64: 1, 1, 9>, scalar_prefetch = 0 : i64, scratch_operands = 1 : i64, tpu.core_type = #tpu.core_type<tc>, window_params = [{transform_indices = @transform_0, window_bounds = array<i64: 32, 128>}, {transform_indices = @transform_1, window_bounds = array<i64: 128, 128>}, {transform_indices = @transform_2, window_bounds = array<i64: 1, 128>}, {transform_indices = @transform_3, window_bounds = array<i64: 1, 128>}, {transform_indices = @transform_4, window_bounds = array<i64: 32, 128>}, {transform_indices = @transform_5, window_bounds = array<i64: 32, 128>}]} {
    %c0_i32 = arith.constant 0 : i32
    %0 = arith.cmpi eq, %arg2, %c0_i32 : i32
    %1 = arith.extui %0 : i1 to i32
    %c0_i32_0 = arith.constant 0 : i32
    %2 = arith.cmpi ne, %1, %c0_i32_0 : i32
    scf.if %2 {
      %cst_9 = arith.constant 0.000000e+00 : f32
      %12 = vector.broadcast %cst_9 : f32 to vector<32x128xf32>
      %c0_10 = arith.constant 0 : index
      %c0_11 = arith.constant 0 : index
      %13 = vector.load %arg9[%c0_10, %c0_11] : memref<32x128xf32, #tpu.memory_space<vmem>>, vector<32x128xf32>
      tpu.vector_store %arg9[%c0_10, %c0_11], %12 {strides = array<i32>} : memref<32x128xf32, #tpu.memory_space<vmem>>, vector<32x128xf32>,
    } else {
    }
    %c0 = arith.constant 0 : index
    %c0_1 = arith.constant 0 : index
    %3 = vector.load %arg9[%c0, %c0_1] : memref<32x128xf32, #tpu.memory_space<vmem>>, vector<32x128xf32>
    %c0_2 = arith.constant 0 : index
    %c0_3 = arith.constant 0 : index
    %4 = vector.load %arg3[%c0_2, %c0_3] : memref<32x128xbf16, #tpu.memory_space<vmem>>, vector<32x128xbf16>
    %c0_4 = arith.constant 0 : index
    %c0_5 = arith.constant 0 : index
    %5 = vector.load %arg4[%c0_4, %c0_5] : memref<128x128xbf16, #tpu.memory_space<vmem>>, vector<128x128xbf16>
    %cst = arith.constant dense<0.000000e+00> : vector<32x128xf32>
    %6 = tpu.matmul %4, %5, %cst {dimension_numbers = #tpu.dot_dimension_numbers<[1], [0], [0], [1], [0, 0, 1, 1], [], []>} : vector<32x128xbf16>, vector<128x128xbf16>, vector<32x128xf32> -> vector<32x128xf32>
    %7 = arith.addf %3, %6 : vector<32x128xf32>
    %c0_6 = arith.constant 0 : index
    %c0_7 = arith.constant 0 : index
    %8 = vector.load %arg9[%c0_6, %c0_7] : memref<32x128xf32, #tpu.memory_space<vmem>>, vector<32x128xf32>
    tpu.vector_store %arg9[%c0_6, %c0_7], %7 {strides = array<i32>} : memref<32x128xf32, #tpu.memory_space<vmem>>, vector<32x128xf32>,
    %c8_i32 = arith.constant 8 : i32
    %9 = arith.cmpi eq, %arg2, %c8_i32 : i32
    %10 = arith.extui %9 : i1 to i32
    %c0_i32_8 = arith.constant 0 : i32
    %11 = arith.cmpi ne, %10, %c0_i32_8 : i32
    scf.if %11 {
      %c0_9 = arith.constant 0 : index
      %c0_10 = arith.constant 0 : index
      %12 = vector.load %arg9[%c0_9, %c0_10] : memref<32x128xf32, #tpu.memory_space<vmem>>, vector<32x128xf32>
      %c0_11 = arith.constant 0 : index
      %c0_12 = arith.constant 0 : index
      %13 = vector.load %arg5[%c0_11, %c0_12] : memref<1x128xf32, #tpu.memory_space<vmem>>, vector<1x128xf32>
      %14 = vector.broadcast %13 : vector<1x128xf32> to vector<32x128xf32>
      %15 = arith.mulf %12, %14 : vector<32x128xf32>
      %c0_13 = arith.constant 0 : index
      %c0_14 = arith.constant 0 : index
      %16 = vector.load %arg6[%c0_13, %c0_14] : memref<1x128xf32, #tpu.memory_space<vmem>>, vector<1x128xf32>
      %17 = vector.broadcast %16 : vector<1x128xf32> to vector<32x128xf32>
      %18 = arith.addf %15, %17 : vector<32x128xf32>
      %c0_15 = arith.constant 0 : index
      %c0_16 = arith.constant 0 : index
      %19 = vector.load %arg7[%c0_15, %c0_16] : memref<32x128xf32, #tpu.memory_space<vmem>>, vector<32x128xf32>
      %20 = arith.addf %18, %19 : vector<32x128xf32>
      %cst_17 = arith.constant 0.000000e+00 : f32
      %21 = vector.broadcast %cst_17 : f32 to vector<32x128xf32>
      %22 = arith.maximumf %20, %21 : vector<32x128xf32>
      %23 = arith.truncf %22 : vector<32x128xf32> to vector<32x128xbf16>
      %c0_18 = arith.constant 0 : index
      %c0_19 = arith.constant 0 : index
      %24 = vector.load %arg8[%c0_18, %c0_19] : memref<32x128xbf16, #tpu.memory_space<vmem>>, vector<32x128xbf16>
      tpu.vector_store %arg8[%c0_18, %c0_19], %23 {strides = array<i32>} : memref<32x128xbf16, #tpu.memory_space<vmem>>, vector<32x128xbf16>,
    } else {
    }
    return
  }
  func.func @transform_0(%arg0: i32, %arg1: i32, %arg2: i32) -> (i32, i32) {
    %c0_i32 = arith.constant 0 : i32
    return %arg0, %arg2 : i32, i32
  }
  func.func @transform_1(%arg0: i32, %arg1: i32, %arg2: i32) -> (i32, i32) {
    %c0_i32 = arith.constant 0 : i32
    return %arg2, %arg1 : i32, i32
  }
  func.func @transform_2(%arg0: i32, %arg1: i32, %arg2: i32) -> (i32, i32) {
    %c0_i32 = arith.constant 0 : i32
    %c0_i32_0 = arith.constant 0 : i32
    return %c0_i32, %arg1 : i32, i32
  }
  func.func @transform_3(%arg0: i32, %arg1: i32, %arg2: i32) -> (i32, i32) {
    %c0_i32 = arith.constant 0 : i32
    %c0_i32_0 = arith.constant 0 : i32
    return %c0_i32, %arg1 : i32, i32
  }
  func.func @transform_4(%arg0: i32, %arg1: i32, %arg2: i32) -> (i32, i32) {
    %c0_i32 = arith.constant 0 : i32
    return %arg0, %arg1 : i32, i32
  }
  func.func @transform_5(%arg0: i32, %arg1: i32, %arg2: i32) -> (i32, i32) {
    %c0_i32 = arith.constant 0 : i32
    return %arg0, %arg1 : i32, i32
  }
}

module attributes {stable_mosaic.version = 11 : i64} {
  func.func @_gemm_affine_kernel(%arg0: i32, %arg1: i32, %arg2: i32, %arg3: memref<32x128xbf16, #tpu.memory_space<vmem>>, %arg4: memref<128x128xbf16, #tpu.memory_space<vmem>>, %arg5: memref<1x128xf32, #tpu.memory_space<vmem>>, %arg6: memref<1x128xf32, #tpu.memory_space<vmem>>, %arg7: memref<32x128xbf16, #tpu.memory_space<vmem>>, %arg8: memref<32x128xf32, #tpu.memory_space<vmem>>) attributes {dimension_semantics = [#tpu.dimension_semantics<parallel>, #tpu.dimension_semantics<parallel>, #tpu.dimension_semantics<arbitrary>], iteration_bounds = array<i64: 1, 1, 9>, scalar_prefetch = 0 : i64, scratch_operands = 1 : i64, tpu.core_type = #tpu.core_type<tc>, window_params = [{transform_indices = @transform_0, window_bounds = array<i64: 32, 128>}, {transform_indices = @transform_1, window_bounds = array<i64: 128, 128>}, {transform_indices = @transform_2, window_bounds = array<i64: 1, 128>}, {transform_indices = @transform_3, window_bounds = array<i64: 1, 128>}, {transform_indices = @transform_4, window_bounds = array<i64: 32, 128>}]} {
    %c0_i32 = arith.constant 0 : i32
    %0 = arith.cmpi eq, %arg2, %c0_i32 : i32
    %1 = arith.extui %0 : i1 to i32
    %c0_i32_0 = arith.constant 0 : i32
    %2 = arith.cmpi ne, %1, %c0_i32_0 : i32
    scf.if %2 {
      %cst_9 = arith.constant 0.000000e+00 : f32
      %12 = vector.broadcast %cst_9 : f32 to vector<32x128xf32>
      %c0_10 = arith.constant 0 : index
      %c0_11 = arith.constant 0 : index
      %13 = vector.load %arg8[%c0_10, %c0_11] : memref<32x128xf32, #tpu.memory_space<vmem>>, vector<32x128xf32>
      tpu.vector_store %arg8[%c0_10, %c0_11], %12 {strides = array<i32>} : memref<32x128xf32, #tpu.memory_space<vmem>>, vector<32x128xf32>,
    } else {
    }
    %c0 = arith.constant 0 : index
    %c0_1 = arith.constant 0 : index
    %3 = vector.load %arg8[%c0, %c0_1] : memref<32x128xf32, #tpu.memory_space<vmem>>, vector<32x128xf32>
    %c0_2 = arith.constant 0 : index
    %c0_3 = arith.constant 0 : index
    %4 = vector.load %arg3[%c0_2, %c0_3] : memref<32x128xbf16, #tpu.memory_space<vmem>>, vector<32x128xbf16>
    %c0_4 = arith.constant 0 : index
    %c0_5 = arith.constant 0 : index
    %5 = vector.load %arg4[%c0_4, %c0_5] : memref<128x128xbf16, #tpu.memory_space<vmem>>, vector<128x128xbf16>
    %cst = arith.constant dense<0.000000e+00> : vector<32x128xf32>
    %6 = tpu.matmul %4, %5, %cst {dimension_numbers = #tpu.dot_dimension_numbers<[1], [0], [0], [1], [0, 0, 1, 1], [], []>} : vector<32x128xbf16>, vector<128x128xbf16>, vector<32x128xf32> -> vector<32x128xf32>
    %7 = arith.addf %3, %6 : vector<32x128xf32>
    %c0_6 = arith.constant 0 : index
    %c0_7 = arith.constant 0 : index
    %8 = vector.load %arg8[%c0_6, %c0_7] : memref<32x128xf32, #tpu.memory_space<vmem>>, vector<32x128xf32>
    tpu.vector_store %arg8[%c0_6, %c0_7], %7 {strides = array<i32>} : memref<32x128xf32, #tpu.memory_space<vmem>>, vector<32x128xf32>,
    %c8_i32 = arith.constant 8 : i32
    %9 = arith.cmpi eq, %arg2, %c8_i32 : i32
    %10 = arith.extui %9 : i1 to i32
    %c0_i32_8 = arith.constant 0 : i32
    %11 = arith.cmpi ne, %10, %c0_i32_8 : i32
    scf.if %11 {
      %c0_9 = arith.constant 0 : index
      %c0_10 = arith.constant 0 : index
      %12 = vector.load %arg8[%c0_9, %c0_10] : memref<32x128xf32, #tpu.memory_space<vmem>>, vector<32x128xf32>
      %c0_11 = arith.constant 0 : index
      %c0_12 = arith.constant 0 : index
      %13 = vector.load %arg5[%c0_11, %c0_12] : memref<1x128xf32, #tpu.memory_space<vmem>>, vector<1x128xf32>
      %14 = vector.broadcast %13 : vector<1x128xf32> to vector<32x128xf32>
      %15 = arith.mulf %12, %14 : vector<32x128xf32>
      %c0_13 = arith.constant 0 : index
      %c0_14 = arith.constant 0 : index
      %16 = vector.load %arg6[%c0_13, %c0_14] : memref<1x128xf32, #tpu.memory_space<vmem>>, vector<1x128xf32>
      %17 = vector.broadcast %16 : vector<1x128xf32> to vector<32x128xf32>
      %18 = arith.addf %15, %17 : vector<32x128xf32>
      %cst_15 = arith.constant 0.000000e+00 : f32
      %19 = vector.broadcast %cst_15 : f32 to vector<32x128xf32>
      %20 = arith.maximumf %18, %19 : vector<32x128xf32>
      %21 = arith.truncf %20 : vector<32x128xf32> to vector<32x128xbf16>
      %c0_16 = arith.constant 0 : index
      %c0_17 = arith.constant 0 : index
      %22 = vector.load %arg7[%c0_16, %c0_17] : memref<32x128xbf16, #tpu.memory_space<vmem>>, vector<32x128xbf16>
      tpu.vector_store %arg7[%c0_16, %c0_17], %21 {strides = array<i32>} : memref<32x128xbf16, #tpu.memory_space<vmem>>, vector<32x128xbf16>,
    } else {
    }
    return
  }
  func.func @transform_0(%arg0: i32, %arg1: i32, %arg2: i32) -> (i32, i32) {
    %c0_i32 = arith.constant 0 : i32
    return %arg0, %arg2 : i32, i32
  }
  func.func @transform_1(%arg0: i32, %arg1: i32, %arg2: i32) -> (i32, i32) {
    %c0_i32 = arith.constant 0 : i32
    return %arg2, %arg1 : i32, i32
  }
  func.func @transform_2(%arg0: i32, %arg1: i32, %arg2: i32) -> (i32, i32) {
    %c0_i32 = arith.constant 0 : i32
    %c0_i32_0 = arith.constant 0 : i32
    return %c0_i32, %arg1 : i32, i32
  }
  func.func @transform_3(%arg0: i32, %arg1: i32, %arg2: i32) -> (i32, i32) {
    %c0_i32 = arith.constant 0 : i32
    %c0_i32_0 = arith.constant 0 : i32
    return %c0_i32, %arg1 : i32, i32
  }
  func.func @transform_4(%arg0: i32, %arg1: i32, %arg2: i32) -> (i32, i32) {
    %c0_i32 = arith.constant 0 : i32
    return %arg0, %arg1 : i32, i32
  }
}

module attributes {stable_mosaic.version = 11 : i64} {
  func.func @_gemm_affine_kernel(%arg0: i32, %arg1: i32, %arg2: i32, %arg3: memref<8x128xbf16, #tpu.memory_space<vmem>>, %arg4: memref<128x256xbf16, #tpu.memory_space<vmem>>, %arg5: memref<1x256xf32, #tpu.memory_space<vmem>>, %arg6: memref<1x256xf32, #tpu.memory_space<vmem>>, %arg7: memref<8x256xbf16, #tpu.memory_space<vmem>>, %arg8: memref<8x256xf32, #tpu.memory_space<vmem>>) attributes {dimension_semantics = [#tpu.dimension_semantics<parallel>, #tpu.dimension_semantics<parallel>, #tpu.dimension_semantics<arbitrary>], iteration_bounds = array<i64: 1, 1, 9>, scalar_prefetch = 0 : i64, scratch_operands = 1 : i64, tpu.core_type = #tpu.core_type<tc>, window_params = [{transform_indices = @transform_0, window_bounds = array<i64: 8, 128>}, {transform_indices = @transform_1, window_bounds = array<i64: 128, 256>}, {transform_indices = @transform_2, window_bounds = array<i64: 1, 256>}, {transform_indices = @transform_3, window_bounds = array<i64: 1, 256>}, {transform_indices = @transform_4, window_bounds = array<i64: 8, 256>}]} {
    %c0_i32 = arith.constant 0 : i32
    %0 = arith.cmpi eq, %arg2, %c0_i32 : i32
    %1 = arith.extui %0 : i1 to i32
    %c0_i32_0 = arith.constant 0 : i32
    %2 = arith.cmpi ne, %1, %c0_i32_0 : i32
    scf.if %2 {
      %cst_9 = arith.constant 0.000000e+00 : f32
      %12 = vector.broadcast %cst_9 : f32 to vector<8x256xf32>
      %c0_10 = arith.constant 0 : index
      %c0_11 = arith.constant 0 : index
      %13 = vector.load %arg8[%c0_10, %c0_11] : memref<8x256xf32, #tpu.memory_space<vmem>>, vector<8x256xf32>
      tpu.vector_store %arg8[%c0_10, %c0_11], %12 {strides = array<i32>} : memref<8x256xf32, #tpu.memory_space<vmem>>, vector<8x256xf32>,
    } else {
    }
    %c0 = arith.constant 0 : index
    %c0_1 = arith.constant 0 : index
    %3 = vector.load %arg8[%c0, %c0_1] : memref<8x256xf32, #tpu.memory_space<vmem>>, vector<8x256xf32>
    %c0_2 = arith.constant 0 : index
    %c0_3 = arith.constant 0 : index
    %4 = vector.load %arg3[%c0_2, %c0_3] : memref<8x128xbf16, #tpu.memory_space<vmem>>, vector<8x128xbf16>
    %c0_4 = arith.constant 0 : index
    %c0_5 = arith.constant 0 : index
    %5 = vector.load %arg4[%c0_4, %c0_5] : memref<128x256xbf16, #tpu.memory_space<vmem>>, vector<128x256xbf16>
    %cst = arith.constant dense<0.000000e+00> : vector<8x256xf32>
    %6 = tpu.matmul %4, %5, %cst {dimension_numbers = #tpu.dot_dimension_numbers<[1], [0], [0], [1], [0, 0, 1, 1], [], []>} : vector<8x128xbf16>, vector<128x256xbf16>, vector<8x256xf32> -> vector<8x256xf32>
    %7 = arith.addf %3, %6 : vector<8x256xf32>
    %c0_6 = arith.constant 0 : index
    %c0_7 = arith.constant 0 : index
    %8 = vector.load %arg8[%c0_6, %c0_7] : memref<8x256xf32, #tpu.memory_space<vmem>>, vector<8x256xf32>
    tpu.vector_store %arg8[%c0_6, %c0_7], %7 {strides = array<i32>} : memref<8x256xf32, #tpu.memory_space<vmem>>, vector<8x256xf32>,
    %c8_i32 = arith.constant 8 : i32
    %9 = arith.cmpi eq, %arg2, %c8_i32 : i32
    %10 = arith.extui %9 : i1 to i32
    %c0_i32_8 = arith.constant 0 : i32
    %11 = arith.cmpi ne, %10, %c0_i32_8 : i32
    scf.if %11 {
      %c0_9 = arith.constant 0 : index
      %c0_10 = arith.constant 0 : index
      %12 = vector.load %arg8[%c0_9, %c0_10] : memref<8x256xf32, #tpu.memory_space<vmem>>, vector<8x256xf32>
      %c0_11 = arith.constant 0 : index
      %c0_12 = arith.constant 0 : index
      %13 = vector.load %arg5[%c0_11, %c0_12] : memref<1x256xf32, #tpu.memory_space<vmem>>, vector<1x256xf32>
      %14 = vector.broadcast %13 : vector<1x256xf32> to vector<8x256xf32>
      %15 = arith.mulf %12, %14 : vector<8x256xf32>
      %c0_13 = arith.constant 0 : index
      %c0_14 = arith.constant 0 : index
      %16 = vector.load %arg6[%c0_13, %c0_14] : memref<1x256xf32, #tpu.memory_space<vmem>>, vector<1x256xf32>
      %17 = vector.broadcast %16 : vector<1x256xf32> to vector<8x256xf32>
      %18 = arith.addf %15, %17 : vector<8x256xf32>
      %cst_15 = arith.constant 0.000000e+00 : f32
      %19 = vector.broadcast %cst_15 : f32 to vector<8x256xf32>
      %20 = arith.maximumf %18, %19 : vector<8x256xf32>
      %21 = arith.truncf %20 : vector<8x256xf32> to vector<8x256xbf16>
      %c0_16 = arith.constant 0 : index
      %c0_17 = arith.constant 0 : index
      %22 = vector.load %arg7[%c0_16, %c0_17] : memref<8x256xbf16, #tpu.memory_space<vmem>>, vector<8x256xbf16>
      tpu.vector_store %arg7[%c0_16, %c0_17], %21 {strides = array<i32>} : memref<8x256xbf16, #tpu.memory_space<vmem>>, vector<8x256xbf16>,
    } else {
    }
    return
  }
  func.func @transform_0(%arg0: i32, %arg1: i32, %arg2: i32) -> (i32, i32) {
    %c0_i32 = arith.constant 0 : i32
    return %arg0, %arg2 : i32, i32
  }
  func.func @transform_1(%arg0: i32, %arg1: i32, %arg2: i32) -> (i32, i32) {
    %c0_i32 = arith.constant 0 : i32
    return %arg2, %arg1 : i32, i32
  }
  func.func @transform_2(%arg0: i32, %arg1: i32, %arg2: i32) -> (i32, i32) {
    %c0_i32 = arith.constant 0 : i32
    %c0_i32_0 = arith.constant 0 : i32
    return %c0_i32, %arg1 : i32, i32
  }
  func.func @transform_3(%arg0: i32, %arg1: i32, %arg2: i32) -> (i32, i32) {
    %c0_i32 = arith.constant 0 : i32
    %c0_i32_0 = arith.constant 0 : i32
    return %c0_i32, %arg1 : i32, i32
  }
  func.func @transform_4(%arg0: i32, %arg1: i32, %arg2: i32) -> (i32, i32) {
    %c0_i32 = arith.constant 0 : i32
    return %arg0, %arg1 : i32, i32
  }
}

module attributes {stable_mosaic.version = 11 : i64} {
  func.func @_gemm_affine_kernel(%arg0: i32, %arg1: i32, %arg2: i32, %arg3: memref<8x128xbf16, #tpu.memory_space<vmem>>, %arg4: memref<128x256xbf16, #tpu.memory_space<vmem>>, %arg5: memref<1x256xf32, #tpu.memory_space<vmem>>, %arg6: memref<1x256xf32, #tpu.memory_space<vmem>>, %arg7: memref<8x256xbf16, #tpu.memory_space<vmem>>, %arg8: memref<8x256xf32, #tpu.memory_space<vmem>>) attributes {dimension_semantics = [#tpu.dimension_semantics<parallel>, #tpu.dimension_semantics<parallel>, #tpu.dimension_semantics<arbitrary>], iteration_bounds = array<i64: 1, 1, 1>, scalar_prefetch = 0 : i64, scratch_operands = 1 : i64, tpu.core_type = #tpu.core_type<tc>, window_params = [{transform_indices = @transform_0, window_bounds = array<i64: 8, 128>}, {transform_indices = @transform_1, window_bounds = array<i64: 128, 256>}, {transform_indices = @transform_2, window_bounds = array<i64: 1, 256>}, {transform_indices = @transform_3, window_bounds = array<i64: 1, 256>}, {transform_indices = @transform_4, window_bounds = array<i64: 8, 256>}]} {
    %c0_i32 = arith.constant 0 : i32
    %0 = arith.cmpi eq, %arg2, %c0_i32 : i32
    %1 = arith.extui %0 : i1 to i32
    %c0_i32_0 = arith.constant 0 : i32
    %2 = arith.cmpi ne, %1, %c0_i32_0 : i32
    scf.if %2 {
      %cst_10 = arith.constant 0.000000e+00 : f32
      %12 = vector.broadcast %cst_10 : f32 to vector<8x256xf32>
      %c0_11 = arith.constant 0 : index
      %c0_12 = arith.constant 0 : index
      %13 = vector.load %arg8[%c0_11, %c0_12] : memref<8x256xf32, #tpu.memory_space<vmem>>, vector<8x256xf32>
      tpu.vector_store %arg8[%c0_11, %c0_12], %12 {strides = array<i32>} : memref<8x256xf32, #tpu.memory_space<vmem>>, vector<8x256xf32>,
    } else {
    }
    %c0 = arith.constant 0 : index
    %c0_1 = arith.constant 0 : index
    %3 = vector.load %arg8[%c0, %c0_1] : memref<8x256xf32, #tpu.memory_space<vmem>>, vector<8x256xf32>
    %c0_2 = arith.constant 0 : index
    %c0_3 = arith.constant 0 : index
    %4 = vector.load %arg3[%c0_2, %c0_3] : memref<8x128xbf16, #tpu.memory_space<vmem>>, vector<8x128xbf16>
    %c0_4 = arith.constant 0 : index
    %c0_5 = arith.constant 0 : index
    %5 = vector.load %arg4[%c0_4, %c0_5] : memref<128x256xbf16, #tpu.memory_space<vmem>>, vector<128x256xbf16>
    %cst = arith.constant dense<0.000000e+00> : vector<8x256xf32>
    %6 = tpu.matmul %4, %5, %cst {dimension_numbers = #tpu.dot_dimension_numbers<[1], [0], [0], [1], [0, 0, 1, 1], [], []>} : vector<8x128xbf16>, vector<128x256xbf16>, vector<8x256xf32> -> vector<8x256xf32>
    %7 = arith.addf %3, %6 : vector<8x256xf32>
    %c0_6 = arith.constant 0 : index
    %c0_7 = arith.constant 0 : index
    %8 = vector.load %arg8[%c0_6, %c0_7] : memref<8x256xf32, #tpu.memory_space<vmem>>, vector<8x256xf32>
    tpu.vector_store %arg8[%c0_6, %c0_7], %7 {strides = array<i32>} : memref<8x256xf32, #tpu.memory_space<vmem>>, vector<8x256xf32>,
    %c0_i32_8 = arith.constant 0 : i32
    %9 = arith.cmpi eq, %arg2, %c0_i32_8 : i32
    %10 = arith.extui %9 : i1 to i32
    %c0_i32_9 = arith.constant 0 : i32
    %11 = arith.cmpi ne, %10, %c0_i32_9 : i32
    scf.if %11 {
      %c0_10 = arith.constant 0 : index
      %c0_11 = arith.constant 0 : index
      %12 = vector.load %arg8[%c0_10, %c0_11] : memref<8x256xf32, #tpu.memory_space<vmem>>, vector<8x256xf32>
      %c0_12 = arith.constant 0 : index
      %c0_13 = arith.constant 0 : index
      %13 = vector.load %arg5[%c0_12, %c0_13] : memref<1x256xf32, #tpu.memory_space<vmem>>, vector<1x256xf32>
      %14 = vector.broadcast %13 : vector<1x256xf32> to vector<8x256xf32>
      %15 = arith.mulf %12, %14 : vector<8x256xf32>
      %c0_14 = arith.constant 0 : index
      %c0_15 = arith.constant 0 : index
      %16 = vector.load %arg6[%c0_14, %c0_15] : memref<1x256xf32, #tpu.memory_space<vmem>>, vector<1x256xf32>
      %17 = vector.broadcast %16 : vector<1x256xf32> to vector<8x256xf32>
      %18 = arith.addf %15, %17 : vector<8x256xf32>
      %19 = arith.truncf %18 : vector<8x256xf32> to vector<8x256xbf16>
      %c0_16 = arith.constant 0 : index
      %c0_17 = arith.constant 0 : index
      %20 = vector.load %arg7[%c0_16, %c0_17] : memref<8x256xbf16, #tpu.memory_space<vmem>>, vector<8x256xbf16>
      tpu.vector_store %arg7[%c0_16, %c0_17], %19 {strides = array<i32>} : memref<8x256xbf16, #tpu.memory_space<vmem>>, vector<8x256xbf16>,
    } else {
    }
    return
  }
  func.func @transform_0(%arg0: i32, %arg1: i32, %arg2: i32) -> (i32, i32) {
    %c0_i32 = arith.constant 0 : i32
    return %arg0, %arg2 : i32, i32
  }
  func.func @transform_1(%arg0: i32, %arg1: i32, %arg2: i32) -> (i32, i32) {
    %c0_i32 = arith.constant 0 : i32
    return %arg2, %arg1 : i32, i32
  }
  func.func @transform_2(%arg0: i32, %arg1: i32, %arg2: i32) -> (i32, i32) {
    %c0_i32 = arith.constant 0 : i32
    %c0_i32_0 = arith.constant 0 : i32
    return %c0_i32, %arg1 : i32, i32
  }
  func.func @transform_3(%arg0: i32, %arg1: i32, %arg2: i32) -> (i32, i32) {
    %c0_i32 = arith.constant 0 : i32
    %c0_i32_0 = arith.constant 0 : i32
    return %c0_i32, %arg1 : i32, i32
  }
  func.func @transform_4(%arg0: i32, %arg1: i32, %arg2: i32) -> (i32, i32) {
    %c0_i32 = arith.constant 0 : i32
    return %arg0, %arg1 : i32, i32
  }
}

module attributes {stable_mosaic.version = 11 : i64} {
  func.func @_gemm_affine_res_kernel(%arg0: i32, %arg1: i32, %arg2: i32, %arg3: memref<8x256xbf16, #tpu.memory_space<vmem>>, %arg4: memref<256x256xbf16, #tpu.memory_space<vmem>>, %arg5: memref<1x256xf32, #tpu.memory_space<vmem>>, %arg6: memref<1x256xf32, #tpu.memory_space<vmem>>, %arg7: memref<8x256xf32, #tpu.memory_space<vmem>>, %arg8: memref<8x256xbf16, #tpu.memory_space<vmem>>, %arg9: memref<8x256xf32, #tpu.memory_space<vmem>>) attributes {dimension_semantics = [#tpu.dimension_semantics<parallel>, #tpu.dimension_semantics<parallel>, #tpu.dimension_semantics<arbitrary>], iteration_bounds = array<i64: 1, 1, 9>, scalar_prefetch = 0 : i64, scratch_operands = 1 : i64, tpu.core_type = #tpu.core_type<tc>, window_params = [{transform_indices = @transform_0, window_bounds = array<i64: 8, 256>}, {transform_indices = @transform_1, window_bounds = array<i64: 256, 256>}, {transform_indices = @transform_2, window_bounds = array<i64: 1, 256>}, {transform_indices = @transform_3, window_bounds = array<i64: 1, 256>}, {transform_indices = @transform_4, window_bounds = array<i64: 8, 256>}, {transform_indices = @transform_5, window_bounds = array<i64: 8, 256>}]} {
    %c0_i32 = arith.constant 0 : i32
    %0 = arith.cmpi eq, %arg2, %c0_i32 : i32
    %1 = arith.extui %0 : i1 to i32
    %c0_i32_0 = arith.constant 0 : i32
    %2 = arith.cmpi ne, %1, %c0_i32_0 : i32
    scf.if %2 {
      %cst_9 = arith.constant 0.000000e+00 : f32
      %12 = vector.broadcast %cst_9 : f32 to vector<8x256xf32>
      %c0_10 = arith.constant 0 : index
      %c0_11 = arith.constant 0 : index
      %13 = vector.load %arg9[%c0_10, %c0_11] : memref<8x256xf32, #tpu.memory_space<vmem>>, vector<8x256xf32>
      tpu.vector_store %arg9[%c0_10, %c0_11], %12 {strides = array<i32>} : memref<8x256xf32, #tpu.memory_space<vmem>>, vector<8x256xf32>,
    } else {
    }
    %c0 = arith.constant 0 : index
    %c0_1 = arith.constant 0 : index
    %3 = vector.load %arg9[%c0, %c0_1] : memref<8x256xf32, #tpu.memory_space<vmem>>, vector<8x256xf32>
    %c0_2 = arith.constant 0 : index
    %c0_3 = arith.constant 0 : index
    %4 = vector.load %arg3[%c0_2, %c0_3] : memref<8x256xbf16, #tpu.memory_space<vmem>>, vector<8x256xbf16>
    %c0_4 = arith.constant 0 : index
    %c0_5 = arith.constant 0 : index
    %5 = vector.load %arg4[%c0_4, %c0_5] : memref<256x256xbf16, #tpu.memory_space<vmem>>, vector<256x256xbf16>
    %cst = arith.constant dense<0.000000e+00> : vector<8x256xf32>
    %6 = tpu.matmul %4, %5, %cst {dimension_numbers = #tpu.dot_dimension_numbers<[1], [0], [0], [1], [0, 0, 1, 1], [], []>} : vector<8x256xbf16>, vector<256x256xbf16>, vector<8x256xf32> -> vector<8x256xf32>
    %7 = arith.addf %3, %6 : vector<8x256xf32>
    %c0_6 = arith.constant 0 : index
    %c0_7 = arith.constant 0 : index
    %8 = vector.load %arg9[%c0_6, %c0_7] : memref<8x256xf32, #tpu.memory_space<vmem>>, vector<8x256xf32>
    tpu.vector_store %arg9[%c0_6, %c0_7], %7 {strides = array<i32>} : memref<8x256xf32, #tpu.memory_space<vmem>>, vector<8x256xf32>,
    %c8_i32 = arith.constant 8 : i32
    %9 = arith.cmpi eq, %arg2, %c8_i32 : i32
    %10 = arith.extui %9 : i1 to i32
    %c0_i32_8 = arith.constant 0 : i32
    %11 = arith.cmpi ne, %10, %c0_i32_8 : i32
    scf.if %11 {
      %c0_9 = arith.constant 0 : index
      %c0_10 = arith.constant 0 : index
      %12 = vector.load %arg9[%c0_9, %c0_10] : memref<8x256xf32, #tpu.memory_space<vmem>>, vector<8x256xf32>
      %c0_11 = arith.constant 0 : index
      %c0_12 = arith.constant 0 : index
      %13 = vector.load %arg5[%c0_11, %c0_12] : memref<1x256xf32, #tpu.memory_space<vmem>>, vector<1x256xf32>
      %14 = vector.broadcast %13 : vector<1x256xf32> to vector<8x256xf32>
      %15 = arith.mulf %12, %14 : vector<8x256xf32>
      %c0_13 = arith.constant 0 : index
      %c0_14 = arith.constant 0 : index
      %16 = vector.load %arg6[%c0_13, %c0_14] : memref<1x256xf32, #tpu.memory_space<vmem>>, vector<1x256xf32>
      %17 = vector.broadcast %16 : vector<1x256xf32> to vector<8x256xf32>
      %18 = arith.addf %15, %17 : vector<8x256xf32>
      %c0_15 = arith.constant 0 : index
      %c0_16 = arith.constant 0 : index
      %19 = vector.load %arg7[%c0_15, %c0_16] : memref<8x256xf32, #tpu.memory_space<vmem>>, vector<8x256xf32>
      %20 = arith.addf %18, %19 : vector<8x256xf32>
      %cst_17 = arith.constant 0.000000e+00 : f32
      %21 = vector.broadcast %cst_17 : f32 to vector<8x256xf32>
      %22 = arith.maximumf %20, %21 : vector<8x256xf32>
      %23 = arith.truncf %22 : vector<8x256xf32> to vector<8x256xbf16>
      %c0_18 = arith.constant 0 : index
      %c0_19 = arith.constant 0 : index
      %24 = vector.load %arg8[%c0_18, %c0_19] : memref<8x256xbf16, #tpu.memory_space<vmem>>, vector<8x256xbf16>
      tpu.vector_store %arg8[%c0_18, %c0_19], %23 {strides = array<i32>} : memref<8x256xbf16, #tpu.memory_space<vmem>>, vector<8x256xbf16>,
    } else {
    }
    return
  }
  func.func @transform_0(%arg0: i32, %arg1: i32, %arg2: i32) -> (i32, i32) {
    %c0_i32 = arith.constant 0 : i32
    return %arg0, %arg2 : i32, i32
  }
  func.func @transform_1(%arg0: i32, %arg1: i32, %arg2: i32) -> (i32, i32) {
    %c0_i32 = arith.constant 0 : i32
    return %arg2, %arg1 : i32, i32
  }
  func.func @transform_2(%arg0: i32, %arg1: i32, %arg2: i32) -> (i32, i32) {
    %c0_i32 = arith.constant 0 : i32
    %c0_i32_0 = arith.constant 0 : i32
    return %c0_i32, %arg1 : i32, i32
  }
  func.func @transform_3(%arg0: i32, %arg1: i32, %arg2: i32) -> (i32, i32) {
    %c0_i32 = arith.constant 0 : i32
    %c0_i32_0 = arith.constant 0 : i32
    return %c0_i32, %arg1 : i32, i32
  }
  func.func @transform_4(%arg0: i32, %arg1: i32, %arg2: i32) -> (i32, i32) {
    %c0_i32 = arith.constant 0 : i32
    return %arg0, %arg1 : i32, i32
  }
  func.func @transform_5(%arg0: i32, %arg1: i32, %arg2: i32) -> (i32, i32) {
    %c0_i32 = arith.constant 0 : i32
    return %arg0, %arg1 : i32, i32
  }
}

module attributes {stable_mosaic.version = 11 : i64} {
  func.func @_gemm_affine_kernel(%arg0: i32, %arg1: i32, %arg2: i32, %arg3: memref<8x256xbf16, #tpu.memory_space<vmem>>, %arg4: memref<256x256xbf16, #tpu.memory_space<vmem>>, %arg5: memref<1x256xf32, #tpu.memory_space<vmem>>, %arg6: memref<1x256xf32, #tpu.memory_space<vmem>>, %arg7: memref<8x256xbf16, #tpu.memory_space<vmem>>, %arg8: memref<8x256xf32, #tpu.memory_space<vmem>>) attributes {dimension_semantics = [#tpu.dimension_semantics<parallel>, #tpu.dimension_semantics<parallel>, #tpu.dimension_semantics<arbitrary>], iteration_bounds = array<i64: 1, 1, 9>, scalar_prefetch = 0 : i64, scratch_operands = 1 : i64, tpu.core_type = #tpu.core_type<tc>, window_params = [{transform_indices = @transform_0, window_bounds = array<i64: 8, 256>}, {transform_indices = @transform_1, window_bounds = array<i64: 256, 256>}, {transform_indices = @transform_2, window_bounds = array<i64: 1, 256>}, {transform_indices = @transform_3, window_bounds = array<i64: 1, 256>}, {transform_indices = @transform_4, window_bounds = array<i64: 8, 256>}]} {
    %c0_i32 = arith.constant 0 : i32
    %0 = arith.cmpi eq, %arg2, %c0_i32 : i32
    %1 = arith.extui %0 : i1 to i32
    %c0_i32_0 = arith.constant 0 : i32
    %2 = arith.cmpi ne, %1, %c0_i32_0 : i32
    scf.if %2 {
      %cst_9 = arith.constant 0.000000e+00 : f32
      %12 = vector.broadcast %cst_9 : f32 to vector<8x256xf32>
      %c0_10 = arith.constant 0 : index
      %c0_11 = arith.constant 0 : index
      %13 = vector.load %arg8[%c0_10, %c0_11] : memref<8x256xf32, #tpu.memory_space<vmem>>, vector<8x256xf32>
      tpu.vector_store %arg8[%c0_10, %c0_11], %12 {strides = array<i32>} : memref<8x256xf32, #tpu.memory_space<vmem>>, vector<8x256xf32>,
    } else {
    }
    %c0 = arith.constant 0 : index
    %c0_1 = arith.constant 0 : index
    %3 = vector.load %arg8[%c0, %c0_1] : memref<8x256xf32, #tpu.memory_space<vmem>>, vector<8x256xf32>
    %c0_2 = arith.constant 0 : index
    %c0_3 = arith.constant 0 : index
    %4 = vector.load %arg3[%c0_2, %c0_3] : memref<8x256xbf16, #tpu.memory_space<vmem>>, vector<8x256xbf16>
    %c0_4 = arith.constant 0 : index
    %c0_5 = arith.constant 0 : index
    %5 = vector.load %arg4[%c0_4, %c0_5] : memref<256x256xbf16, #tpu.memory_space<vmem>>, vector<256x256xbf16>
    %cst = arith.constant dense<0.000000e+00> : vector<8x256xf32>
    %6 = tpu.matmul %4, %5, %cst {dimension_numbers = #tpu.dot_dimension_numbers<[1], [0], [0], [1], [0, 0, 1, 1], [], []>} : vector<8x256xbf16>, vector<256x256xbf16>, vector<8x256xf32> -> vector<8x256xf32>
    %7 = arith.addf %3, %6 : vector<8x256xf32>
    %c0_6 = arith.constant 0 : index
    %c0_7 = arith.constant 0 : index
    %8 = vector.load %arg8[%c0_6, %c0_7] : memref<8x256xf32, #tpu.memory_space<vmem>>, vector<8x256xf32>
    tpu.vector_store %arg8[%c0_6, %c0_7], %7 {strides = array<i32>} : memref<8x256xf32, #tpu.memory_space<vmem>>, vector<8x256xf32>,
    %c8_i32 = arith.constant 8 : i32
    %9 = arith.cmpi eq, %arg2, %c8_i32 : i32
    %10 = arith.extui %9 : i1 to i32
    %c0_i32_8 = arith.constant 0 : i32
    %11 = arith.cmpi ne, %10, %c0_i32_8 : i32
    scf.if %11 {
      %c0_9 = arith.constant 0 : index
      %c0_10 = arith.constant 0 : index
      %12 = vector.load %arg8[%c0_9, %c0_10] : memref<8x256xf32, #tpu.memory_space<vmem>>, vector<8x256xf32>
      %c0_11 = arith.constant 0 : index
      %c0_12 = arith.constant 0 : index
      %13 = vector.load %arg5[%c0_11, %c0_12] : memref<1x256xf32, #tpu.memory_space<vmem>>, vector<1x256xf32>
      %14 = vector.broadcast %13 : vector<1x256xf32> to vector<8x256xf32>
      %15 = arith.mulf %12, %14 : vector<8x256xf32>
      %c0_13 = arith.constant 0 : index
      %c0_14 = arith.constant 0 : index
      %16 = vector.load %arg6[%c0_13, %c0_14] : memref<1x256xf32, #tpu.memory_space<vmem>>, vector<1x256xf32>
      %17 = vector.broadcast %16 : vector<1x256xf32> to vector<8x256xf32>
      %18 = arith.addf %15, %17 : vector<8x256xf32>
      %cst_15 = arith.constant 0.000000e+00 : f32
      %19 = vector.broadcast %cst_15 : f32 to vector<8x256xf32>
      %20 = arith.maximumf %18, %19 : vector<8x256xf32>
      %21 = arith.truncf %20 : vector<8x256xf32> to vector<8x256xbf16>
      %c0_16 = arith.constant 0 : index
      %c0_17 = arith.constant 0 : index
      %22 = vector.load %arg7[%c0_16, %c0_17] : memref<8x256xbf16, #tpu.memory_space<vmem>>, vector<8x256xbf16>
      tpu.vector_store %arg7[%c0_16, %c0_17], %21 {strides = array<i32>} : memref<8x256xbf16, #tpu.memory_space<vmem>>, vector<8x256xbf16>,
    } else {
    }
    return
  }
  func.func @transform_0(%arg0: i32, %arg1: i32, %arg2: i32) -> (i32, i32) {
    %c0_i32 = arith.constant 0 : i32
    return %arg0, %arg2 : i32, i32
  }
  func.func @transform_1(%arg0: i32, %arg1: i32, %arg2: i32) -> (i32, i32) {
    %c0_i32 = arith.constant 0 : i32
    return %arg2, %arg1 : i32, i32
  }
  func.func @transform_2(%arg0: i32, %arg1: i32, %arg2: i32) -> (i32, i32) {
    %c0_i32 = arith.constant 0 : i32
    %c0_i32_0 = arith.constant 0 : i32
    return %c0_i32, %arg1 : i32, i32
  }
  func.func @transform_3(%arg0: i32, %arg1: i32, %arg2: i32) -> (i32, i32) {
    %c0_i32 = arith.constant 0 : i32
    %c0_i32_0 = arith.constant 0 : i32
    return %c0_i32, %arg1 : i32, i32
  }
  func.func @transform_4(%arg0: i32, %arg1: i32, %arg2: i32) -> (i32, i32) {
    %c0_i32 = arith.constant 0 : i32
    return %arg0, %arg1 : i32, i32
  }
}

module attributes {stable_mosaic.version = 11 : i64} {
  func.func @_gemm_affine_kernel(%arg0: i32, %arg1: i32, %arg2: i32, %arg3: memref<8x256xbf16, #tpu.memory_space<vmem>>, %arg4: memref<256x512xbf16, #tpu.memory_space<vmem>>, %arg5: memref<1x512xf32, #tpu.memory_space<vmem>>, %arg6: memref<1x512xf32, #tpu.memory_space<vmem>>, %arg7: memref<8x512xbf16, #tpu.memory_space<vmem>>, %arg8: memref<8x512xf32, #tpu.memory_space<vmem>>) attributes {dimension_semantics = [#tpu.dimension_semantics<parallel>, #tpu.dimension_semantics<parallel>, #tpu.dimension_semantics<arbitrary>], iteration_bounds = array<i64: 1, 1, 9>, scalar_prefetch = 0 : i64, scratch_operands = 1 : i64, tpu.core_type = #tpu.core_type<tc>, window_params = [{transform_indices = @transform_0, window_bounds = array<i64: 8, 256>}, {transform_indices = @transform_1, window_bounds = array<i64: 256, 512>}, {transform_indices = @transform_2, window_bounds = array<i64: 1, 512>}, {transform_indices = @transform_3, window_bounds = array<i64: 1, 512>}, {transform_indices = @transform_4, window_bounds = array<i64: 8, 512>}]} {
    %c0_i32 = arith.constant 0 : i32
    %0 = arith.cmpi eq, %arg2, %c0_i32 : i32
    %1 = arith.extui %0 : i1 to i32
    %c0_i32_0 = arith.constant 0 : i32
    %2 = arith.cmpi ne, %1, %c0_i32_0 : i32
    scf.if %2 {
      %cst_9 = arith.constant 0.000000e+00 : f32
      %12 = vector.broadcast %cst_9 : f32 to vector<8x512xf32>
      %c0_10 = arith.constant 0 : index
      %c0_11 = arith.constant 0 : index
      %13 = vector.load %arg8[%c0_10, %c0_11] : memref<8x512xf32, #tpu.memory_space<vmem>>, vector<8x512xf32>
      tpu.vector_store %arg8[%c0_10, %c0_11], %12 {strides = array<i32>} : memref<8x512xf32, #tpu.memory_space<vmem>>, vector<8x512xf32>,
    } else {
    }
    %c0 = arith.constant 0 : index
    %c0_1 = arith.constant 0 : index
    %3 = vector.load %arg8[%c0, %c0_1] : memref<8x512xf32, #tpu.memory_space<vmem>>, vector<8x512xf32>
    %c0_2 = arith.constant 0 : index
    %c0_3 = arith.constant 0 : index
    %4 = vector.load %arg3[%c0_2, %c0_3] : memref<8x256xbf16, #tpu.memory_space<vmem>>, vector<8x256xbf16>
    %c0_4 = arith.constant 0 : index
    %c0_5 = arith.constant 0 : index
    %5 = vector.load %arg4[%c0_4, %c0_5] : memref<256x512xbf16, #tpu.memory_space<vmem>>, vector<256x512xbf16>
    %cst = arith.constant dense<0.000000e+00> : vector<8x512xf32>
    %6 = tpu.matmul %4, %5, %cst {dimension_numbers = #tpu.dot_dimension_numbers<[1], [0], [0], [1], [0, 0, 1, 1], [], []>} : vector<8x256xbf16>, vector<256x512xbf16>, vector<8x512xf32> -> vector<8x512xf32>
    %7 = arith.addf %3, %6 : vector<8x512xf32>
    %c0_6 = arith.constant 0 : index
    %c0_7 = arith.constant 0 : index
    %8 = vector.load %arg8[%c0_6, %c0_7] : memref<8x512xf32, #tpu.memory_space<vmem>>, vector<8x512xf32>
    tpu.vector_store %arg8[%c0_6, %c0_7], %7 {strides = array<i32>} : memref<8x512xf32, #tpu.memory_space<vmem>>, vector<8x512xf32>,
    %c8_i32 = arith.constant 8 : i32
    %9 = arith.cmpi eq, %arg2, %c8_i32 : i32
    %10 = arith.extui %9 : i1 to i32
    %c0_i32_8 = arith.constant 0 : i32
    %11 = arith.cmpi ne, %10, %c0_i32_8 : i32
    scf.if %11 {
      %c0_9 = arith.constant 0 : index
      %c0_10 = arith.constant 0 : index
      %12 = vector.load %arg8[%c0_9, %c0_10] : memref<8x512xf32, #tpu.memory_space<vmem>>, vector<8x512xf32>
      %c0_11 = arith.constant 0 : index
      %c0_12 = arith.constant 0 : index
      %13 = vector.load %arg5[%c0_11, %c0_12] : memref<1x512xf32, #tpu.memory_space<vmem>>, vector<1x512xf32>
      %14 = vector.broadcast %13 : vector<1x512xf32> to vector<8x512xf32>
      %15 = arith.mulf %12, %14 : vector<8x512xf32>
      %c0_13 = arith.constant 0 : index
      %c0_14 = arith.constant 0 : index
      %16 = vector.load %arg6[%c0_13, %c0_14] : memref<1x512xf32, #tpu.memory_space<vmem>>, vector<1x512xf32>
      %17 = vector.broadcast %16 : vector<1x512xf32> to vector<8x512xf32>
      %18 = arith.addf %15, %17 : vector<8x512xf32>
      %cst_15 = arith.constant 0.000000e+00 : f32
      %19 = vector.broadcast %cst_15 : f32 to vector<8x512xf32>
      %20 = arith.maximumf %18, %19 : vector<8x512xf32>
      %21 = arith.truncf %20 : vector<8x512xf32> to vector<8x512xbf16>
      %c0_16 = arith.constant 0 : index
      %c0_17 = arith.constant 0 : index
      %22 = vector.load %arg7[%c0_16, %c0_17] : memref<8x512xbf16, #tpu.memory_space<vmem>>, vector<8x512xbf16>
      tpu.vector_store %arg7[%c0_16, %c0_17], %21 {strides = array<i32>} : memref<8x512xbf16, #tpu.memory_space<vmem>>, vector<8x512xbf16>,
    } else {
    }
    return
  }
  func.func @transform_0(%arg0: i32, %arg1: i32, %arg2: i32) -> (i32, i32) {
    %c0_i32 = arith.constant 0 : i32
    return %arg0, %arg2 : i32, i32
  }
  func.func @transform_1(%arg0: i32, %arg1: i32, %arg2: i32) -> (i32, i32) {
    %c0_i32 = arith.constant 0 : i32
    return %arg2, %arg1 : i32, i32
  }
  func.func @transform_2(%arg0: i32, %arg1: i32, %arg2: i32) -> (i32, i32) {
    %c0_i32 = arith.constant 0 : i32
    %c0_i32_0 = arith.constant 0 : i32
    return %c0_i32, %arg1 : i32, i32
  }
  func.func @transform_3(%arg0: i32, %arg1: i32, %arg2: i32) -> (i32, i32) {
    %c0_i32 = arith.constant 0 : i32
    %c0_i32_0 = arith.constant 0 : i32
    return %c0_i32, %arg1 : i32, i32
  }
  func.func @transform_4(%arg0: i32, %arg1: i32, %arg2: i32) -> (i32, i32) {
    %c0_i32 = arith.constant 0 : i32
    return %arg0, %arg1 : i32, i32
  }
}

module attributes {stable_mosaic.version = 11 : i64} {
  func.func @_gemm_affine_res_kernel(%arg0: i32, %arg1: i32, %arg2: i32, %arg3: memref<8x512xbf16, #tpu.memory_space<vmem>>, %arg4: memref<512x512xbf16, #tpu.memory_space<vmem>>, %arg5: memref<1x512xf32, #tpu.memory_space<vmem>>, %arg6: memref<1x512xf32, #tpu.memory_space<vmem>>, %arg7: memref<8x512xf32, #tpu.memory_space<vmem>>, %arg8: memref<8x512xbf16, #tpu.memory_space<vmem>>, %arg9: memref<8x512xf32, #tpu.memory_space<vmem>>) attributes {dimension_semantics = [#tpu.dimension_semantics<parallel>, #tpu.dimension_semantics<parallel>, #tpu.dimension_semantics<arbitrary>], iteration_bounds = array<i64: 1, 1, 9>, scalar_prefetch = 0 : i64, scratch_operands = 1 : i64, tpu.core_type = #tpu.core_type<tc>, window_params = [{transform_indices = @transform_0, window_bounds = array<i64: 8, 512>}, {transform_indices = @transform_1, window_bounds = array<i64: 512, 512>}, {transform_indices = @transform_2, window_bounds = array<i64: 1, 512>}, {transform_indices = @transform_3, window_bounds = array<i64: 1, 512>}, {transform_indices = @transform_4, window_bounds = array<i64: 8, 512>}, {transform_indices = @transform_5, window_bounds = array<i64: 8, 512>}]} {
    %c0_i32 = arith.constant 0 : i32
    %0 = arith.cmpi eq, %arg2, %c0_i32 : i32
    %1 = arith.extui %0 : i1 to i32
    %c0_i32_0 = arith.constant 0 : i32
    %2 = arith.cmpi ne, %1, %c0_i32_0 : i32
    scf.if %2 {
      %cst_9 = arith.constant 0.000000e+00 : f32
      %12 = vector.broadcast %cst_9 : f32 to vector<8x512xf32>
      %c0_10 = arith.constant 0 : index
      %c0_11 = arith.constant 0 : index
      %13 = vector.load %arg9[%c0_10, %c0_11] : memref<8x512xf32, #tpu.memory_space<vmem>>, vector<8x512xf32>
      tpu.vector_store %arg9[%c0_10, %c0_11], %12 {strides = array<i32>} : memref<8x512xf32, #tpu.memory_space<vmem>>, vector<8x512xf32>,
    } else {
    }
    %c0 = arith.constant 0 : index
    %c0_1 = arith.constant 0 : index
    %3 = vector.load %arg9[%c0, %c0_1] : memref<8x512xf32, #tpu.memory_space<vmem>>, vector<8x512xf32>
    %c0_2 = arith.constant 0 : index
    %c0_3 = arith.constant 0 : index
    %4 = vector.load %arg3[%c0_2, %c0_3] : memref<8x512xbf16, #tpu.memory_space<vmem>>, vector<8x512xbf16>
    %c0_4 = arith.constant 0 : index
    %c0_5 = arith.constant 0 : index
    %5 = vector.load %arg4[%c0_4, %c0_5] : memref<512x512xbf16, #tpu.memory_space<vmem>>, vector<512x512xbf16>
    %cst = arith.constant dense<0.000000e+00> : vector<8x512xf32>
    %6 = tpu.matmul %4, %5, %cst {dimension_numbers = #tpu.dot_dimension_numbers<[1], [0], [0], [1], [0, 0, 1, 1], [], []>} : vector<8x512xbf16>, vector<512x512xbf16>, vector<8x512xf32> -> vector<8x512xf32>
    %7 = arith.addf %3, %6 : vector<8x512xf32>
    %c0_6 = arith.constant 0 : index
    %c0_7 = arith.constant 0 : index
    %8 = vector.load %arg9[%c0_6, %c0_7] : memref<8x512xf32, #tpu.memory_space<vmem>>, vector<8x512xf32>
    tpu.vector_store %arg9[%c0_6, %c0_7], %7 {strides = array<i32>} : memref<8x512xf32, #tpu.memory_space<vmem>>, vector<8x512xf32>,
    %c8_i32 = arith.constant 8 : i32
    %9 = arith.cmpi eq, %arg2, %c8_i32 : i32
    %10 = arith.extui %9 : i1 to i32
    %c0_i32_8 = arith.constant 0 : i32
    %11 = arith.cmpi ne, %10, %c0_i32_8 : i32
    scf.if %11 {
      %c0_9 = arith.constant 0 : index
      %c0_10 = arith.constant 0 : index
      %12 = vector.load %arg9[%c0_9, %c0_10] : memref<8x512xf32, #tpu.memory_space<vmem>>, vector<8x512xf32>
      %c0_11 = arith.constant 0 : index
      %c0_12 = arith.constant 0 : index
      %13 = vector.load %arg5[%c0_11, %c0_12] : memref<1x512xf32, #tpu.memory_space<vmem>>, vector<1x512xf32>
      %14 = vector.broadcast %13 : vector<1x512xf32> to vector<8x512xf32>
      %15 = arith.mulf %12, %14 : vector<8x512xf32>
      %c0_13 = arith.constant 0 : index
      %c0_14 = arith.constant 0 : index
      %16 = vector.load %arg6[%c0_13, %c0_14] : memref<1x512xf32, #tpu.memory_space<vmem>>, vector<1x512xf32>
      %17 = vector.broadcast %16 : vector<1x512xf32> to vector<8x512xf32>
      %18 = arith.addf %15, %17 : vector<8x512xf32>
      %c0_15 = arith.constant 0 : index
      %c0_16 = arith.constant 0 : index
      %19 = vector.load %arg7[%c0_15, %c0_16] : memref<8x512xf32, #tpu.memory_space<vmem>>, vector<8x512xf32>
      %20 = arith.addf %18, %19 : vector<8x512xf32>
      %cst_17 = arith.constant 0.000000e+00 : f32
      %21 = vector.broadcast %cst_17 : f32 to vector<8x512xf32>
      %22 = arith.maximumf %20, %21 : vector<8x512xf32>
      %23 = arith.truncf %22 : vector<8x512xf32> to vector<8x512xbf16>
      %c0_18 = arith.constant 0 : index
      %c0_19 = arith.constant 0 : index
      %24 = vector.load %arg8[%c0_18, %c0_19] : memref<8x512xbf16, #tpu.memory_space<vmem>>, vector<8x512xbf16>
      tpu.vector_store %arg8[%c0_18, %c0_19], %23 {strides = array<i32>} : memref<8x512xbf16, #tpu.memory_space<vmem>>, vector<8x512xbf16>,
    } else {
    }
    return
  }
  func.func @transform_0(%arg0: i32, %arg1: i32, %arg2: i32) -> (i32, i32) {
    %c0_i32 = arith.constant 0 : i32
    return %arg0, %arg2 : i32, i32
  }
  func.func @transform_1(%arg0: i32, %arg1: i32, %arg2: i32) -> (i32, i32) {
    %c0_i32 = arith.constant 0 : i32
    return %arg2, %arg1 : i32, i32
  }
  func.func @transform_2(%arg0: i32, %arg1: i32, %arg2: i32) -> (i32, i32) {
    %c0_i32 = arith.constant 0 : i32
    %c0_i32_0 = arith.constant 0 : i32
    return %c0_i32, %arg1 : i32, i32
  }
  func.func @transform_3(%arg0: i32, %arg1: i32, %arg2: i32) -> (i32, i32) {
    %c0_i32 = arith.constant 0 : i32
    %c0_i32_0 = arith.constant 0 : i32
    return %c0_i32, %arg1 : i32, i32
  }
  func.func @transform_4(%arg0: i32, %arg1: i32, %arg2: i32) -> (i32, i32) {
    %c0_i32 = arith.constant 0 : i32
    return %arg0, %arg1 : i32, i32
  }
  func.func @transform_5(%arg0: i32, %arg1: i32, %arg2: i32) -> (i32, i32) {
    %c0_i32 = arith.constant 0 : i32
    return %arg0, %arg1 : i32, i32
  }
}

module attributes {stable_mosaic.version = 11 : i64} {
  func.func @_gemm_affine_kernel(%arg0: i32, %arg1: i32, %arg2: i32, %arg3: memref<8x256xbf16, #tpu.memory_space<vmem>>, %arg4: memref<256x512xbf16, #tpu.memory_space<vmem>>, %arg5: memref<1x512xf32, #tpu.memory_space<vmem>>, %arg6: memref<1x512xf32, #tpu.memory_space<vmem>>, %arg7: memref<8x512xbf16, #tpu.memory_space<vmem>>, %arg8: memref<8x512xf32, #tpu.memory_space<vmem>>) attributes {dimension_semantics = [#tpu.dimension_semantics<parallel>, #tpu.dimension_semantics<parallel>, #tpu.dimension_semantics<arbitrary>], iteration_bounds = array<i64: 1, 1, 1>, scalar_prefetch = 0 : i64, scratch_operands = 1 : i64, tpu.core_type = #tpu.core_type<tc>, window_params = [{transform_indices = @transform_0, window_bounds = array<i64: 8, 256>}, {transform_indices = @transform_1, window_bounds = array<i64: 256, 512>}, {transform_indices = @transform_2, window_bounds = array<i64: 1, 512>}, {transform_indices = @transform_3, window_bounds = array<i64: 1, 512>}, {transform_indices = @transform_4, window_bounds = array<i64: 8, 512>}]} {
    %c0_i32 = arith.constant 0 : i32
    %0 = arith.cmpi eq, %arg2, %c0_i32 : i32
    %1 = arith.extui %0 : i1 to i32
    %c0_i32_0 = arith.constant 0 : i32
    %2 = arith.cmpi ne, %1, %c0_i32_0 : i32
    scf.if %2 {
      %cst_10 = arith.constant 0.000000e+00 : f32
      %12 = vector.broadcast %cst_10 : f32 to vector<8x512xf32>
      %c0_11 = arith.constant 0 : index
      %c0_12 = arith.constant 0 : index
      %13 = vector.load %arg8[%c0_11, %c0_12] : memref<8x512xf32, #tpu.memory_space<vmem>>, vector<8x512xf32>
      tpu.vector_store %arg8[%c0_11, %c0_12], %12 {strides = array<i32>} : memref<8x512xf32, #tpu.memory_space<vmem>>, vector<8x512xf32>,
    } else {
    }
    %c0 = arith.constant 0 : index
    %c0_1 = arith.constant 0 : index
    %3 = vector.load %arg8[%c0, %c0_1] : memref<8x512xf32, #tpu.memory_space<vmem>>, vector<8x512xf32>
    %c0_2 = arith.constant 0 : index
    %c0_3 = arith.constant 0 : index
    %4 = vector.load %arg3[%c0_2, %c0_3] : memref<8x256xbf16, #tpu.memory_space<vmem>>, vector<8x256xbf16>
    %c0_4 = arith.constant 0 : index
    %c0_5 = arith.constant 0 : index
    %5 = vector.load %arg4[%c0_4, %c0_5] : memref<256x512xbf16, #tpu.memory_space<vmem>>, vector<256x512xbf16>
    %cst = arith.constant dense<0.000000e+00> : vector<8x512xf32>
    %6 = tpu.matmul %4, %5, %cst {dimension_numbers = #tpu.dot_dimension_numbers<[1], [0], [0], [1], [0, 0, 1, 1], [], []>} : vector<8x256xbf16>, vector<256x512xbf16>, vector<8x512xf32> -> vector<8x512xf32>
    %7 = arith.addf %3, %6 : vector<8x512xf32>
    %c0_6 = arith.constant 0 : index
    %c0_7 = arith.constant 0 : index
    %8 = vector.load %arg8[%c0_6, %c0_7] : memref<8x512xf32, #tpu.memory_space<vmem>>, vector<8x512xf32>
    tpu.vector_store %arg8[%c0_6, %c0_7], %7 {strides = array<i32>} : memref<8x512xf32, #tpu.memory_space<vmem>>, vector<8x512xf32>,
    %c0_i32_8 = arith.constant 0 : i32
    %9 = arith.cmpi eq, %arg2, %c0_i32_8 : i32
    %10 = arith.extui %9 : i1 to i32
    %c0_i32_9 = arith.constant 0 : i32
    %11 = arith.cmpi ne, %10, %c0_i32_9 : i32
    scf.if %11 {
      %c0_10 = arith.constant 0 : index
      %c0_11 = arith.constant 0 : index
      %12 = vector.load %arg8[%c0_10, %c0_11] : memref<8x512xf32, #tpu.memory_space<vmem>>, vector<8x512xf32>
      %c0_12 = arith.constant 0 : index
      %c0_13 = arith.constant 0 : index
      %13 = vector.load %arg5[%c0_12, %c0_13] : memref<1x512xf32, #tpu.memory_space<vmem>>, vector<1x512xf32>
      %14 = vector.broadcast %13 : vector<1x512xf32> to vector<8x512xf32>
      %15 = arith.mulf %12, %14 : vector<8x512xf32>
      %c0_14 = arith.constant 0 : index
      %c0_15 = arith.constant 0 : index
      %16 = vector.load %arg6[%c0_14, %c0_15] : memref<1x512xf32, #tpu.memory_space<vmem>>, vector<1x512xf32>
      %17 = vector.broadcast %16 : vector<1x512xf32> to vector<8x512xf32>
      %18 = arith.addf %15, %17 : vector<8x512xf32>
      %19 = arith.truncf %18 : vector<8x512xf32> to vector<8x512xbf16>
      %c0_16 = arith.constant 0 : index
      %c0_17 = arith.constant 0 : index
      %20 = vector.load %arg7[%c0_16, %c0_17] : memref<8x512xbf16, #tpu.memory_space<vmem>>, vector<8x512xbf16>
      tpu.vector_store %arg7[%c0_16, %c0_17], %19 {strides = array<i32>} : memref<8x512xbf16, #tpu.memory_space<vmem>>, vector<8x512xbf16>,
    } else {
    }
    return
  }
  func.func @transform_0(%arg0: i32, %arg1: i32, %arg2: i32) -> (i32, i32) {
    %c0_i32 = arith.constant 0 : i32
    return %arg0, %arg2 : i32, i32
  }
  func.func @transform_1(%arg0: i32, %arg1: i32, %arg2: i32) -> (i32, i32) {
    %c0_i32 = arith.constant 0 : i32
    return %arg2, %arg1 : i32, i32
  }
  func.func @transform_2(%arg0: i32, %arg1: i32, %arg2: i32) -> (i32, i32) {
    %c0_i32 = arith.constant 0 : i32
    %c0_i32_0 = arith.constant 0 : i32
    return %c0_i32, %arg1 : i32, i32
  }
  func.func @transform_3(%arg0: i32, %arg1: i32, %arg2: i32) -> (i32, i32) {
    %c0_i32 = arith.constant 0 : i32
    %c0_i32_0 = arith.constant 0 : i32
    return %c0_i32, %arg1 : i32, i32
  }
  func.func @transform_4(%arg0: i32, %arg1: i32, %arg2: i32) -> (i32, i32) {
    %c0_i32 = arith.constant 0 : i32
    return %arg0, %arg1 : i32, i32
  }
}

module attributes {stable_mosaic.version = 11 : i64} {
  func.func @_gemm_affine_kernel(%arg0: i32, %arg1: i32, %arg2: i32, %arg3: memref<8x512xbf16, #tpu.memory_space<vmem>>, %arg4: memref<512x512xbf16, #tpu.memory_space<vmem>>, %arg5: memref<1x512xf32, #tpu.memory_space<vmem>>, %arg6: memref<1x512xf32, #tpu.memory_space<vmem>>, %arg7: memref<8x512xbf16, #tpu.memory_space<vmem>>, %arg8: memref<8x512xf32, #tpu.memory_space<vmem>>) attributes {dimension_semantics = [#tpu.dimension_semantics<parallel>, #tpu.dimension_semantics<parallel>, #tpu.dimension_semantics<arbitrary>], iteration_bounds = array<i64: 1, 1, 9>, scalar_prefetch = 0 : i64, scratch_operands = 1 : i64, tpu.core_type = #tpu.core_type<tc>, window_params = [{transform_indices = @transform_0, window_bounds = array<i64: 8, 512>}, {transform_indices = @transform_1, window_bounds = array<i64: 512, 512>}, {transform_indices = @transform_2, window_bounds = array<i64: 1, 512>}, {transform_indices = @transform_3, window_bounds = array<i64: 1, 512>}, {transform_indices = @transform_4, window_bounds = array<i64: 8, 512>}]} {
    %c0_i32 = arith.constant 0 : i32
    %0 = arith.cmpi eq, %arg2, %c0_i32 : i32
    %1 = arith.extui %0 : i1 to i32
    %c0_i32_0 = arith.constant 0 : i32
    %2 = arith.cmpi ne, %1, %c0_i32_0 : i32
    scf.if %2 {
      %cst_9 = arith.constant 0.000000e+00 : f32
      %12 = vector.broadcast %cst_9 : f32 to vector<8x512xf32>
      %c0_10 = arith.constant 0 : index
      %c0_11 = arith.constant 0 : index
      %13 = vector.load %arg8[%c0_10, %c0_11] : memref<8x512xf32, #tpu.memory_space<vmem>>, vector<8x512xf32>
      tpu.vector_store %arg8[%c0_10, %c0_11], %12 {strides = array<i32>} : memref<8x512xf32, #tpu.memory_space<vmem>>, vector<8x512xf32>,
    } else {
    }
    %c0 = arith.constant 0 : index
    %c0_1 = arith.constant 0 : index
    %3 = vector.load %arg8[%c0, %c0_1] : memref<8x512xf32, #tpu.memory_space<vmem>>, vector<8x512xf32>
    %c0_2 = arith.constant 0 : index
    %c0_3 = arith.constant 0 : index
    %4 = vector.load %arg3[%c0_2, %c0_3] : memref<8x512xbf16, #tpu.memory_space<vmem>>, vector<8x512xbf16>
    %c0_4 = arith.constant 0 : index
    %c0_5 = arith.constant 0 : index
    %5 = vector.load %arg4[%c0_4, %c0_5] : memref<512x512xbf16, #tpu.memory_space<vmem>>, vector<512x512xbf16>
    %cst = arith.constant dense<0.000000e+00> : vector<8x512xf32>
    %6 = tpu.matmul %4, %5, %cst {dimension_numbers = #tpu.dot_dimension_numbers<[1], [0], [0], [1], [0, 0, 1, 1], [], []>} : vector<8x512xbf16>, vector<512x512xbf16>, vector<8x512xf32> -> vector<8x512xf32>
    %7 = arith.addf %3, %6 : vector<8x512xf32>
    %c0_6 = arith.constant 0 : index
    %c0_7 = arith.constant 0 : index
    %8 = vector.load %arg8[%c0_6, %c0_7] : memref<8x512xf32, #tpu.memory_space<vmem>>, vector<8x512xf32>
    tpu.vector_store %arg8[%c0_6, %c0_7], %7 {strides = array<i32>} : memref<8x512xf32, #tpu.memory_space<vmem>>, vector<8x512xf32>,
    %c8_i32 = arith.constant 8 : i32
    %9 = arith.cmpi eq, %arg2, %c8_i32 : i32
    %10 = arith.extui %9 : i1 to i32
    %c0_i32_8 = arith.constant 0 : i32
    %11 = arith.cmpi ne, %10, %c0_i32_8 : i32
    scf.if %11 {
      %c0_9 = arith.constant 0 : index
      %c0_10 = arith.constant 0 : index
      %12 = vector.load %arg8[%c0_9, %c0_10] : memref<8x512xf32, #tpu.memory_space<vmem>>, vector<8x512xf32>
      %c0_11 = arith.constant 0 : index
      %c0_12 = arith.constant 0 : index
      %13 = vector.load %arg5[%c0_11, %c0_12] : memref<1x512xf32, #tpu.memory_space<vmem>>, vector<1x512xf32>
      %14 = vector.broadcast %13 : vector<1x512xf32> to vector<8x512xf32>
      %15 = arith.mulf %12, %14 : vector<8x512xf32>
      %c0_13 = arith.constant 0 : index
      %c0_14 = arith.constant 0 : index
      %16 = vector.load %arg6[%c0_13, %c0_14] : memref<1x512xf32, #tpu.memory_space<vmem>>, vector<1x512xf32>
      %17 = vector.broadcast %16 : vector<1x512xf32> to vector<8x512xf32>
      %18 = arith.addf %15, %17 : vector<8x512xf32>
      %cst_15 = arith.constant 0.000000e+00 : f32
      %19 = vector.broadcast %cst_15 : f32 to vector<8x512xf32>
      %20 = arith.maximumf %18, %19 : vector<8x512xf32>
      %21 = arith.truncf %20 : vector<8x512xf32> to vector<8x512xbf16>
      %c0_16 = arith.constant 0 : index
      %c0_17 = arith.constant 0 : index
      %22 = vector.load %arg7[%c0_16, %c0_17] : memref<8x512xbf16, #tpu.memory_space<vmem>>, vector<8x512xbf16>
      tpu.vector_store %arg7[%c0_16, %c0_17], %21 {strides = array<i32>} : memref<8x512xbf16, #tpu.memory_space<vmem>>, vector<8x512xbf16>,
    } else {
    }
    return
  }
  func.func @transform_0(%arg0: i32, %arg1: i32, %arg2: i32) -> (i32, i32) {
    %c0_i32 = arith.constant 0 : i32
    return %arg0, %arg2 : i32, i32
  }
  func.func @transform_1(%arg0: i32, %arg1: i32, %arg2: i32) -> (i32, i32) {
    %c0_i32 = arith.constant 0 : i32
    return %arg2, %arg1 : i32, i32
  }
  func.func @transform_2(%arg0: i32, %arg1: i32, %arg2: i32) -> (i32, i32) {
    %c0_i32 = arith.constant 0 : i32
    %c0_i32_0 = arith.constant 0 : i32
    return %c0_i32, %arg1 : i32, i32
  }
  func.func @transform_3(%arg0: i32, %arg1: i32, %arg2: i32) -> (i32, i32) {
    %c0_i32 = arith.constant 0 : i32
    %c0_i32_0 = arith.constant 0 : i32
    return %c0_i32, %arg1 : i32, i32
  }
  func.func @transform_4(%arg0: i32, %arg1: i32, %arg2: i32) -> (i32, i32) {
    %c0_i32 = arith.constant 0 : i32
    return %arg0, %arg1 : i32, i32
  }
}

module attributes {stable_mosaic.version = 11 : i64} {
  func.func @_head_kernel(%arg0: memref<8x512xbf16, #tpu.memory_space<vmem>>, %arg1: memref<512x128xbf16, #tpu.memory_space<vmem>>, %arg2: memref<1x128xf32, #tpu.memory_space<vmem>>, %arg3: memref<128x128xbf16, #tpu.memory_space<vmem>>, %arg4: memref<8x128xf32, #tpu.memory_space<vmem>>) attributes {dimension_semantics = [], scalar_prefetch = 0 : i64, scratch_operands = 0 : i64, tpu.core_type = #tpu.core_type<tc>} {
    %c0 = arith.constant 0 : index
    %c0_0 = arith.constant 0 : index
    %0 = vector.load %arg0[%c0, %c0_0] : memref<8x512xbf16, #tpu.memory_space<vmem>>, vector<8x512xbf16>
    %c0_1 = arith.constant 0 : index
    %c0_2 = arith.constant 0 : index
    %1 = vector.load %arg1[%c0_1, %c0_2] : memref<512x128xbf16, #tpu.memory_space<vmem>>, vector<512x128xbf16>
    %cst = arith.constant dense<0.000000e+00> : vector<8x128xf32>
    %2 = tpu.matmul %0, %1, %cst {dimension_numbers = #tpu.dot_dimension_numbers<[1], [0], [0], [1], [0, 0, 1, 1], [], []>} : vector<8x512xbf16>, vector<512x128xbf16>, vector<8x128xf32> -> vector<8x128xf32>
    %c0_3 = arith.constant 0 : index
    %c0_4 = arith.constant 0 : index
    %3 = vector.load %arg2[%c0_3, %c0_4] : memref<1x128xf32, #tpu.memory_space<vmem>>, vector<1x128xf32>
    %4 = vector.broadcast %3 : vector<1x128xf32> to vector<8x128xf32>
    %5 = arith.addf %2, %4 : vector<8x128xf32>
    %6 = arith.truncf %5 : vector<8x128xf32> to vector<8x128xbf16>
    %c0_5 = arith.constant 0 : index
    %c0_6 = arith.constant 0 : index
    %7 = vector.load %arg3[%c0_5, %c0_6] : memref<128x128xbf16, #tpu.memory_space<vmem>>, vector<128x128xbf16>
    %cst_7 = arith.constant dense<0.000000e+00> : vector<8x128xf32>
    %8 = tpu.matmul %6, %7, %cst_7 {dimension_numbers = #tpu.dot_dimension_numbers<[1], [0], [0], [1], [0, 0, 1, 1], [], []>} : vector<8x128xbf16>, vector<128x128xbf16>, vector<8x128xf32> -> vector<8x128xf32>
    %c0_8 = arith.constant 0 : index
    %c0_9 = arith.constant 0 : index
    %9 = vector.load %arg4[%c0_8, %c0_9] : memref<8x128xf32, #tpu.memory_space<vmem>>, vector<8x128xf32>
    tpu.vector_store %arg4[%c0_8, %c0_9], %8 {strides = array<i32>} : memref<8x128xf32, #tpu.memory_space<vmem>>, vector<8x128xf32>,
    return
  }
}

</mosaic_0001>

<bundles_post_ra>
// kernel: _lambda_.22
= control target key start
LH: loop header
LB: loop body
LE: loop exit
PB: predicated region body
PF: predicated region fallthrough
CT: control target
= control target key end

     0   :  { %s1843_s15 = smov 0   ;;  %s1845_s16 = smov 0   ;;  %s2054_s0 = inlined_call_operand.vmem [shape: bf16[512,256], index: 0, kind: input, shape index: {}]   ;;  %s2055_s1 = inlined_call_operand.vmem [shape: bf16[256,128], index: 1, kind: input, shape index: {}]   ;;  %s2056_s2 = inlined_call_operand.vmem [shape: f32[1,128], index: 2, kind: input, shape index: {}]   ;;  %s2057_s3 = inlined_call_operand.vmem [shape: f32[1,128], index: 3, kind: input, shape index: {}]   ;;  %s2058_s4 = inlined_call_operand.vmem [shape: bf16[512,128], index: 4, kind: output, shape index: {}]  }
   0x1   :  { %s1847_s17 = smov 0  }
   0x2 LB: > { %s33_s18 = sadd.s32 1, %s1812_s16  ;;  %p1360_p0 = scmp.ge.s32.totalorder %s1816_s17, 1  ;;  %s1816_s17 = sphi %s1847_s17, %s14_s17   ;;  %s1812_s16 = sphi %s1845_s16, %s2060_s16   ;;  %s1808_s15 = sphi %s1843_s15, %s2059_s15  }
   0x3   : > { %p35_p1 = scmp.ge.s32.totalorder %s33_s18, 2  ;;  %p224_p2 = scmp.lt.s32.totalorder %s1816_s17, 3 }
   0x5   : > { %s2062_s18 = smov (%p35_p1, %s33_s18), 0  ;;  %p225_p3 = pnand %p1360_p0, %p224_p2 }
   0x6   : > { %v1730_v0 = vld [vmem:[%s2055_s1 + $0x40] sm:$0xff] (!%p225_p3)   ;;  %s1361_s21 = sshll.u32 (!%p225_p3), %s1808_s15, 5  ;;  %v1732_v2 = vld [vmem:[%s2055_s1 + $0x48] sm:$0xff] (!%p225_p3)   ;;  %v1734_v4 = vld [vmem:[%s2055_s1 + $0x50] sm:$0xff] (!%p225_p3)  }
   0x7   : > { %228 = sbr.rel (%p225_p3) target bundleno = 322 (0x142), region = 36  ;;  %v1731_v1 = vld [vmem:[%s2055_s1] sm:$0xff] (!%p225_p3)   ;;  %1578 = vmatprep.subr.bf16.mxu0 (!%p225_p3), %v1730_v0  ;;  %1690 = vmatprep.subr.bf16.mxu1 (!%p225_p3), %v1730_v0  ;;  %v1733_v3 = vld [vmem:[%s2055_s1 + $0x8] sm:$0xff] (!%p225_p3)   ;;  %p274_p4 = scmp.lt.s32.totalorder (!%p225_p3), %s1361_s21, 63  ;;  %v1735_v5 = vld [vmem:[%s2055_s1 + $0x10] sm:$0xff] (!%p225_p3)  }
   0x8   : > { %1579 = vmatpush3.bf16.msra.mxu0 (!%p225_p3), %v1731_v1  ;;  %1698 = vmatpush3.bf16.msra.mxu1 (!%p225_p3), %v1731_v1  ;;  %v1736_v6 = vld [vmem:[%s2055_s1 + $0x58] sm:$0xff] (!%p225_p3)   ;;  %v1738_v8 = vld [vmem:[%s2055_s1 + $0x60] sm:$0xff] (!%p225_p3)   ;;  %v1740_v10 = vld [vmem:[%s2055_s1 + $0x68] sm:$0xff] (!%p225_p3)  }
   0x9   : > { %1580 = vmatprep.subr.bf16.mxu0 (!%p225_p3), %v1732_v2  ;;  %1691 = vmatprep.subr.bf16.mxu1 (!%p225_p3), %v1732_v2  ;;  %v1737_v7 = vld [vmem:[%s2055_s1 + $0x18] sm:$0xff] (!%p225_p3)   ;;  %v1739_v9 = vld [vmem:[%s2055_s1 + $0x20] sm:$0xff] (!%p225_p3)   ;;  %v1741_v13 = vld [vmem:[%s2055_s1 + $0x28] sm:$0xff] (!%p225_p3)  }
   0xa   : > { %v1742_v14 = vld [vmem:[%s2055_s1 + $0x70] sm:$0xff] (!%p225_p3)   ;;  %v1744_v16 = vld [vmem:[%s2055_s1 + $0x78] sm:$0xff] (!%p225_p3)   ;;  %v1952_v51 = vld [vmem:[%s2056_s2] ss:$0 sm:$0xff] (!%p225_p3) }
   0xb   : > { %v1743_v15 = vld [vmem:[%s2055_s1 + $0x30] sm:$0xff] (!%p225_p3)   ;;  %v1745_v17 = vld [vmem:[%s2055_s1 + $0x38] sm:$0xff] (!%p225_p3)   ;;  %v1957_v57 = vld [vmem:[%s2057_s3] ss:$0 sm:$0xff] (!%p225_p3) }
   0xc   : > { %1581 = vmatpush3.bf16.msra.mxu0 (!%p225_p3), %v1733_v3  ;;  %1699 = vmatpush3.bf16.msra.mxu1 (!%p225_p3), %v1733_v3 }
   0xd   : > { %1582 = vmatprep.subr.bf16.mxu0 (!%p225_p3), %v1734_v4  ;;  %1692 = vmatprep.subr.bf16.mxu1 (!%p225_p3), %v1734_v4 }
   0xe   : > { %s2064_s21 = smov (!%p274_p4, %s1361_s21), 63 }
   0xf   : > { %s1450_s10 = sshll.u32 %s2064_s21, 3  ;;  %s1365_s12 = sshll.u32 %s2064_s21, 2 }
  0x10   : > { %1583 = vmatpush3.bf16.msra.mxu0 %v1735_v5  ;;  %1700 = vmatpush3.bf16.msra.mxu1 %v1735_v5  ;;  %s1894_s15 = scalar_lea.vmem %s2054_s0, %s1450_s10  ;;  %s1971_s21 = scalar_lea.vmem %s2058_s4, %s1365_s12 }
  0x11   : > { %1584 = vmatprep.subr.bf16.mxu0 %v1736_v6  ;;  %1693 = vmatprep.subr.bf16.mxu1 %v1736_v6  ;;  %v1748_v11 = vld [vmem:[%s1894_s15 + $0x4] ss:$8 sps:$4 sm:$0xff]   ;;  %v1746_v18 = vld [vmem:[%s1894_s15] ss:$8 sps:$4 sm:$0xff]   ;;  %v1752_v20 = vld [vmem:[%s1894_s15 + $0x14] ss:$8 sps:$4 sm:$0xff]  }
  0x12   : > { %v1751_v12 = vld [vmem:[%s1894_s15 + $0x84] ss:$8 sps:$4 sm:$0xff]   ;;  %729 = vmatprep.mubr.bf16.mxu0 %v1748_v11  ;;  %v1749_v19 = vld [vmem:[%s1894_s15 + $0x80] ss:$8 sps:$4 sm:$0xff]   ;;  %v1754_v21 = vld [vmem:[%s1894_s15 + $0x94] ss:$8 sps:$4 sm:$0xff]  }
  0x13   : > { %793 = vmatprep.mubr.bf16.mxu1 %v1751_v12  ;;  %v1756_v22 = vld [vmem:[%s1894_s15 + $0x10] ss:$8 sps:$4 sm:$0xff]   ;;  %v1758_v24 = vld [vmem:[%s1894_s15 + $0x24] ss:$8 sps:$4 sm:$0xff]   ;;  %v1762_v26 = vld [vmem:[%s1894_s15 + $0x20] ss:$8 sps:$4 sm:$0xff]  }
  0x14   : > { %1585 = vmatpush3.bf16.msra.mxu0 %v1737_v7  ;;  %1701 = vmatpush3.bf16.msra.mxu1 %v1737_v7  ;;  %v1757_v23 = vld [vmem:[%s1894_s15 + $0x90] ss:$8 sps:$4 sm:$0xff]   ;;  %v1760_v25 = vld [vmem:[%s1894_s15 + $0xa4] ss:$8 sps:$4 sm:$0xff]   ;;  %v1763_v27 = vld [vmem:[%s1894_s15 + $0xa0] ss:$8 sps:$4 sm:$0xff]  }
  0x15   : > { %1586 = vmatprep.subr.bf16.mxu0 %v1738_v8  ;;  %1694 = vmatprep.subr.bf16.mxu1 %v1738_v8  ;;  %v1764_v28 = vld [vmem:[%s1894_s15 + $0x34] ss:$8 sps:$4 sm:$0xff]   ;;  %v1768_v30 = vld [vmem:[%s1894_s15 + $0x30] ss:$8 sps:$4 sm:$0xff]   ;;  %v1770_v32 = vld [vmem:[%s1894_s15 + $0x44] ss:$8 sps:$4 sm:$0xff]  }
  0x16   : > { %v1766_v29 = vld [vmem:[%s1894_s15 + $0xb4] ss:$8 sps:$4 sm:$0xff]   ;;  %v1769_v31 = vld [vmem:[%s1894_s15 + $0xb0] ss:$8 sps:$4 sm:$0xff]   ;;  %v1772_v33 = vld [vmem:[%s1894_s15 + $0xc4] ss:$8 sps:$4 sm:$0xff]  }
  0x17   : > { %v1774_v34 = vld [vmem:[%s1894_s15 + $0x40] ss:$8 sps:$4 sm:$0xff]   ;;  %v1776_v36 = vld [vmem:[%s1894_s15 + $0x54] ss:$8 sps:$4 sm:$0xff]   ;;  %v1780_v38 = vld [vmem:[%s1894_s15 + $0x50] ss:$8 sps:$4 sm:$0xff]  }
  0x18   : > { %1587 = vmatpush3.bf16.msra.mxu0 %v1739_v9  ;;  %1702 = vmatpush3.bf16.msra.mxu1 %v1739_v9  ;;  %v1775_v35 = vld [vmem:[%s1894_s15 + $0xc0] ss:$8 sps:$4 sm:$0xff]   ;;  %v1778_v37 = vld [vmem:[%s1894_s15 + $0xd4] ss:$8 sps:$4 sm:$0xff]   ;;  %v1781_v39 = vld [vmem:[%s1894_s15 + $0xd0] ss:$8 sps:$4 sm:$0xff]  }
  0x19   : > { %1588 = vmatprep.subr.bf16.mxu0 %v1740_v10  ;;  %1695 = vmatprep.subr.bf16.mxu1 %v1740_v10  ;;  %v1782_v40 = vld [vmem:[%s1894_s15 + $0x64] ss:$8 sps:$4 sm:$0xff]   ;;  %v1786_v42 = vld [vmem:[%s1894_s15 + $0x60] ss:$8 sps:$4 sm:$0xff]   ;;  %v1788_v44 = vld [vmem:[%s1894_s15 + $0x74] ss:$8 sps:$4 sm:$0xff]  }
  0x1a   : > { %v1784_v41 = vld [vmem:[%s1894_s15 + $0xe4] ss:$8 sps:$4 sm:$0xff]   ;;  %v1787_v43 = vld [vmem:[%s1894_s15 + $0xe0] ss:$8 sps:$4 sm:$0xff]   ;;  %v1790_v45 = vld [vmem:[%s1894_s15 + $0xf4] ss:$8 sps:$4 sm:$0xff]  }
  0x1b   : > { %v1792_v46 = vld [vmem:[%s1894_s15 + $0x70] ss:$8 sps:$4 sm:$0xff]  }
  0x1c   : > { %1589 = vmatpush3.bf16.msra.mxu0 %v1741_v13  ;;  %1703 = vmatpush3.bf16.msra.mxu1 %v1741_v13  ;;  %v1793_v47 = vld [vmem:[%s1894_s15 + $0xf0] ss:$8 sps:$4 sm:$0xff]  }
  0x1d   : > { %1590 = vmatprep.subr.bf16.mxu0 %v1742_v14  ;;  %1696 = vmatprep.subr.bf16.mxu1 %v1742_v14 }
  0x20   : > { %1591 = vmatpush3.bf16.msra.mxu0 %v1743_v15  ;;  %1704 = vmatpush3.bf16.msra.mxu1 %v1743_v15 }
  0x21   : > { %1592 = vmatprep.subr.bf16.mxu0 %v1744_v16  ;;  %1697 = vmatprep.subr.bf16.mxu1 %v1744_v16 }
  0x24   : > { %1593 = vmatpush3.bf16.msra.mxu0 %v1745_v17  ;;  %1705 = vmatpush3.bf16.msra.mxu1 %v1745_v17 }
  0x27   : > { %730 = vmatmul.mubr.bf16.vlgmr.msra.gmra.mrb[0].mxu0 %v1746_v18  ;;  %794 = vmatmul.mubr.bf16.vlgmr.msra.gmra.mrb[0].mxu1 %v1749_v19 }
  0x28   : > { %737 = vmatprep.mubr.bf16.mxu0 %v1752_v20  ;;  %801 = vmatprep.mubr.bf16.mxu1 %v1754_v21 }
  0x2f   : > { %738 = vmatmul.mubr.bf16.gmra.mrb[4].mxu0 %v1756_v22  ;;  %802 = vmatmul.mubr.bf16.gmra.mrb[4].mxu1 %v1757_v23 }
  0x30   : > { %745 = vmatprep.mubr.bf16.mxu0 %v1758_v24  ;;  %809 = vmatprep.mubr.bf16.mxu1 %v1760_v25 }
  0x37   : > { %746 = vmatmul.mubr.bf16.gmra.mrb[8].mxu0 %v1762_v26  ;;  %810 = vmatmul.mubr.bf16.gmra.mrb[8].mxu1 %v1763_v27 }
  0x38   : > { %753 = vmatprep.mubr.bf16.mxu0 %v1764_v28  ;;  %817 = vmatprep.mubr.bf16.mxu1 %v1766_v29 }
  0x3f   : > { %754 = vmatmul.mubr.bf16.gmra.mrb[12].mxu0 %v1768_v30  ;;  %818 = vmatmul.mubr.bf16.gmra.mrb[12].mxu1 %v1769_v31 }
  0x40   : > { %761 = vmatprep.mubr.bf16.mxu0 %v1770_v32  ;;  %825 = vmatprep.mubr.bf16.mxu1 %v1772_v33 }
  0x47   : > { %762 = vmatmul.mubr.bf16.gmra.mrb[16].mxu0 %v1774_v34  ;;  %826 = vmatmul.mubr.bf16.gmra.mrb[16].mxu1 %v1775_v35 }
  0x48   : > { %769 = vmatprep.mubr.bf16.mxu0 %v1776_v36  ;;  %833 = vmatprep.mubr.bf16.mxu1 %v1778_v37 }
  0x4f   : > { %770 = vmatmul.mubr.bf16.gmra.mrb[20].mxu0 %v1780_v38  ;;  %834 = vmatmul.mubr.bf16.gmra.mrb[20].mxu1 %v1781_v39 }
  0x50   : > { %777 = vmatprep.mubr.bf16.mxu0 %v1782_v40  ;;  %841 = vmatprep.mubr.bf16.mxu1 %v1784_v41 }
  0x57   : > { %778 = vmatmul.mubr.bf16.gmra.mrb[24].mxu0 %v1786_v42  ;;  %842 = vmatmul.mubr.bf16.gmra.mrb[24].mxu1 %v1787_v43 }
  0x58   : > { %785 = vmatprep.mubr.bf16.mxu0 %v1788_v44  ;;  %849 = vmatprep.mubr.bf16.mxu1 %v1790_v45 }
  0x5f   : > { %786 = vmatmul.mubr.bf16.gmra.mrb[28].mxu0 %v1792_v46  ;;  %850 = vmatmul.mubr.bf16.gmra.mrb[28].mxu1 %v1793_v47 }
  0xfa   : > { %v1594_v48 = vpop.f32.mrb[0].mxu0  ;;  %v1642_v49 = vpop.f32.mrb[0].mxu1 }
  0xfb   : > { %v1595_v50 = vpop.f32.mrb[1].mxu0  ;;  %v1643_v52 = vpop.f32.mrb[1].mxu1 }
  0xfc   : > { %v1596_v53 = vadd.f32 %v1595_v50, %v1594_v48  ;;  %v1644_v54 = vadd.f32 %v1643_v52, %v1642_v49  ;;  %v1597_v55 = vpop.f32.mrb[2].mxu0  ;;  %v1645_v56 = vpop.f32.mrb[2].mxu1 }
  0xfd   : > { %v1598_v58 = vpop.f32.mrb[3].mxu0  ;;  %v1646_v59 = vpop.f32.mrb[3].mxu1 }
  0xfe   : > { %v964_v60 = vmul.f32 %v1596_v53, %v1952_v51  ;;  %v980_v61 = vmul.f32 %v1644_v54, %v1952_v51  ;;  %v1599_v62 = vadd.f32 %v1598_v58, %v1597_v55  ;;  %v1647_v63 = vadd.f32 %v1646_v59, %v1645_v56 }
 0x100   : > { %v1003_v0 = vadd.f32 %v1957_v57, %v964_v60  ;;  %v1019_v1 = vadd.f32 %v1957_v57, %v980_v61  ;;  %v965_v2 = vmul.f32 %v1599_v62, %v1952_v51  ;;  %v981_v3 = vmul.f32 %v1647_v63, %v1952_v51 }
 0x102   : > { %v1004_v4 = vadd.f32 %v1957_v57, %v965_v2  ;;  %v1020_v5 = vadd.f32 %v1957_v57, %v981_v3  ;;  %v1600_v6 = vpop.f32.mrb[4].mxu0  ;;  %v1648_v7 = vpop.f32.mrb[4].mxu1  ;;  %v1035_v8 = vmax.f32 %v1003_v0, 0.0  ;;  %v1051_v9 = vmax.f32 %v1019_v1, 0.0 }
 0x103   : > { %v1601_v10 = vpop.f32.mrb[5].mxu0  ;;  %v1649_v11 = vpop.f32.mrb[5].mxu1 }
 0x104   : > { %v1036_v12 = vmax.f32 %v1004_v4, 0.0  ;;  %v1052_v13 = vmax.f32 %v1020_v5, 0.0  ;;  %v1602_v14 = vadd.f32 %v1601_v10, %v1600_v6  ;;  %v1650_v15 = vadd.f32 %v1649_v11, %v1648_v7  ;;  %v1603_v16 = vpop.f32.mrb[6].mxu0  ;;  %v1651_v17 = vpop.f32.mrb[6].mxu1 }
 0x105   : > { %v1604_v18 = vpop.f32.mrb[7].mxu0  ;;  %v1652_v19 = vpop.f32.mrb[7].mxu1 }
 0x106   : > { %v1486_v20 = vpack.c.bf16 %v1036_v12, %v1035_v8  ;;  %v1526_v21 = vpack.c.bf16 %v1052_v13, %v1051_v9  ;;  %v966_v22 = vmul.f32 %v1602_v14, %v1952_v51  ;;  %v982_v23 = vmul.f32 %v1650_v15, %v1952_v51 }
 0x107   : > { %v1605_v24 = vadd.f32 %v1604_v18, %v1603_v16  ;;  %v1653_v25 = vadd.f32 %v1652_v19, %v1651_v17 }
 0x108   : > { %1487 = vst [vmem:[%s1971_s21] sm:$0xff] %v1486_v20   ;;  %1570 = vst [vmem:[%s1971_s21 + $0x40] sm:$0xff] %v1526_v21   ;;  %v1005_v26 = vadd.f32 %v1957_v57, %v966_v22  ;;  %v1021_v27 = vadd.f32 %v1957_v57, %v982_v23 }
 0x109   : > { %v967_v28 = vmul.f32 %v1605_v24, %v1952_v51  ;;  %v983_v29 = vmul.f32 %v1653_v25, %v1952_v51 }
 0x10a   : > { %v1606_v30 = vpop.f32.mrb[8].mxu0  ;;  %v1654_v31 = vpop.f32.mrb[8].mxu1  ;;  %v1037_v40 = vmax.f32 %v1005_v26, 0.0  ;;  %v1053_v41 = vmax.f32 %v1021_v27, 0.0 }
 0x10b   : > { %v1006_v32 = vadd.f32 %v1957_v57, %v967_v28  ;;  %v1022_v33 = vadd.f32 %v1957_v57, %v983_v29  ;;  %v1607_v34 = vpop.f32.mrb[9].mxu0  ;;  %v1655_v35 = vpop.f32.mrb[9].mxu1 }
 0x10c   : > { %v1608_v36 = vadd.f32 %v1607_v34, %v1606_v30  ;;  %v1656_v37 = vadd.f32 %v1655_v35, %v1654_v31  ;;  %v1609_v38 = vpop.f32.mrb[10].mxu0  ;;  %v1657_v39 = vpop.f32.mrb[10].mxu1 }
 0x10d   : > { %v1038_v42 = vmax.f32 %v1006_v32, 0.0  ;;  %v1054_v43 = vmax.f32 %v1022_v33, 0.0  ;;  %v1610_v44 = vpop.f32.mrb[11].mxu0  ;;  %v1658_v45 = vpop.f32.mrb[11].mxu1 }
 0x10e   : > { %v968_v46 = vmul.f32 %v1608_v36, %v1952_v51  ;;  %v984_v47 = vmul.f32 %v1656_v37, %v1952_v51  ;;  %v1611_v48 = vadd.f32 %v1610_v44, %v1609_v38  ;;  %v1659_v49 = vadd.f32 %v1658_v45, %v1657_v39 }
 0x10f   : > { %v1491_v50 = vpack.c.bf16 %v1038_v42, %v1037_v40  ;;  %v1531_v52 = vpack.c.bf16 %v1054_v43, %v1053_v41 }
 0x110   : > { %v1007_v53 = vadd.f32 %v1957_v57, %v968_v46  ;;  %v1023_v54 = vadd.f32 %v1957_v57, %v984_v47  ;;  %v969_v55 = vmul.f32 %v1611_v48, %v1952_v51  ;;  %v985_v56 = vmul.f32 %v1659_v49, %v1952_v51 }
 0x111   : > { %1563 = vst [vmem:[%s1971_s21 + $0x8] sm:$0xff] %v1491_v50   ;;  %1571 = vst [vmem:[%s1971_s21 + $0x48] sm:$0xff] %v1531_v52  }
 0x112   : > { %v1008_v58 = vadd.f32 %v1957_v57, %v969_v55  ;;  %v1024_v59 = vadd.f32 %v1957_v57, %v985_v56  ;;  %v1612_v60 = vpop.f32.mrb[12].mxu0  ;;  %v1660_v61 = vpop.f32.mrb[12].mxu1  ;;  %v1039_v62 = vmax.f32 %v1007_v53, 0.0  ;;  %v1055_v63 = vmax.f32 %v1023_v54, 0.0 }
 0x113   : > { %v1613_v0 = vpop.f32.mrb[13].mxu0  ;;  %v1661_v1 = vpop.f32.mrb[13].mxu1 }
 0x114   : > { %v1040_v2 = vmax.f32 %v1008_v58, 0.0  ;;  %v1056_v3 = vmax.f32 %v1024_v59, 0.0  ;;  %v1614_v4 = vadd.f32 %v1613_v0, %v1612_v60  ;;  %v1662_v5 = vadd.f32 %v1661_v1, %v1660_v61  ;;  %v1615_v6 = vpop.f32.mrb[14].mxu0  ;;  %v1663_v7 = vpop.f32.mrb[14].mxu1 }
 0x115   : > { %v1616_v8 = vpop.f32.mrb[15].mxu0  ;;  %v1664_v9 = vpop.f32.mrb[15].mxu1 }
 0x116   : > { %v1496_v10 = vpack.c.bf16 %v1040_v2, %v1039_v62  ;;  %v1536_v11 = vpack.c.bf16 %v1056_v3, %v1055_v63  ;;  %v970_v12 = vmul.f32 %v1614_v4, %v1952_v51  ;;  %v986_v13 = vmul.f32 %v1662_v5, %v1952_v51 }
 0x117   : > { %v1617_v14 = vadd.f32 %v1616_v8, %v1615_v6  ;;  %v1665_v15 = vadd.f32 %v1664_v9, %v1663_v7 }
 0x118   : > { %1564 = vst [vmem:[%s1971_s21 + $0x10] sm:$0xff] %v1496_v10   ;;  %1572 = vst [vmem:[%s1971_s21 + $0x50] sm:$0xff] %v1536_v11   ;;  %v1009_v16 = vadd.f32 %v1957_v57, %v970_v12  ;;  %v1025_v17 = vadd.f32 %v1957_v57, %v986_v13 }
 0x119   : > { %v971_v18 = vmul.f32 %v1617_v14, %v1952_v51  ;;  %v987_v19 = vmul.f32 %v1665_v15, %v1952_v51 }
 0x11a   : > { %v1618_v20 = vpop.f32.mrb[16].mxu0  ;;  %v1666_v21 = vpop.f32.mrb[16].mxu1  ;;  %v1041_v30 = vmax.f32 %v1009_v16, 0.0  ;;  %v1057_v31 = vmax.f32 %v1025_v17, 0.0 }
 0x11b   : > { %v1010_v22 = vadd.f32 %v1957_v57, %v971_v18  ;;  %v1026_v23 = vadd.f32 %v1957_v57, %v987_v19  ;;  %v1619_v24 = vpop.f32.mrb[17].mxu0  ;;  %v1667_v25 = vpop.f32.mrb[17].mxu1 }
 0x11c   : > { %v1620_v26 = vadd.f32 %v1619_v24, %v1618_v20  ;;  %v1668_v27 = vadd.f32 %v1667_v25, %v1666_v21  ;;  %v1621_v28 = vpop.f32.mrb[18].mxu0  ;;  %v1669_v29 = vpop.f32.mrb[18].mxu1 }
 0x11d   : > { %v1042_v32 = vmax.f32 %v1010_v22, 0.0  ;;  %v1058_v33 = vmax.f32 %v1026_v23, 0.0  ;;  %v1622_v34 = vpop.f32.mrb[19].mxu0  ;;  %v1670_v35 = vpop.f32.mrb[19].mxu1 }
 0x11e   : > { %v972_v36 = vmul.f32 %v1620_v26, %v1952_v51  ;;  %v988_v37 = vmul.f32 %v1668_v27, %v1952_v51  ;;  %v1623_v38 = vadd.f32 %v1622_v34, %v1621_v28  ;;  %v1671_v39 = vadd.f32 %v1670_v35, %v1669_v29 }
 0x11f   : > { %v1501_v40 = vpack.c.bf16 %v1042_v32, %v1041_v30  ;;  %v1541_v41 = vpack.c.bf16 %v1058_v33, %v1057_v31 }
 0x120   : > { %v1011_v42 = vadd.f32 %v1957_v57, %v972_v36  ;;  %v1027_v43 = vadd.f32 %v1957_v57, %v988_v37  ;;  %v973_v44 = vmul.f32 %v1623_v38, %v1952_v51  ;;  %v989_v45 = vmul.f32 %v1671_v39, %v1952_v51 }
 0x121   : > { %1565 = vst [vmem:[%s1971_s21 + $0x18] sm:$0xff] %v1501_v40   ;;  %1573 = vst [vmem:[%s1971_s21 + $0x58] sm:$0xff] %v1541_v41  }
 0x122   : > { %v1012_v46 = vadd.f32 %v1957_v57, %v973_v44  ;;  %v1028_v47 = vadd.f32 %v1957_v57, %v989_v45  ;;  %v1624_v48 = vpop.f32.mrb[20].mxu0  ;;  %v1672_v49 = vpop.f32.mrb[20].mxu1  ;;  %v1043_v50 = vmax.f32 %v1011_v42, 0.0  ;;  %v1059_v52 = vmax.f32 %v1027_v43, 0.0 }
 0x123   : > { %v1625_v53 = vpop.f32.mrb[21].mxu0  ;;  %v1673_v54 = vpop.f32.mrb[21].mxu1 }
 0x124   : > { %v1044_v55 = vmax.f32 %v1012_v46, 0.0  ;;  %v1060_v56 = vmax.f32 %v1028_v47, 0.0  ;;  %v1626_v58 = vadd.f32 %v1625_v53, %v1624_v48  ;;  %v1674_v59 = vadd.f32 %v1673_v54, %v1672_v49  ;;  %v1627_v60 = vpop.f32.mrb[22].mxu0  ;;  %v1675_v61 = vpop.f32.mrb[22].mxu1 }
 0x125   : > { %v1628_v62 = vpop.f32.mrb[23].mxu0  ;;  %v1676_v63 = vpop.f32.mrb[23].mxu1 }
 0x126   : > { %v1506_v0 = vpack.c.bf16 %v1044_v55, %v1043_v50  ;;  %v1546_v1 = vpack.c.bf16 %v1060_v56, %v1059_v52  ;;  %v974_v2 = vmul.f32 %v1626_v58, %v1952_v51  ;;  %v990_v3 = vmul.f32 %v1674_v59, %v1952_v51 }
 0x127   : > { %v1629_v4 = vadd.f32 %v1628_v62, %v1627_v60  ;;  %v1677_v5 = vadd.f32 %v1676_v63, %v1675_v61 }
 0x128   : > { %1566 = vst [vmem:[%s1971_s21 + $0x20] sm:$0xff] %v1506_v0   ;;  %1574 = vst [vmem:[%s1971_s21 + $0x60] sm:$0xff] %v1546_v1   ;;  %v1013_v6 = vadd.f32 %v1957_v57, %v974_v2  ;;  %v1029_v7 = vadd.f32 %v1957_v57, %v990_v3 }
 0x129   : > { %v975_v8 = vmul.f32 %v1629_v4, %v1952_v51  ;;  %v991_v9 = vmul.f32 %v1677_v5, %v1952_v51 }
 0x12a   : > { %v1630_v10 = vpop.f32.mrb[24].mxu0  ;;  %v1678_v11 = vpop.f32.mrb[24].mxu1  ;;  %v1045_v20 = vmax.f32 %v1013_v6, 0.0  ;;  %v1061_v21 = vmax.f32 %v1029_v7, 0.0 }
 0x12b   : > { %v1014_v12 = vadd.f32 %v1957_v57, %v975_v8  ;;  %v1030_v13 = vadd.f32 %v1957_v57, %v991_v9  ;;  %v1631_v14 = vpop.f32.mrb[25].mxu0  ;;  %v1679_v15 = vpop.f32.mrb[25].mxu1 }
 0x12c   : > { %v1632_v16 = vadd.f32 %v1631_v14, %v1630_v10  ;;  %v1680_v17 = vadd.f32 %v1679_v15, %v1678_v11  ;;  %v1633_v18 = vpop.f32.mrb[26].mxu0  ;;  %v1681_v19 = vpop.f32.mrb[26].mxu1 }
 0x12d   : > { %v1046_v22 = vmax.f32 %v1014_v12, 0.0  ;;  %v1062_v23 = vmax.f32 %v1030_v13, 0.0  ;;  %v1634_v24 = vpop.f32.mrb[27].mxu0  ;;  %v1682_v25 = vpop.f32.mrb[27].mxu1 }
 0x12e   : > { %v976_v26 = vmul.f32 %v1632_v16, %v1952_v51  ;;  %v992_v27 = vmul.f32 %v1680_v17, %v1952_v51  ;;  %v1635_v28 = vadd.f32 %v1634_v24, %v1633_v18  ;;  %v1683_v29 = vadd.f32 %v1682_v25, %v1681_v19 }
 0x12f   : > { %v1511_v30 = vpack.c.bf16 %v1046_v22, %v1045_v20  ;;  %v1551_v31 = vpack.c.bf16 %v1062_v23, %v1061_v21 }
 0x130   : > { %v1015_v32 = vadd.f32 %v1957_v57, %v976_v26  ;;  %v1031_v33 = vadd.f32 %v1957_v57, %v992_v27  ;;  %v977_v34 = vmul.f32 %v1635_v28, %v1952_v51  ;;  %v993_v35 = vmul.f32 %v1683_v29, %v1952_v51 }
 0x131   : > { %1567 = vst [vmem:[%s1971_s21 + $0x28] sm:$0xff] %v1511_v30   ;;  %1575 = vst [vmem:[%s1971_s21 + $0x68] sm:$0xff] %v1551_v31  }
 0x132   : > { %v1016_v36 = vadd.f32 %v1957_v57, %v977_v34  ;;  %v1032_v37 = vadd.f32 %v1957_v57, %v993_v35  ;;  %v1636_v38 = vpop.f32.mrb[28].mxu0  ;;  %v1684_v39 = vpop.f32.mrb[28].mxu1  ;;  %v1047_v40 = vmax.f32 %v1015_v32, 0.0  ;;  %v1063_v41 = vmax.f32 %v1031_v33, 0.0 }
 0x133   : > { %v1637_v42 = vpop.f32.mrb[29].mxu0  ;;  %v1685_v43 = vpop.f32.mrb[29].mxu1 }
 0x134   : > { %v1048_v44 = vmax.f32 %v1016_v36, 0.0  ;;  %v1064_v45 = vmax.f32 %v1032_v37, 0.0  ;;  %v1638_v46 = vadd.f32 %v1637_v42, %v1636_v38  ;;  %v1686_v47 = vadd.f32 %v1685_v43, %v1684_v39  ;;  %v1639_v48 = vpop.f32.mrb[30].mxu0  ;;  %v1687_v49 = vpop.f32.mrb[30].mxu1 }
 0x135   : > { %v1640_v50 = vpop.f32.mrb[31].mxu0  ;;  %v1688_v52 = vpop.f32.mrb[31].mxu1 }
 0x136   : > { %v1516_v53 = vpack.c.bf16 %v1048_v44, %v1047_v40  ;;  %v1556_v54 = vpack.c.bf16 %v1064_v45, %v1063_v41  ;;  %v978_v55 = vmul.f32 %v1638_v46, %v1952_v51  ;;  %v994_v56 = vmul.f32 %v1686_v47, %v1952_v51 }
 0x137   : > { %v1641_v58 = vadd.f32 %v1640_v50, %v1639_v48  ;;  %v1689_v59 = vadd.f32 %v1688_v52, %v1687_v49 }
 0x138   : > { %1568 = vst [vmem:[%s1971_s21 + $0x30] sm:$0xff] %v1516_v53   ;;  %1576 = vst [vmem:[%s1971_s21 + $0x70] sm:$0xff] %v1556_v54   ;;  %v1017_v60 = vadd.f32 %v1957_v57, %v978_v55  ;;  %v1033_v61 = vadd.f32 %v1957_v57, %v994_v56 }
 0x139   : > { %v979_v62 = vmul.f32 %v1641_v58, %v1952_v51  ;;  %v995_v63 = vmul.f32 %v1689_v59, %v1952_v51 }
 0x13a   : > { %v1049_v2 = vmax.f32 %v1017_v60, 0.0  ;;  %v1065_v3 = vmax.f32 %v1033_v61, 0.0 }
 0x13b   : > { %v1018_v0 = vadd.f32 %v1957_v57, %v979_v62  ;;  %v1034_v1 = vadd.f32 %v1957_v57, %v995_v63 }
 0x13d   : > { %v1050_v4 = vmax.f32 %v1018_v0, 0.0  ;;  %v1066_v5 = vmax.f32 %v1034_v1, 0.0 }
 0x13f   : > { %v1521_v6 = vpack.c.bf16 %v1050_v4, %v1049_v2  ;;  %v1561_v7 = vpack.c.bf16 %v1066_v5, %v1065_v3 }
 0x141   : > { %1569 = vst [vmem:[%s1971_s21 + $0x38] sm:$0xff] %v1521_v6   ;;  %1577 = vst [vmem:[%s1971_s21 + $0x78] sm:$0xff] %v1561_v7  }
 0x142 PF: > { %s14_s17 = sadd.s32 1, %s1816_s17   ;;  %s2059_s15 = smov %s1812_s16 }
 0x143   : > { %p11_p5 = scmp.ge.s32.totalorder %s14_s17, 4   ;;  %s2060_s16 = smov %s2062_s18 }
 0x145   :  { %13 = sbr.rel (!%p11_p5) target bundleno = 2 (0x2), region = 83 }

// kernel: _lambda_.23
= control target key start
LH: loop header
LB: loop body
LE: loop exit
PB: predicated region body
PF: predicated region fallthrough
CT: control target
= control target key end

     0   :  { %s939_s15 = smov 0   ;;  %s1224_s0 = inlined_call_operand.vmem [shape: bf16[2,9,9,64], index: 0, kind: input, shape index: {}]   ;;  %s1225_s1 = inlined_call_operand.vmem [shape: bf16[2,9,9,64], index: 1, kind: input, shape index: {}]   ;;  %s1226_s2 = inlined_call_operand.vmem [shape: bf16[2,9,9,64], index: 2, kind: input, shape index: {}]   ;;  %s1227_s3 = inlined_call_operand.vmem [shape: bf16[2,9,9,64], index: 3, kind: input, shape index: {}]   ;;  %s1228_s4 = inlined_call_operand.vmem [shape: bf16[2,8,8,64], index: 4, kind: output, shape index: {}]  }
   0x1 LB: > { %s859_s16 = sadd.s32 4294967295, %s912_s15   ;;  %p863_p0 = scmp.ge.s32.totalorder %s912_s15, 1  ;;  %s912_s15 = sphi %s939_s15, %s14_s15  }
   0x2   : > { %p192_p1 = scmp.lt.s32.totalorder %s912_s15, 3 }
   0x4   : > { %p193_p2 = pnand %p863_p0, %p192_p1 }
   0x5   : > { %p233_p3 = scmp.lt.s32.totalorder (!%p193_p2), %s859_s16, 1  ;;  %vm290_vm0 = vsmask.f32 (!%p193_p2), 3328  ;;  %vm291_vm1 = vsmask.f32 (!%p193_p2), 7440  ;;  %vm759_vm3 = vcmask (!%p193_p2), 519168  }
   0x6   : > { %196 = sbr.rel (%p193_p2) target bundleno = 100 (0x64), region = 36  ;;  %vm984_vm2 = vmor (!%p193_p2), %vm290_vm0, %vm291_vm1 }
   0xd   : > { %s1232_s16 = smov (!%p233_p3, %s859_s16), 1 }
   0xe   : > { %s950_s17 = smul.u32 72, %s1232_s16  ;;  %s896_s30 = sshll.u32 %s1232_s16, 5 }
   0xf   : > { %s1049_s7 = scalar_lea.vmem %s1228_s4, %s896_s30 }
  0x10   : > { %s956_s20 = scalar_lea.vmem %s1224_s0, %s950_s17  ;;  %s962_s23 = scalar_lea.vmem %s1225_s1, %s950_s17 }
  0x11   : > { %s968_s26 = scalar_lea.vmem %s1226_s2, %s950_s17  ;;  %v258_v0 = vld [vmem:[%s956_s20] sm:$0xf]  ;;  %v282_v1 = vld [vmem:[%s956_s20 + $0x4] sm:$0x1]  ;;  %v976_v13 = vld [vmem:[%s956_s20 + $0x8] sm:$0xf]  ;;  %s997_s29 = scalar_lea.vmem %s1227_s3, %s950_s17 }
  0x12   : > { %v294_v2 = vshrl.u32 %v258_v0, 16  ;;  %v297_v3 = vshll.u32 %v258_v0, 16  ;;  %v303_v4 = vshll.u32 %v282_v1, 16  ;;  %v421_v5 = vld [vmem:[%s968_s26] sm:$0xf]  ;;  %v632_v19 = vshrl.u32 %v976_v13, 16 }
  0x13   : > { %v266_v6 = vld [vmem:[%s962_s23] sm:$0xf]  ;;  %v453_v7 = vld [vmem:[%s968_s26 + $0x4] sm:$0x1]  ;;  %v462_v8 = vshrl.u32 %v421_v5, 16  ;;  %v465_v9 = vshll.u32 %v421_v5, 16 }
  0x14   : > { %v296_v10 = vrot.slane %v294_v2, 4  ;;  %v299_v11 = vrot.slane %v297_v3, 5  ;;  %v471_v12 = vshll.u32 %v453_v7, 16  ;;  %v886_v16 = vld [vmem:[%s956_s20 + $0xc] sm:$0x1]  ;;  %v305_v18 = vrot.slane %v303_v4, 5 }
  0x15   : > { %v464_v14 = vrot.slane %v462_v8, 4  ;;  %v467_v15 = vrot.slane %v465_v9, 5  ;;  %v635_v20 = vshll.u32 %v976_v13, 16  ;;  %v259_v21 = vld [vmem:[%s956_s20 + $0x8] sm:$0xf]  ;;  %v274_v22 = vmax.bf16 %v266_v6, %v258_v0 }
  0x16   : > { %v300_v17 = vor.u32 %v299_v11, %v296_v10  ;;  %v641_v25 = vshll.u32 %v886_v16, 16  ;;  %v267_v26 = vld [vmem:[%s962_s23 + $0x8] sm:$0xf]  ;;  %v283_v27 = vld [vmem:[%s956_s20 + $0xc] sm:$0x1]  ;;  %v308_v28 = vshrl.u32 %v259_v21, 16 }
  0x17   : > { %v468_v24 = vor.u32 %v467_v15, %v464_v14  ;;  %v473_v30 = vrot.slane %v471_v12, 5  ;;  %v634_v31 = vrot.slane %v632_v19, 4  ;;  %v637_v32 = vrot.slane %v635_v20, 5  ;;  %v991_v33 = vld [vmem:[%s968_s26 + $0x8] sm:$0xf] }
  0x18   : > { %v301_v29 = vrot.slane %v300_v17, 4  ;;  %v275_v35 = vmax.bf16 %v267_v26, %v259_v21  ;;  %v310_v36 = vrot.slane %v308_v28, 4  ;;  %v311_v37 = vshll.u32 %v259_v21, 16  ;;  %v454_v41 = vld [vmem:[%s968_s26 + $0xc] sm:$0x1] }
  0x19   : > { %v469_v34 = vrot.slane %v468_v24, 4  ;;  %v638_v39 = vor.u32 %v637_v32, %v634_v31  ;;  %v317_v40 = vshll.u32 %v283_v27, 16  ;;  %v476_v42 = vshrl.u32 %v991_v33, 16  ;;  %v1004_v43 = vld [vmem:[%s956_s20 + $0x10] sm:$0xf] }
  0x1a   : > { %v306_v38 = vsel %vm984_vm2, %v301_v29, %v305_v18  ;;  %v1006_v45 = vrot.slane %v641_v25, 5  ;;  %v313_v46 = vrot.slane %v311_v37, 5  ;;  %v479_v47 = vshll.u32 %v991_v33, 16  ;;  %v887_v48 = vld [vmem:[%s956_s20 + $0x14] sm:$0x1] }
  0x1b   : > { %v413_v44 = vmax.bf16 %v306_v38, %v274_v22  ;;  %v437_v49 = vld [vmem:[%s997_s29] sm:$0xf]  ;;  %v639_v50 = vrot.slane %v638_v39, 4  ;;  %v319_v51 = vrot.slane %v317_v40, 5  ;;  %v478_v52 = vrot.slane %v476_v42, 4 }
  0x1c   : > { %v485_v53 = vshll.u32 %v454_v41, 16  ;;  %v314_v55 = vor.u32 %v313_v46, %v310_v36  ;;  %v481_v56 = vrot.slane %v479_v47, 5  ;;  %v646_v57 = vshrl.u32 %v1004_v43, 16  ;;  %v1013_v58 = vld [vmem:[%s956_s20 + $0x10] sm:$0xf] }
  0x1d   : > { %v429_v54 = vmax.bf16 %v421_v5, %v413_v44  ;;  %v474_v59 = vsel %vm984_vm2, %v469_v34, %v473_v30  ;;  %v649_v61 = vshll.u32 %v1004_v43, 16  ;;  %v655_v62 = vshll.u32 %v887_v48, 16  ;;  %v284_v3 = vld [vmem:[%s956_s20 + $0x14] sm:$0x1]  ;;  %v1026_v8 = vld [vmem:[%s968_s26 + $0x10] sm:$0xf] }
  0x1e   : > { %v487_v60 = vrot.slane %v485_v53, 5  ;;  %v315_v0 = vrot.slane %v314_v55, 4  ;;  %v482_v1 = vor.u32 %v481_v56, %v478_v52  ;;  %v648_v2 = vrot.slane %v646_v57, 4  ;;  %v878_v10 = vld [vmem:[%s962_s23 + $0x8] sm:$0xf] }
  0x1f   : > { %v445_v63 = vmax.bf16 %v437_v49, %v429_v54  ;;  %v644_v4 = vsel %vm984_vm2, %v639_v50, %v1006_v45  ;;  %v651_v5 = vrot.slane %v649_v61, 5  ;;  %v1022_v6 = vrot.slane %v655_v62, 5  ;;  %v438_v16 = vld [vmem:[%s997_s29 + $0x8] sm:$0xf]  ;;  %v455_v20 = vld [vmem:[%s968_s26 + $0x14] sm:$0x1] }
  0x20   : > { %v322_v7 = vshrl.u32 %v1013_v58, 16  ;;  %v320_v11 = vsel %vm984_vm2, %v315_v0, %v319_v51  ;;  %v483_v12 = vrot.slane %v482_v1, 4  ;;  %v325_v14 = vshll.u32 %v1013_v58, 16  ;;  %v268_v24 = vld [vmem:[%s962_s23 + $0x10] sm:$0xf] }
  0x21   : > { %v581_v9 = vmax.bf16 %v474_v59, %v445_v63  ;;  %v414_v15 = vmax.bf16 %v320_v11, %v275_v35  ;;  %v652_v17 = vor.u32 %v651_v5, %v648_v2  ;;  %v331_v19 = vshll.u32 %v284_v3, 16  ;;  %v1041_v27 = vld [vmem:[%s956_s20 + $0x18] sm:$0xf]  ;;  %v888_v36 = vld [vmem:[%s956_s20 + $0x1c] sm:$0x1] }
  0x22   : > { %v324_v18 = vrot.slane %v322_v7, 4  ;;  %v488_v22 = vsel %vm984_vm2, %v483_v12, %v487_v60  ;;  %v327_v25 = vrot.slane %v325_v14, 5  ;;  %v490_v26 = vshrl.u32 %v1026_v8, 16  ;;  %v1054_v40 = vld [vmem:[%s956_s20 + $0x18] sm:$0xf] }
  0x23   : > { %v598_v21 = vmax.bf16 %v976_v13, %v581_v9  ;;  %v430_v28 = vmax.bf16 %v991_v33, %v414_v15  ;;  %v653_v29 = vrot.slane %v652_v17, 4  ;;  %v333_v30 = vrot.slane %v331_v19, 5  ;;  %v1061_v46 = vld [vmem:[%s962_s23 + $0x18] sm:$0xf]  ;;  %v879_v48 = vld [vmem:[%s962_s23 + $0x10] sm:$0xf] }
  0x24   : > { %v493_v31 = vshll.u32 %v1026_v8, 16  ;;  %v328_v34 = vor.u32 %v327_v25, %v324_v18  ;;  %v492_v13 = vrot.slane %v490_v26, 4  ;;  %v499_v35 = vshll.u32 %v455_v20, 16  ;;  %v285_v52 = vld [vmem:[%s956_s20 + $0x1c] sm:$0x1] }
  0x25   : > { %v615_v32 = vmax.bf16 %v878_v10, %v598_v21  ;;  %v446_v37 = vmax.bf16 %v438_v16, %v430_v28  ;;  %v276_v33 = vmax.bf16 %v268_v24, %v1013_v58  ;;  %v660_v39 = vshrl.u32 %v1041_v27, 16  ;;  %v1071_v57 = vld [vmem:[%s968_s26 + $0x18] sm:$0xf]  ;;  %v439_v60 = vld [vmem:[%s997_s29 + $0x10] sm:$0xf] }
  0x26   : > { %v495_v38 = vrot.slane %v493_v31, 5  ;;  %v658_v42 = vsel %vm984_vm2, %v653_v29, %v1022_v6  ;;  %v329_v44 = vrot.slane %v328_v34, 4  ;;  %v663_v45 = vshll.u32 %v1041_v27, 16  ;;  %v456_v3 = vld [vmem:[%s968_s26 + $0x1c] sm:$0x1] }
  0x27   : > { %v751_v41 = vmax.bf16 %v644_v4, %v615_v32  ;;  %v582_v47 = vmax.bf16 %v488_v22, %v446_v37  ;;  %v662_v50 = vrot.slane %v660_v39, 4  ;;  %v669_v51 = vshll.u32 %v888_v36, 16  ;;  %v1082_v7 = vld [vmem:[%s956_s20 + $0x20] sm:$0xf]  ;;  %v889_v14 = vld [vmem:[%s956_s20 + $0x24] sm:$0x1] }
  0x28   : > { %v496_v49 = vor.u32 %v495_v38, %v492_v13  ;;  %v334_v53 = vsel %vm984_vm2, %v329_v44, %v333_v30  ;;  %v501_v54 = vrot.slane %v499_v35, 5  ;;  %v665_v55 = vrot.slane %v663_v45, 5  ;;  %v1090_v22 = vld [vmem:[%s956_s20 + $0x20] sm:$0xf]  ;;  %v286_v29 = vld [vmem:[%s956_s20 + $0x24] sm:$0x1] }
  0x29   : > { %760 = vst.msk [vmem:[%s1049_s7] sm:$0xf] %vm759_vm3, %v751_v41  ;;  %v336_v56 = vshrl.u32 %v1054_v40, 16  ;;  %v599_v58 = vmax.bf16 %v1004_v43, %v582_v47  ;;  %v415_v59 = vmax.bf16 %v334_v53, %v276_v33  ;;  %v277_v62 = vmax.bf16 %v1061_v46, %v1054_v40  ;;  %v880_v30 = vld [vmem:[%s962_s23 + $0x18] sm:$0xf] }
  0x2a   : > { %v497_v61 = vrot.slane %v496_v49, 4  ;;  %v666_v63 = vor.u32 %v665_v55, %v662_v50  ;;  %v339_v1 = vshll.u32 %v1054_v40, 16  ;;  %v345_v2 = vshll.u32 %v285_v52, 16  ;;  %v1104_v38 = vld [vmem:[%s968_s26 + $0x20] sm:$0xf] }
  0x2b   : > { %v338_v0 = vrot.slane %v336_v56, 4  ;;  %v616_v4 = vmax.bf16 %v879_v48, %v599_v58  ;;  %v431_v5 = vmax.bf16 %v1026_v8, %v415_v59  ;;  %v671_v6 = vrot.slane %v669_v51, 5  ;;  %v440_v40 = vld [vmem:[%s997_s29 + $0x18] sm:$0xf]  ;;  %v457_v48 = vld [vmem:[%s968_s26 + $0x24] sm:$0x1] }
  0x2c   : > { %v504_v43 = vshrl.u32 %v1071_v57, 16  ;;  %v502_v9 = vsel %vm984_vm2, %v497_v61, %v501_v54  ;;  %v667_v10 = vrot.slane %v666_v63, 4  ;;  %v341_v11 = vrot.slane %v339_v1, 5  ;;  %v1112_v49 = vld [vmem:[%s956_s20 + $0x28] sm:$0xf] }
  0x2d   : > { %v507_v12 = vshll.u32 %v1071_v57, 16  ;;  %v752_v15 = vmax.bf16 %v658_v42, %v616_v4  ;;  %v447_v16 = vmax.bf16 %v439_v60, %v431_v5  ;;  %v513_v17 = vshll.u32 %v456_v3, 16  ;;  %v270_v51 = vld [vmem:[%s962_s23 + $0x20] sm:$0xf]  ;;  %v890_v63 = vld [vmem:[%s956_s20 + $0x2c] sm:$0x1] }
  0x2e   : > { %v506_v8 = vrot.slane %v504_v43, 4  ;;  %v342_v18 = vor.u32 %v341_v11, %v338_v0  ;;  %v347_v19 = vrot.slane %v345_v2, 5  ;;  %v674_v21 = vshrl.u32 %v1082_v7, 16  ;;  %v263_v4 = vld [vmem:[%s956_s20 + $0x28] sm:$0xf] }
  0x2f   : > { %v509_v20 = vrot.slane %v507_v12, 5  ;;  %761 = vst.msk [vmem:[%s1049_s7 + $0x4] sm:$0xf] %vm759_vm3, %v752_v15  ;;  %v583_v24 = vmax.bf16 %v502_v9, %v447_v16  ;;  %v672_v25 = vsel %vm984_vm2, %v667_v10, %v671_v6  ;;  %v677_v26 = vshll.u32 %v1082_v7, 16  ;;  %v271_v5 = vld [vmem:[%s962_s23 + $0x28] sm:$0xf] }
  0x30   : > { %v683_v28 = vshll.u32 %v889_v14, 16  ;;  %v343_v31 = vrot.slane %v342_v18, 4  ;;  %v515_v34 = vrot.slane %v513_v17, 5  ;;  %v676_v13 = vrot.slane %v674_v21, 4  ;;  %v287_v16 = vld [vmem:[%s956_s20 + $0x2c] sm:$0x1] }
  0x31   : > { %v510_v32 = vor.u32 %v509_v20, %v506_v8  ;;  %v600_v35 = vmax.bf16 %v1041_v27, %v583_v24  ;;  %v679_v36 = vrot.slane %v677_v26, 5  ;;  %v350_v33 = vshrl.u32 %v1090_v22, 16  ;;  %v1133_v8 = vld [vmem:[%s968_s26 + $0x28] sm:$0xf]  ;;  %v881_v17 = vld [vmem:[%s962_s23 + $0x20] sm:$0xf] }
  0x32   : > { %v1100_v37 = vrot.slane %v683_v28, 5  ;;  %v348_v39 = vsel %vm984_vm2, %v343_v31, %v347_v19  ;;  %v353_v42 = vshll.u32 %v1090_v22, 16  ;;  %v359_v44 = vshll.u32 %v286_v29, 16 }
  0x33   : > { %v511_v41 = vrot.slane %v510_v32, 4  ;;  %v617_v45 = vmax.bf16 %v880_v30, %v600_v35  ;;  %v416_v46 = vmax.bf16 %v348_v39, %v277_v62  ;;  %v680_v47 = vor.u32 %v679_v36, %v676_v13  ;;  %v458_v32 = vld [vmem:[%s968_s26 + $0x2c] sm:$0x1] }
  0x34   : > { %v352_v27 = vrot.slane %v350_v33, 4  ;;  %v355_v52 = vrot.slane %v353_v42, 5  ;;  %v361_v53 = vrot.slane %v359_v44, 5  ;;  %v518_v54 = vshrl.u32 %v1104_v38, 16  ;;  %v891_v42 = vld [vmem:[%s956_s20 + $0x34] sm:$0x1] }
  0x35   : > { %v516_v50 = vsel %vm984_vm2, %v511_v41, %v515_v34  ;;  %v753_v55 = vmax.bf16 %v672_v25, %v617_v45  ;;  %v432_v56 = vmax.bf16 %v1071_v57, %v416_v46  ;;  %v681_v58 = vrot.slane %v680_v47, 4  ;;  %v441_v25 = vld [vmem:[%s997_s29 + $0x20] sm:$0xf] }
  0x36   : > { %v521_v59 = vshll.u32 %v1104_v38, 16  ;;  %v356_v60 = vor.u32 %v355_v52, %v352_v27  ;;  %v520_v61 = vrot.slane %v518_v54, 4  ;;  %v527_v62 = vshll.u32 %v457_v48, 16 }
  0x37   : > { %v688_v0 = vshrl.u32 %v1112_v49, 16  ;;  %762 = vst.msk [vmem:[%s1049_s7 + $0x8] sm:$0xf] %vm759_vm3, %v753_v55  ;;  %v448_v1 = vmax.bf16 %v440_v40, %v432_v56  ;;  %v278_v2 = vmax.bf16 %v270_v51, %v1090_v22  ;;  %v691_v57 = vshll.u32 %v1112_v49, 16  ;;  %v1153_v51 = vld [vmem:[%s956_s20 + $0x30] sm:$0xf] }
  0x38   : > { %v523_v3 = vrot.slane %v521_v59, 5  ;;  %v686_v6 = vsel %vm984_vm2, %v681_v58, %v1100_v37  ;;  %v357_v43 = vrot.slane %v356_v60, 4  ;;  %v529_v9 = vrot.slane %v527_v62, 5  ;;  %v288_v55 = vld [vmem:[%s956_s20 + $0x34] sm:$0x1] }
  0x39   : > { %v690_v10 = vrot.slane %v688_v0, 4  ;;  %v584_v11 = vmax.bf16 %v516_v50, %v448_v1  ;;  %v693_v14 = vrot.slane %v691_v57, 5  ;;  %v697_v15 = vshll.u32 %v890_v63, 16  ;;  %v882_v56 = vld [vmem:[%s962_s23 + $0x28] sm:$0xf] }
  0x3a   : > { %v524_v12 = vor.u32 %v523_v3, %v520_v61  ;;  %v362_v18 = vsel %vm984_vm2, %v357_v43, %v361_v53  ;;  %v279_v19 = vmax.bf16 %v271_v5, %v263_v4  ;;  %v364_v20 = vshrl.u32 %v263_v4, 16  ;;  %v1162_v62 = vld [vmem:[%s968_s26 + $0x30] sm:$0xf]  ;;  %v442_v3 = vld [vmem:[%s997_s29 + $0x28] sm:$0xf] }
  0x3b   : > { %v367_v21 = vshll.u32 %v263_v4, 16  ;;  %v601_v22 = vmax.bf16 %v1082_v7, %v584_v11  ;;  %v417_v24 = vmax.bf16 %v362_v18, %v278_v2  ;;  %v694_v28 = vor.u32 %v693_v14, %v690_v10  ;;  %v1146_v7 = vld [vmem:[%s956_s20 + $0x30] sm:$0xf] }
  0x3c   : > { %v525_v26 = vrot.slane %v524_v12, 4  ;;  %v366_v29 = vrot.slane %v364_v20, 4  ;;  %v373_v31 = vshll.u32 %v287_v16, 16  ;;  %v532_v34 = vshrl.u32 %v1133_v8, 16  ;;  %v1174_v12 = vld [vmem:[%s956_s20 + $0x38] sm:$0xf] }
  0x3d   : > { %v369_v30 = vrot.slane %v367_v21, 5  ;;  %v618_v13 = vmax.bf16 %v881_v17, %v601_v22  ;;  %v433_v35 = vmax.bf16 %v1104_v38, %v417_v24  ;;  %v699_v37 = vrot.slane %v697_v15, 5  ;;  %v272_v17 = vld [vmem:[%s962_s23 + $0x30] sm:$0xf]  ;;  %v892_v22 = vld [vmem:[%s956_s20 + $0x3c] sm:$0x1] }
  0x3e   : > { %v530_v36 = vsel %vm984_vm2, %v525_v26, %v529_v9  ;;  %v375_v39 = vrot.slane %v373_v31, 5  ;;  %v534_v40 = vrot.slane %v532_v34, 4  ;;  %v535_v41 = vshll.u32 %v1133_v8, 16  ;;  %v883_v24 = vld [vmem:[%s962_s23 + $0x30] sm:$0xf] }
  0x3f   : > { %v370_v33 = vor.u32 %v369_v30, %v366_v29  ;;  %v754_v44 = vmax.bf16 %v686_v6, %v618_v13  ;;  %v449_v45 = vmax.bf16 %v441_v25, %v433_v35  ;;  %v695_v46 = vrot.slane %v694_v28, 4  ;;  %v265_v13 = vld [vmem:[%s956_s20 + $0x38] sm:$0xf]  ;;  %v289_v35 = vld [vmem:[%s956_s20 + $0x3c] sm:$0x1] }
  0x40   : > { %v541_v38 = vshll.u32 %v458_v32, 16  ;;  %v537_v27 = vrot.slane %v535_v41, 5  ;;  %v702_v48 = vshrl.u32 %v1146_v7, 16  ;;  %v705_v50 = vshll.u32 %v1146_v7, 16 }
  0x41   : > { %v371_v47 = vrot.slane %v370_v33, 4  ;;  %763 = vst.msk [vmem:[%s1049_s7 + $0xc] sm:$0xf] %vm759_vm3, %v754_v44  ;;  %v585_v52 = vmax.bf16 %v530_v36, %v449_v45  ;;  %v711_v54 = vshll.u32 %v891_v42, 16  ;;  %v700_v0 = vsel %vm984_vm2, %v695_v46, %v699_v37  ;;  %v428_v46 = vld [vmem:[%s968_s26 + $0x38] sm:$0xf] }
  0x42   : > { %v543_v53 = vrot.slane %v541_v38, 5  ;;  %v538_v59 = vor.u32 %v537_v27, %v534_v40  ;;  %v704_v60 = vrot.slane %v702_v48, 4  ;;  %v707_v61 = vrot.slane %v705_v50, 5  ;;  %v273_v40 = vld [vmem:[%s962_s23 + $0x38] sm:$0xf] }
  0x43   : > { %v376_v58 = vsel %vm984_vm2, %v371_v47, %v375_v39  ;;  %v602_v63 = vmax.bf16 %v1112_v49, %v585_v52  ;;  %v378_v2 = vshrl.u32 %v1153_v51, 16  ;;  %v381_v5 = vshll.u32 %v1153_v51, 16  ;;  %v459_v49 = vld [vmem:[%s968_s26 + $0x34] sm:$0x1]  ;;  %v443_v52 = vld [vmem:[%s997_s29 + $0x30] sm:$0xf] }
  0x44   : > { %v418_v1 = vmax.bf16 %v376_v58, %v279_v19  ;;  %v539_v57 = vrot.slane %v538_v59, 4  ;;  %v708_v4 = vor.u32 %v707_v61, %v704_v60  ;;  %v387_v6 = vshll.u32 %v288_v55, 16  ;;  %v460_v55 = vld [vmem:[%s968_s26 + $0x3c] sm:$0x1]  ;;  %v877_v60 = vld [vmem:[%s956_s20 + $0x40] sm:$0xf] }
  0x45   : > { %v619_v43 = vmax.bf16 %v882_v56, %v602_v63  ;;  %v380_v10 = vrot.slane %v378_v2, 4  ;;  %v546_v11 = vshrl.u32 %v1162_v62, 16  ;;  %v713_v16 = vrot.slane %v711_v54, 5  ;;  %v893_v2 = vld [vmem:[%s956_s20 + $0x44] sm:$0x1] }
  0x46   : > { %v434_v9 = vmax.bf16 %v1133_v8, %v418_v1  ;;  %v544_v14 = vsel %vm984_vm2, %v539_v57, %v543_v53  ;;  %v709_v15 = vrot.slane %v708_v4, 4  ;;  %v383_v18 = vrot.slane %v381_v5, 5 }
  0x47   : > { %v755_v19 = vmax.bf16 %v700_v0, %v619_v43  ;;  %v548_v21 = vrot.slane %v546_v11, 4  ;;  %v549_v8 = vshll.u32 %v1162_v62, 16  ;;  %v389_v26 = vrot.slane %v387_v6, 5 }
  0x48   : > { %v450_v20 = vmax.bf16 %v442_v3, %v434_v9  ;;  %v384_v25 = vor.u32 %v383_v18, %v380_v10  ;;  %v555_v28 = vshll.u32 %v459_v49, 16  ;;  %v716_v29 = vshrl.u32 %v1174_v12, 16  ;;  %v884_v18 = vld [vmem:[%s962_s23 + $0x38] sm:$0xf] }
  0x49   : > { %764 = vst.msk [vmem:[%s1049_s7 + $0x10] sm:$0xf] %vm759_vm3, %v755_v19  ;;  %v280_v31 = vmax.bf16 %v272_v17, %v1153_v51  ;;  %v551_v32 = vrot.slane %v549_v8, 5  ;;  %v719_v34 = vshll.u32 %v1174_v12, 16  ;;  %v714_v36 = vsel %vm984_vm2, %v709_v15, %v713_v16 }
  0x4a   : > { %v586_v30 = vmax.bf16 %v544_v14, %v450_v20  ;;  %v385_v37 = vrot.slane %v384_v25, 4  ;;  %v718_v33 = vrot.slane %v716_v29, 4  ;;  %v725_v39 = vshll.u32 %v892_v22, 16 }
  0x4b   : > { %v552_v42 = vor.u32 %v551_v32, %v548_v21  ;;  %v557_v44 = vrot.slane %v555_v28, 5  ;;  %v721_v45 = vrot.slane %v719_v34, 5  ;;  %v392_v47 = vshrl.u32 %v265_v13, 16  ;;  %v444_v28 = vld [vmem:[%s997_s29 + $0x38] sm:$0xf] }
  0x4c   : > { %v603_v41 = vmax.bf16 %v1146_v7, %v586_v30  ;;  %v390_v38 = vsel %vm984_vm2, %v385_v37, %v389_v26  ;;  %v395_v27 = vshll.u32 %v265_v13, 16  ;;  %v401_v48 = vshll.u32 %v289_v35, 16  ;;  %v885_v37 = vld [vmem:[%s962_s23 + $0x40] sm:$0xf] }
  0x4d   : > { %v419_v51 = vmax.bf16 %v390_v38, %v280_v31  ;;  %v553_v53 = vrot.slane %v552_v42, 4  ;;  %v281_v54 = vmax.bf16 %v273_v40, %v265_v13  ;;  %v722_v7 = vor.u32 %v721_v45, %v718_v33 }
  0x4e   : > { %v620_v50 = vmax.bf16 %v883_v24, %v603_v41  ;;  %v394_v56 = vrot.slane %v392_v47, 4  ;;  %v397_v58 = vrot.slane %v395_v27, 5  ;;  %v560_v59 = vshrl.u32 %v428_v46, 16 }
  0x4f   : > { %v435_v63 = vmax.bf16 %v1162_v62, %v419_v51  ;;  %v558_v0 = vsel %vm984_vm2, %v553_v53, %v557_v44  ;;  %v403_v1 = vrot.slane %v401_v48, 5  ;;  %v563_v4 = vshll.u32 %v428_v46, 16 }
  0x50   : > { %v756_v61 = vmax.bf16 %v714_v36, %v620_v50  ;;  %v398_v3 = vor.u32 %v397_v58, %v394_v56  ;;  %v562_v57 = vrot.slane %v560_v59, 4  ;;  %v569_v5 = vshll.u32 %v460_v55, 16 }
  0x51   : > { %v451_v6 = vmax.bf16 %v443_v52, %v435_v63  ;;  %v727_v43 = vrot.slane %v725_v39, 5  ;;  %v730_v9 = vshrl.u32 %v877_v60, 16  ;;  %v733_v10 = vshll.u32 %v877_v60, 16 }
  0x52   : > { %765 = vst.msk [vmem:[%s1049_s7 + $0x14] sm:$0xf] %vm759_vm3, %v756_v61  ;;  %v723_v49 = vrot.slane %v722_v7, 4  ;;  %v399_v11 = vrot.slane %v398_v3, 4  ;;  %v565_v62 = vrot.slane %v563_v4, 5  ;;  %v739_v14 = vshll.u32 %v893_v2, 16 }
  0x53   : > { %v587_v15 = vmax.bf16 %v558_v0, %v451_v6  ;;  %v732_v16 = vrot.slane %v730_v9, 4  ;;  %v735_v17 = vrot.slane %v733_v10, 5  ;;  %v571_v21 = vrot.slane %v569_v5, 5 }
  0x54   : > { %v404_v19 = vsel %vm984_vm2, %v399_v11, %v403_v1  ;;  %v566_v20 = vor.u32 %v565_v62, %v562_v57  ;;  %v741_v25 = vrot.slane %v739_v14, 5  ;;  %v728_v26 = vsel %vm984_vm2, %v723_v49, %v727_v43 }
  0x55   : > { %v604_v8 = vmax.bf16 %v1174_v12, %v587_v15  ;;  %v420_v22 = vmax.bf16 %v404_v19, %v281_v54  ;;  %v736_v24 = vor.u32 %v735_v17, %v732_v16 }
  0x56   : > { %v567_v29 = vrot.slane %v566_v20, 4 }
  0x57   : > { %v621_v30 = vmax.bf16 %v884_v18, %v604_v8  ;;  %v436_v31 = vmax.bf16 %v428_v46, %v420_v22  ;;  %v737_v32 = vrot.slane %v736_v24, 4 }
  0x58   : > { %v572_v34 = vsel %vm984_vm2, %v567_v29, %v571_v21 }
  0x59   : > { %v757_v13 = vmax.bf16 %v728_v26, %v621_v30  ;;  %v452_v35 = vmax.bf16 %v444_v28, %v436_v31  ;;  %v742_v12 = vsel %vm984_vm2, %v737_v32, %v741_v25 }
  0x5b   : > { %766 = vst.msk [vmem:[%s1049_s7 + $0x18] sm:$0xf] %vm759_vm3, %v757_v13  ;;  %v588_v36 = vmax.bf16 %v572_v34, %v452_v35 }
  0x5d   : > { %v605_v33 = vmax.bf16 %v877_v60, %v588_v36 }
  0x5f   : > { %v622_v39 = vmax.bf16 %v885_v37, %v605_v33 }
  0x61   : > { %v758_v40 = vmax.bf16 %v742_v12, %v622_v39 }
  0x63   : > { %767 = vst.msk [vmem:[%s1049_s7 + $0x1c] sm:$0xf] %vm759_vm3, %v758_v40 }
  0x64 PF: > { %s14_s15 = sadd.s32 1, %s912_s15  }
  0x65   : > { %p11_p4 = scmp.ge.s32.totalorder %s14_s15, 4  }
  0x67   :  { %13 = sbr.rel (!%p11_p4) target bundleno = 1 (0x1), region = 77 }

// kernel: _lambda_.24
= control target key start
LH: loop header
LB: loop body
LE: loop exit
PB: predicated region body
PF: predicated region fallthrough
CT: control target
= control target key end

     0   :  { %s1273_s15 = smov 0   ;;  %s1275_s16 = smov 0   ;;  %s1444_s0 = inlined_call_operand.vmem [shape: bf16[128,640], index: 0, kind: input, shape index: {}]   ;;  %s1445_s1 = inlined_call_operand.vmem [shape: bf16[640,128], index: 1, kind: input, shape index: {}]   ;;  %s1446_s2 = inlined_call_operand.vmem [shape: f32[1,128], index: 2, kind: input, shape index: {}]   ;;  %s1447_s3 = inlined_call_operand.vmem [shape: f32[1,128], index: 3, kind: input, shape index: {}]   ;;  %s1448_s4 = inlined_call_operand.vmem [shape: bf16[128,128], index: 4, kind: output, shape index: {}]  }
   0x1   :  { %s1277_s17 = smov 0   ;;  %s1279_s18 = smov 0  }
   0x2   :  { %s1281_s19 = smov 0  }
   0x3 LB: > { %s26_s20 = sadd.s32 1, %s1241_s18  ;;  %p49_p1 = scmp.ne.s32.totalorder %s1233_s16, %s1229_s15  ;;  %s1245_s19 = sphi %s1281_s19, %s14_s19   ;;  %s1241_s18 = sphi %s1279_s18, %s1452_s18   ;;  %s1237_s17 = sphi %s1277_s17, %s1451_s17   ;;  %s1233_s16 = sphi %s1275_s16, %s1450_s16   ;;  %s1229_s15 = sphi %s1273_s15, %s1449_s15  }
   0x4   : > { %p27_p0 = scmp.ge.s32.totalorder %s26_s20, 5  ;;  %p50_p2 = scmp.eq.s32.totalorder %s1245_s19, 0 }
   0x5   : > { %s42_s22 = sadd.s32 1, %s1233_s16  ;;  %p976_p5 = scmp.ge.s32.totalorder %s1245_s19, 5 }
   0x6   : > { %s1454_s20 = smov (%p27_p0, %s26_s20), 0  ;;  %p51_p3 = por %p50_p2, %p49_p1 }
   0x7   : > { %s38_s21 = ssub.s32 %s1241_s18, %s1454_s20  ;;  %195 = sbr.rel (%p976_p5) target bundleno = 28 (0x1c), region = 24 }
   0x8   : > { %p40_p4 = scmp.eq.s32.totalorder %s38_s21, 0 }
   0xa   : > { %s1308_s23 = scalar_select %p40_p4, %s1233_s16, %s42_s22  }
   0xe   : > { %198 = sbr.rel (!%p51_p3) target bundleno = 28 (0x1c), region = 28  ;;  %s200_s24 = sand.u32 (%p51_p3), 1, %s1233_s16  }
   0xf   : > { %s978_s25 = sshll.u32 (%p51_p3), %s1241_s18, 2  ;;  %s977_s26 = sshll.u32 (%p51_p3), %s200_s24, 6 }
  0x10   : > { %s1316_s29 = scalar_lea.vmem (%p51_p3), %s1444_s0, %s978_s25  ;;  %s202_s30 = scalar_lea.vmem (%p51_p3), [#allocation3], %s977_s26 }
  0x11   : > { %v223_v0 = vld [vmem:[%s1316_s29] sm:$0xf] (%p51_p3)  ;;  %v225_v1 = vld [vmem:[%s1316_s29 + $0x14] sm:$0xf] (%p51_p3)  ;;  %v227_v2 = vld [vmem:[%s1316_s29 + $0x28] sm:$0xf] (%p51_p3) }
  0x12   : > { %224 = vst [vmem:[%s202_s30] sm:$0xf] (%p51_p3), %v223_v0  ;;  %226 = vst [vmem:[%s202_s30 + $0x4] sm:$0xf] (%p51_p3), %v225_v1  ;;  %v229_v3 = vld [vmem:[%s1316_s29 + $0x3c] sm:$0xf] (%p51_p3) }
  0x13   : > { %v231_v4 = vld [vmem:[%s1316_s29 + $0x50] sm:$0xf] (%p51_p3)  ;;  %228 = vst [vmem:[%s202_s30 + $0x8] sm:$0xf] (%p51_p3), %v227_v2  ;;  %230 = vst [vmem:[%s202_s30 + $0xc] sm:$0xf] (%p51_p3), %v229_v3 }
  0x14   : > { %232 = vst [vmem:[%s202_s30 + $0x10] sm:$0xf] (%p51_p3), %v231_v4  ;;  %v233_v5 = vld [vmem:[%s1316_s29 + $0x64] sm:$0xf] (%p51_p3)  ;;  %v235_v6 = vld [vmem:[%s1316_s29 + $0x78] sm:$0xf] (%p51_p3) }
  0x15   : > { %v237_v7 = vld [vmem:[%s1316_s29 + $0x8c] sm:$0xf]  ;;  %234 = vst [vmem:[%s202_s30 + $0x14] sm:$0xf] %v233_v5  ;;  %236 = vst [vmem:[%s202_s30 + $0x18] sm:$0xf] %v235_v6 }
  0x16   : > { %238 = vst [vmem:[%s202_s30 + $0x1c] sm:$0xf] %v237_v7  ;;  %v239_v8 = vld [vmem:[%s1316_s29 + $0xa0] sm:$0xf]  ;;  %v241_v9 = vld [vmem:[%s1316_s29 + $0xb4] sm:$0xf] }
  0x17   : > { %v243_v10 = vld [vmem:[%s1316_s29 + $0xc8] sm:$0xf]  ;;  %240 = vst [vmem:[%s202_s30 + $0x20] sm:$0xf] %v239_v8  ;;  %242 = vst [vmem:[%s202_s30 + $0x24] sm:$0xf] %v241_v9 }
  0x18   : > { %244 = vst [vmem:[%s202_s30 + $0x28] sm:$0xf] %v243_v10  ;;  %v245_v11 = vld [vmem:[%s1316_s29 + $0xdc] sm:$0xf]  ;;  %v247_v12 = vld [vmem:[%s1316_s29 + $0xf0] sm:$0xf] }
  0x19   : > { %v249_v13 = vld [vmem:[%s1316_s29 + $0x104] sm:$0xf]  ;;  %246 = vst [vmem:[%s202_s30 + $0x2c] sm:$0xf] %v245_v11  ;;  %248 = vst [vmem:[%s202_s30 + $0x30] sm:$0xf] %v247_v12 }
  0x1a   : > { %250 = vst [vmem:[%s202_s30 + $0x34] sm:$0xf] %v249_v13  ;;  %v251_v14 = vld [vmem:[%s1316_s29 + $0x118] sm:$0xf]  ;;  %v253_v15 = vld [vmem:[%s1316_s29 + $0x12c] sm:$0xf] }
  0x1b   : > { %252 = vst [vmem:[%s202_s30 + $0x38] sm:$0xf] %v251_v14  ;;  %254 = vst [vmem:[%s202_s30 + $0x3c] sm:$0xf] %v253_v15 }
  0x1c PF: > { %p979_p6 = scmp.ge.s32.totalorder %s1245_s19, 1  ;;  %p320_p7 = scmp.lt.s32.totalorder %s1245_s19, 6 }
  0x1e   : > { %p321_p8 = pnand %p979_p6, %p320_p7 }
  0x1f   : > { %s327_s5 = sand.u32 (!%p321_p8), 1, %s1229_s15   ;;  %s981_s6 = sshll.u32 (!%p321_p8), %s1237_s17, 4 }
  0x20   : > { %324 = sbr.rel (%p321_p8) target bundleno = 325 (0x145), region = 73  ;;  %s980_s7 = sshll.u32 (!%p321_p8), %s327_s5, 6 }
  0x21   : > { %p371_p9 = scmp.lt.s32.totalorder (!%p321_p8), %s981_s6, 79  ;;  %s1343_s12 = scalar_lea.vmem (!%p321_p8), [#allocation3], %s980_s7 }
  0x22   : > { %p983_p10 = scmp.ne.s32.totalorder (!%p321_p8), %s1237_s17, 0 }
  0x27   : > { %s1456_s6 = smov (!%p371_p9, %s981_s6), 79  ;;  %398 = sbr.rel (%p983_p10) target bundleno = 49 (0x31), region = 81 }
  0x28   : > { %s982_s8 = sshll.u32 %s1456_s6, 2  ;;  %v1247_v16 = vmov (!%p983_p10), 0.0  }
  0x29   : > { %s1341_s11 = scalar_lea.vmem %s1445_s1, %s982_s8  ;;  %399 = vst [vmem:[#allocation2] sm:$0xff] (!%p983_p10), %v1247_v16  ;;  %400 = vst [vmem:[#allocation2 + $0x8] sm:$0xff] (!%p983_p10), %v1247_v16 }
  0x2a   : > { %401 = vst [vmem:[#allocation2 + $0x10] sm:$0xff] (!%p983_p10), %v1247_v16  ;;  %402 = vst [vmem:[#allocation2 + $0x18] sm:$0xff] (!%p983_p10), %v1247_v16 }
  0x2b   : > { %403 = vst [vmem:[#allocation2 + $0x20] sm:$0xff] (!%p983_p10), %v1247_v16  ;;  %404 = vst [vmem:[#allocation2 + $0x28] sm:$0xff] (!%p983_p10), %v1247_v16 }
  0x2c   : > { %405 = vst [vmem:[#allocation2 + $0x30] sm:$0xff] (!%p983_p10), %v1247_v16  ;;  %406 = vst [vmem:[#allocation2 + $0x38] sm:$0xff] (!%p983_p10), %v1247_v16 }
  0x2d   : > { %407 = vst [vmem:[#allocation2 + $0x40] sm:$0xff] (!%p983_p10), %v1247_v16  ;;  %408 = vst [vmem:[#allocation2 + $0x48] sm:$0xff] (!%p983_p10), %v1247_v16 }
  0x2e   : > { %409 = vst [vmem:[#allocation2 + $0x50] sm:$0xff] %v1247_v16  ;;  %410 = vst [vmem:[#allocation2 + $0x58] sm:$0xff] %v1247_v16 }
  0x2f   : > { %411 = vst [vmem:[#allocation2 + $0x60] sm:$0xff] %v1247_v16  ;;  %412 = vst [vmem:[#allocation2 + $0x68] sm:$0xff] %v1247_v16 }
  0x30   : > { %413 = vst [vmem:[#allocation2 + $0x70] sm:$0xff] %v1247_v16  ;;  %414 = vst [vmem:[#allocation2 + $0x78] sm:$0xff] %v1247_v16 }
  0x31 PF: > { %v1191_v17 = vld [vmem:[%s1341_s11] sm:$0xff]   ;;  %v1192_v18 = vld [vmem:[%s1341_s11 + $0x8] sm:$0xff]   ;;  %v1193_v19 = vld [vmem:[%s1341_s11 + $0x10] sm:$0xff]   ;;  %p1000_p11 = scmp.ne.s32.totalorder %s1237_s17, 4 }
  0x32   : > { %1102 = vmatprep.subr.bf16.mxu0 %v1191_v17  ;;  %1134 = vmatprep.subr.bf16.mxu1 %v1191_v17  ;;  %v1194_v20 = vld [vmem:[%s1341_s11 + $0x18] sm:$0xff]   ;;  %v1199_v21 = vld [vmem:[%s1343_s12] sm:$0xff]   ;;  %v1196_v24 = vld [vmem:[%s1341_s11 + $0x28] sm:$0xff]  }
  0x33   : > { %1103 = vmatpush3.bf16.msra.mxu0 %v1191_v17  ;;  %1142 = vmatpush3.bf16.msra.mxu1 %v1191_v17  ;;  %v1200_v22 = vld [vmem:[%s1343_s12 + $0x20] sm:$0xff]   ;;  %v1197_v25 = vld [vmem:[%s1341_s11 + $0x30] sm:$0xff]   ;;  %v1198_v26 = vld [vmem:[%s1341_s11 + $0x38] sm:$0xff]  }
  0x34   : > { %1104 = vmatprep.subr.bf16.mxu0 %v1192_v18  ;;  %1135 = vmatprep.subr.bf16.mxu1 %v1192_v18  ;;  %v1195_v23 = vld [vmem:[%s1341_s11 + $0x20] sm:$0xff]   ;;  %v1201_v27 = vld [vmem:[%s1343_s12 + $0x8] sm:$0xff]   ;;  %v1203_v29 = vld [vmem:[%s1343_s12 + $0x10] sm:$0xff]  }
  0x35   : > { %1118 = vmatprep.mubr.bf16.mxu0 %v1199_v21  ;;  %1126 = vmatprep.mubr.bf16.mxu1 %v1200_v22  ;;  %v1202_v28 = vld [vmem:[%s1343_s12 + $0x28] sm:$0xff]   ;;  %v1204_v30 = vld [vmem:[%s1343_s12 + $0x30] sm:$0xff]   ;;  %v1205_v31 = vld [vmem:[%s1343_s12 + $0x18] sm:$0xff]  }
  0x36   : > { %v1206_v32 = vld [vmem:[%s1343_s12 + $0x38] sm:$0xff]   ;;  %v417_v33 = vld [vmem:[#allocation2 + $0x10] sm:$0xff]  ;;  %v415_v35 = vld [vmem:[#allocation2] sm:$0xff] }
  0x37   : > { %1105 = vmatpush3.bf16.msra.mxu0 %v1192_v18  ;;  %1143 = vmatpush3.bf16.msra.mxu1 %v1192_v18  ;;  %v425_v34 = vld [vmem:[#allocation2 + $0x50] sm:$0xff]  ;;  %v423_v36 = vld [vmem:[#allocation2 + $0x40] sm:$0xff]  ;;  %v418_v39 = vld [vmem:[#allocation2 + $0x18] sm:$0xff] }
  0x38   : > { %1106 = vmatprep.subr.bf16.mxu0 %v1193_v19  ;;  %1136 = vmatprep.subr.bf16.mxu1 %v1193_v19  ;;  %v426_v40 = vld [vmem:[#allocation2 + $0x58] sm:$0xff]  ;;  %v416_v45 = vld [vmem:[#allocation2 + $0x8] sm:$0xff]  ;;  %v421_v57 = vld [vmem:[#allocation2 + $0x30] sm:$0xff] }
  0x39   : > { %v424_v46 = vld [vmem:[#allocation2 + $0x48] sm:$0xff]  ;;  %v429_v58 = vld [vmem:[#allocation2 + $0x70] sm:$0xff]  ;;  %v419_v59 = vld [vmem:[#allocation2 + $0x20] sm:$0xff] }
  0x3a   : > { %v427_v60 = vld [vmem:[#allocation2 + $0x60] sm:$0xff]  ;;  %v422_v63 = vld [vmem:[#allocation2 + $0x38] sm:$0xff]  ;;  %v420_v5 = vld [vmem:[#allocation2 + $0x28] sm:$0xff] }
  0x3b   : > { %1107 = vmatpush3.bf16.msra.mxu0 %v1193_v19  ;;  %1144 = vmatpush3.bf16.msra.mxu1 %v1193_v19  ;;  %v430_v0 = vld [vmem:[#allocation2 + $0x78] sm:$0xff]  ;;  %v428_v6 = vld [vmem:[#allocation2 + $0x68] sm:$0xff]  ;;  %v1366_v19 = vld [vmem:[%s1446_s2] ss:$0 sm:$0xff] (!%p1000_p11) }
  0x3c   : > { %1108 = vmatprep.subr.bf16.mxu0 %v1194_v20  ;;  %1137 = vmatprep.subr.bf16.mxu1 %v1194_v20  ;;  %v1373_v22 = vld [vmem:[%s1447_s3] ss:$0 sm:$0xff] (!%p1000_p11) }
  0x3f   : > { %1109 = vmatpush3.bf16.msra.mxu0 %v1194_v20  ;;  %1145 = vmatpush3.bf16.msra.mxu1 %v1194_v20 }
  0x40   : > { %1110 = vmatprep.subr.bf16.mxu0 %v1195_v23  ;;  %1138 = vmatprep.subr.bf16.mxu1 %v1195_v23 }
  0x43   : > { %1111 = vmatpush3.bf16.msra.mxu0 %v1195_v23  ;;  %1146 = vmatpush3.bf16.msra.mxu1 %v1195_v23 }
  0x44   : > { %1112 = vmatprep.subr.bf16.mxu0 %v1196_v24  ;;  %1139 = vmatprep.subr.bf16.mxu1 %v1196_v24 }
  0x47   : > { %1113 = vmatpush3.bf16.msra.mxu0 %v1196_v24  ;;  %1147 = vmatpush3.bf16.msra.mxu1 %v1196_v24 }
  0x48   : > { %1114 = vmatprep.subr.bf16.mxu0 %v1197_v25  ;;  %1140 = vmatprep.subr.bf16.mxu1 %v1197_v25 }
  0x4b   : > { %1115 = vmatpush3.bf16.msra.mxu0 %v1197_v25  ;;  %1148 = vmatpush3.bf16.msra.mxu1 %v1197_v25 }
  0x4c   : > { %1116 = vmatprep.subr.bf16.mxu0 %v1198_v26  ;;  %1141 = vmatprep.subr.bf16.mxu1 %v1198_v26 }
  0x4f   : > { %1117 = vmatpush3.bf16.msra.mxu0 %v1198_v26  ;;  %1149 = vmatpush3.bf16.msra.mxu1 %v1198_v26 }
  0x52   : > { %1119 = vmatmul.mubr.bf16.vlgmr.msra.gmra.mrb[0].mxu0 %v1201_v27  ;;  %1127 = vmatmul.mubr.bf16.vlgmr.msra.gmra.mrb[0].mxu1 %v1202_v28 }
  0x53   : > { %1122 = vmatprep.mubr.bf16.mxu0 %v1203_v29  ;;  %1130 = vmatprep.mubr.bf16.mxu1 %v1204_v30 }
  0x5a   : > { %1123 = vmatmul.mubr.bf16.gmra.mrb[4].mxu0 %v1205_v31  ;;  %1131 = vmatmul.mubr.bf16.gmra.mrb[4].mxu1 %v1206_v32 }
 0x125   : > { %v1120_v37 = vpop.f32.mrb[0].mxu0  ;;  %v1128_v38 = vpop.f32.mrb[0].mxu1 }
 0x126   : > { %v658_v41 = vadd.f32 %v1120_v37, %v417_v33  ;;  %v666_v42 = vadd.f32 %v1128_v38, %v425_v34  ;;  %v593_v43 = vpop.f32.mrb[1].mxu0  ;;  %v625_v44 = vpop.f32.mrb[1].mxu1 }
 0x127   : > { %v656_v47 = vadd.f32 %v593_v43, %v415_v35  ;;  %v664_v48 = vadd.f32 %v625_v44, %v423_v36  ;;  %v1121_v49 = vpop.f32.mrb[2].mxu0  ;;  %v1129_v50 = vpop.f32.mrb[2].mxu1 }
 0x128   : > { %674 = vst [vmem:[#allocation2 + $0x10] sm:$0xff] %v658_v41  ;;  %682 = vst [vmem:[#allocation2 + $0x50] sm:$0xff] %v666_v42  ;;  %v659_v51 = vadd.f32 %v1121_v49, %v418_v39  ;;  %v667_v52 = vadd.f32 %v1129_v50, %v426_v40  ;;  %v596_v53 = vpop.f32.mrb[3].mxu0  ;;  %v628_v54 = vpop.f32.mrb[3].mxu1 }
 0x129   : > { %672 = vst [vmem:[#allocation2] sm:$0xff] %v656_v47  ;;  %680 = vst [vmem:[#allocation2 + $0x40] sm:$0xff] %v664_v48  ;;  %v657_v55 = vadd.f32 %v596_v53, %v416_v45  ;;  %v665_v56 = vadd.f32 %v628_v54, %v424_v46 }
 0x12a   : > { %675 = vst [vmem:[#allocation2 + $0x18] sm:$0xff] %v659_v51  ;;  %683 = vst [vmem:[#allocation2 + $0x58] sm:$0xff] %v667_v52 }
 0x12b   : > { %673 = vst [vmem:[#allocation2 + $0x8] sm:$0xff] %v657_v55  ;;  %681 = vst [vmem:[#allocation2 + $0x48] sm:$0xff] %v665_v56 }
 0x12d   : > { %v1124_v61 = vpop.f32.mrb[4].mxu0  ;;  %v1132_v62 = vpop.f32.mrb[4].mxu1  ;;  %691 = sbr.rel (%p1000_p11) target bundleno = 325 (0x145), region = 85 }
 0x12e   : > { %v662_v1 = vadd.f32 %v1124_v61, %v421_v57  ;;  %v670_v2 = vadd.f32 %v1132_v62, %v429_v58  ;;  %v609_v3 = vpop.f32.mrb[5].mxu0  ;;  %v641_v4 = vpop.f32.mrb[5].mxu1 }
 0x12f   : > { %v660_v7 = vadd.f32 %v609_v3, %v419_v59  ;;  %v668_v8 = vadd.f32 %v641_v4, %v427_v60  ;;  %v1125_v9 = vpop.f32.mrb[6].mxu0  ;;  %v1133_v10 = vpop.f32.mrb[6].mxu1  ;;  %v694_v23 = vld [vmem:[#allocation2 + $0x10] sm:$0xff] (!%p1000_p11) }
 0x130   : > { %678 = vst [vmem:[#allocation2 + $0x30] sm:$0xff] %v662_v1  ;;  %686 = vst [vmem:[#allocation2 + $0x70] sm:$0xff] %v670_v2  ;;  %v663_v11 = vadd.f32 %v1125_v9, %v422_v63  ;;  %v671_v12 = vadd.f32 %v1133_v10, %v430_v0  ;;  %v612_v13 = vpop.f32.mrb[7].mxu0  ;;  %v644_v14 = vpop.f32.mrb[7].mxu1  ;;  %v692_v17 = vld [vmem:[#allocation2] sm:$0xff] (!%p1000_p11)  ;;  %v717_v25 = vmul.f32 (!%p1000_p11), %v1366_v19, %v694_v23  ;;  %v702_v49 = vld [vmem:[#allocation2 + $0x50] sm:$0xff] (!%p1000_p11) }
 0x131   : > { %676 = vst [vmem:[#allocation2 + $0x20] sm:$0xff] %v660_v7  ;;  %684 = vst [vmem:[#allocation2 + $0x60] sm:$0xff] %v668_v8  ;;  %v661_v15 = vadd.f32 %v612_v13, %v420_v5  ;;  %v669_v16 = vadd.f32 %v644_v14, %v428_v6  ;;  %v715_v20 = vmul.f32 (!%p1000_p11), %v1366_v19, %v692_v17  ;;  %v695_v24 = vld [vmem:[#allocation2 + $0x18] sm:$0xff] (!%p1000_p11)  ;;  %v700_v39 = vld [vmem:[#allocation2 + $0x40] sm:$0xff] (!%p1000_p11) }
 0x132   : > { %679 = vst [vmem:[#allocation2 + $0x38] sm:$0xff] %v663_v11  ;;  %687 = vst [vmem:[#allocation2 + $0x78] sm:$0xff] %v671_v12  ;;  %v693_v18 = vld [vmem:[#allocation2 + $0x8] sm:$0xff] (!%p1000_p11)  ;;  %v718_v26 = vmul.f32 (!%p1000_p11), %v1366_v19, %v695_v24  ;;  %v740_v35 = vadd.f32 (!%p1000_p11), %v1373_v22, %v717_v25  ;;  %v703_v50 = vld [vmem:[#allocation2 + $0x58] sm:$0xff] (!%p1000_p11)  ;;  %v723_v54 = vmul.f32 (!%p1000_p11), %v1366_v19, %v700_v39 }
 0x133   : > { %677 = vst [vmem:[#allocation2 + $0x28] sm:$0xff] %v661_v15  ;;  %685 = vst [vmem:[#allocation2 + $0x68] sm:$0xff] %v669_v16  ;;  %v716_v21 = vmul.f32 (!%p1000_p11), %v1366_v19, %v693_v18  ;;  %v738_v30 = vadd.f32 (!%p1000_p11), %v1373_v22, %v715_v20  ;;  %v701_v44 = vld [vmem:[#allocation2 + $0x48] sm:$0xff] (!%p1000_p11)  ;;  %v725_v0 = vmul.f32 (!%p1000_p11), %v1366_v19, %v702_v49 }
 0x134   : > { %v741_v36 = vadd.f32 %v1373_v22, %v718_v26  ;;  %v756_v45 = vmax.f32 %v740_v35, 0.0  ;;  %v724_v60 = vmul.f32 %v1366_v19, %v701_v44  ;;  %v746_v63 = vadd.f32 %v1373_v22, %v723_v54 }
 0x135   : > { %v739_v31 = vadd.f32 %v1373_v22, %v716_v21  ;;  %v754_v40 = vmax.f32 %v738_v30, 0.0  ;;  %v726_v1 = vmul.f32 %v1366_v19, %v703_v50  ;;  %v748_v8 = vadd.f32 %v1373_v22, %v725_v0 }
 0x136   : > { %v757_v46 = vmax.f32 %v741_v36, 0.0  ;;  %v747_v4 = vadd.f32 %v1373_v22, %v724_v60  ;;  %v762_v7 = vmax.f32 %v746_v63, 0.0 }
 0x137   : > { %v698_v29 = vld [vmem:[#allocation2 + $0x30] sm:$0xff]  ;;  %v755_v41 = vmax.f32 %v739_v31, 0.0  ;;  %v749_v9 = vadd.f32 %v1373_v22, %v726_v1  ;;  %v764_v15 = vmax.f32 %v748_v8, 0.0 }
 0x138   : > { %v696_v27 = vld [vmem:[#allocation2 + $0x20] sm:$0xff]  ;;  %v721_v37 = vmul.f32 %v1366_v19, %v698_v29  ;;  %v1047_v57 = vpack.c.bf16 %v757_v46, %v756_v45  ;;  %v706_v61 = vld [vmem:[#allocation2 + $0x70] sm:$0xff]  ;;  %v763_v11 = vmax.f32 %v747_v4, 0.0 }
 0x139   : > { %v719_v32 = vmul.f32 %v1366_v19, %v696_v27  ;;  %v699_v34 = vld [vmem:[#allocation2 + $0x38] sm:$0xff]  ;;  %v1042_v51 = vpack.c.bf16 %v755_v41, %v754_v40  ;;  %v704_v55 = vld [vmem:[#allocation2 + $0x60] sm:$0xff]  ;;  %v729_v10 = vmul.f32 %v1366_v19, %v706_v61  ;;  %v765_v16 = vmax.f32 %v749_v9, 0.0 }
 0x13a   : > { %v697_v28 = vld [vmem:[#allocation2 + $0x28] sm:$0xff]  ;;  %v722_v38 = vmul.f32 %v1366_v19, %v699_v34  ;;  %v744_v47 = vadd.f32 %v1373_v22, %v721_v37  ;;  %v707_v2 = vld [vmem:[#allocation2 + $0x78] sm:$0xff]  ;;  %1079 = vst [vmem:[%s1448_s4 + $0x8] sm:$0xff] %v1047_v57   ;;  %v727_v5 = vmul.f32 %v1366_v19, %v704_v55  ;;  %v1062_v18 = vpack.c.bf16 %v763_v11, %v762_v7 }
 0x13b   : > { %v720_v33 = vmul.f32 %v1366_v19, %v697_v28  ;;  %v742_v42 = vadd.f32 %v1373_v22, %v719_v32  ;;  %v705_v56 = vld [vmem:[#allocation2 + $0x68] sm:$0xff]  ;;  %1043 = vst [vmem:[%s1448_s4] sm:$0xff] %v1042_v51   ;;  %v730_v14 = vmul.f32 %v1366_v19, %v707_v2  ;;  %v752_v17 = vadd.f32 %v1373_v22, %v729_v10 }
 0x13c   : > { %v745_v48 = vadd.f32 %v1373_v22, %v722_v38  ;;  %v760_v58 = vmax.f32 %v744_v47, 0.0  ;;  %v728_v6 = vmul.f32 %v1366_v19, %v705_v56  ;;  %v750_v12 = vadd.f32 %v1373_v22, %v727_v5  ;;  %1082 = vst [vmem:[%s1448_s4 + $0x20] sm:$0xff] %v1062_v18  }
 0x13d   : > { %v743_v43 = vadd.f32 %v1373_v22, %v720_v33  ;;  %v758_v52 = vmax.f32 %v742_v42, 0.0  ;;  %v753_v23 = vadd.f32 %v1373_v22, %v730_v14  ;;  %v1067_v24 = vpack.c.bf16 %v765_v16, %v764_v15 }
 0x13e   : > { %v761_v59 = vmax.f32 %v745_v48, 0.0  ;;  %v751_v13 = vadd.f32 %v1373_v22, %v728_v6  ;;  %v766_v20 = vmax.f32 %v750_v12, 0.0  ;;  %v768_v25 = vmax.f32 %v752_v17, 0.0 }
 0x13f   : > { %v759_v53 = vmax.f32 %v743_v43, 0.0  ;;  %v769_v27 = vmax.f32 %v753_v23, 0.0  ;;  %1083 = vst [vmem:[%s1448_s4 + $0x28] sm:$0xff] %v1067_v24  }
 0x140   : > { %v1057_v3 = vpack.c.bf16 %v761_v59, %v760_v58  ;;  %v767_v21 = vmax.f32 %v751_v13, 0.0 }
 0x141   : > { %v1052_v62 = vpack.c.bf16 %v759_v53, %v758_v52  ;;  %v1077_v19 = vpack.c.bf16 %v769_v27, %v768_v25 }
 0x142   : > { %1081 = vst [vmem:[%s1448_s4 + $0x18] sm:$0xff] %v1057_v3   ;;  %v1072_v26 = vpack.c.bf16 %v767_v21, %v766_v20 }
 0x143   : > { %1080 = vst [vmem:[%s1448_s4 + $0x10] sm:$0xff] %v1052_v62   ;;  %1085 = vst [vmem:[%s1448_s4 + $0x38] sm:$0xff] %v1077_v19  }
 0x144   : > { %1084 = vst [vmem:[%s1448_s4 + $0x30] sm:$0xff] %v1072_v26  }
 0x145 PF: > { %s14_s19 = sadd.s32 1, %s1245_s19   ;;  %s1449_s15 = smov %s1233_s16 }
 0x146   : > { %p11_p12 = scmp.ge.s32.totalorder %s14_s19, 7   ;;  %s1450_s16 = smov %s1308_s23 }
 0x147   : > { %s1451_s17 = smov %s1241_s18  ;;  %s1452_s18 = smov %s1454_s20 }
 0x148   :  { %13 = sbr.rel (!%p11_p12) target bundleno = 3 (0x3), region = 129 }

// kernel: _lambda_.25
= control target key start
LH: loop header
LB: loop body
LE: loop exit
PB: predicated region body
PF: predicated region fallthrough
CT: control target
= control target key end

     0   :  { %s1389_s18 = smov 0   ;;  %s1391_s19 = smov 0   ;;  %s1608_s0 = inlined_call_operand.vmem [shape: bf16[128,640], index: 0, kind: input, shape index: {}]   ;;  %s1609_s1 = inlined_call_operand.vmem [shape: bf16[640,128], index: 1, kind: input, shape index: {}]   ;;  %s1610_s2 = inlined_call_operand.vmem [shape: f32[1,128], index: 2, kind: input, shape index: {}]   ;;  %s1611_s3 = inlined_call_operand.vmem [shape: f32[1,128], index: 3, kind: input, shape index: {}]   ;;  %s1612_s4 = inlined_call_operand.vmem [shape: f32[128,128], index: 4, kind: input, shape index: {}]   ;;  %s1613_s5 = inlined_call_operand.vmem [shape: bf16[128,128], index: 5, kind: output, shape index: {}]  }
   0x1   :  { %s1393_s20 = smov 0   ;;  %s1395_s21 = smov 0  }
   0x2   :  { %s1397_s22 = smov 0  }
   0x3 LB: > { %s27_s23 = sadd.s32 1, %s1352_s21  ;;  %p50_p1 = scmp.ne.s32.totalorder %s1344_s19, %s1340_s18  ;;  %s1356_s22 = sphi %s1397_s22, %s15_s22   ;;  %s1352_s21 = sphi %s1395_s21, %s1617_s21   ;;  %s1348_s20 = sphi %s1393_s20, %s1616_s20   ;;  %s1344_s19 = sphi %s1391_s19, %s1615_s19   ;;  %s1340_s18 = sphi %s1389_s18, %s1614_s18  }
   0x4   : > { %p28_p0 = scmp.ge.s32.totalorder %s27_s23, 5  ;;  %p51_p2 = scmp.eq.s32.totalorder %s1356_s22, 0 }
   0x5   : > { %s43_s25 = sadd.s32 1, %s1344_s19  ;;  %p1087_p5 = scmp.ge.s32.totalorder %s1356_s22, 5 }
   0x6   : > { %s1619_s23 = smov (%p28_p0, %s27_s23), 0  ;;  %p52_p3 = por %p51_p2, %p50_p1 }
   0x7   : > { %s39_s24 = ssub.s32 %s1352_s21, %s1619_s23  ;;  %236 = sbr.rel (%p1087_p5) target bundleno = 28 (0x1c), region = 28 }
   0x8   : > { %p41_p4 = scmp.eq.s32.totalorder %s39_s24, 0 }
   0xa   : > { %s1424_s26 = scalar_select %p41_p4, %s1344_s19, %s43_s25  }
   0xe   : > { %239 = sbr.rel (!%p52_p3) target bundleno = 28 (0x1c), region = 32  ;;  %s241_s27 = sand.u32 (%p52_p3), 1, %s1344_s19  }
   0xf   : > { %s1089_s28 = sshll.u32 (%p52_p3), %s1352_s21, 2  ;;  %s1088_s29 = sshll.u32 (%p52_p3), %s241_s27, 6 }
  0x10   : > { %s1432_s7 = scalar_lea.vmem (%p52_p3), %s1608_s0, %s1089_s28  ;;  %s243_s8 = scalar_lea.vmem (%p52_p3), [#allocation3], %s1088_s29 }
  0x11   : > { %v264_v0 = vld [vmem:[%s1432_s7] sm:$0xf] (%p52_p3)  ;;  %v266_v1 = vld [vmem:[%s1432_s7 + $0x14] sm:$0xf] (%p52_p3)  ;;  %v268_v2 = vld [vmem:[%s1432_s7 + $0x28] sm:$0xf] (%p52_p3) }
  0x12   : > { %265 = vst [vmem:[%s243_s8] sm:$0xf] (%p52_p3), %v264_v0  ;;  %267 = vst [vmem:[%s243_s8 + $0x4] sm:$0xf] (%p52_p3), %v266_v1  ;;  %v270_v3 = vld [vmem:[%s1432_s7 + $0x3c] sm:$0xf] (%p52_p3) }
  0x13   : > { %v272_v4 = vld [vmem:[%s1432_s7 + $0x50] sm:$0xf] (%p52_p3)  ;;  %269 = vst [vmem:[%s243_s8 + $0x8] sm:$0xf] (%p52_p3), %v268_v2  ;;  %271 = vst [vmem:[%s243_s8 + $0xc] sm:$0xf] (%p52_p3), %v270_v3 }
  0x14   : > { %273 = vst [vmem:[%s243_s8 + $0x10] sm:$0xf] (%p52_p3), %v272_v4  ;;  %v274_v5 = vld [vmem:[%s1432_s7 + $0x64] sm:$0xf] (%p52_p3)  ;;  %v276_v6 = vld [vmem:[%s1432_s7 + $0x78] sm:$0xf] (%p52_p3) }
  0x15   : > { %v278_v7 = vld [vmem:[%s1432_s7 + $0x8c] sm:$0xf]  ;;  %275 = vst [vmem:[%s243_s8 + $0x14] sm:$0xf] %v274_v5  ;;  %277 = vst [vmem:[%s243_s8 + $0x18] sm:$0xf] %v276_v6 }
  0x16   : > { %279 = vst [vmem:[%s243_s8 + $0x1c] sm:$0xf] %v278_v7  ;;  %v280_v8 = vld [vmem:[%s1432_s7 + $0xa0] sm:$0xf]  ;;  %v282_v9 = vld [vmem:[%s1432_s7 + $0xb4] sm:$0xf] }
  0x17   : > { %v284_v10 = vld [vmem:[%s1432_s7 + $0xc8] sm:$0xf]  ;;  %281 = vst [vmem:[%s243_s8 + $0x20] sm:$0xf] %v280_v8  ;;  %283 = vst [vmem:[%s243_s8 + $0x24] sm:$0xf] %v282_v9 }
  0x18   : > { %285 = vst [vmem:[%s243_s8 + $0x28] sm:$0xf] %v284_v10  ;;  %v286_v11 = vld [vmem:[%s1432_s7 + $0xdc] sm:$0xf]  ;;  %v288_v12 = vld [vmem:[%s1432_s7 + $0xf0] sm:$0xf] }
  0x19   : > { %v290_v13 = vld [vmem:[%s1432_s7 + $0x104] sm:$0xf]  ;;  %287 = vst [vmem:[%s243_s8 + $0x2c] sm:$0xf] %v286_v11  ;;  %289 = vst [vmem:[%s243_s8 + $0x30] sm:$0xf] %v288_v12 }
  0x1a   : > { %291 = vst [vmem:[%s243_s8 + $0x34] sm:$0xf] %v290_v13  ;;  %v292_v14 = vld [vmem:[%s1432_s7 + $0x118] sm:$0xf]  ;;  %v294_v15 = vld [vmem:[%s1432_s7 + $0x12c] sm:$0xf] }
  0x1b   : > { %293 = vst [vmem:[%s243_s8 + $0x38] sm:$0xf] %v292_v14  ;;  %295 = vst [vmem:[%s243_s8 + $0x3c] sm:$0xf] %v294_v15 }
  0x1c PF: > { %p1090_p6 = scmp.ge.s32.totalorder %s1356_s22, 1  ;;  %p361_p7 = scmp.lt.s32.totalorder %s1356_s22, 6 }
  0x1e   : > { %p362_p8 = pnand %p1090_p6, %p361_p7 }
  0x1f   : > { %s368_s9 = sand.u32 (!%p362_p8), 1, %s1340_s18   ;;  %s1092_s10 = sshll.u32 (!%p362_p8), %s1348_s20, 4 }
  0x20   : > { %365 = sbr.rel (%p362_p8) target bundleno = 330 (0x14a), region = 77  ;;  %s1091_s11 = sshll.u32 (!%p362_p8), %s368_s9, 6 }
  0x21   : > { %p422_p9 = scmp.lt.s32.totalorder (!%p362_p8), %s1092_s10, 79  ;;  %s1459_s16 = scalar_lea.vmem (!%p362_p8), [#allocation3], %s1091_s11 }
  0x22   : > { %p1094_p10 = scmp.ne.s32.totalorder (!%p362_p8), %s1348_s20, 0 }
  0x27   : > { %s1621_s10 = smov (!%p422_p9, %s1092_s10), 79  ;;  %458 = sbr.rel (%p1094_p10) target bundleno = 49 (0x31), region = 85 }
  0x28   : > { %s1093_s12 = sshll.u32 %s1621_s10, 2  ;;  %v1358_v16 = vmov (!%p1094_p10), 0.0  }
  0x29   : > { %s1457_s15 = scalar_lea.vmem %s1609_s1, %s1093_s12  ;;  %459 = vst [vmem:[#allocation2] sm:$0xff] (!%p1094_p10), %v1358_v16  ;;  %460 = vst [vmem:[#allocation2 + $0x8] sm:$0xff] (!%p1094_p10), %v1358_v16 }
  0x2a   : > { %461 = vst [vmem:[#allocation2 + $0x10] sm:$0xff] (!%p1094_p10), %v1358_v16  ;;  %462 = vst [vmem:[#allocation2 + $0x18] sm:$0xff] (!%p1094_p10), %v1358_v16 }
  0x2b   : > { %463 = vst [vmem:[#allocation2 + $0x20] sm:$0xff] (!%p1094_p10), %v1358_v16  ;;  %464 = vst [vmem:[#allocation2 + $0x28] sm:$0xff] (!%p1094_p10), %v1358_v16 }
  0x2c   : > { %465 = vst [vmem:[#allocation2 + $0x30] sm:$0xff] (!%p1094_p10), %v1358_v16  ;;  %466 = vst [vmem:[#allocation2 + $0x38] sm:$0xff] (!%p1094_p10), %v1358_v16 }
  0x2d   : > { %467 = vst [vmem:[#allocation2 + $0x40] sm:$0xff] (!%p1094_p10), %v1358_v16  ;;  %468 = vst [vmem:[#allocation2 + $0x48] sm:$0xff] (!%p1094_p10), %v1358_v16 }
  0x2e   : > { %469 = vst [vmem:[#allocation2 + $0x50] sm:$0xff] %v1358_v16  ;;  %470 = vst [vmem:[#allocation2 + $0x58] sm:$0xff] %v1358_v16 }
  0x2f   : > { %471 = vst [vmem:[#allocation2 + $0x60] sm:$0xff] %v1358_v16  ;;  %472 = vst [vmem:[#allocation2 + $0x68] sm:$0xff] %v1358_v16 }
  0x30   : > { %473 = vst [vmem:[#allocation2 + $0x70] sm:$0xff] %v1358_v16  ;;  %474 = vst [vmem:[#allocation2 + $0x78] sm:$0xff] %v1358_v16 }
  0x31 PF: > { %v1302_v17 = vld [vmem:[%s1457_s15] sm:$0xff]   ;;  %v1303_v18 = vld [vmem:[%s1457_s15 + $0x8] sm:$0xff]   ;;  %v1304_v19 = vld [vmem:[%s1457_s15 + $0x10] sm:$0xff]   ;;  %p1111_p11 = scmp.ne.s32.totalorder %s1348_s20, 4 }
  0x32   : > { %1213 = vmatprep.subr.bf16.mxu0 %v1302_v17  ;;  %1245 = vmatprep.subr.bf16.mxu1 %v1302_v17  ;;  %v1305_v20 = vld [vmem:[%s1457_s15 + $0x18] sm:$0xff]   ;;  %v1310_v21 = vld [vmem:[%s1459_s16] sm:$0xff]   ;;  %v1307_v24 = vld [vmem:[%s1457_s15 + $0x28] sm:$0xff]  }
  0x33   : > { %1214 = vmatpush3.bf16.msra.mxu0 %v1302_v17  ;;  %1253 = vmatpush3.bf16.msra.mxu1 %v1302_v17  ;;  %v1311_v22 = vld [vmem:[%s1459_s16 + $0x20] sm:$0xff]   ;;  %v1308_v25 = vld [vmem:[%s1457_s15 + $0x30] sm:$0xff]   ;;  %v1309_v26 = vld [vmem:[%s1457_s15 + $0x38] sm:$0xff]  }
  0x34   : > { %1215 = vmatprep.subr.bf16.mxu0 %v1303_v18  ;;  %1246 = vmatprep.subr.bf16.mxu1 %v1303_v18  ;;  %v1306_v23 = vld [vmem:[%s1457_s15 + $0x20] sm:$0xff]   ;;  %v1312_v27 = vld [vmem:[%s1459_s16 + $0x8] sm:$0xff]   ;;  %v1314_v29 = vld [vmem:[%s1459_s16 + $0x10] sm:$0xff]  }
  0x35   : > { %1229 = vmatprep.mubr.bf16.mxu0 %v1310_v21  ;;  %1237 = vmatprep.mubr.bf16.mxu1 %v1311_v22  ;;  %v1313_v28 = vld [vmem:[%s1459_s16 + $0x28] sm:$0xff]   ;;  %v1315_v30 = vld [vmem:[%s1459_s16 + $0x30] sm:$0xff]   ;;  %v1316_v31 = vld [vmem:[%s1459_s16 + $0x18] sm:$0xff]  }
  0x36   : > { %v1317_v32 = vld [vmem:[%s1459_s16 + $0x38] sm:$0xff]   ;;  %v477_v33 = vld [vmem:[#allocation2 + $0x10] sm:$0xff]  ;;  %v475_v35 = vld [vmem:[#allocation2] sm:$0xff] }
  0x37   : > { %1216 = vmatpush3.bf16.msra.mxu0 %v1303_v18  ;;  %1254 = vmatpush3.bf16.msra.mxu1 %v1303_v18  ;;  %v485_v34 = vld [vmem:[#allocation2 + $0x50] sm:$0xff]  ;;  %v483_v36 = vld [vmem:[#allocation2 + $0x40] sm:$0xff]  ;;  %v478_v39 = vld [vmem:[#allocation2 + $0x18] sm:$0xff] }
  0x38   : > { %1217 = vmatprep.subr.bf16.mxu0 %v1304_v19  ;;  %1247 = vmatprep.subr.bf16.mxu1 %v1304_v19  ;;  %v486_v40 = vld [vmem:[#allocation2 + $0x58] sm:$0xff]  ;;  %v476_v45 = vld [vmem:[#allocation2 + $0x8] sm:$0xff]  ;;  %v481_v57 = vld [vmem:[#allocation2 + $0x30] sm:$0xff] }
  0x39   : > { %v484_v46 = vld [vmem:[#allocation2 + $0x48] sm:$0xff]  ;;  %v489_v58 = vld [vmem:[#allocation2 + $0x70] sm:$0xff]  ;;  %v479_v59 = vld [vmem:[#allocation2 + $0x20] sm:$0xff] }
  0x3a   : > { %v487_v60 = vld [vmem:[#allocation2 + $0x60] sm:$0xff]  ;;  %v482_v63 = vld [vmem:[#allocation2 + $0x38] sm:$0xff]  ;;  %v480_v5 = vld [vmem:[#allocation2 + $0x28] sm:$0xff] }
  0x3b   : > { %1218 = vmatpush3.bf16.msra.mxu0 %v1304_v19  ;;  %1255 = vmatpush3.bf16.msra.mxu1 %v1304_v19  ;;  %v490_v0 = vld [vmem:[#allocation2 + $0x78] sm:$0xff]  ;;  %v488_v6 = vld [vmem:[#allocation2 + $0x68] sm:$0xff]  ;;  %v1482_v19 = vld [vmem:[%s1610_s2] ss:$0 sm:$0xff] (!%p1111_p11) }
  0x3c   : > { %1219 = vmatprep.subr.bf16.mxu0 %v1305_v20  ;;  %1248 = vmatprep.subr.bf16.mxu1 %v1305_v20  ;;  %v1489_v22 = vld [vmem:[%s1611_s3] ss:$0 sm:$0xff] (!%p1111_p11) }
  0x3f   : > { %1220 = vmatpush3.bf16.msra.mxu0 %v1305_v20  ;;  %1256 = vmatpush3.bf16.msra.mxu1 %v1305_v20 }
  0x40   : > { %1221 = vmatprep.subr.bf16.mxu0 %v1306_v23  ;;  %1249 = vmatprep.subr.bf16.mxu1 %v1306_v23 }
  0x43   : > { %1222 = vmatpush3.bf16.msra.mxu0 %v1306_v23  ;;  %1257 = vmatpush3.bf16.msra.mxu1 %v1306_v23  ;;  %v814_v23 = vld [vmem:[%s1612_s4] sm:$0xff] (!%p1111_p11) }
  0x44   : > { %1223 = vmatprep.subr.bf16.mxu0 %v1307_v24  ;;  %1250 = vmatprep.subr.bf16.mxu1 %v1307_v24 }
  0x47   : > { %1224 = vmatpush3.bf16.msra.mxu0 %v1307_v24  ;;  %1258 = vmatpush3.bf16.msra.mxu1 %v1307_v24  ;;  %v815_v24 = vld [vmem:[%s1612_s4 + $0x8] sm:$0xff] (!%p1111_p11) }
  0x48   : > { %1225 = vmatprep.subr.bf16.mxu0 %v1308_v25  ;;  %1251 = vmatprep.subr.bf16.mxu1 %v1308_v25 }
  0x4b   : > { %1226 = vmatpush3.bf16.msra.mxu0 %v1308_v25  ;;  %1259 = vmatpush3.bf16.msra.mxu1 %v1308_v25 }
  0x4c   : > { %1227 = vmatprep.subr.bf16.mxu0 %v1309_v26  ;;  %1252 = vmatprep.subr.bf16.mxu1 %v1309_v26 }
  0x4f   : > { %1228 = vmatpush3.bf16.msra.mxu0 %v1309_v26  ;;  %1260 = vmatpush3.bf16.msra.mxu1 %v1309_v26 }
  0x52   : > { %1230 = vmatmul.mubr.bf16.vlgmr.msra.gmra.mrb[0].mxu0 %v1312_v27  ;;  %1238 = vmatmul.mubr.bf16.vlgmr.msra.gmra.mrb[0].mxu1 %v1313_v28 }
  0x53   : > { %1233 = vmatprep.mubr.bf16.mxu0 %v1314_v29  ;;  %1241 = vmatprep.mubr.bf16.mxu1 %v1315_v30 }
  0x5a   : > { %1234 = vmatmul.mubr.bf16.gmra.mrb[4].mxu0 %v1316_v31  ;;  %1242 = vmatmul.mubr.bf16.gmra.mrb[4].mxu1 %v1317_v32 }
 0x125   : > { %v1231_v37 = vpop.f32.mrb[0].mxu0  ;;  %v1239_v38 = vpop.f32.mrb[0].mxu1 }
 0x126   : > { %v718_v41 = vadd.f32 %v1231_v37, %v477_v33  ;;  %v726_v42 = vadd.f32 %v1239_v38, %v485_v34  ;;  %v653_v43 = vpop.f32.mrb[1].mxu0  ;;  %v685_v44 = vpop.f32.mrb[1].mxu1  ;;  %v816_v33 = vld [vmem:[%s1612_s4 + $0x10] sm:$0xff] (!%p1111_p11)  ;;  %v817_v34 = vld [vmem:[%s1612_s4 + $0x18] sm:$0xff] (!%p1111_p11) }
 0x127   : > { %v716_v47 = vadd.f32 %v653_v43, %v475_v35  ;;  %v724_v48 = vadd.f32 %v685_v44, %v483_v36  ;;  %v1232_v49 = vpop.f32.mrb[2].mxu0  ;;  %v1240_v50 = vpop.f32.mrb[2].mxu1  ;;  %v819_v43 = vld [vmem:[%s1612_s4 + $0x28] sm:$0xff] (!%p1111_p11) }
 0x128   : > { %734 = vst [vmem:[#allocation2 + $0x10] sm:$0xff] %v718_v41  ;;  %742 = vst [vmem:[#allocation2 + $0x50] sm:$0xff] %v726_v42  ;;  %v719_v51 = vadd.f32 %v1232_v49, %v478_v39  ;;  %v727_v52 = vadd.f32 %v1240_v50, %v486_v40  ;;  %v656_v53 = vpop.f32.mrb[3].mxu0  ;;  %v688_v54 = vpop.f32.mrb[3].mxu1  ;;  %v818_v42 = vld [vmem:[%s1612_s4 + $0x20] sm:$0xff] (!%p1111_p11) }
 0x129   : > { %732 = vst [vmem:[#allocation2] sm:$0xff] %v716_v47  ;;  %740 = vst [vmem:[#allocation2 + $0x40] sm:$0xff] %v724_v48  ;;  %v717_v55 = vadd.f32 %v656_v53, %v476_v45  ;;  %v725_v56 = vadd.f32 %v688_v54, %v484_v46  ;;  %v820_v54 = vld [vmem:[%s1612_s4 + $0x30] sm:$0xff] (!%p1111_p11) }
 0x12a   : > { %735 = vst [vmem:[#allocation2 + $0x18] sm:$0xff] %v719_v51  ;;  %743 = vst [vmem:[#allocation2 + $0x58] sm:$0xff] %v727_v52 }
 0x12b   : > { %733 = vst [vmem:[#allocation2 + $0x8] sm:$0xff] %v717_v55  ;;  %741 = vst [vmem:[#allocation2 + $0x48] sm:$0xff] %v725_v56  ;;  %v821_v55 = vld [vmem:[%s1612_s4 + $0x38] sm:$0xff] (!%p1111_p11) }
 0x12d   : > { %v1235_v61 = vpop.f32.mrb[4].mxu0  ;;  %v1243_v62 = vpop.f32.mrb[4].mxu1  ;;  %751 = sbr.rel (%p1111_p11) target bundleno = 330 (0x14a), region = 89 }
 0x12e   : > { %v722_v1 = vadd.f32 %v1235_v61, %v481_v57  ;;  %v730_v2 = vadd.f32 %v1243_v62, %v489_v58  ;;  %v669_v3 = vpop.f32.mrb[5].mxu0  ;;  %v701_v4 = vpop.f32.mrb[5].mxu1 }
 0x12f   : > { %v720_v7 = vadd.f32 %v669_v3, %v479_v59  ;;  %v728_v8 = vadd.f32 %v701_v4, %v487_v60  ;;  %v1236_v9 = vpop.f32.mrb[6].mxu0  ;;  %v1244_v10 = vpop.f32.mrb[6].mxu1  ;;  %v754_v25 = vld [vmem:[#allocation2 + $0x10] sm:$0xff] (!%p1111_p11) }
 0x130   : > { %738 = vst [vmem:[#allocation2 + $0x30] sm:$0xff] %v722_v1  ;;  %746 = vst [vmem:[#allocation2 + $0x70] sm:$0xff] %v730_v2  ;;  %v723_v11 = vadd.f32 %v1236_v9, %v482_v63  ;;  %v731_v12 = vadd.f32 %v1244_v10, %v490_v0  ;;  %v672_v13 = vpop.f32.mrb[7].mxu0  ;;  %v704_v14 = vpop.f32.mrb[7].mxu1  ;;  %v752_v17 = vld [vmem:[#allocation2] sm:$0xff] (!%p1111_p11)  ;;  %v777_v29 = vmul.f32 (!%p1111_p11), %v1482_v19, %v754_v25  ;;  %v762_v61 = vld [vmem:[#allocation2 + $0x50] sm:$0xff] (!%p1111_p11) }
 0x131   : > { %736 = vst [vmem:[#allocation2 + $0x20] sm:$0xff] %v720_v7  ;;  %744 = vst [vmem:[#allocation2 + $0x60] sm:$0xff] %v728_v8  ;;  %v721_v15 = vadd.f32 %v672_v13, %v480_v5  ;;  %v729_v16 = vadd.f32 %v704_v14, %v488_v6  ;;  %v775_v20 = vmul.f32 (!%p1111_p11), %v1482_v19, %v752_v17  ;;  %v755_v26 = vld [vmem:[#allocation2 + $0x18] sm:$0xff] (!%p1111_p11)  ;;  %v760_v49 = vld [vmem:[#allocation2 + $0x40] sm:$0xff] (!%p1111_p11) }
 0x132   : > { %739 = vst [vmem:[#allocation2 + $0x38] sm:$0xff] %v723_v11  ;;  %747 = vst [vmem:[#allocation2 + $0x78] sm:$0xff] %v731_v12  ;;  %v753_v18 = vld [vmem:[#allocation2 + $0x8] sm:$0xff] (!%p1111_p11)  ;;  %v778_v30 = vmul.f32 (!%p1111_p11), %v1482_v19, %v755_v26  ;;  %v800_v40 = vadd.f32 (!%p1111_p11), %v1489_v22, %v777_v29  ;;  %v783_v1 = vmul.f32 (!%p1111_p11), %v1482_v19, %v760_v49  ;;  %v763_v2 = vld [vmem:[#allocation2 + $0x58] sm:$0xff] (!%p1111_p11) }
 0x133   : > { %737 = vst [vmem:[#allocation2 + $0x28] sm:$0xff] %v721_v15  ;;  %745 = vst [vmem:[#allocation2 + $0x68] sm:$0xff] %v729_v16  ;;  %v776_v21 = vmul.f32 (!%p1111_p11), %v1482_v19, %v753_v18  ;;  %v798_v27 = vadd.f32 (!%p1111_p11), %v1489_v22, %v775_v20  ;;  %v761_v60 = vld [vmem:[#allocation2 + $0x48] sm:$0xff] (!%p1111_p11)  ;;  %v822_v7 = vld [vmem:[%s1612_s4 + $0x40] sm:$0xff] (!%p1111_p11)  ;;  %v785_v12 = vmul.f32 (!%p1111_p11), %v1482_v19, %v762_v61 }
 0x134   : > { %v801_v41 = vadd.f32 %v1489_v22, %v778_v30  ;;  %v832_v52 = vadd.f32 %v816_v33, %v800_v40  ;;  %v784_v10 = vmul.f32 %v1482_v19, %v761_v60  ;;  %v806_v11 = vadd.f32 %v1489_v22, %v783_v1  ;;  %v823_v18 = vld [vmem:[%s1612_s4 + $0x48] sm:$0xff]  ;;  %v825_v26 = vld [vmem:[%s1612_s4 + $0x58] sm:$0xff] }
 0x135   : > { %v799_v28 = vadd.f32 %v1489_v22, %v776_v21  ;;  %v830_v38 = vadd.f32 %v814_v23, %v798_v27  ;;  %v786_v20 = vmul.f32 %v1482_v19, %v763_v2  ;;  %v824_v21 = vld [vmem:[%s1612_s4 + $0x50] sm:$0xff]  ;;  %v808_v25 = vadd.f32 %v1489_v22, %v785_v12 }
 0x136   : > { %v833_v53 = vadd.f32 %v817_v34, %v801_v41  ;;  %v848_v63 = vmax.f32 %v832_v52, 0.0  ;;  %v807_v23 = vadd.f32 %v1489_v22, %v784_v10 }
 0x137   : > { %v758_v37 = vld [vmem:[#allocation2 + $0x30] sm:$0xff]  ;;  %v831_v39 = vadd.f32 %v815_v24, %v799_v28  ;;  %v846_v50 = vmax.f32 %v830_v38, 0.0  ;;  %v838_v24 = vadd.f32 %v822_v7, %v806_v11  ;;  %v809_v30 = vadd.f32 %v1489_v22, %v786_v20  ;;  %v827_v38 = vld [vmem:[%s1612_s4 + $0x68] sm:$0xff] }
 0x138   : > { %v756_v31 = vld [vmem:[#allocation2 + $0x20] sm:$0xff]  ;;  %v781_v47 = vmul.f32 %v1482_v19, %v758_v37  ;;  %v849_v0 = vmax.f32 %v833_v53, 0.0  ;;  %v766_v14 = vld [vmem:[#allocation2 + $0x70] sm:$0xff]  ;;  %v839_v34 = vadd.f32 %v823_v18, %v807_v23 }
 0x139   : > { %v779_v35 = vmul.f32 %v1482_v19, %v756_v31  ;;  %v759_v44 = vld [vmem:[#allocation2 + $0x38] sm:$0xff]  ;;  %v847_v51 = vmax.f32 %v831_v39, 0.0  ;;  %v764_v8 = vld [vmem:[#allocation2 + $0x60] sm:$0xff]  ;;  %v789_v33 = vmul.f32 %v1482_v19, %v766_v14  ;;  %v828_v39 = vld [vmem:[%s1612_s4 + $0x70] sm:$0xff]  ;;  %v841_v40 = vadd.f32 %v825_v26, %v809_v30 }
 0x13a   : > { %v757_v32 = vld [vmem:[#allocation2 + $0x28] sm:$0xff]  ;;  %v782_v48 = vmul.f32 %v1482_v19, %v759_v44  ;;  %v804_v58 = vadd.f32 %v1489_v22, %v781_v47  ;;  %v1158_v9 = vpack.c.bf16 %v849_v0, %v848_v63  ;;  %v787_v27 = vmul.f32 %v1482_v19, %v764_v8  ;;  %v767_v28 = vld [vmem:[#allocation2 + $0x78] sm:$0xff] }
 0x13b   : > { %v780_v36 = vmul.f32 %v1482_v19, %v757_v32  ;;  %v802_v45 = vadd.f32 %v1489_v22, %v779_v35  ;;  %v1153_v62 = vpack.c.bf16 %v847_v51, %v846_v50  ;;  %v765_v13 = vld [vmem:[#allocation2 + $0x68] sm:$0xff]  ;;  %v826_v32 = vld [vmem:[%s1612_s4 + $0x60] sm:$0xff]  ;;  %v854_v35 = vmax.f32 %v838_v24, 0.0  ;;  %v829_v47 = vld [vmem:[%s1612_s4 + $0x78] sm:$0xff] }
 0x13c   : > { %v805_v59 = vadd.f32 %v1489_v22, %v782_v48  ;;  %v836_v5 = vadd.f32 %v820_v54, %v804_v58  ;;  %1190 = vst [vmem:[%s1613_s5 + $0x8] sm:$0xff] %v1158_v9   ;;  %v788_v31 = vmul.f32 %v1482_v19, %v765_v13  ;;  %v810_v37 = vadd.f32 %v1489_v22, %v787_v27 }
 0x13d   : > { %v803_v46 = vadd.f32 %v1489_v22, %v780_v36  ;;  %v834_v56 = vadd.f32 %v818_v42, %v802_v45  ;;  %1154 = vst [vmem:[%s1613_s5] sm:$0xff] %v1153_v62   ;;  %v840_v36 = vadd.f32 %v824_v21, %v808_v25  ;;  %v790_v42 = vmul.f32 %v1482_v19, %v767_v28 }
 0x13e   : > { %v837_v6 = vadd.f32 %v821_v55, %v805_v59  ;;  %v852_v16 = vmax.f32 %v836_v5, 0.0  ;;  %v811_v41 = vadd.f32 %v1489_v22, %v788_v31  ;;  %v855_v44 = vmax.f32 %v839_v34, 0.0 }
 0x13f   : > { %v835_v57 = vadd.f32 %v819_v43, %v803_v46  ;;  %v850_v3 = vmax.f32 %v834_v56, 0.0  ;;  %v812_v43 = vadd.f32 %v1489_v22, %v789_v33  ;;  %v856_v45 = vmax.f32 %v840_v36, 0.0 }
 0x140   : > { %v853_v17 = vmax.f32 %v837_v6, 0.0  ;;  %v842_v46 = vadd.f32 %v826_v32, %v810_v37  ;;  %v857_v48 = vmax.f32 %v841_v40, 0.0  ;;  %v843_v49 = vadd.f32 %v827_v38, %v811_v41 }
 0x141   : > { %v851_v4 = vmax.f32 %v835_v57, 0.0  ;;  %v813_v50 = vadd.f32 %v1489_v22, %v790_v42  ;;  %v844_v51 = vadd.f32 %v828_v39, %v812_v43  ;;  %v1173_v52 = vpack.c.bf16 %v855_v44, %v854_v35 }
 0x142   : > { %v1168_v29 = vpack.c.bf16 %v853_v17, %v852_v16  ;;  %v858_v53 = vmax.f32 %v842_v46, 0.0  ;;  %v1178_v54 = vpack.c.bf16 %v857_v48, %v856_v45  ;;  %v859_v55 = vmax.f32 %v843_v49, 0.0 }
 0x143   : > { %v1163_v15 = vpack.c.bf16 %v851_v4, %v850_v3  ;;  %v845_v56 = vadd.f32 %v829_v47, %v813_v50  ;;  %v860_v19 = vmax.f32 %v844_v51, 0.0  ;;  %1193 = vst [vmem:[%s1613_s5 + $0x20] sm:$0xff] %v1173_v52  }
 0x144   : > { %1192 = vst [vmem:[%s1613_s5 + $0x18] sm:$0xff] %v1168_v29   ;;  %1194 = vst [vmem:[%s1613_s5 + $0x28] sm:$0xff] %v1178_v54   ;;  %v1183_v57 = vpack.c.bf16 %v859_v55, %v858_v53 }
 0x145   : > { %1191 = vst [vmem:[%s1613_s5 + $0x10] sm:$0xff] %v1163_v15   ;;  %v861_v58 = vmax.f32 %v845_v56, 0.0 }
 0x146   : > { %1195 = vst [vmem:[%s1613_s5 + $0x30] sm:$0xff] %v1183_v57  }
 0x147   : > { %v1188_v22 = vpack.c.bf16 %v861_v58, %v860_v19 }
 0x149   : > { %1196 = vst [vmem:[%s1613_s5 + $0x38] sm:$0xff] %v1188_v22  }
 0x14a PF: > { %s15_s22 = sadd.s32 1, %s1356_s22   ;;  %s1614_s18 = smov %s1344_s19 }
 0x14b   : > { %p12_p12 = scmp.ge.s32.totalorder %s15_s22, 7   ;;  %s1615_s19 = smov %s1424_s26 }
 0x14c   : > { %s1616_s20 = smov %s1352_s21  ;;  %s1617_s21 = smov %s1619_s23 }
 0x14d   :  { %14 = sbr.rel (!%p12_p12) target bundleno = 3 (0x3), region = 136 }

// kernel: _lambda_.28
= control target key start
LH: loop header
LB: loop body
LE: loop exit
PB: predicated region body
PF: predicated region fallthrough
CT: control target
= control target key end

     0   :  { %s867_s15 = smov 0   ;;  %s869_s16 = smov 0   ;;  %s963_s0 = inlined_call_operand.vmem [shape: bf16[32,640], index: 0, kind: input, shape index: {}]   ;;  %s964_s1 = inlined_call_operand.vmem [shape: bf16[640,128], index: 1, kind: input, shape index: {}]   ;;  %s965_s2 = inlined_call_operand.vmem [shape: f32[1,128], index: 2, kind: input, shape index: {}]   ;;  %s966_s3 = inlined_call_operand.vmem [shape: f32[1,128], index: 3, kind: input, shape index: {}]   ;;  %s967_s4 = inlined_call_operand.vmem [shape: bf16[32,128], index: 4, kind: output, shape index: {}]  }
   0x1   :  { %s871_s17 = smov 0   ;;  %s873_s18 = smov 0  }
   0x2   :  { %s875_s19 = smov 0  }
   0x3 LB: > { %s26_s20 = sadd.s32 1, %s835_s18  ;;  %p49_p1 = scmp.ne.s32.totalorder %s827_s16, %s823_s15  ;;  %s839_s19 = sphi %s875_s19, %s14_s19   ;;  %s835_s18 = sphi %s873_s18, %s971_s18   ;;  %s831_s17 = sphi %s871_s17, %s970_s17   ;;  %s827_s16 = sphi %s869_s16, %s969_s16   ;;  %s823_s15 = sphi %s867_s15, %s968_s15  }
   0x4   : > { %p27_p0 = scmp.ge.s32.totalorder %s26_s20, 5  ;;  %p50_p2 = scmp.eq.s32.totalorder %s839_s19, 0 }
   0x5   : > { %s42_s22 = sadd.s32 1, %s827_s16  ;;  %p676_p5 = scmp.ge.s32.totalorder %s839_s19, 5 }
   0x6   : > { %s973_s20 = smov (%p27_p0, %s26_s20), 0  ;;  %p51_p3 = por %p50_p2, %p49_p1 }
   0x7   : > { %s38_s21 = ssub.s32 %s835_s18, %s973_s20  ;;  %195 = sbr.rel (%p676_p5) target bundleno = 21 (0x15), region = 24 }
   0x8   : > { %p40_p4 = scmp.eq.s32.totalorder %s38_s21, 0 }
   0xa   : > { %s902_s23 = scalar_select %p40_p4, %s827_s16, %s42_s22  }
   0xe   : > { %198 = sbr.rel (!%p51_p3) target bundleno = 21 (0x15), region = 28  ;;  %s200_s24 = sand.u32 (%p51_p3), 1, %s827_s16  }
   0xf   : > { %s678_s25 = sshll.u32 (%p51_p3), %s835_s18, 2  ;;  %s677_s26 = sshll.u32 (%p51_p3), %s200_s24, 4 }
  0x10   : > { %s207_s29 = scalar_lea.vmem (%p51_p3), %s963_s0, %s678_s25  ;;  %s202_s30 = scalar_lea.vmem (%p51_p3), [#allocation3], %s677_s26 }
  0x11   : > { %v223_v0 = vld [vmem:[%s207_s29] sm:$0xf] (%p51_p3)  ;;  %v225_v1 = vld [vmem:[%s207_s29 + $0x14] sm:$0xf] (%p51_p3)  ;;  %v227_v2 = vld [vmem:[%s207_s29 + $0x28] sm:$0xf] (%p51_p3) }
  0x12   : > { %224 = vst [vmem:[%s202_s30] sm:$0xf] (%p51_p3), %v223_v0  ;;  %226 = vst [vmem:[%s202_s30 + $0x4] sm:$0xf] (%p51_p3), %v225_v1  ;;  %v229_v3 = vld [vmem:[%s207_s29 + $0x3c] sm:$0xf] (%p51_p3) }
  0x13   : > { %228 = vst [vmem:[%s202_s30 + $0x8] sm:$0xf] (%p51_p3), %v227_v2  ;;  %230 = vst [vmem:[%s202_s30 + $0xc] sm:$0xf] (%p51_p3), %v229_v3 }
  0x15 PF: > { %p679_p6 = scmp.ge.s32.totalorder %s839_s19, 1  ;;  %p272_p7 = scmp.lt.s32.totalorder %s839_s19, 6 }
  0x17   : > { %p273_p8 = pnand %p679_p6, %p272_p7 }
  0x18   : > { %s279_s5 = sand.u32 (!%p273_p8), 1, %s823_s15   ;;  %s681_s6 = sshll.u32 (!%p273_p8), %s831_s17, 4 }
  0x19   : > { %276 = sbr.rel (%p273_p8) target bundleno = 306 (0x132), region = 73  ;;  %s914_s7 = sshll.u32 (!%p273_p8), %s279_s5, 4 }
  0x1a   : > { %p323_p9 = scmp.lt.s32.totalorder (!%p273_p8), %s681_s6, 79  ;;  %s281_s12 = scalar_lea.vmem (!%p273_p8), [#allocation3], %s914_s7 }
  0x1b   : > { %p683_p10 = scmp.ne.s32.totalorder (!%p273_p8), %s831_s17, 0 }
  0x20   : > { %s975_s6 = smov (!%p323_p9, %s681_s6), 79  ;;  %350 = sbr.rel (%p683_p10) target bundleno = 39 (0x27), region = 81 }
  0x21   : > { %s682_s8 = sshll.u32 %s975_s6, 2  ;;  %v841_v4 = vmov (!%p683_p10), 0.0  }
  0x22   : > { %s919_s11 = scalar_lea.vmem %s964_s1, %s682_s8  ;;  %351 = vst [vmem:[#allocation2] sm:$0xff] (!%p683_p10), %v841_v4  ;;  %352 = vst [vmem:[#allocation2 + $0x8] sm:$0xff] (!%p683_p10), %v841_v4 }
  0x23   : > { %353 = vst [vmem:[#allocation2 + $0x10] sm:$0xff] (!%p683_p10), %v841_v4  ;;  %354 = vst [vmem:[#allocation2 + $0x18] sm:$0xff] (!%p683_p10), %v841_v4 }
  0x27 PF: > { %v791_v5 = vld [vmem:[%s919_s11] sm:$0xff]   ;;  %v792_v6 = vld [vmem:[%s919_s11 + $0x8] sm:$0xff]   ;;  %v793_v7 = vld [vmem:[%s919_s11 + $0x10] sm:$0xff]   ;;  %p694_p11 = scmp.ne.s32.totalorder %s831_s17, 4 }
  0x28   : > { %730 = vmatprep.subr.bf16.mxu0 %v791_v5  ;;  %v794_v8 = vld [vmem:[%s919_s11 + $0x18] sm:$0xff]   ;;  %v799_v9 = vld [vmem:[%s281_s12] sm:$0xff]   ;;  %v796_v11 = vld [vmem:[%s919_s11 + $0x28] sm:$0xff]  }
  0x29   : > { %731 = vmatpush3.bf16.msra.mxu0 %v791_v5  ;;  %746 = vmatprep.mubr.bf16.mxu0 %v799_v9  ;;  %v795_v10 = vld [vmem:[%s919_s11 + $0x20] sm:$0xff]   ;;  %v797_v12 = vld [vmem:[%s919_s11 + $0x30] sm:$0xff]   ;;  %v798_v13 = vld [vmem:[%s919_s11 + $0x38] sm:$0xff]  }
  0x2a   : > { %732 = vmatprep.subr.bf16.mxu0 %v792_v6  ;;  %v800_v14 = vld [vmem:[%s281_s12 + $0x8] sm:$0xff]   ;;  %v357_v15 = vld [vmem:[#allocation2 + $0x10] sm:$0xff]  ;;  %v355_v16 = vld [vmem:[#allocation2] sm:$0xff] }
  0x2b   : > { %v358_v18 = vld [vmem:[#allocation2 + $0x18] sm:$0xff]  ;;  %v356_v21 = vld [vmem:[#allocation2 + $0x8] sm:$0xff]  ;;  %v695_v29 = vld [vmem:[%s965_s2] ss:$0 sm:$0xff] (!%p694_p11) }
  0x2c   : > { %v696_v32 = vld [vmem:[%s966_s3] ss:$0 sm:$0xff] (!%p694_p11) }
  0x2d   : > { %733 = vmatpush3.bf16.msra.mxu0 %v792_v6 }
  0x2e   : > { %734 = vmatprep.subr.bf16.mxu0 %v793_v7 }
  0x31   : > { %735 = vmatpush3.bf16.msra.mxu0 %v793_v7 }
  0x32   : > { %736 = vmatprep.subr.bf16.mxu0 %v794_v8 }
  0x35   : > { %737 = vmatpush3.bf16.msra.mxu0 %v794_v8 }
  0x36   : > { %738 = vmatprep.subr.bf16.mxu0 %v795_v10 }
  0x39   : > { %739 = vmatpush3.bf16.msra.mxu0 %v795_v10 }
  0x3a   : > { %740 = vmatprep.subr.bf16.mxu0 %v796_v11 }
  0x3d   : > { %741 = vmatpush3.bf16.msra.mxu0 %v796_v11 }
  0x3e   : > { %742 = vmatprep.subr.bf16.mxu0 %v797_v12 }
  0x41   : > { %743 = vmatpush3.bf16.msra.mxu0 %v797_v12 }
  0x42   : > { %744 = vmatprep.subr.bf16.mxu0 %v798_v13 }
  0x45   : > { %745 = vmatpush3.bf16.msra.mxu0 %v798_v13 }
  0x48   : > { %747 = vmatmul.mubr.bf16.vlgmr.msra.gmra.mrb[0].mxu0 %v800_v14 }
 0x11b   : > { %v748_v17 = vpop.f32.mrb[0].mxu0  ;;  %499 = sbr.rel (%p694_p11) target bundleno = 306 (0x132), region = 85 }
 0x11c   : > { %v490_v19 = vadd.f32 %v748_v17, %v357_v15  ;;  %v473_v20 = vpop.f32.mrb[1].mxu0 }
 0x11d   : > { %v488_v22 = vadd.f32 %v473_v20, %v355_v16  ;;  %v749_v23 = vpop.f32.mrb[2].mxu0 }
 0x11e   : > { %494 = vst [vmem:[#allocation2 + $0x10] sm:$0xff] %v490_v19  ;;  %v491_v24 = vadd.f32 %v749_v23, %v358_v18  ;;  %v476_v25 = vpop.f32.mrb[3].mxu0 }
 0x11f   : > { %492 = vst [vmem:[#allocation2] sm:$0xff] %v488_v22  ;;  %v489_v26 = vadd.f32 %v476_v25, %v356_v21 }
 0x120   : > { %495 = vst [vmem:[#allocation2 + $0x18] sm:$0xff] %v491_v24 }
 0x121   : > { %493 = vst [vmem:[#allocation2 + $0x8] sm:$0xff] %v489_v26 }
 0x125   : > { %v502_v33 = vld [vmem:[#allocation2 + $0x10] sm:$0xff] }
 0x126   : > { %v500_v27 = vld [vmem:[#allocation2] sm:$0xff]  ;;  %v513_v35 = vmul.f32 %v695_v29, %v502_v33 }
 0x127   : > { %v511_v30 = vmul.f32 %v695_v29, %v500_v27  ;;  %v503_v34 = vld [vmem:[#allocation2 + $0x18] sm:$0xff] }
 0x128   : > { %v501_v28 = vld [vmem:[#allocation2 + $0x8] sm:$0xff]  ;;  %v514_v36 = vmul.f32 %v695_v29, %v503_v34  ;;  %v524_v39 = vadd.f32 %v696_v32, %v513_v35 }
 0x129   : > { %v512_v31 = vmul.f32 %v695_v29, %v501_v28  ;;  %v522_v37 = vadd.f32 %v696_v32, %v511_v30 }
 0x12a   : > { %v525_v40 = vadd.f32 %v696_v32, %v514_v36  ;;  %v528_v43 = vmax.f32 %v524_v39, 0.0 }
 0x12b   : > { %v523_v38 = vadd.f32 %v696_v32, %v512_v31  ;;  %v526_v41 = vmax.f32 %v522_v37, 0.0 }
 0x12c   : > { %v529_v44 = vmax.f32 %v525_v40, 0.0 }
 0x12d   : > { %v527_v42 = vmax.f32 %v523_v38, 0.0 }
 0x12e   : > { %v717_v46 = vpack.c.bf16 %v529_v44, %v528_v43 }
 0x12f   : > { %v712_v45 = vpack.c.bf16 %v527_v42, %v526_v41 }
 0x130   : > { %719 = vst [vmem:[%s967_s4 + $0x8] sm:$0xff] %v717_v46  }
 0x131   : > { %713 = vst [vmem:[%s967_s4] sm:$0xff] %v712_v45  }
 0x132 PF: > { %s14_s19 = sadd.s32 1, %s839_s19   ;;  %s968_s15 = smov %s827_s16 }
 0x133   : > { %p11_p12 = scmp.ge.s32.totalorder %s14_s19, 7   ;;  %s969_s16 = smov %s902_s23 }
 0x134   : > { %s970_s17 = smov %s835_s18  ;;  %s971_s18 = smov %s973_s20 }
 0x135   :  { %13 = sbr.rel (!%p11_p12) target bundleno = 3 (0x3), region = 129 }

// kernel: _lambda_.31
= control target key start
LH: loop header
LB: loop body
LE: loop exit
PB: predicated region body
PF: predicated region fallthrough
CT: control target
= control target key end

     0   :  { %s867_s15 = smov 0   ;;  %s869_s16 = smov 0   ;;  %s963_s0 = inlined_call_operand.vmem [shape: bf16[32,1152], index: 0, kind: input, shape index: {}]   ;;  %s964_s1 = inlined_call_operand.vmem [shape: bf16[1152,128], index: 1, kind: input, shape index: {}]   ;;  %s965_s2 = inlined_call_operand.vmem [shape: f32[1,128], index: 2, kind: input, shape index: {}]   ;;  %s966_s3 = inlined_call_operand.vmem [shape: f32[1,128], index: 3, kind: input, shape index: {}]   ;;  %s967_s4 = inlined_call_operand.vmem [shape: bf16[32,128], index: 4, kind: output, shape index: {}]  }
   0x1   :  { %s871_s17 = smov 0   ;;  %s873_s18 = smov 0  }
   0x2   :  { %s875_s19 = smov 0  }
   0x3 LB: > { %s26_s20 = sadd.s32 1, %s835_s18  ;;  %p49_p1 = scmp.ne.s32.totalorder %s827_s16, %s823_s15  ;;  %s839_s19 = sphi %s875_s19, %s14_s19   ;;  %s835_s18 = sphi %s873_s18, %s971_s18   ;;  %s831_s17 = sphi %s871_s17, %s970_s17   ;;  %s827_s16 = sphi %s869_s16, %s969_s16   ;;  %s823_s15 = sphi %s867_s15, %s968_s15  }
   0x4   : > { %p27_p0 = scmp.ge.s32.totalorder %s26_s20, 9  ;;  %p50_p2 = scmp.eq.s32.totalorder %s839_s19, 0 }
   0x5   : > { %s42_s22 = sadd.s32 1, %s827_s16  ;;  %p676_p5 = scmp.ge.s32.totalorder %s839_s19, 9 }
   0x6   : > { %s973_s20 = smov (%p27_p0, %s26_s20), 0  ;;  %p51_p3 = por %p50_p2, %p49_p1 }
   0x7   : > { %s38_s21 = ssub.s32 %s835_s18, %s973_s20  ;;  %195 = sbr.rel (%p676_p5) target bundleno = 21 (0x15), region = 24 }
   0x8   : > { %p40_p4 = scmp.eq.s32.totalorder %s38_s21, 0 }
   0xa   : > { %s902_s23 = scalar_select %p40_p4, %s827_s16, %s42_s22  }
   0xe   : > { %198 = sbr.rel (!%p51_p3) target bundleno = 21 (0x15), region = 28  ;;  %s200_s24 = sand.u32 (%p51_p3), 1, %s827_s16  }
   0xf   : > { %s678_s25 = sshll.u32 (%p51_p3), %s835_s18, 2  ;;  %s677_s26 = sshll.u32 (%p51_p3), %s200_s24, 4 }
  0x10   : > { %s207_s29 = scalar_lea.vmem (%p51_p3), %s963_s0, %s678_s25  ;;  %s202_s30 = scalar_lea.vmem (%p51_p3), [#allocation3], %s677_s26 }
  0x11   : > { %v223_v0 = vld [vmem:[%s207_s29] sm:$0xf] (%p51_p3)  ;;  %v225_v1 = vld [vmem:[%s207_s29 + $0x24] sm:$0xf] (%p51_p3)  ;;  %v227_v2 = vld [vmem:[%s207_s29 + $0x48] sm:$0xf] (%p51_p3) }
  0x12   : > { %224 = vst [vmem:[%s202_s30] sm:$0xf] (%p51_p3), %v223_v0  ;;  %226 = vst [vmem:[%s202_s30 + $0x4] sm:$0xf] (%p51_p3), %v225_v1  ;;  %v229_v3 = vld [vmem:[%s207_s29 + $0x6c] sm:$0xf] (%p51_p3) }
  0x13   : > { %228 = vst [vmem:[%s202_s30 + $0x8] sm:$0xf] (%p51_p3), %v227_v2  ;;  %230 = vst [vmem:[%s202_s30 + $0xc] sm:$0xf] (%p51_p3), %v229_v3 }
  0x15 PF: > { %p679_p6 = scmp.ge.s32.totalorder %s839_s19, 1  ;;  %p272_p7 = scmp.lt.s32.totalorder %s839_s19, 10 }
  0x17   : > { %p273_p8 = pnand %p679_p6, %p272_p7 }
  0x18   : > { %s279_s5 = sand.u32 (!%p273_p8), 1, %s823_s15   ;;  %s681_s6 = sshll.u32 (!%p273_p8), %s831_s17, 4 }
  0x19   : > { %276 = sbr.rel (%p273_p8) target bundleno = 306 (0x132), region = 73  ;;  %s914_s7 = sshll.u32 (!%p273_p8), %s279_s5, 4 }
  0x1a   : > { %p323_p9 = scmp.lt.s32.totalorder (!%p273_p8), %s681_s6, 143  ;;  %s281_s12 = scalar_lea.vmem (!%p273_p8), [#allocation3], %s914_s7 }
  0x1b   : > { %p683_p10 = scmp.ne.s32.totalorder (!%p273_p8), %s831_s17, 0 }
  0x20   : > { %s975_s6 = smov (!%p323_p9, %s681_s6), 143  ;;  %350 = sbr.rel (%p683_p10) target bundleno = 39 (0x27), region = 81 }
  0x21   : > { %s682_s8 = sshll.u32 %s975_s6, 2  ;;  %v841_v4 = vmov (!%p683_p10), 0.0  }
  0x22   : > { %s919_s11 = scalar_lea.vmem %s964_s1, %s682_s8  ;;  %351 = vst [vmem:[#allocation2] sm:$0xff] (!%p683_p10), %v841_v4  ;;  %352 = vst [vmem:[#allocation2 + $0x8] sm:$0xff] (!%p683_p10), %v841_v4 }
  0x23   : > { %353 = vst [vmem:[#allocation2 + $0x10] sm:$0xff] (!%p683_p10), %v841_v4  ;;  %354 = vst [vmem:[#allocation2 + $0x18] sm:$0xff] (!%p683_p10), %v841_v4 }
  0x27 PF: > { %v791_v5 = vld [vmem:[%s919_s11] sm:$0xff]   ;;  %v792_v6 = vld [vmem:[%s919_s11 + $0x8] sm:$0xff]   ;;  %v793_v7 = vld [vmem:[%s919_s11 + $0x10] sm:$0xff]   ;;  %p694_p11 = scmp.ne.s32.totalorder %s831_s17, 8 }
  0x28   : > { %730 = vmatprep.subr.bf16.mxu0 %v791_v5  ;;  %v794_v8 = vld [vmem:[%s919_s11 + $0x18] sm:$0xff]   ;;  %v799_v9 = vld [vmem:[%s281_s12] sm:$0xff]   ;;  %v796_v11 = vld [vmem:[%s919_s11 + $0x28] sm:$0xff]  }
  0x29   : > { %731 = vmatpush3.bf16.msra.mxu0 %v791_v5  ;;  %746 = vmatprep.mubr.bf16.mxu0 %v799_v9  ;;  %v795_v10 = vld [vmem:[%s919_s11 + $0x20] sm:$0xff]   ;;  %v797_v12 = vld [vmem:[%s919_s11 + $0x30] sm:$0xff]   ;;  %v798_v13 = vld [vmem:[%s919_s11 + $0x38] sm:$0xff]  }
  0x2a   : > { %732 = vmatprep.subr.bf16.mxu0 %v792_v6  ;;  %v800_v14 = vld [vmem:[%s281_s12 + $0x8] sm:$0xff]   ;;  %v357_v15 = vld [vmem:[#allocation2 + $0x10] sm:$0xff]  ;;  %v355_v16 = vld [vmem:[#allocation2] sm:$0xff] }
  0x2b   : > { %v358_v18 = vld [vmem:[#allocation2 + $0x18] sm:$0xff]  ;;  %v356_v21 = vld [vmem:[#allocation2 + $0x8] sm:$0xff]  ;;  %v695_v29 = vld [vmem:[%s965_s2] ss:$0 sm:$0xff] (!%p694_p11) }
  0x2c   : > { %v696_v32 = vld [vmem:[%s966_s3] ss:$0 sm:$0xff] (!%p694_p11) }
  0x2d   : > { %733 = vmatpush3.bf16.msra.mxu0 %v792_v6 }
  0x2e   : > { %734 = vmatprep.subr.bf16.mxu0 %v793_v7 }
  0x31   : > { %735 = vmatpush3.bf16.msra.mxu0 %v793_v7 }
  0x32   : > { %736 = vmatprep.subr.bf16.mxu0 %v794_v8 }
  0x35   : > { %737 = vmatpush3.bf16.msra.mxu0 %v794_v8 }
  0x36   : > { %738 = vmatprep.subr.bf16.mxu0 %v795_v10 }
  0x39   : > { %739 = vmatpush3.bf16.msra.mxu0 %v795_v10 }
  0x3a   : > { %740 = vmatprep.subr.bf16.mxu0 %v796_v11 }
  0x3d   : > { %741 = vmatpush3.bf16.msra.mxu0 %v796_v11 }
  0x3e   : > { %742 = vmatprep.subr.bf16.mxu0 %v797_v12 }
  0x41   : > { %743 = vmatpush3.bf16.msra.mxu0 %v797_v12 }
  0x42   : > { %744 = vmatprep.subr.bf16.mxu0 %v798_v13 }
  0x45   : > { %745 = vmatpush3.bf16.msra.mxu0 %v798_v13 }
  0x48   : > { %747 = vmatmul.mubr.bf16.vlgmr.msra.gmra.mrb[0].mxu0 %v800_v14 }
 0x11b   : > { %v748_v17 = vpop.f32.mrb[0].mxu0  ;;  %499 = sbr.rel (%p694_p11) target bundleno = 306 (0x132), region = 85 }
 0x11c   : > { %v490_v19 = vadd.f32 %v748_v17, %v357_v15  ;;  %v473_v20 = vpop.f32.mrb[1].mxu0 }
 0x11d   : > { %v488_v22 = vadd.f32 %v473_v20, %v355_v16  ;;  %v749_v23 = vpop.f32.mrb[2].mxu0 }
 0x11e   : > { %494 = vst [vmem:[#allocation2 + $0x10] sm:$0xff] %v490_v19  ;;  %v491_v24 = vadd.f32 %v749_v23, %v358_v18  ;;  %v476_v25 = vpop.f32.mrb[3].mxu0 }
 0x11f   : > { %492 = vst [vmem:[#allocation2] sm:$0xff] %v488_v22  ;;  %v489_v26 = vadd.f32 %v476_v25, %v356_v21 }
 0x120   : > { %495 = vst [vmem:[#allocation2 + $0x18] sm:$0xff] %v491_v24 }
 0x121   : > { %493 = vst [vmem:[#allocation2 + $0x8] sm:$0xff] %v489_v26 }
 0x125   : > { %v502_v33 = vld [vmem:[#allocation2 + $0x10] sm:$0xff] }
 0x126   : > { %v500_v27 = vld [vmem:[#allocation2] sm:$0xff]  ;;  %v513_v35 = vmul.f32 %v695_v29, %v502_v33 }
 0x127   : > { %v511_v30 = vmul.f32 %v695_v29, %v500_v27  ;;  %v503_v34 = vld [vmem:[#allocation2 + $0x18] sm:$0xff] }
 0x128   : > { %v501_v28 = vld [vmem:[#allocation2 + $0x8] sm:$0xff]  ;;  %v514_v36 = vmul.f32 %v695_v29, %v503_v34  ;;  %v524_v39 = vadd.f32 %v696_v32, %v513_v35 }
 0x129   : > { %v512_v31 = vmul.f32 %v695_v29, %v501_v28  ;;  %v522_v37 = vadd.f32 %v696_v32, %v511_v30 }
 0x12a   : > { %v525_v40 = vadd.f32 %v696_v32, %v514_v36  ;;  %v528_v43 = vmax.f32 %v524_v39, 0.0 }
 0x12b   : > { %v523_v38 = vadd.f32 %v696_v32, %v512_v31  ;;  %v526_v41 = vmax.f32 %v522_v37, 0.0 }
 0x12c   : > { %v529_v44 = vmax.f32 %v525_v40, 0.0 }
 0x12d   : > { %v527_v42 = vmax.f32 %v523_v38, 0.0 }
 0x12e   : > { %v717_v46 = vpack.c.bf16 %v529_v44, %v528_v43 }
 0x12f   : > { %v712_v45 = vpack.c.bf16 %v527_v42, %v526_v41 }
 0x130   : > { %719 = vst [vmem:[%s967_s4 + $0x8] sm:$0xff] %v717_v46  }
 0x131   : > { %713 = vst [vmem:[%s967_s4] sm:$0xff] %v712_v45  }
 0x132 PF: > { %s14_s19 = sadd.s32 1, %s839_s19   ;;  %s968_s15 = smov %s827_s16 }
 0x133   : > { %p11_p12 = scmp.ge.s32.totalorder %s14_s19, 11   ;;  %s969_s16 = smov %s902_s23 }
 0x134   : > { %s970_s17 = smov %s835_s18  ;;  %s971_s18 = smov %s973_s20 }
 0x135   :  { %13 = sbr.rel (!%p11_p12) target bundleno = 3 (0x3), region = 129 }

// kernel: _lambda_.30
= control target key start
LH: loop header
LB: loop body
LE: loop exit
PB: predicated region body
PF: predicated region fallthrough
CT: control target
= control target key end

     0   :  { %s959_s18 = smov 0   ;;  %s961_s19 = smov 0   ;;  %s1067_s0 = inlined_call_operand.vmem [shape: bf16[32,1152], index: 0, kind: input, shape index: {}]   ;;  %s1068_s1 = inlined_call_operand.vmem [shape: bf16[1152,128], index: 1, kind: input, shape index: {}]   ;;  %s1069_s2 = inlined_call_operand.vmem [shape: f32[1,128], index: 2, kind: input, shape index: {}]   ;;  %s1070_s3 = inlined_call_operand.vmem [shape: f32[1,128], index: 3, kind: input, shape index: {}]   ;;  %s1071_s4 = inlined_call_operand.vmem [shape: f32[32,128], index: 4, kind: input, shape index: {}]   ;;  %s1072_s5 = inlined_call_operand.vmem [shape: bf16[32,128], index: 5, kind: output, shape index: {}]  }
   0x1   :  { %s963_s20 = smov 0   ;;  %s965_s21 = smov 0  }
   0x2   :  { %s967_s22 = smov 0  }
   0x3 LB: > { %s27_s23 = sadd.s32 1, %s922_s21  ;;  %p50_p1 = scmp.ne.s32.totalorder %s914_s19, %s910_s18  ;;  %s926_s22 = sphi %s967_s22, %s15_s22   ;;  %s922_s21 = sphi %s965_s21, %s1076_s21   ;;  %s918_s20 = sphi %s963_s20, %s1075_s20   ;;  %s914_s19 = sphi %s961_s19, %s1074_s19   ;;  %s910_s18 = sphi %s959_s18, %s1073_s18  }
   0x4   : > { %p28_p0 = scmp.ge.s32.totalorder %s27_s23, 9  ;;  %p51_p2 = scmp.eq.s32.totalorder %s926_s22, 0 }
   0x5   : > { %s43_s25 = sadd.s32 1, %s914_s19  ;;  %p763_p5 = scmp.ge.s32.totalorder %s926_s22, 9 }
   0x6   : > { %s1078_s23 = smov (%p28_p0, %s27_s23), 0  ;;  %p52_p3 = por %p51_p2, %p50_p1 }
   0x7   : > { %s39_s24 = ssub.s32 %s922_s21, %s1078_s23  ;;  %236 = sbr.rel (%p763_p5) target bundleno = 21 (0x15), region = 28 }
   0x8   : > { %p41_p4 = scmp.eq.s32.totalorder %s39_s24, 0 }
   0xa   : > { %s994_s26 = scalar_select %p41_p4, %s914_s19, %s43_s25  }
   0xe   : > { %239 = sbr.rel (!%p52_p3) target bundleno = 21 (0x15), region = 32  ;;  %s241_s27 = sand.u32 (%p52_p3), 1, %s914_s19  }
   0xf   : > { %s765_s28 = sshll.u32 (%p52_p3), %s922_s21, 2  ;;  %s764_s29 = sshll.u32 (%p52_p3), %s241_s27, 4 }
  0x10   : > { %s248_s7 = scalar_lea.vmem (%p52_p3), %s1067_s0, %s765_s28  ;;  %s243_s8 = scalar_lea.vmem (%p52_p3), [#allocation3], %s764_s29 }
  0x11   : > { %v264_v0 = vld [vmem:[%s248_s7] sm:$0xf] (%p52_p3)  ;;  %v266_v1 = vld [vmem:[%s248_s7 + $0x24] sm:$0xf] (%p52_p3)  ;;  %v268_v2 = vld [vmem:[%s248_s7 + $0x48] sm:$0xf] (%p52_p3) }
  0x12   : > { %265 = vst [vmem:[%s243_s8] sm:$0xf] (%p52_p3), %v264_v0  ;;  %267 = vst [vmem:[%s243_s8 + $0x4] sm:$0xf] (%p52_p3), %v266_v1  ;;  %v270_v3 = vld [vmem:[%s248_s7 + $0x6c] sm:$0xf] (%p52_p3) }
  0x13   : > { %269 = vst [vmem:[%s243_s8 + $0x8] sm:$0xf] (%p52_p3), %v268_v2  ;;  %271 = vst [vmem:[%s243_s8 + $0xc] sm:$0xf] (%p52_p3), %v270_v3 }
  0x15 PF: > { %p766_p6 = scmp.ge.s32.totalorder %s926_s22, 1  ;;  %p313_p7 = scmp.lt.s32.totalorder %s926_s22, 10 }
  0x17   : > { %p314_p8 = pnand %p766_p6, %p313_p7 }
  0x18   : > { %s320_s9 = sand.u32 (!%p314_p8), 1, %s910_s18   ;;  %s768_s10 = sshll.u32 (!%p314_p8), %s918_s20, 4 }
  0x19   : > { %317 = sbr.rel (%p314_p8) target bundleno = 308 (0x134), region = 77  ;;  %s1006_s11 = sshll.u32 (!%p314_p8), %s320_s9, 4 }
  0x1a   : > { %p374_p9 = scmp.lt.s32.totalorder (!%p314_p8), %s768_s10, 143  ;;  %s322_s16 = scalar_lea.vmem (!%p314_p8), [#allocation3], %s1006_s11 }
  0x1b   : > { %p770_p10 = scmp.ne.s32.totalorder (!%p314_p8), %s918_s20, 0 }
  0x20   : > { %s1080_s10 = smov (!%p374_p9, %s768_s10), 143  ;;  %410 = sbr.rel (%p770_p10) target bundleno = 39 (0x27), region = 85 }
  0x21   : > { %s769_s12 = sshll.u32 %s1080_s10, 2  ;;  %v928_v4 = vmov (!%p770_p10), 0.0  }
  0x22   : > { %s1011_s15 = scalar_lea.vmem %s1068_s1, %s769_s12  ;;  %411 = vst [vmem:[#allocation2] sm:$0xff] (!%p770_p10), %v928_v4  ;;  %412 = vst [vmem:[#allocation2 + $0x8] sm:$0xff] (!%p770_p10), %v928_v4 }
  0x23   : > { %413 = vst [vmem:[#allocation2 + $0x10] sm:$0xff] (!%p770_p10), %v928_v4  ;;  %414 = vst [vmem:[#allocation2 + $0x18] sm:$0xff] (!%p770_p10), %v928_v4 }
  0x27 PF: > { %v878_v5 = vld [vmem:[%s1011_s15] sm:$0xff]   ;;  %v879_v6 = vld [vmem:[%s1011_s15 + $0x8] sm:$0xff]   ;;  %v880_v7 = vld [vmem:[%s1011_s15 + $0x10] sm:$0xff]   ;;  %p781_p11 = scmp.ne.s32.totalorder %s918_s20, 8 }
  0x28   : > { %817 = vmatprep.subr.bf16.mxu0 %v878_v5  ;;  %v881_v8 = vld [vmem:[%s1011_s15 + $0x18] sm:$0xff]   ;;  %v886_v9 = vld [vmem:[%s322_s16] sm:$0xff]   ;;  %v883_v11 = vld [vmem:[%s1011_s15 + $0x28] sm:$0xff]  }
  0x29   : > { %818 = vmatpush3.bf16.msra.mxu0 %v878_v5  ;;  %833 = vmatprep.mubr.bf16.mxu0 %v886_v9  ;;  %v882_v10 = vld [vmem:[%s1011_s15 + $0x20] sm:$0xff]   ;;  %v884_v12 = vld [vmem:[%s1011_s15 + $0x30] sm:$0xff]   ;;  %v885_v13 = vld [vmem:[%s1011_s15 + $0x38] sm:$0xff]  }
  0x2a   : > { %819 = vmatprep.subr.bf16.mxu0 %v879_v6  ;;  %v887_v14 = vld [vmem:[%s322_s16 + $0x8] sm:$0xff]   ;;  %v417_v15 = vld [vmem:[#allocation2 + $0x10] sm:$0xff]  ;;  %v415_v16 = vld [vmem:[#allocation2] sm:$0xff] }
  0x2b   : > { %v418_v18 = vld [vmem:[#allocation2 + $0x18] sm:$0xff]  ;;  %v416_v21 = vld [vmem:[#allocation2 + $0x8] sm:$0xff]  ;;  %v782_v29 = vld [vmem:[%s1069_s2] ss:$0 sm:$0xff] (!%p781_p11) }
  0x2c   : > { %v783_v32 = vld [vmem:[%s1070_s3] ss:$0 sm:$0xff] (!%p781_p11)  ;;  %v587_v34 = vld [vmem:[%s1071_s4 + $0x8] sm:$0xff] (!%p781_p11)  ;;  %v588_v41 = vld [vmem:[%s1071_s4 + $0x10] sm:$0xff] (!%p781_p11) }
  0x2d   : > { %820 = vmatpush3.bf16.msra.mxu0 %v879_v6  ;;  %v586_v33 = vld [vmem:[%s1071_s4] sm:$0xff] (!%p781_p11)  ;;  %v589_v42 = vld [vmem:[%s1071_s4 + $0x18] sm:$0xff] (!%p781_p11) }
  0x2e   : > { %821 = vmatprep.subr.bf16.mxu0 %v880_v7 }
  0x31   : > { %822 = vmatpush3.bf16.msra.mxu0 %v880_v7 }
  0x32   : > { %823 = vmatprep.subr.bf16.mxu0 %v881_v8 }
  0x35   : > { %824 = vmatpush3.bf16.msra.mxu0 %v881_v8 }
  0x36   : > { %825 = vmatprep.subr.bf16.mxu0 %v882_v10 }
  0x39   : > { %826 = vmatpush3.bf16.msra.mxu0 %v882_v10 }
  0x3a   : > { %827 = vmatprep.subr.bf16.mxu0 %v883_v11 }
  0x3d   : > { %828 = vmatpush3.bf16.msra.mxu0 %v883_v11 }
  0x3e   : > { %829 = vmatprep.subr.bf16.mxu0 %v884_v12 }
  0x41   : > { %830 = vmatpush3.bf16.msra.mxu0 %v884_v12 }
  0x42   : > { %831 = vmatprep.subr.bf16.mxu0 %v885_v13 }
  0x45   : > { %832 = vmatpush3.bf16.msra.mxu0 %v885_v13 }
  0x48   : > { %834 = vmatmul.mubr.bf16.vlgmr.msra.gmra.mrb[0].mxu0 %v887_v14 }
 0x11b   : > { %v835_v17 = vpop.f32.mrb[0].mxu0  ;;  %559 = sbr.rel (%p781_p11) target bundleno = 308 (0x134), region = 89 }
 0x11c   : > { %v550_v19 = vadd.f32 %v835_v17, %v417_v15  ;;  %v533_v20 = vpop.f32.mrb[1].mxu0 }
 0x11d   : > { %v548_v22 = vadd.f32 %v533_v20, %v415_v16  ;;  %v836_v23 = vpop.f32.mrb[2].mxu0 }
 0x11e   : > { %554 = vst [vmem:[#allocation2 + $0x10] sm:$0xff] %v550_v19  ;;  %v551_v24 = vadd.f32 %v836_v23, %v418_v18  ;;  %v536_v25 = vpop.f32.mrb[3].mxu0 }
 0x11f   : > { %552 = vst [vmem:[#allocation2] sm:$0xff] %v548_v22  ;;  %v549_v26 = vadd.f32 %v536_v25, %v416_v21 }
 0x120   : > { %555 = vst [vmem:[#allocation2 + $0x18] sm:$0xff] %v551_v24 }
 0x121   : > { %553 = vst [vmem:[#allocation2 + $0x8] sm:$0xff] %v549_v26 }
 0x125   : > { %v562_v35 = vld [vmem:[#allocation2 + $0x10] sm:$0xff] }
 0x126   : > { %v560_v27 = vld [vmem:[#allocation2] sm:$0xff]  ;;  %v573_v39 = vmul.f32 %v782_v29, %v562_v35 }
 0x127   : > { %v571_v30 = vmul.f32 %v782_v29, %v560_v27  ;;  %v563_v36 = vld [vmem:[#allocation2 + $0x18] sm:$0xff] }
 0x128   : > { %v561_v28 = vld [vmem:[#allocation2 + $0x8] sm:$0xff]  ;;  %v574_v40 = vmul.f32 %v782_v29, %v563_v36  ;;  %v584_v45 = vadd.f32 %v783_v32, %v573_v39 }
 0x129   : > { %v572_v31 = vmul.f32 %v782_v29, %v561_v28  ;;  %v582_v37 = vadd.f32 %v783_v32, %v571_v30 }
 0x12a   : > { %v585_v46 = vadd.f32 %v783_v32, %v574_v40  ;;  %v592_v49 = vadd.f32 %v588_v41, %v584_v45 }
 0x12b   : > { %v583_v38 = vadd.f32 %v783_v32, %v572_v31  ;;  %v590_v43 = vadd.f32 %v586_v33, %v582_v37 }
 0x12c   : > { %v593_v50 = vadd.f32 %v589_v42, %v585_v46  ;;  %v596_v52 = vmax.f32 %v592_v49, 0.0 }
 0x12d   : > { %v591_v44 = vadd.f32 %v587_v34, %v583_v38  ;;  %v594_v47 = vmax.f32 %v590_v43, 0.0 }
 0x12e   : > { %v597_v53 = vmax.f32 %v593_v50, 0.0 }
 0x12f   : > { %v595_v48 = vmax.f32 %v591_v44, 0.0 }
 0x130   : > { %v804_v54 = vpack.c.bf16 %v597_v53, %v596_v52 }
 0x131   : > { %v799_v51 = vpack.c.bf16 %v595_v48, %v594_v47 }
 0x132   : > { %806 = vst [vmem:[%s1072_s5 + $0x8] sm:$0xff] %v804_v54  }
 0x133   : > { %800 = vst [vmem:[%s1072_s5] sm:$0xff] %v799_v51  }
 0x134 PF: > { %s15_s22 = sadd.s32 1, %s926_s22   ;;  %s1073_s18 = smov %s914_s19 }
 0x135   : > { %p12_p12 = scmp.ge.s32.totalorder %s15_s22, 11   ;;  %s1074_s19 = smov %s994_s26 }
 0x136   : > { %s1075_s20 = smov %s922_s21  ;;  %s1076_s21 = smov %s1078_s23 }
 0x137   :  { %14 = sbr.rel (!%p12_p12) target bundleno = 3 (0x3), region = 136 }

// kernel: _lambda_.29
= control target key start
LH: loop header
LB: loop body
LE: loop exit
PB: predicated region body
PF: predicated region fallthrough
CT: control target
= control target key end

     0   :  { %s358_s1 = inlined_call_operand.vmem [shape: bf16[128,128], index: 1, kind: input, shape index: {}]   ;;  %s359_s0 = inlined_call_operand.vmem [shape: bf16[32,128], index: 0, kind: input, shape index: {}]   ;;  %s360_s2 = inlined_call_operand.vmem [shape: f32[1,128], index: 2, kind: input, shape index: {}]   ;;  %s361_s3 = inlined_call_operand.vmem [shape: f32[1,128], index: 3, kind: input, shape index: {}]   ;;  %s362_s4 = inlined_call_operand.vmem [shape: bf16[32,128], index: 4, kind: output, shape index: {}]  }
   0x1   :  { %v281_v0 = vld [vmem:[%s358_s1] sm:$0xff]   ;;  %v282_v1 = vld [vmem:[%s358_s1 + $0x8] sm:$0xff]   ;;  %v283_v2 = vld [vmem:[%s358_s1 + $0x10] sm:$0xff]  }
   0x2   :  { %261 = vmatprep.subr.bf16.mxu0 %v281_v0  ;;  %v284_v3 = vld [vmem:[%s358_s1 + $0x18] sm:$0xff]   ;;  %v289_v4 = vld [vmem:[%s359_s0] sm:$0xff]   ;;  %v286_v6 = vld [vmem:[%s358_s1 + $0x28] sm:$0xff]  }
   0x3   :  { %262 = vmatpush3.bf16.msra.mxu0 %v281_v0  ;;  %277 = vmatprep.mubr.bf16.mxu0 %v289_v4  ;;  %v285_v5 = vld [vmem:[%s358_s1 + $0x20] sm:$0xff]   ;;  %v287_v7 = vld [vmem:[%s358_s1 + $0x30] sm:$0xff]   ;;  %v288_v8 = vld [vmem:[%s358_s1 + $0x38] sm:$0xff]  }
   0x4   :  { %263 = vmatprep.subr.bf16.mxu0 %v282_v1  ;;  %v290_v9 = vld [vmem:[%s359_s0 + $0x8] sm:$0xff]   ;;  %v230_v10 = vld [vmem:[%s360_s2] ss:$0 sm:$0xff] }
   0x5   :  { %v231_v14 = vld [vmem:[%s361_s3] ss:$0 sm:$0xff] }
   0x7   :  { %264 = vmatpush3.bf16.msra.mxu0 %v282_v1 }
   0x8   :  { %265 = vmatprep.subr.bf16.mxu0 %v283_v2 }
   0xb   :  { %266 = vmatpush3.bf16.msra.mxu0 %v283_v2 }
   0xc   :  { %267 = vmatprep.subr.bf16.mxu0 %v284_v3 }
   0xf   :  { %268 = vmatpush3.bf16.msra.mxu0 %v284_v3 }
  0x10   :  { %269 = vmatprep.subr.bf16.mxu0 %v285_v5 }
  0x13   :  { %270 = vmatpush3.bf16.msra.mxu0 %v285_v5 }
  0x14   :  { %271 = vmatprep.subr.bf16.mxu0 %v286_v6 }
  0x17   :  { %272 = vmatpush3.bf16.msra.mxu0 %v286_v6 }
  0x18   :  { %273 = vmatprep.subr.bf16.mxu0 %v287_v7 }
  0x1b   :  { %274 = vmatpush3.bf16.msra.mxu0 %v287_v7 }
  0x1c   :  { %275 = vmatprep.subr.bf16.mxu0 %v288_v8 }
  0x1f   :  { %276 = vmatpush3.bf16.msra.mxu0 %v288_v8 }
  0x22   :  { %278 = vmatmul.mubr.bf16.vlgmr.msra.gmra.mrb[0].mxu0 %v290_v9 }
  0xf5   :  { %v279_v11 = vpop.f32.mrb[0].mxu0 }
  0xf6   :  { %v183_v12 = vmul.f32 %v279_v11, %v230_v10  ;;  %v144_v13 = vpop.f32.mrb[1].mxu0 }
  0xf7   :  { %v181_v15 = vmul.f32 %v230_v10, %v144_v13  ;;  %v280_v16 = vpop.f32.mrb[2].mxu0 }
  0xf8   :  { %v184_v17 = vmul.f32 %v280_v16, %v230_v10  ;;  %v147_v18 = vpop.f32.mrb[3].mxu0  ;;  %v194_v20 = vadd.f32 %v231_v14, %v183_v12 }
  0xf9   :  { %v182_v19 = vmul.f32 %v230_v10, %v147_v18  ;;  %v192_v22 = vadd.f32 %v231_v14, %v181_v15 }
  0xfa   :  { %v195_v21 = vadd.f32 %v231_v14, %v184_v17 }
  0xfb   :  { %v193_v23 = vadd.f32 %v231_v14, %v182_v19 }
  0xfc   :  { %v248_v24 = vpack.c.bf16 %v195_v21, %v194_v20 }
  0xfd   :  { %v243_v25 = vpack.c.bf16 %v193_v23, %v192_v22 }
  0xfe   :  { %250 = vst [vmem:[%s362_s4 + $0x8] sm:$0xff] %v248_v24  }
  0xff   :  { %244 = vst [vmem:[%s362_s4] sm:$0xff] %v243_v25  }

// kernel: _lambda_.33
= control target key start
LH: loop header
LB: loop body
LE: loop exit
PB: predicated region body
PF: predicated region fallthrough
CT: control target
= control target key end

     0   :  { %s779_s15 = smov 0   ;;  %s781_s16 = smov 0   ;;  %s849_s0 = inlined_call_operand.vmem [shape: bf16[8,1152], index: 0, kind: input, shape index: {}]   ;;  %s850_s1 = inlined_call_operand.vmem [shape: bf16[1152,256], index: 1, kind: input, shape index: {}]   ;;  %s851_s2 = inlined_call_operand.vmem [shape: f32[1,256], index: 2, kind: input, shape index: {}]   ;;  %s852_s3 = inlined_call_operand.vmem [shape: f32[1,256], index: 3, kind: input, shape index: {}]   ;;  %s853_s4 = inlined_call_operand.vmem [shape: bf16[8,256], index: 4, kind: output, shape index: {}]  }
   0x1   :  { %s783_s17 = smov 0  }
   0x2 LB: > { %s26_s18 = sadd.s32 1, %s746_s16  ;;  %p648_p0 = scmp.ge.s32.totalorder %s750_s17, 1  ;;  %s750_s17 = sphi %s783_s17, %s14_s17   ;;  %s746_s16 = sphi %s781_s16, %s855_s16   ;;  %s742_s15 = sphi %s779_s15, %s854_s15  }
   0x3   : > { %p27_p1 = scmp.ge.s32.totalorder %s26_s18, 9  ;;  %p227_p2 = scmp.lt.s32.totalorder %s750_s17, 10 }
   0x5   : > { %s857_s18 = smov (%p27_p1, %s26_s18), 0  ;;  %p228_p3 = pnand %p648_p0, %p227_p2 }
   0x6   : > { %p280_p4 = scmp.lt.s32.totalorder (!%p228_p3), %s742_s15, 8  ;;  %s650_s19 = sshll.u32 (!%p228_p3), %s742_s15, 4 }
   0x7   : > { %231 = sbr.rel (%p228_p3) target bundleno = 287 (0x11f), region = 36  ;;  %p288_p5 = scmp.lt.s32.totalorder (!%p228_p3), %s650_s19, 143 }
   0x8   : > { %p653_p6 = scmp.ne.s32.totalorder (!%p228_p3), %s742_s15, 0 }
   0xe   : > { %s281_s20 = scalar_select %p280_p4, %s742_s15, 8 }
   0xf   : > { %s859_s19 = smov (!%p288_p5, %s650_s19), 143  ;;  %322 = sbr.rel (%p653_p6) target bundleno = 22 (0x16), region = 40 }
  0x10   : > { %s649_s21 = sshll.u32 %s281_s20, 2  ;;  %s676_s25 = sshll.u32 %s859_s19, 3  ;;  %v752_v0 = vmov (!%p653_p6), 0.0  }
  0x11   : > { %s805_s24 = scalar_lea.vmem %s849_s0, %s649_s21  ;;  %s810_s28 = scalar_lea.vmem %s850_s1, %s676_s25  ;;  %323 = vst [vmem:[#allocation2] sm:$0xff] (!%p653_p6), %v752_v0  ;;  %324 = vst [vmem:[#allocation2 + $0x8] sm:$0xff] (!%p653_p6), %v752_v0 }
  0x16 PF: > { %v704_v1 = vld [vmem:[%s810_s28 + $0x4] ss:$8 sps:$4 sm:$0xff]   ;;  %v706_v2 = vld [vmem:[%s810_s28] ss:$8 sps:$4 sm:$0xff]   ;;  %v753_v3 = vmov 0   ;;  %p670_p7 = scmp.ne.s32.totalorder %s742_s15, 8 }
  0x17   : > { %456 = vmatprep.mubr.bf16.mxu0 %v753_v3  ;;  %424 = vmatprep.subr.bf16.mxu0 %v704_v1  ;;  %v707_v4 = vld [vmem:[%s810_s28 + $0x14] ss:$8 sps:$4 sm:$0xff]   ;;  %v709_v5 = vld [vmem:[%s810_s28 + $0x10] ss:$8 sps:$4 sm:$0xff]   ;;  %v710_v6 = vld [vmem:[%s810_s28 + $0x24] ss:$8 sps:$4 sm:$0xff]   ;;  %v477_v27 = vlaneseq (!%p670_p7) }
  0x18   : > { %425 = vmatpush1.bf16.msra.mxu0 %v706_v2  ;;  %v712_v7 = vld [vmem:[%s810_s28 + $0x20] ss:$8 sps:$4 sm:$0xff]   ;;  %v713_v8 = vld [vmem:[%s810_s28 + $0x34] ss:$8 sps:$4 sm:$0xff]   ;;  %v715_v9 = vld [vmem:[%s810_s28 + $0x30] ss:$8 sps:$4 sm:$0xff]  }
  0x19   : > { %426 = vmatprep.subr.bf16.mxu0 %v707_v4  ;;  %v716_v10 = vld [vmem:[%s810_s28 + $0x44] ss:$8 sps:$4 sm:$0xff]   ;;  %v718_v11 = vld [vmem:[%s810_s28 + $0x40] ss:$8 sps:$4 sm:$0xff]   ;;  %v719_v12 = vld [vmem:[%s810_s28 + $0x54] ss:$8 sps:$4 sm:$0xff]  }
  0x1a   : > { %v721_v13 = vld [vmem:[%s810_s28 + $0x50] ss:$8 sps:$4 sm:$0xff]   ;;  %v722_v14 = vld [vmem:[%s810_s28 + $0x64] ss:$8 sps:$4 sm:$0xff]   ;;  %v724_v15 = vld [vmem:[%s810_s28 + $0x60] ss:$8 sps:$4 sm:$0xff]  }
  0x1b   : > { %v725_v16 = vld [vmem:[%s810_s28 + $0x74] ss:$8 sps:$4 sm:$0xff]   ;;  %v727_v17 = vld [vmem:[%s810_s28 + $0x70] ss:$8 sps:$4 sm:$0xff]   ;;  %v327_v18 = vld [vmem:[%s805_s24] sm:$0xf] }
  0x1c   : > { %427 = vmatpush1.bf16.msra.mxu0 %v709_v5  ;;  %v325_v19 = vld [vmem:[#allocation2] sm:$0xff]  ;;  %v326_v20 = vld [vmem:[#allocation2 + $0x8] sm:$0xff]  ;;  %v478_v28 = vshrl.u32 (!%p670_p7), %v477_v27, 7 }
  0x1d   : > { %428 = vmatprep.subr.bf16.mxu0 %v710_v6  ;;  %v475_v29 = vld [vmem:[%s851_s2] sm:$0x3] (!%p670_p7) }
  0x1e   : > { %v489_v30 = vld [vmem:[%s852_s3] sm:$0x3] (!%p670_p7)  ;;  %v479_v31 = vsub.s32 (!%p670_p7), 0, %v478_v28  ;;  %v483_v32 = vsub.s32 (!%p670_p7), 1, %v478_v28 }
  0x20   : > { %429 = vmatpush1.bf16.msra.mxu0 %v712_v7  ;;  %v480_v35 = vrot.slane (!%p670_p7), %v475_v29, %v479_v31  ;;  %v484_v36 = vrot.slane (!%p670_p7), %v475_v29, %v483_v32  ;;  %v494_v37 = vrot.slane (!%p670_p7), %v489_v30, %v479_v31  ;;  %v498_v38 = vrot.slane (!%p670_p7), %v489_v30, %v483_v32 }
  0x21   : > { %430 = vmatprep.subr.bf16.mxu0 %v713_v8 }
  0x24   : > { %431 = vmatpush1.bf16.msra.mxu0 %v715_v9 }
  0x25   : > { %432 = vmatprep.subr.bf16.mxu0 %v716_v10 }
  0x28   : > { %433 = vmatpush1.bf16.msra.mxu0 %v718_v11 }
  0x29   : > { %434 = vmatprep.subr.bf16.mxu0 %v719_v12 }
  0x2c   : > { %435 = vmatpush1.bf16.msra.mxu0 %v721_v13 }
  0x2d   : > { %436 = vmatprep.subr.bf16.mxu0 %v722_v14 }
  0x30   : > { %437 = vmatpush1.bf16.msra.mxu0 %v724_v15 }
  0x31   : > { %438 = vmatprep.subr.bf16.mxu0 %v725_v16 }
  0x34   : > { %439 = vmatpush1.bf16.msra.mxu0 %v727_v17 }
  0x37   : > { %457 = vmatmul.mubr.bf16.vlgmr.msra.gmra.mrb[0].mxu0 %v327_v18 }
 0x108   : > { %472 = sbr.rel (%p670_p7) target bundleno = 287 (0x11f), region = 44 }
 0x10a   : > { %v458_v21 = vpop.f32.mrb[0].mxu0 }
 0x10b   : > { %v465_v22 = vadd.f32 %v458_v21, %v325_v19  ;;  %v460_v23 = vpop.f32.mrb[1].mxu0 }
 0x10c   : > { %v466_v24 = vadd.f32 %v460_v23, %v326_v20  ;;  %v462_v25 = vpop.f32.mrb[2].mxu0 }
 0x10d   : > { %467 = vst [vmem:[#allocation2] sm:$0xff] %v465_v22  ;;  %v463_v26 = vpop.f32.mrb[3].mxu0 }
 0x10e   : > { %468 = vst [vmem:[#allocation2 + $0x8] sm:$0xff] %v466_v24 }
 0x114   : > { %v473_v33 = vld [vmem:[#allocation2] sm:$0xff] }
 0x115   : > { %v474_v34 = vld [vmem:[#allocation2 + $0x8] sm:$0xff]  ;;  %v487_v39 = vmul.f32 %v480_v35, %v473_v33 }
 0x116   : > { %v488_v40 = vmul.f32 %v484_v36, %v474_v34 }
 0x117   : > { %v501_v41 = vadd.f32 %v494_v37, %v487_v39 }
 0x118   : > { %v502_v42 = vadd.f32 %v498_v38, %v488_v40 }
 0x119   : > { %v503_v43 = vmax.f32 %v501_v41, 0.0 }
 0x11a   : > { %v504_v44 = vmax.f32 %v502_v42, 0.0 }
 0x11c   : > { %v677_v45 = vpack.c.bf16 %v504_v44, %v503_v43 }
 0x11e   : > { %513 = vst [vmem:[%s853_s4] sm:$0xff] %v677_v45 }
 0x11f PF: > { %s14_s17 = sadd.s32 1, %s750_s17   ;;  %s854_s15 = smov %s746_s16 }
 0x120   : > { %p11_p8 = scmp.ge.s32.totalorder %s14_s17, 11   ;;  %s855_s16 = smov %s857_s18 }
 0x122   :  { %13 = sbr.rel (!%p11_p8) target bundleno = 2 (0x2), region = 83 }

// kernel: _lambda_.34
= control target key start
LH: loop header
LB: loop body
LE: loop exit
PB: predicated region body
PF: predicated region fallthrough
CT: control target
= control target key end

     0   :  { %v257_v1 = vmov 0   ;;  %v175_v18 = vlaneseq  ;;  %s343_s1 = inlined_call_operand.vmem [shape: bf16[128,256], index: 1, kind: input, shape index: {}]   ;;  %s344_s0 = inlined_call_operand.vmem [shape: bf16[8,128], index: 0, kind: input, shape index: {}]   ;;  %s345_s2 = inlined_call_operand.vmem [shape: f32[1,256], index: 2, kind: input, shape index: {}]   ;;  %s346_s3 = inlined_call_operand.vmem [shape: f32[1,256], index: 3, kind: input, shape index: {}]   ;;  %s347_s4 = inlined_call_operand.vmem [shape: bf16[8,256], index: 4, kind: output, shape index: {}]  }
   0x1   :  { %v233_v0 = vld [vmem:[%s343_s1 + $0x4] ss:$8 sps:$4 sm:$0xff]   ;;  %155 = vmatprep.mubr.bf16.mxu0 %v257_v1  ;;  %v235_v2 = vld [vmem:[%s343_s1] ss:$8 sps:$4 sm:$0xff]   ;;  %v236_v3 = vld [vmem:[%s343_s1 + $0x14] ss:$8 sps:$4 sm:$0xff]  }
   0x2   :  { %123 = vmatprep.subr.bf16.mxu0 %v233_v0  ;;  %v238_v4 = vld [vmem:[%s343_s1 + $0x10] ss:$8 sps:$4 sm:$0xff]   ;;  %v239_v5 = vld [vmem:[%s343_s1 + $0x24] ss:$8 sps:$4 sm:$0xff]   ;;  %v241_v6 = vld [vmem:[%s343_s1 + $0x20] ss:$8 sps:$4 sm:$0xff]  }
   0x3   :  { %124 = vmatpush1.bf16.msra.mxu0 %v235_v2  ;;  %v242_v7 = vld [vmem:[%s343_s1 + $0x34] ss:$8 sps:$4 sm:$0xff]   ;;  %v244_v8 = vld [vmem:[%s343_s1 + $0x30] ss:$8 sps:$4 sm:$0xff]   ;;  %v245_v9 = vld [vmem:[%s343_s1 + $0x44] ss:$8 sps:$4 sm:$0xff]  }
   0x4   :  { %125 = vmatprep.subr.bf16.mxu0 %v236_v3  ;;  %v247_v10 = vld [vmem:[%s343_s1 + $0x40] ss:$8 sps:$4 sm:$0xff]   ;;  %v248_v11 = vld [vmem:[%s343_s1 + $0x54] ss:$8 sps:$4 sm:$0xff]   ;;  %v250_v12 = vld [vmem:[%s343_s1 + $0x50] ss:$8 sps:$4 sm:$0xff]  }
   0x5   :  { %v251_v13 = vld [vmem:[%s343_s1 + $0x64] ss:$8 sps:$4 sm:$0xff]   ;;  %v253_v14 = vld [vmem:[%s343_s1 + $0x60] ss:$8 sps:$4 sm:$0xff]   ;;  %v254_v15 = vld [vmem:[%s343_s1 + $0x74] ss:$8 sps:$4 sm:$0xff]  }
   0x6   :  { %v256_v16 = vld [vmem:[%s343_s1 + $0x70] ss:$8 sps:$4 sm:$0xff]   ;;  %v26_v17 = vld [vmem:[%s344_s0] sm:$0xf]  ;;  %v176_v19 = vshrl.u32 %v175_v18, 7 }
   0x7   :  { %126 = vmatpush1.bf16.msra.mxu0 %v238_v4  ;;  %v173_v21 = vld [vmem:[%s345_s2] sm:$0x3] }
   0x8   :  { %127 = vmatprep.subr.bf16.mxu0 %v239_v5  ;;  %v177_v20 = vsub.s32 0, %v176_v19  ;;  %v181_v22 = vsub.s32 1, %v176_v19  ;;  %v187_v23 = vld [vmem:[%s346_s3] sm:$0x3] }
   0xa   :  { %v178_v24 = vrot.slane %v173_v21, %v177_v20  ;;  %v182_v25 = vrot.slane %v173_v21, %v181_v22  ;;  %v192_v26 = vrot.slane %v187_v23, %v177_v20  ;;  %v196_v28 = vrot.slane %v187_v23, %v181_v22 }
   0xb   :  { %128 = vmatpush1.bf16.msra.mxu0 %v241_v6 }
   0xc   :  { %129 = vmatprep.subr.bf16.mxu0 %v242_v7 }
   0xf   :  { %130 = vmatpush1.bf16.msra.mxu0 %v244_v8 }
  0x10   :  { %131 = vmatprep.subr.bf16.mxu0 %v245_v9 }
  0x13   :  { %132 = vmatpush1.bf16.msra.mxu0 %v247_v10 }
  0x14   :  { %133 = vmatprep.subr.bf16.mxu0 %v248_v11 }
  0x17   :  { %134 = vmatpush1.bf16.msra.mxu0 %v250_v12 }
  0x18   :  { %135 = vmatprep.subr.bf16.mxu0 %v251_v13 }
  0x1b   :  { %136 = vmatpush1.bf16.msra.mxu0 %v253_v14 }
  0x1c   :  { %137 = vmatprep.subr.bf16.mxu0 %v254_v15 }
  0x1f   :  { %138 = vmatpush1.bf16.msra.mxu0 %v256_v16 }
  0x22   :  { %156 = vmatmul.mubr.bf16.vlgmr.msra.gmra.mrb[0].mxu0 %v26_v17 }
  0xf5   :  { %v157_v27 = vpop.f32.mrb[0].mxu0 }
  0xf6   :  { %v185_v29 = vmul.f32 %v178_v24, %v157_v27  ;;  %v159_v30 = vpop.f32.mrb[1].mxu0 }
  0xf7   :  { %v186_v31 = vmul.f32 %v182_v25, %v159_v30  ;;  %v161_v32 = vpop.f32.mrb[2].mxu0 }
  0xf8   :  { %v199_v33 = vadd.f32 %v192_v26, %v185_v29  ;;  %v162_v34 = vpop.f32.mrb[3].mxu0 }
  0xf9   :  { %v200_v35 = vadd.f32 %v196_v28, %v186_v31 }
  0xfb   :  { %v231_v36 = vpack.c.bf16 %v200_v35, %v199_v33 }
  0xfd   :  { %209 = vst [vmem:[%s347_s4] sm:$0xff] %v231_v36 }

// kernel: _lambda_.35
= control target key start
LH: loop header
LB: loop body
LE: loop exit
PB: predicated region body
PF: predicated region fallthrough
CT: control target
= control target key end

     0   :  { %s1023_s18 = smov 0   ;;  %s1025_s19 = smov 0   ;;  %s1114_s0 = inlined_call_operand.vmem [shape: bf16[8,2304], index: 0, kind: input, shape index: {}]   ;;  %s1115_s1 = inlined_call_operand.vmem [shape: bf16[2304,256], index: 1, kind: input, shape index: {}]   ;;  %s1116_s2 = inlined_call_operand.vmem [shape: f32[1,256], index: 2, kind: input, shape index: {}]   ;;  %s1117_s3 = inlined_call_operand.vmem [shape: f32[1,256], index: 3, kind: input, shape index: {}]   ;;  %s1118_s4 = inlined_call_operand.vmem [shape: f32[8,256], index: 4, kind: input, shape index: {}]   ;;  %s1119_s5 = inlined_call_operand.vmem [shape: bf16[8,256], index: 5, kind: output, shape index: {}]  }
   0x1   :  { %s1027_s20 = smov 0  }
   0x2 LB: > { %s27_s21 = sadd.s32 1, %s986_s19  ;;  %p844_p0 = scmp.ge.s32.totalorder %s990_s20, 1  ;;  %s990_s20 = sphi %s1027_s20, %s15_s20   ;;  %s986_s19 = sphi %s1025_s19, %s1121_s19   ;;  %s982_s18 = sphi %s1023_s18, %s1120_s18  }
   0x3   : > { %p28_p1 = scmp.ge.s32.totalorder %s27_s21, 9  ;;  %p271_p2 = scmp.lt.s32.totalorder %s990_s20, 10 }
   0x5   : > { %s1123_s21 = smov (%p28_p1, %s27_s21), 0  ;;  %p272_p3 = pnand %p844_p0, %p271_p2 }
   0x6   : > { %s845_s22 = sshll.u32 (!%p272_p3), %s982_s18, 1  ;;  %s847_s23 = sshll.u32 (!%p272_p3), %s982_s18, 5 }
   0x7   : > { %275 = sbr.rel (%p272_p3) target bundleno = 323 (0x143), region = 40  ;;  %p337_p4 = scmp.lt.s32.totalorder (!%p272_p3), %s845_s22, 17 }
   0x8   : > { %p346_p5 = scmp.lt.s32.totalorder (!%p272_p3), %s847_s23, 287  ;;  %p850_p6 = scmp.ne.s32.totalorder (!%p272_p3), %s982_s18, 0 }
   0xe   : > { %s1125_s22 = smov (!%p337_p4, %s845_s22), 17  ;;  %s1127_s23 = smov (!%p346_p5, %s847_s23), 287 }
   0xf   : > { %s846_s24 = sshll.u32 %s1125_s22, 2  ;;  %s891_s28 = sshll.u32 %s1127_s23, 3  ;;  %v992_v0 = vmov (!%p850_p6), 0.0  }
  0x10   : > { %s1048_s27 = scalar_lea.vmem %s1114_s0, %s846_s24  ;;  %s1053_s6 = scalar_lea.vmem %s1115_s1, %s891_s28  ;;  %390 = vst [vmem:[#allocation2] sm:$0xff] (!%p850_p6), %v992_v0  ;;  %391 = vst [vmem:[#allocation2 + $0x8] sm:$0xff] (!%p850_p6), %v992_v0 }
  0x11   : > { %389 = sbr.rel (%p850_p6) target bundleno = 24 (0x18), region = 44 }
  0x18 PF: > { %v918_v1 = vld [vmem:[%s1053_s6 + $0x4] ss:$8 sps:$4 sm:$0xff]   ;;  %v920_v2 = vld [vmem:[%s1053_s6] ss:$8 sps:$4 sm:$0xff]   ;;  %v921_v3 = vld [vmem:[%s1053_s6 + $0x14] ss:$8 sps:$4 sm:$0xff]  }
  0x19   : > { %594 = vmatprep.subr.bf16.mxu0 %v918_v1  ;;  %v923_v4 = vld [vmem:[%s1053_s6 + $0x10] ss:$8 sps:$4 sm:$0xff]   ;;  %v924_v5 = vld [vmem:[%s1053_s6 + $0x24] ss:$8 sps:$4 sm:$0xff]   ;;  %v926_v6 = vld [vmem:[%s1053_s6 + $0x20] ss:$8 sps:$4 sm:$0xff]  }
  0x1a   : > { %595 = vmatpush1.bf16.msra.mxu0 %v920_v2  ;;  %v927_v7 = vld [vmem:[%s1053_s6 + $0x34] ss:$8 sps:$4 sm:$0xff]   ;;  %v929_v8 = vld [vmem:[%s1053_s6 + $0x30] ss:$8 sps:$4 sm:$0xff]   ;;  %v930_v9 = vld [vmem:[%s1053_s6 + $0x44] ss:$8 sps:$4 sm:$0xff]  }
  0x1b   : > { %596 = vmatprep.subr.bf16.mxu0 %v921_v3  ;;  %v932_v10 = vld [vmem:[%s1053_s6 + $0x40] ss:$8 sps:$4 sm:$0xff]   ;;  %v933_v11 = vld [vmem:[%s1053_s6 + $0x54] ss:$8 sps:$4 sm:$0xff]   ;;  %v935_v12 = vld [vmem:[%s1053_s6 + $0x50] ss:$8 sps:$4 sm:$0xff]  }
  0x1c   : > { %v936_v13 = vld [vmem:[%s1053_s6 + $0x64] ss:$8 sps:$4 sm:$0xff]   ;;  %v938_v16 = vld [vmem:[%s1053_s6 + $0x60] ss:$8 sps:$4 sm:$0xff]   ;;  %v939_v17 = vld [vmem:[%s1053_s6 + $0x74] ss:$8 sps:$4 sm:$0xff]  }
  0x1d   : > { %v394_v14 = vld [vmem:[%s1048_s27] sm:$0xff]  ;;  %v941_v18 = vld [vmem:[%s1053_s6 + $0x70] ss:$8 sps:$4 sm:$0xff]   ;;  %v945_v21 = vld [vmem:[%s1053_s6 + $0x94] ss:$8 sps:$4 sm:$0xff]   ;;  %p885_p7 = scmp.ne.s32.totalorder %s982_s18, 8 }
  0x1e   : > { %597 = vmatpush1.bf16.msra.mxu0 %v923_v4  ;;  %v852_v15 = vcombine.high %v394_v14, %v394_v14  ;;  %v942_v19 = vld [vmem:[%s1053_s6 + $0x84] ss:$8 sps:$4 sm:$0xff]   ;;  %v944_v20 = vld [vmem:[%s1053_s6 + $0x80] ss:$8 sps:$4 sm:$0xff]   ;;  %v947_v22 = vld [vmem:[%s1053_s6 + $0x90] ss:$8 sps:$4 sm:$0xff]   ;;  %v851_v35 = vcombine.low %v394_v14, %v394_v14  ;;  %v647_v44 = vlaneseq (!%p885_p7) }
  0x1f   : > { %598 = vmatprep.subr.bf16.mxu0 %v924_v5  ;;  %v948_v23 = vld [vmem:[%s1053_s6 + $0xa4] ss:$8 sps:$4 sm:$0xff]   ;;  %v950_v24 = vld [vmem:[%s1053_s6 + $0xa0] ss:$8 sps:$4 sm:$0xff]   ;;  %v951_v25 = vld [vmem:[%s1053_s6 + $0xb4] ss:$8 sps:$4 sm:$0xff]  }
  0x20   : > { %626 = vmatprep.mubr.bf16.mxu0 %v852_v15  ;;  %v953_v26 = vld [vmem:[%s1053_s6 + $0xb0] ss:$8 sps:$4 sm:$0xff]   ;;  %v954_v27 = vld [vmem:[%s1053_s6 + $0xc4] ss:$8 sps:$4 sm:$0xff]   ;;  %v956_v28 = vld [vmem:[%s1053_s6 + $0xc0] ss:$8 sps:$4 sm:$0xff]  }
  0x21   : > { %v957_v29 = vld [vmem:[%s1053_s6 + $0xd4] ss:$8 sps:$4 sm:$0xff]   ;;  %v959_v30 = vld [vmem:[%s1053_s6 + $0xd0] ss:$8 sps:$4 sm:$0xff]   ;;  %v960_v31 = vld [vmem:[%s1053_s6 + $0xe4] ss:$8 sps:$4 sm:$0xff]  }
  0x22   : > { %599 = vmatpush1.bf16.msra.mxu0 %v926_v6  ;;  %v962_v32 = vld [vmem:[%s1053_s6 + $0xe0] ss:$8 sps:$4 sm:$0xff]   ;;  %v963_v33 = vld [vmem:[%s1053_s6 + $0xf4] ss:$8 sps:$4 sm:$0xff]   ;;  %v965_v34 = vld [vmem:[%s1053_s6 + $0xf0] ss:$8 sps:$4 sm:$0xff]  }
  0x23   : > { %600 = vmatprep.subr.bf16.mxu0 %v927_v7  ;;  %v392_v36 = vld [vmem:[#allocation2] sm:$0xff]  ;;  %v393_v37 = vld [vmem:[#allocation2 + $0x8] sm:$0xff]  ;;  %v648_v45 = vshrl.u32 (!%p885_p7), %v647_v44, 7 }
  0x24   : > { %v645_v46 = vld [vmem:[%s1116_s2] sm:$0x3] (!%p885_p7)  ;;  %v674_v59 = vld [vmem:[%s1118_s4 + $0x8] sm:$0xff] (!%p885_p7) }
  0x25   : > { %v659_v47 = vld [vmem:[%s1117_s3] sm:$0x3] (!%p885_p7)  ;;  %v649_v48 = vsub.s32 (!%p885_p7), 0, %v648_v45  ;;  %v653_v49 = vsub.s32 (!%p885_p7), 1, %v648_v45 }
  0x26   : > { %601 = vmatpush1.bf16.msra.mxu0 %v929_v8  ;;  %v673_v58 = vld [vmem:[%s1118_s4] sm:$0xff] (!%p885_p7) }
  0x27   : > { %602 = vmatprep.subr.bf16.mxu0 %v930_v9  ;;  %v650_v52 = vrot.slane (!%p885_p7), %v645_v46, %v649_v48  ;;  %v654_v53 = vrot.slane (!%p885_p7), %v645_v46, %v653_v49  ;;  %v664_v54 = vrot.slane (!%p885_p7), %v659_v47, %v649_v48  ;;  %v668_v55 = vrot.slane (!%p885_p7), %v659_v47, %v653_v49 }
  0x2a   : > { %603 = vmatpush1.bf16.msra.mxu0 %v932_v10 }
  0x2b   : > { %604 = vmatprep.subr.bf16.mxu0 %v933_v11 }
  0x2e   : > { %605 = vmatpush1.bf16.msra.mxu0 %v935_v12 }
  0x2f   : > { %606 = vmatprep.subr.bf16.mxu0 %v936_v13 }
  0x32   : > { %607 = vmatpush1.bf16.msra.mxu0 %v938_v16 }
  0x33   : > { %608 = vmatprep.subr.bf16.mxu0 %v939_v17 }
  0x36   : > { %609 = vmatpush1.bf16.msra.mxu0 %v941_v18 }
  0x37   : > { %610 = vmatprep.subr.bf16.mxu0 %v942_v19 }
  0x3a   : > { %611 = vmatpush1.bf16.msra.mxu0 %v944_v20 }
  0x3b   : > { %612 = vmatprep.subr.bf16.mxu0 %v945_v21 }
  0x3e   : > { %613 = vmatpush1.bf16.msra.mxu0 %v947_v22 }
  0x3f   : > { %614 = vmatprep.subr.bf16.mxu0 %v948_v23 }
  0x42   : > { %615 = vmatpush1.bf16.msra.mxu0 %v950_v24 }
  0x43   : > { %616 = vmatprep.subr.bf16.mxu0 %v951_v25 }
  0x46   : > { %617 = vmatpush1.bf16.msra.mxu0 %v953_v26 }
  0x47   : > { %618 = vmatprep.subr.bf16.mxu0 %v954_v27 }
  0x4a   : > { %619 = vmatpush1.bf16.msra.mxu0 %v956_v28 }
  0x4b   : > { %620 = vmatprep.subr.bf16.mxu0 %v957_v29 }
  0x4e   : > { %621 = vmatpush1.bf16.msra.mxu0 %v959_v30 }
  0x4f   : > { %622 = vmatprep.subr.bf16.mxu0 %v960_v31 }
  0x52   : > { %623 = vmatpush1.bf16.msra.mxu0 %v962_v32 }
  0x53   : > { %624 = vmatprep.subr.bf16.mxu0 %v963_v33 }
  0x56   : > { %625 = vmatpush1.bf16.msra.mxu0 %v965_v34 }
  0x59   : > { %627 = vmatmul.mubr.bf16.vlgmr.msra.gmra.mrb[0].mxu0 %v851_v35 }
 0x12a   : > { %642 = sbr.rel (%p885_p7) target bundleno = 323 (0x143), region = 48 }
 0x12c   : > { %v628_v38 = vpop.f32.mrb[0].mxu0 }
 0x12d   : > { %v635_v39 = vadd.f32 %v628_v38, %v392_v36  ;;  %v630_v40 = vpop.f32.mrb[1].mxu0 }
 0x12e   : > { %v636_v41 = vadd.f32 %v630_v40, %v393_v37  ;;  %v632_v42 = vpop.f32.mrb[2].mxu0 }
 0x12f   : > { %637 = vst [vmem:[#allocation2] sm:$0xff] %v635_v39  ;;  %v633_v43 = vpop.f32.mrb[3].mxu0 }
 0x130   : > { %638 = vst [vmem:[#allocation2 + $0x8] sm:$0xff] %v636_v41 }
 0x136   : > { %v643_v50 = vld [vmem:[#allocation2] sm:$0xff] }
 0x137   : > { %v644_v51 = vld [vmem:[#allocation2 + $0x8] sm:$0xff]  ;;  %v657_v56 = vmul.f32 %v650_v52, %v643_v50 }
 0x138   : > { %v658_v57 = vmul.f32 %v654_v53, %v644_v51 }
 0x139   : > { %v671_v60 = vadd.f32 %v664_v54, %v657_v56 }
 0x13a   : > { %v672_v61 = vadd.f32 %v668_v55, %v658_v57 }
 0x13b   : > { %v675_v62 = vadd.f32 %v673_v58, %v671_v60 }
 0x13c   : > { %v676_v63 = vadd.f32 %v674_v59, %v672_v61 }
 0x13d   : > { %v677_v0 = vmax.f32 %v675_v62, 0.0 }
 0x13e   : > { %v678_v1 = vmax.f32 %v676_v63, 0.0 }
 0x140   : > { %v892_v2 = vpack.c.bf16 %v678_v1, %v677_v0 }
 0x142   : > { %687 = vst [vmem:[%s1119_s5] sm:$0xff] %v892_v2 }
 0x143 PF: > { %s15_s20 = sadd.s32 1, %s990_s20   ;;  %s1120_s18 = smov %s986_s19 }
 0x144   : > { %p12_p8 = scmp.ge.s32.totalorder %s15_s20, 11   ;;  %s1121_s19 = smov %s1123_s21 }
 0x146   :  { %14 = sbr.rel (!%p12_p8) target bundleno = 2 (0x2), region = 90 }

// kernel: _lambda_.36
= control target key start
LH: loop header
LB: loop body
LE: loop exit
PB: predicated region body
PF: predicated region fallthrough
CT: control target
= control target key end

     0   :  { %s929_s15 = smov 0   ;;  %s931_s16 = smov 0   ;;  %s1014_s0 = inlined_call_operand.vmem [shape: bf16[8,2304], index: 0, kind: input, shape index: {}]   ;;  %s1015_s1 = inlined_call_operand.vmem [shape: bf16[2304,256], index: 1, kind: input, shape index: {}]   ;;  %s1016_s2 = inlined_call_operand.vmem [shape: f32[1,256], index: 2, kind: input, shape index: {}]   ;;  %s1017_s3 = inlined_call_operand.vmem [shape: f32[1,256], index: 3, kind: input, shape index: {}]   ;;  %s1018_s4 = inlined_call_operand.vmem [shape: bf16[8,256], index: 4, kind: output, shape index: {}]  }
   0x1   :  { %s933_s17 = smov 0  }
   0x2 LB: > { %s26_s18 = sadd.s32 1, %s897_s16  ;;  %p755_p0 = scmp.ge.s32.totalorder %s901_s17, 1  ;;  %s901_s17 = sphi %s933_s17, %s14_s17   ;;  %s897_s16 = sphi %s931_s16, %s1020_s16   ;;  %s893_s15 = sphi %s929_s15, %s1019_s15  }
   0x3   : > { %p27_p1 = scmp.ge.s32.totalorder %s26_s18, 9  ;;  %p229_p2 = scmp.lt.s32.totalorder %s901_s17, 10 }
   0x5   : > { %s1022_s18 = smov (%p27_p1, %s26_s18), 0  ;;  %p230_p3 = pnand %p755_p0, %p229_p2 }
   0x6   : > { %s756_s19 = sshll.u32 (!%p230_p3), %s893_s15, 1  ;;  %s758_s20 = sshll.u32 (!%p230_p3), %s893_s15, 5 }
   0x7   : > { %233 = sbr.rel (%p230_p3) target bundleno = 321 (0x141), region = 36  ;;  %p284_p4 = scmp.lt.s32.totalorder (!%p230_p3), %s756_s19, 17 }
   0x8   : > { %p293_p5 = scmp.lt.s32.totalorder (!%p230_p3), %s758_s20, 287  ;;  %p761_p6 = scmp.ne.s32.totalorder (!%p230_p3), %s893_s15, 0 }
   0xe   : > { %s1024_s19 = smov (!%p284_p4, %s756_s19), 17  ;;  %s1026_s20 = smov (!%p293_p5, %s758_s20), 287 }
   0xf   : > { %s757_s21 = sshll.u32 %s1024_s19, 2  ;;  %s802_s25 = sshll.u32 %s1026_s20, 3  ;;  %v903_v0 = vmov (!%p761_p6), 0.0  }
  0x10   : > { %s954_s24 = scalar_lea.vmem %s1014_s0, %s757_s21  ;;  %s959_s28 = scalar_lea.vmem %s1015_s1, %s802_s25  ;;  %327 = vst [vmem:[#allocation2] sm:$0xff] (!%p761_p6), %v903_v0  ;;  %328 = vst [vmem:[#allocation2 + $0x8] sm:$0xff] (!%p761_p6), %v903_v0 }
  0x11   : > { %326 = sbr.rel (%p761_p6) target bundleno = 24 (0x18), region = 40 }
  0x18 PF: > { %v829_v1 = vld [vmem:[%s959_s28 + $0x4] ss:$8 sps:$4 sm:$0xff]   ;;  %v831_v2 = vld [vmem:[%s959_s28] ss:$8 sps:$4 sm:$0xff]   ;;  %v832_v3 = vld [vmem:[%s959_s28 + $0x14] ss:$8 sps:$4 sm:$0xff]  }
  0x19   : > { %531 = vmatprep.subr.bf16.mxu0 %v829_v1  ;;  %v834_v4 = vld [vmem:[%s959_s28 + $0x10] ss:$8 sps:$4 sm:$0xff]   ;;  %v835_v5 = vld [vmem:[%s959_s28 + $0x24] ss:$8 sps:$4 sm:$0xff]   ;;  %v837_v6 = vld [vmem:[%s959_s28 + $0x20] ss:$8 sps:$4 sm:$0xff]  }
  0x1a   : > { %532 = vmatpush1.bf16.msra.mxu0 %v831_v2  ;;  %v838_v7 = vld [vmem:[%s959_s28 + $0x34] ss:$8 sps:$4 sm:$0xff]   ;;  %v840_v8 = vld [vmem:[%s959_s28 + $0x30] ss:$8 sps:$4 sm:$0xff]   ;;  %v841_v9 = vld [vmem:[%s959_s28 + $0x44] ss:$8 sps:$4 sm:$0xff]  }
  0x1b   : > { %533 = vmatprep.subr.bf16.mxu0 %v832_v3  ;;  %v843_v10 = vld [vmem:[%s959_s28 + $0x40] ss:$8 sps:$4 sm:$0xff]   ;;  %v844_v11 = vld [vmem:[%s959_s28 + $0x54] ss:$8 sps:$4 sm:$0xff]   ;;  %v846_v12 = vld [vmem:[%s959_s28 + $0x50] ss:$8 sps:$4 sm:$0xff]  }
  0x1c   : > { %v847_v13 = vld [vmem:[%s959_s28 + $0x64] ss:$8 sps:$4 sm:$0xff]   ;;  %v849_v16 = vld [vmem:[%s959_s28 + $0x60] ss:$8 sps:$4 sm:$0xff]   ;;  %v850_v17 = vld [vmem:[%s959_s28 + $0x74] ss:$8 sps:$4 sm:$0xff]  }
  0x1d   : > { %v331_v14 = vld [vmem:[%s954_s24] sm:$0xff]  ;;  %v852_v18 = vld [vmem:[%s959_s28 + $0x70] ss:$8 sps:$4 sm:$0xff]   ;;  %v856_v21 = vld [vmem:[%s959_s28 + $0x94] ss:$8 sps:$4 sm:$0xff]   ;;  %p796_p7 = scmp.ne.s32.totalorder %s893_s15, 8 }
  0x1e   : > { %534 = vmatpush1.bf16.msra.mxu0 %v834_v4  ;;  %v763_v15 = vcombine.high %v331_v14, %v331_v14  ;;  %v853_v19 = vld [vmem:[%s959_s28 + $0x84] ss:$8 sps:$4 sm:$0xff]   ;;  %v855_v20 = vld [vmem:[%s959_s28 + $0x80] ss:$8 sps:$4 sm:$0xff]   ;;  %v858_v22 = vld [vmem:[%s959_s28 + $0x90] ss:$8 sps:$4 sm:$0xff]   ;;  %v762_v35 = vcombine.low %v331_v14, %v331_v14  ;;  %v584_v44 = vlaneseq (!%p796_p7) }
  0x1f   : > { %535 = vmatprep.subr.bf16.mxu0 %v835_v5  ;;  %v859_v23 = vld [vmem:[%s959_s28 + $0xa4] ss:$8 sps:$4 sm:$0xff]   ;;  %v861_v24 = vld [vmem:[%s959_s28 + $0xa0] ss:$8 sps:$4 sm:$0xff]   ;;  %v862_v25 = vld [vmem:[%s959_s28 + $0xb4] ss:$8 sps:$4 sm:$0xff]  }
  0x20   : > { %563 = vmatprep.mubr.bf16.mxu0 %v763_v15  ;;  %v864_v26 = vld [vmem:[%s959_s28 + $0xb0] ss:$8 sps:$4 sm:$0xff]   ;;  %v865_v27 = vld [vmem:[%s959_s28 + $0xc4] ss:$8 sps:$4 sm:$0xff]   ;;  %v867_v28 = vld [vmem:[%s959_s28 + $0xc0] ss:$8 sps:$4 sm:$0xff]  }
  0x21   : > { %v868_v29 = vld [vmem:[%s959_s28 + $0xd4] ss:$8 sps:$4 sm:$0xff]   ;;  %v870_v30 = vld [vmem:[%s959_s28 + $0xd0] ss:$8 sps:$4 sm:$0xff]   ;;  %v871_v31 = vld [vmem:[%s959_s28 + $0xe4] ss:$8 sps:$4 sm:$0xff]  }
  0x22   : > { %536 = vmatpush1.bf16.msra.mxu0 %v837_v6  ;;  %v873_v32 = vld [vmem:[%s959_s28 + $0xe0] ss:$8 sps:$4 sm:$0xff]   ;;  %v874_v33 = vld [vmem:[%s959_s28 + $0xf4] ss:$8 sps:$4 sm:$0xff]   ;;  %v876_v34 = vld [vmem:[%s959_s28 + $0xf0] ss:$8 sps:$4 sm:$0xff]  }
  0x23   : > { %537 = vmatprep.subr.bf16.mxu0 %v838_v7  ;;  %v329_v36 = vld [vmem:[#allocation2] sm:$0xff]  ;;  %v330_v37 = vld [vmem:[#allocation2 + $0x8] sm:$0xff]  ;;  %v585_v45 = vshrl.u32 (!%p796_p7), %v584_v44, 7 }
  0x24   : > { %v582_v46 = vld [vmem:[%s1016_s2] sm:$0x3] (!%p796_p7) }
  0x25   : > { %v596_v47 = vld [vmem:[%s1017_s3] sm:$0x3] (!%p796_p7)  ;;  %v586_v48 = vsub.s32 (!%p796_p7), 0, %v585_v45  ;;  %v590_v49 = vsub.s32 (!%p796_p7), 1, %v585_v45 }
  0x26   : > { %538 = vmatpush1.bf16.msra.mxu0 %v840_v8 }
  0x27   : > { %539 = vmatprep.subr.bf16.mxu0 %v841_v9  ;;  %v587_v52 = vrot.slane (!%p796_p7), %v582_v46, %v586_v48  ;;  %v591_v53 = vrot.slane (!%p796_p7), %v582_v46, %v590_v49  ;;  %v601_v54 = vrot.slane (!%p796_p7), %v596_v47, %v586_v48  ;;  %v605_v55 = vrot.slane (!%p796_p7), %v596_v47, %v590_v49 }
  0x2a   : > { %540 = vmatpush1.bf16.msra.mxu0 %v843_v10 }
  0x2b   : > { %541 = vmatprep.subr.bf16.mxu0 %v844_v11 }
  0x2e   : > { %542 = vmatpush1.bf16.msra.mxu0 %v846_v12 }
  0x2f   : > { %543 = vmatprep.subr.bf16.mxu0 %v847_v13 }
  0x32   : > { %544 = vmatpush1.bf16.msra.mxu0 %v849_v16 }
  0x33   : > { %545 = vmatprep.subr.bf16.mxu0 %v850_v17 }
  0x36   : > { %546 = vmatpush1.bf16.msra.mxu0 %v852_v18 }
  0x37   : > { %547 = vmatprep.subr.bf16.mxu0 %v853_v19 }
  0x3a   : > { %548 = vmatpush1.bf16.msra.mxu0 %v855_v20 }
  0x3b   : > { %549 = vmatprep.subr.bf16.mxu0 %v856_v21 }
  0x3e   : > { %550 = vmatpush1.bf16.msra.mxu0 %v858_v22 }
  0x3f   : > { %551 = vmatprep.subr.bf16.mxu0 %v859_v23 }
  0x42   : > { %552 = vmatpush1.bf16.msra.mxu0 %v861_v24 }
  0x43   : > { %553 = vmatprep.subr.bf16.mxu0 %v862_v25 }
  0x46   : > { %554 = vmatpush1.bf16.msra.mxu0 %v864_v26 }
  0x47   : > { %555 = vmatprep.subr.bf16.mxu0 %v865_v27 }
  0x4a   : > { %556 = vmatpush1.bf16.msra.mxu0 %v867_v28 }
  0x4b   : > { %557 = vmatprep.subr.bf16.mxu0 %v868_v29 }
  0x4e   : > { %558 = vmatpush1.bf16.msra.mxu0 %v870_v30 }
  0x4f   : > { %559 = vmatprep.subr.bf16.mxu0 %v871_v31 }
  0x52   : > { %560 = vmatpush1.bf16.msra.mxu0 %v873_v32 }
  0x53   : > { %561 = vmatprep.subr.bf16.mxu0 %v874_v33 }
  0x56   : > { %562 = vmatpush1.bf16.msra.mxu0 %v876_v34 }
  0x59   : > { %564 = vmatmul.mubr.bf16.vlgmr.msra.gmra.mrb[0].mxu0 %v762_v35 }
 0x12a   : > { %579 = sbr.rel (%p796_p7) target bundleno = 321 (0x141), region = 44 }
 0x12c   : > { %v565_v38 = vpop.f32.mrb[0].mxu0 }
 0x12d   : > { %v572_v39 = vadd.f32 %v565_v38, %v329_v36  ;;  %v567_v40 = vpop.f32.mrb[1].mxu0 }
 0x12e   : > { %v573_v41 = vadd.f32 %v567_v40, %v330_v37  ;;  %v569_v42 = vpop.f32.mrb[2].mxu0 }
 0x12f   : > { %574 = vst [vmem:[#allocation2] sm:$0xff] %v572_v39  ;;  %v570_v43 = vpop.f32.mrb[3].mxu0 }
 0x130   : > { %575 = vst [vmem:[#allocation2 + $0x8] sm:$0xff] %v573_v41 }
 0x136   : > { %v580_v50 = vld [vmem:[#allocation2] sm:$0xff] }
 0x137   : > { %v581_v51 = vld [vmem:[#allocation2 + $0x8] sm:$0xff]  ;;  %v594_v56 = vmul.f32 %v587_v52, %v580_v50 }
 0x138   : > { %v595_v57 = vmul.f32 %v591_v53, %v581_v51 }
 0x139   : > { %v608_v58 = vadd.f32 %v601_v54, %v594_v56 }
 0x13a   : > { %v609_v59 = vadd.f32 %v605_v55, %v595_v57 }
 0x13b   : > { %v610_v60 = vmax.f32 %v608_v58, 0.0 }
 0x13c   : > { %v611_v61 = vmax.f32 %v609_v59, 0.0 }
 0x13e   : > { %v803_v62 = vpack.c.bf16 %v611_v61, %v610_v60 }
 0x140   : > { %620 = vst [vmem:[%s1018_s4] sm:$0xff] %v803_v62 }
 0x141 PF: > { %s14_s17 = sadd.s32 1, %s901_s17   ;;  %s1019_s15 = smov %s897_s16 }
 0x142   : > { %p11_p8 = scmp.ge.s32.totalorder %s14_s17, 11   ;;  %s1020_s16 = smov %s1022_s18 }
 0x144   :  { %13 = sbr.rel (!%p11_p8) target bundleno = 2 (0x2), region = 83 }

// kernel: _lambda_.38
= control target key start
LH: loop header
LB: loop body
LE: loop exit
PB: predicated region body
PF: predicated region fallthrough
CT: control target
= control target key end

     0   :  { %s1289_s15 = smov 0   ;;  %s1291_s16 = smov 0   ;;  %s1409_s0 = inlined_call_operand.vmem [shape: bf16[8,2304], index: 0, kind: input, shape index: {}]   ;;  %s1410_s1 = inlined_call_operand.vmem [shape: bf16[2304,512], index: 1, kind: input, shape index: {}]   ;;  %s1411_s2 = inlined_call_operand.vmem [shape: f32[1,512], index: 2, kind: input, shape index: {}]   ;;  %s1412_s3 = inlined_call_operand.vmem [shape: f32[1,512], index: 3, kind: input, shape index: {}]   ;;  %s1413_s4 = inlined_call_operand.vmem [shape: bf16[8,512], index: 4, kind: output, shape index: {}]  }
   0x1   :  { %s1293_s17 = smov 0  }
   0x2 LB: > { %s26_s18 = sadd.s32 1, %s1257_s16  ;;  %p1033_p0 = scmp.ge.s32.totalorder %s1261_s17, 1  ;;  %s1261_s17 = sphi %s1293_s17, %s14_s17   ;;  %s1257_s16 = sphi %s1291_s16, %s1415_s16   ;;  %s1253_s15 = sphi %s1289_s15, %s1414_s15  }
   0x3   : > { %p27_p1 = scmp.ge.s32.totalorder %s26_s18, 9  ;;  %p229_p2 = scmp.lt.s32.totalorder %s1261_s17, 10 }
   0x5   : > { %s1417_s18 = smov (%p27_p1, %s26_s18), 0  ;;  %p230_p3 = pnand %p1033_p0, %p229_p2 }
   0x6   : > { %s1034_s19 = sshll.u32 (!%p230_p3), %s1253_s15, 1  ;;  %s1036_s20 = sshll.u32 (!%p230_p3), %s1253_s15, 5 }
   0x7   : > { %233 = sbr.rel (%p230_p3) target bundleno = 321 (0x141), region = 36  ;;  %p284_p4 = scmp.lt.s32.totalorder (!%p230_p3), %s1034_s19, 17 }
   0x8   : > { %p293_p5 = scmp.lt.s32.totalorder (!%p230_p3), %s1036_s20, 287  ;;  %p1039_p6 = scmp.ne.s32.totalorder (!%p230_p3), %s1253_s15, 0 }
   0xe   : > { %s1419_s19 = smov (!%p284_p4, %s1034_s19), 17  ;;  %s1421_s20 = smov (!%p293_p5, %s1036_s20), 287 }
   0xf   : > { %s1035_s21 = sshll.u32 %s1419_s19, 2  ;;  %s1113_s25 = sshll.u32 %s1421_s20, 4  ;;  %v1263_v0 = vmov (!%p1039_p6), 0.0  }
  0x10   : > { %s1314_s24 = scalar_lea.vmem %s1409_s0, %s1035_s21  ;;  %s1319_s28 = scalar_lea.vmem %s1410_s1, %s1113_s25  ;;  %327 = vst [vmem:[#allocation2] sm:$0xff] (!%p1039_p6), %v1263_v0  ;;  %328 = vst [vmem:[#allocation2 + $0x8] sm:$0xff] (!%p1039_p6), %v1263_v0 }
  0x11   : > { %326 = sbr.rel (%p1039_p6) target bundleno = 24 (0x18), region = 40  ;;  %329 = vst [vmem:[#allocation2 + $0x10] sm:$0xff] (!%p1039_p6), %v1263_v0  ;;  %330 = vst [vmem:[#allocation2 + $0x18] sm:$0xff] (!%p1039_p6), %v1263_v0 }
  0x18 PF: > { %v1141_v1 = vld [vmem:[%s1319_s28 + $0x4] ss:$16 sps:$4 sm:$0xff]   ;;  %v1143_v2 = vld [vmem:[%s1319_s28 + $0xc] ss:$16 sps:$4 sm:$0xff]   ;;  %v1145_v3 = vld [vmem:[%s1319_s28] ss:$16 sps:$4 sm:$0xff]  }
  0x19   : > { %727 = vmatprep.subr.bf16.mxu0 %v1141_v1  ;;  %v1146_v4 = vld [vmem:[%s1319_s28 + $0x8] ss:$16 sps:$4 sm:$0xff]   ;;  %768 = vmatprep.subr.bf16.mxu1 %v1143_v2  ;;  %v1147_v5 = vld [vmem:[%s1319_s28 + $0x24] ss:$16 sps:$4 sm:$0xff]   ;;  %v1149_v6 = vld [vmem:[%s1319_s28 + $0x2c] ss:$16 sps:$4 sm:$0xff]  }
  0x1a   : > { %728 = vmatpush1.bf16.msra.mxu0 %v1145_v3  ;;  %769 = vmatpush1.bf16.msra.mxu1 %v1146_v4  ;;  %v1151_v7 = vld [vmem:[%s1319_s28 + $0x20] ss:$16 sps:$4 sm:$0xff]   ;;  %v1152_v8 = vld [vmem:[%s1319_s28 + $0x28] ss:$16 sps:$4 sm:$0xff]   ;;  %v1153_v9 = vld [vmem:[%s1319_s28 + $0x44] ss:$16 sps:$4 sm:$0xff]  }
  0x1b   : > { %729 = vmatprep.subr.bf16.mxu0 %v1147_v5  ;;  %770 = vmatprep.subr.bf16.mxu1 %v1149_v6  ;;  %v1155_v10 = vld [vmem:[%s1319_s28 + $0x4c] ss:$16 sps:$4 sm:$0xff]   ;;  %v1157_v11 = vld [vmem:[%s1319_s28 + $0x40] ss:$16 sps:$4 sm:$0xff]   ;;  %v1158_v12 = vld [vmem:[%s1319_s28 + $0x48] ss:$16 sps:$4 sm:$0xff]  }
  0x1c   : > { %v1159_v13 = vld [vmem:[%s1319_s28 + $0x64] ss:$16 sps:$4 sm:$0xff]   ;;  %v1161_v14 = vld [vmem:[%s1319_s28 + $0x6c] ss:$16 sps:$4 sm:$0xff]   ;;  %v1163_v15 = vld [vmem:[%s1319_s28 + $0x60] ss:$16 sps:$4 sm:$0xff]  }
  0x1d   : > { %v1164_v16 = vld [vmem:[%s1319_s28 + $0x68] ss:$16 sps:$4 sm:$0xff]   ;;  %v1165_v17 = vld [vmem:[%s1319_s28 + $0x84] ss:$16 sps:$4 sm:$0xff]   ;;  %v1167_v18 = vld [vmem:[%s1319_s28 + $0x8c] ss:$16 sps:$4 sm:$0xff]  }
  0x1e   : > { %730 = vmatpush1.bf16.msra.mxu0 %v1151_v7  ;;  %771 = vmatpush1.bf16.msra.mxu1 %v1152_v8  ;;  %v1169_v19 = vld [vmem:[%s1319_s28 + $0x80] ss:$16 sps:$4 sm:$0xff]   ;;  %v1170_v20 = vld [vmem:[%s1319_s28 + $0x88] ss:$16 sps:$4 sm:$0xff]   ;;  %v1171_v21 = vld [vmem:[%s1319_s28 + $0xa4] ss:$16 sps:$4 sm:$0xff]  }
  0x1f   : > { %731 = vmatprep.subr.bf16.mxu0 %v1153_v9  ;;  %772 = vmatprep.subr.bf16.mxu1 %v1155_v10  ;;  %v1173_v22 = vld [vmem:[%s1319_s28 + $0xac] ss:$16 sps:$4 sm:$0xff]   ;;  %v1175_v23 = vld [vmem:[%s1319_s28 + $0xa0] ss:$16 sps:$4 sm:$0xff]   ;;  %v1176_v24 = vld [vmem:[%s1319_s28 + $0xa8] ss:$16 sps:$4 sm:$0xff]  }
  0x20   : > { %v1177_v25 = vld [vmem:[%s1319_s28 + $0xc4] ss:$16 sps:$4 sm:$0xff]   ;;  %v1179_v26 = vld [vmem:[%s1319_s28 + $0xcc] ss:$16 sps:$4 sm:$0xff]   ;;  %v1181_v27 = vld [vmem:[%s1319_s28 + $0xc0] ss:$16 sps:$4 sm:$0xff]  }
  0x21   : > { %v1182_v28 = vld [vmem:[%s1319_s28 + $0xc8] ss:$16 sps:$4 sm:$0xff]   ;;  %v1183_v29 = vld [vmem:[%s1319_s28 + $0xe4] ss:$16 sps:$4 sm:$0xff]   ;;  %v1185_v30 = vld [vmem:[%s1319_s28 + $0xec] ss:$16 sps:$4 sm:$0xff]  }
  0x22   : > { %732 = vmatpush1.bf16.msra.mxu0 %v1157_v11  ;;  %773 = vmatpush1.bf16.msra.mxu1 %v1158_v12  ;;  %v1187_v31 = vld [vmem:[%s1319_s28 + $0xe0] ss:$16 sps:$4 sm:$0xff]   ;;  %v1188_v32 = vld [vmem:[%s1319_s28 + $0xe8] ss:$16 sps:$4 sm:$0xff]   ;;  %v1189_v33 = vld [vmem:[%s1319_s28 + $0x104] ss:$16 sps:$4 sm:$0xff]  }
  0x23   : > { %733 = vmatprep.subr.bf16.mxu0 %v1159_v13  ;;  %774 = vmatprep.subr.bf16.mxu1 %v1161_v14  ;;  %v1191_v34 = vld [vmem:[%s1319_s28 + $0x10c] ss:$16 sps:$4 sm:$0xff]   ;;  %v1193_v35 = vld [vmem:[%s1319_s28 + $0x100] ss:$16 sps:$4 sm:$0xff]   ;;  %v1194_v36 = vld [vmem:[%s1319_s28 + $0x108] ss:$16 sps:$4 sm:$0xff]  }
  0x24   : > { %v1195_v37 = vld [vmem:[%s1319_s28 + $0x124] ss:$16 sps:$4 sm:$0xff]   ;;  %v1197_v38 = vld [vmem:[%s1319_s28 + $0x12c] ss:$16 sps:$4 sm:$0xff]   ;;  %v1199_v39 = vld [vmem:[%s1319_s28 + $0x120] ss:$16 sps:$4 sm:$0xff]  }
  0x25   : > { %v1200_v40 = vld [vmem:[%s1319_s28 + $0x128] ss:$16 sps:$4 sm:$0xff]   ;;  %v1201_v41 = vld [vmem:[%s1319_s28 + $0x144] ss:$16 sps:$4 sm:$0xff]   ;;  %v1203_v42 = vld [vmem:[%s1319_s28 + $0x14c] ss:$16 sps:$4 sm:$0xff]  }
  0x26   : > { %734 = vmatpush1.bf16.msra.mxu0 %v1163_v15  ;;  %775 = vmatpush1.bf16.msra.mxu1 %v1164_v16  ;;  %v1205_v43 = vld [vmem:[%s1319_s28 + $0x140] ss:$16 sps:$4 sm:$0xff]   ;;  %v1206_v44 = vld [vmem:[%s1319_s28 + $0x148] ss:$16 sps:$4 sm:$0xff]   ;;  %v1207_v45 = vld [vmem:[%s1319_s28 + $0x164] ss:$16 sps:$4 sm:$0xff]  }
  0x27   : > { %735 = vmatprep.subr.bf16.mxu0 %v1165_v17  ;;  %776 = vmatprep.subr.bf16.mxu1 %v1167_v18  ;;  %v1209_v46 = vld [vmem:[%s1319_s28 + $0x16c] ss:$16 sps:$4 sm:$0xff]   ;;  %v335_v47 = vld [vmem:[%s1314_s24] sm:$0xff]  ;;  %v1212_v50 = vld [vmem:[%s1319_s28 + $0x168] ss:$16 sps:$4 sm:$0xff]   ;;  %p1106_p7 = scmp.ne.s32.totalorder %s1253_s15, 8 }
  0x28   : > { %v1041_v48 = vcombine.high %v335_v47, %v335_v47  ;;  %v1211_v49 = vld [vmem:[%s1319_s28 + $0x160] ss:$16 sps:$4 sm:$0xff]   ;;  %v1213_v51 = vld [vmem:[%s1319_s28 + $0x184] ss:$16 sps:$4 sm:$0xff]   ;;  %v1215_v52 = vld [vmem:[%s1319_s28 + $0x18c] ss:$16 sps:$4 sm:$0xff]   ;;  %v1040_v3 = vcombine.low %v335_v47, %v335_v47 }
  0x29   : > { %v1217_v53 = vld [vmem:[%s1319_s28 + $0x180] ss:$16 sps:$4 sm:$0xff]   ;;  %v1218_v54 = vld [vmem:[%s1319_s28 + $0x188] ss:$16 sps:$4 sm:$0xff]   ;;  %v1219_v55 = vld [vmem:[%s1319_s28 + $0x1a4] ss:$16 sps:$4 sm:$0xff]  }
  0x2a   : > { %736 = vmatpush1.bf16.msra.mxu0 %v1169_v19  ;;  %777 = vmatpush1.bf16.msra.mxu1 %v1170_v20  ;;  %v1221_v56 = vld [vmem:[%s1319_s28 + $0x1ac] ss:$16 sps:$4 sm:$0xff]   ;;  %v1223_v57 = vld [vmem:[%s1319_s28 + $0x1a0] ss:$16 sps:$4 sm:$0xff]   ;;  %v1224_v58 = vld [vmem:[%s1319_s28 + $0x1a8] ss:$16 sps:$4 sm:$0xff]   ;;  %v827_v20 = vlaneseq (!%p1106_p7) }
  0x2b   : > { %737 = vmatprep.subr.bf16.mxu0 %v1171_v21  ;;  %778 = vmatprep.subr.bf16.mxu1 %v1173_v22  ;;  %v1225_v59 = vld [vmem:[%s1319_s28 + $0x1c4] ss:$16 sps:$4 sm:$0xff]   ;;  %v1227_v60 = vld [vmem:[%s1319_s28 + $0x1cc] ss:$16 sps:$4 sm:$0xff]   ;;  %v1229_v61 = vld [vmem:[%s1319_s28 + $0x1c0] ss:$16 sps:$4 sm:$0xff]  }
  0x2c   : > { %759 = vmatprep.mubr.bf16.mxu0 %v1041_v48  ;;  %800 = vmatprep.mubr.bf16.mxu1 %v1041_v48  ;;  %v1230_v62 = vld [vmem:[%s1319_s28 + $0x1c8] ss:$16 sps:$4 sm:$0xff]   ;;  %v1231_v63 = vld [vmem:[%s1319_s28 + $0x1e4] ss:$16 sps:$4 sm:$0xff]   ;;  %v1233_v0 = vld [vmem:[%s1319_s28 + $0x1ec] ss:$16 sps:$4 sm:$0xff]  }
  0x2d   : > { %v1235_v1 = vld [vmem:[%s1319_s28 + $0x1e0] ss:$16 sps:$4 sm:$0xff]   ;;  %v1236_v2 = vld [vmem:[%s1319_s28 + $0x1e8] ss:$16 sps:$4 sm:$0xff]   ;;  %v828_v21 = vshrl.u32 (!%p1106_p7), %v827_v20, 7 }
  0x2e   : > { %738 = vmatpush1.bf16.msra.mxu0 %v1175_v23  ;;  %779 = vmatpush1.bf16.msra.mxu1 %v1176_v24  ;;  %v331_v4 = vld [vmem:[#allocation2] sm:$0xff]  ;;  %v333_v5 = vld [vmem:[#allocation2 + $0x10] sm:$0xff]  ;;  %v332_v6 = vld [vmem:[#allocation2 + $0x8] sm:$0xff] }
  0x2f   : > { %739 = vmatprep.subr.bf16.mxu0 %v1177_v25  ;;  %780 = vmatprep.subr.bf16.mxu1 %v1179_v26  ;;  %v334_v7 = vld [vmem:[#allocation2 + $0x18] sm:$0xff]  ;;  %v825_v22 = vld [vmem:[%s1411_s2] sm:$0xf] (!%p1106_p7)  ;;  %v829_v24 = vsub.s32 (!%p1106_p7), 0, %v828_v21  ;;  %v833_v25 = vsub.s32 (!%p1106_p7), 1, %v828_v21  ;;  %v837_v26 = vsub.s32 (!%p1106_p7), 2, %v828_v21 }
  0x30   : > { %v851_v23 = vld [vmem:[%s1412_s3] sm:$0xf] (!%p1106_p7) }
  0x32   : > { %740 = vmatpush1.bf16.msra.mxu0 %v1181_v27  ;;  %781 = vmatpush1.bf16.msra.mxu1 %v1182_v28  ;;  %v841_v27 = vsub.s32 (!%p1106_p7), 3, %v828_v21 }
  0x33   : > { %741 = vmatprep.subr.bf16.mxu0 %v1183_v29  ;;  %782 = vmatprep.subr.bf16.mxu1 %v1185_v30  ;;  %v830_v30 = vrot.slane (!%p1106_p7), %v825_v22, %v829_v24 }
  0x36   : > { %742 = vmatpush1.bf16.msra.mxu0 %v1187_v31  ;;  %783 = vmatpush1.bf16.msra.mxu1 %v1188_v32  ;;  %v834_v31 = vrot.slane (!%p1106_p7), %v825_v22, %v833_v25  ;;  %v856_v32 = vrot.slane (!%p1106_p7), %v851_v23, %v829_v24 }
  0x37   : > { %743 = vmatprep.subr.bf16.mxu0 %v1189_v33  ;;  %784 = vmatprep.subr.bf16.mxu1 %v1191_v34  ;;  %v860_v33 = vrot.slane (!%p1106_p7), %v851_v23, %v833_v25 }
  0x3a   : > { %744 = vmatpush1.bf16.msra.mxu0 %v1193_v35  ;;  %785 = vmatpush1.bf16.msra.mxu1 %v1194_v36  ;;  %v838_v36 = vrot.slane (!%p1106_p7), %v825_v22, %v837_v26 }
  0x3b   : > { %745 = vmatprep.subr.bf16.mxu0 %v1195_v37  ;;  %786 = vmatprep.subr.bf16.mxu1 %v1197_v38  ;;  %v842_v37 = vrot.slane (!%p1106_p7), %v825_v22, %v841_v27  ;;  %v864_v38 = vrot.slane (!%p1106_p7), %v851_v23, %v837_v26 }
  0x3e   : > { %746 = vmatpush1.bf16.msra.mxu0 %v1199_v39  ;;  %787 = vmatpush1.bf16.msra.mxu1 %v1200_v40  ;;  %v868_v39 = vrot.slane (!%p1106_p7), %v851_v23, %v841_v27 }
  0x3f   : > { %747 = vmatprep.subr.bf16.mxu0 %v1201_v41  ;;  %788 = vmatprep.subr.bf16.mxu1 %v1203_v42 }
  0x42   : > { %748 = vmatpush1.bf16.msra.mxu0 %v1205_v43  ;;  %789 = vmatpush1.bf16.msra.mxu1 %v1206_v44 }
  0x43   : > { %749 = vmatprep.subr.bf16.mxu0 %v1207_v45  ;;  %790 = vmatprep.subr.bf16.mxu1 %v1209_v46 }
  0x46   : > { %750 = vmatpush1.bf16.msra.mxu0 %v1211_v49  ;;  %791 = vmatpush1.bf16.msra.mxu1 %v1212_v50 }
  0x47   : > { %751 = vmatprep.subr.bf16.mxu0 %v1213_v51  ;;  %792 = vmatprep.subr.bf16.mxu1 %v1215_v52 }
  0x4a   : > { %752 = vmatpush1.bf16.msra.mxu0 %v1217_v53  ;;  %793 = vmatpush1.bf16.msra.mxu1 %v1218_v54 }
  0x4b   : > { %753 = vmatprep.subr.bf16.mxu0 %v1219_v55  ;;  %794 = vmatprep.subr.bf16.mxu1 %v1221_v56 }
  0x4e   : > { %754 = vmatpush1.bf16.msra.mxu0 %v1223_v57  ;;  %795 = vmatpush1.bf16.msra.mxu1 %v1224_v58 }
  0x4f   : > { %755 = vmatprep.subr.bf16.mxu0 %v1225_v59  ;;  %796 = vmatprep.subr.bf16.mxu1 %v1227_v60 }
  0x52   : > { %756 = vmatpush1.bf16.msra.mxu0 %v1229_v61  ;;  %797 = vmatpush1.bf16.msra.mxu1 %v1230_v62 }
  0x53   : > { %757 = vmatprep.subr.bf16.mxu0 %v1231_v63  ;;  %798 = vmatprep.subr.bf16.mxu1 %v1233_v0 }
  0x56   : > { %758 = vmatpush1.bf16.msra.mxu0 %v1235_v1  ;;  %799 = vmatpush1.bf16.msra.mxu1 %v1236_v2 }
  0x59   : > { %760 = vmatmul.mubr.bf16.vlgmr.msra.gmra.mrb[0].mxu0 %v1040_v3  ;;  %801 = vmatmul.mubr.bf16.vlgmr.msra.gmra.mrb[0].mxu1 %v1040_v3 }
 0x12a   : > { %820 = sbr.rel (%p1106_p7) target bundleno = 321 (0x141), region = 44 }
 0x12c   : > { %v761_v8 = vpop.f32.mrb[0].mxu0  ;;  %v802_v9 = vpop.f32.mrb[0].mxu1 }
 0x12d   : > { %v809_v10 = vadd.f32 %v761_v8, %v331_v4  ;;  %v811_v11 = vadd.f32 %v802_v9, %v333_v5  ;;  %v763_v12 = vpop.f32.mrb[1].mxu0  ;;  %v804_v13 = vpop.f32.mrb[1].mxu1 }
 0x12e   : > { %v810_v14 = vadd.f32 %v763_v12, %v332_v6  ;;  %v812_v15 = vadd.f32 %v804_v13, %v334_v7  ;;  %v765_v16 = vpop.f32.mrb[2].mxu0  ;;  %v806_v17 = vpop.f32.mrb[2].mxu1 }
 0x12f   : > { %813 = vst [vmem:[#allocation2] sm:$0xff] %v809_v10  ;;  %815 = vst [vmem:[#allocation2 + $0x10] sm:$0xff] %v811_v11  ;;  %v766_v18 = vpop.f32.mrb[3].mxu0  ;;  %v807_v19 = vpop.f32.mrb[3].mxu1 }
 0x130   : > { %814 = vst [vmem:[#allocation2 + $0x8] sm:$0xff] %v810_v14  ;;  %816 = vst [vmem:[#allocation2 + $0x18] sm:$0xff] %v812_v15 }
 0x136   : > { %v821_v28 = vld [vmem:[#allocation2] sm:$0xff]  ;;  %v823_v34 = vld [vmem:[#allocation2 + $0x10] sm:$0xff] }
 0x137   : > { %v822_v29 = vld [vmem:[#allocation2 + $0x8] sm:$0xff]  ;;  %v824_v35 = vld [vmem:[#allocation2 + $0x18] sm:$0xff]  ;;  %v847_v40 = vmul.f32 %v830_v30, %v821_v28  ;;  %v849_v42 = vmul.f32 %v838_v36, %v823_v34 }
 0x138   : > { %v848_v41 = vmul.f32 %v834_v31, %v822_v29  ;;  %v850_v43 = vmul.f32 %v842_v37, %v824_v35 }
 0x139   : > { %v873_v44 = vadd.f32 %v856_v32, %v847_v40  ;;  %v875_v46 = vadd.f32 %v864_v38, %v849_v42 }
 0x13a   : > { %v874_v45 = vadd.f32 %v860_v33, %v848_v41  ;;  %v876_v47 = vadd.f32 %v868_v39, %v850_v43 }
 0x13b   : > { %v877_v48 = vmax.f32 %v873_v44, 0.0  ;;  %v879_v50 = vmax.f32 %v875_v46, 0.0 }
 0x13c   : > { %v878_v49 = vmax.f32 %v874_v45, 0.0  ;;  %v880_v51 = vmax.f32 %v876_v47, 0.0 }
 0x13e   : > { %v1114_v52 = vpack.c.bf16 %v878_v49, %v877_v48  ;;  %v1115_v53 = vpack.c.bf16 %v880_v51, %v879_v50 }
 0x140   : > { %897 = vst [vmem:[%s1413_s4] sm:$0xff] %v1114_v52  ;;  %898 = vst [vmem:[%s1413_s4 + $0x8] sm:$0xff] %v1115_v53 }
 0x141 PF: > { %s14_s17 = sadd.s32 1, %s1261_s17   ;;  %s1414_s15 = smov %s1257_s16 }
 0x142   : > { %p11_p8 = scmp.ge.s32.totalorder %s14_s17, 11   ;;  %s1415_s16 = smov %s1417_s18 }
 0x144   :  { %13 = sbr.rel (!%p11_p8) target bundleno = 2 (0x2), region = 83 }

// kernel: _lambda_.40
= control target key start
LH: loop header
LB: loop body
LE: loop exit
PB: predicated region body
PF: predicated region fallthrough
CT: control target
= control target key end

     0   :  { %s2025_s18 = smov 0   ;;  %s2027_s19 = smov 0   ;;  %s2234_s0 = inlined_call_operand.vmem [shape: bf16[8,4608], index: 0, kind: input, shape index: {}]   ;;  %s2235_s1 = inlined_call_operand.vmem [shape: bf16[4608,512], index: 1, kind: input, shape index: {}]   ;;  %s2236_s2 = inlined_call_operand.vmem [shape: f32[1,512], index: 2, kind: input, shape index: {}]   ;;  %s2237_s3 = inlined_call_operand.vmem [shape: f32[1,512], index: 3, kind: input, shape index: {}]   ;;  %s2238_s4 = inlined_call_operand.vmem [shape: f32[8,512], index: 4, kind: input, shape index: {}]   ;;  %s2239_s5 = inlined_call_operand.vmem [shape: bf16[8,512], index: 5, kind: output, shape index: {}]  }
   0x1   :  { %s2029_s20 = smov 0  }
   0x2 LB: > { %s27_s21 = sadd.s32 1, %s1988_s19  ;;  %p1600_p0 = scmp.ge.s32.totalorder %s1992_s20, 1  ;;  %s1992_s20 = sphi %s2029_s20, %s15_s20   ;;  %s1988_s19 = sphi %s2027_s19, %s2241_s19   ;;  %s1984_s18 = sphi %s2025_s18, %s2240_s18  }
   0x3   : > { %p28_p1 = scmp.ge.s32.totalorder %s27_s21, 9  ;;  %p271_p2 = scmp.lt.s32.totalorder %s1992_s20, 10 }
   0x5   : > { %s2243_s21 = smov (%p28_p1, %s27_s21), 0  ;;  %p272_p3 = pnand %p1600_p0, %p271_p2 }
   0x6   : > { %s1601_s22 = sshll.u32 (!%p272_p3), %s1984_s18, 2  ;;  %s1603_s23 = sshll.u32 (!%p272_p3), %s1984_s18, 6 }
   0x7   : > { %275 = sbr.rel (%p272_p3) target bundleno = 390 (0x186), region = 40  ;;  %p337_p4 = scmp.lt.s32.totalorder (!%p272_p3), %s1601_s22, 35 }
   0x8   : > { %p346_p5 = scmp.lt.s32.totalorder (!%p272_p3), %s1603_s23, 575  ;;  %p1606_p6 = scmp.ne.s32.totalorder (!%p272_p3), %s1984_s18, 0 }
   0xe   : > { %s2245_s22 = smov (!%p337_p4, %s1601_s22), 35  ;;  %s2247_s23 = smov (!%p346_p5, %s1603_s23), 575 }
   0xf   : > { %s1602_s24 = sshll.u32 %s2245_s22, 2  ;;  %s1746_s28 = sshll.u32 %s2247_s23, 4  ;;  %v1994_v0 = vmov (!%p1606_p6), 0.0  }
  0x10   : > { %s2050_s27 = scalar_lea.vmem %s2234_s0, %s1602_s24  ;;  %s2055_s6 = scalar_lea.vmem %s2235_s1, %s1746_s28  ;;  %390 = vst [vmem:[#allocation2] sm:$0xff] (!%p1606_p6), %v1994_v0  ;;  %391 = vst [vmem:[#allocation2 + $0x8] sm:$0xff] (!%p1606_p6), %v1994_v0 }
  0x11   : > { %389 = sbr.rel (%p1606_p6) target bundleno = 24 (0x18), region = 44  ;;  %392 = vst [vmem:[#allocation2 + $0x10] sm:$0xff] (!%p1606_p6), %v1994_v0  ;;  %393 = vst [vmem:[#allocation2 + $0x18] sm:$0xff] (!%p1606_p6), %v1994_v0 }
  0x18 PF: > { %v1774_v1 = vld [vmem:[%s2055_s6 + $0x4] ss:$16 sps:$4 sm:$0xff]   ;;  %v1778_v3 = vld [vmem:[%s2055_s6] ss:$16 sps:$4 sm:$0xff]   ;;  %v399_v49 = vld [vmem:[%s2050_s27 + $0x8] sm:$0xff]  ;;  %p1739_p7 = scmp.ne.s32.totalorder %s1984_s18, 8 }
  0x19   : > { %v1776_v2 = vld [vmem:[%s2055_s6 + $0x204] ss:$16 sps:$4 sm:$0xff]   ;;  %1182 = vmatprep.subr.bf16.mxu0 %v1774_v1  ;;  %v1779_v4 = vld [vmem:[%s2055_s6 + $0x200] ss:$16 sps:$4 sm:$0xff]   ;;  %v1610_v52 = vcombine.high %v399_v49, %v399_v49 }
  0x1a   : > { %1223 = vmatprep.subr.bf16.mxu1 %v1776_v2  ;;  %v1780_v5 = vld [vmem:[%s2055_s6 + $0x24] ss:$16 sps:$4 sm:$0xff]   ;;  %1183 = vmatpush1.bf16.msra.mxu0 %v1778_v3  ;;  %v1784_v7 = vld [vmem:[%s2055_s6 + $0x20] ss:$16 sps:$4 sm:$0xff]  }
  0x1b   : > { %1224 = vmatpush1.bf16.msra.mxu1 %v1779_v4  ;;  %v1782_v6 = vld [vmem:[%s2055_s6 + $0x224] ss:$16 sps:$4 sm:$0xff]   ;;  %1184 = vmatprep.subr.bf16.mxu0 %v1780_v5  ;;  %v1785_v8 = vld [vmem:[%s2055_s6 + $0x220] ss:$16 sps:$4 sm:$0xff]   ;;  %v1876_v5 = vld [vmem:[%s2055_s6 + $0xc] ss:$16 sps:$4 sm:$0xff]  }
  0x1c   : > { %1225 = vmatprep.subr.bf16.mxu1 %v1782_v6  ;;  %v1786_v9 = vld [vmem:[%s2055_s6 + $0x44] ss:$16 sps:$4 sm:$0xff]   ;;  %v1790_v11 = vld [vmem:[%s2055_s6 + $0x40] ss:$16 sps:$4 sm:$0xff]   ;;  %1255 = vmatprep.mubr.bf16.mxu1 %v1610_v52  ;;  %v1879_v6 = vld [vmem:[%s2055_s6 + $0x20c] ss:$16 sps:$4 sm:$0xff]  }
  0x1d   : > { %v1788_v10 = vld [vmem:[%s2055_s6 + $0x244] ss:$16 sps:$4 sm:$0xff]   ;;  %v1791_v12 = vld [vmem:[%s2055_s6 + $0x240] ss:$16 sps:$4 sm:$0xff]  }
  0x1e   : > { %1185 = vmatpush1.bf16.msra.mxu0 %v1784_v7  ;;  %v1792_v13 = vld [vmem:[%s2055_s6 + $0x64] ss:$16 sps:$4 sm:$0xff]   ;;  %v1796_v15 = vld [vmem:[%s2055_s6 + $0x60] ss:$16 sps:$4 sm:$0xff]  }
  0x1f   : > { %1226 = vmatpush1.bf16.msra.mxu1 %v1785_v8  ;;  %1186 = vmatprep.subr.bf16.mxu0 %v1786_v9  ;;  %v1794_v14 = vld [vmem:[%s2055_s6 + $0x264] ss:$16 sps:$4 sm:$0xff]   ;;  %v1797_v16 = vld [vmem:[%s2055_s6 + $0x260] ss:$16 sps:$4 sm:$0xff]   ;;  %v2131_v8 = vcombine.low %v399_v49, %v399_v49  ;;  %v1874_v9 = vld [vmem:[%s2055_s6 + $0x8] ss:$16 sps:$4 sm:$0xff]  }
  0x20   : > { %1227 = vmatprep.subr.bf16.mxu1 %v1788_v10  ;;  %v1798_v17 = vld [vmem:[%s2055_s6 + $0x84] ss:$16 sps:$4 sm:$0xff]   ;;  %v1802_v19 = vld [vmem:[%s2055_s6 + $0x80] ss:$16 sps:$4 sm:$0xff]   ;;  %v1877_v10 = vld [vmem:[%s2055_s6 + $0x208] ss:$16 sps:$4 sm:$0xff]  }
  0x21   : > { %v1800_v18 = vld [vmem:[%s2055_s6 + $0x284] ss:$16 sps:$4 sm:$0xff]   ;;  %v1803_v20 = vld [vmem:[%s2055_s6 + $0x280] ss:$16 sps:$4 sm:$0xff]   ;;  %v1934_v49 = vld [vmem:[%s2055_s6 + $0x148] ss:$16 sps:$4 sm:$0xff]  }
  0x22   : > { %1187 = vmatpush1.bf16.msra.mxu0 %v1790_v11  ;;  %v1804_v21 = vld [vmem:[%s2055_s6 + $0xa4] ss:$16 sps:$4 sm:$0xff]   ;;  %v1808_v23 = vld [vmem:[%s2055_s6 + $0xa0] ss:$16 sps:$4 sm:$0xff]   ;;  %v1882_v11 = vld [vmem:[%s2055_s6 + $0x2c] ss:$16 sps:$4 sm:$0xff]  }
  0x23   : > { %1228 = vmatpush1.bf16.msra.mxu1 %v1791_v12  ;;  %1188 = vmatprep.subr.bf16.mxu0 %v1792_v13  ;;  %v1806_v22 = vld [vmem:[%s2055_s6 + $0x2a4] ss:$16 sps:$4 sm:$0xff]   ;;  %v1809_v24 = vld [vmem:[%s2055_s6 + $0x2a0] ss:$16 sps:$4 sm:$0xff]   ;;  %v1885_v12 = vld [vmem:[%s2055_s6 + $0x22c] ss:$16 sps:$4 sm:$0xff]  }
  0x24   : > { %1229 = vmatprep.subr.bf16.mxu1 %v1794_v14  ;;  %v1810_v25 = vld [vmem:[%s2055_s6 + $0xc4] ss:$16 sps:$4 sm:$0xff]   ;;  %v1814_v27 = vld [vmem:[%s2055_s6 + $0xc0] ss:$16 sps:$4 sm:$0xff]   ;;  %v1880_v13 = vld [vmem:[%s2055_s6 + $0x28] ss:$16 sps:$4 sm:$0xff]  }
  0x25   : > { %v1812_v26 = vld [vmem:[%s2055_s6 + $0x2c4] ss:$16 sps:$4 sm:$0xff]   ;;  %v1815_v28 = vld [vmem:[%s2055_s6 + $0x2c0] ss:$16 sps:$4 sm:$0xff]   ;;  %v1883_v14 = vld [vmem:[%s2055_s6 + $0x228] ss:$16 sps:$4 sm:$0xff]  }
  0x26   : > { %1189 = vmatpush1.bf16.msra.mxu0 %v1796_v15  ;;  %v1816_v29 = vld [vmem:[%s2055_s6 + $0xe4] ss:$16 sps:$4 sm:$0xff]   ;;  %v1820_v31 = vld [vmem:[%s2055_s6 + $0xe0] ss:$16 sps:$4 sm:$0xff]   ;;  %v1888_v15 = vld [vmem:[%s2055_s6 + $0x4c] ss:$16 sps:$4 sm:$0xff]  }
  0x27   : > { %1230 = vmatpush1.bf16.msra.mxu1 %v1797_v16  ;;  %1190 = vmatprep.subr.bf16.mxu0 %v1798_v17  ;;  %v1818_v30 = vld [vmem:[%s2055_s6 + $0x2e4] ss:$16 sps:$4 sm:$0xff]   ;;  %v1821_v32 = vld [vmem:[%s2055_s6 + $0x2e0] ss:$16 sps:$4 sm:$0xff]   ;;  %v1891_v16 = vld [vmem:[%s2055_s6 + $0x24c] ss:$16 sps:$4 sm:$0xff]  }
  0x28   : > { %1231 = vmatprep.subr.bf16.mxu1 %v1800_v18  ;;  %v1822_v33 = vld [vmem:[%s2055_s6 + $0x104] ss:$16 sps:$4 sm:$0xff]   ;;  %v1826_v35 = vld [vmem:[%s2055_s6 + $0x100] ss:$16 sps:$4 sm:$0xff]   ;;  %v1886_v17 = vld [vmem:[%s2055_s6 + $0x48] ss:$16 sps:$4 sm:$0xff]  }
  0x29   : > { %v1824_v34 = vld [vmem:[%s2055_s6 + $0x304] ss:$16 sps:$4 sm:$0xff]   ;;  %v1827_v36 = vld [vmem:[%s2055_s6 + $0x300] ss:$16 sps:$4 sm:$0xff]   ;;  %v1889_v18 = vld [vmem:[%s2055_s6 + $0x248] ss:$16 sps:$4 sm:$0xff]  }
  0x2a   : > { %1191 = vmatpush1.bf16.msra.mxu0 %v1802_v19  ;;  %v1828_v37 = vld [vmem:[%s2055_s6 + $0x124] ss:$16 sps:$4 sm:$0xff]   ;;  %v1832_v39 = vld [vmem:[%s2055_s6 + $0x120] ss:$16 sps:$4 sm:$0xff]   ;;  %v1894_v19 = vld [vmem:[%s2055_s6 + $0x6c] ss:$16 sps:$4 sm:$0xff]  }
  0x2b   : > { %1232 = vmatpush1.bf16.msra.mxu1 %v1803_v20  ;;  %1192 = vmatprep.subr.bf16.mxu0 %v1804_v21  ;;  %v1830_v38 = vld [vmem:[%s2055_s6 + $0x324] ss:$16 sps:$4 sm:$0xff]   ;;  %v1833_v40 = vld [vmem:[%s2055_s6 + $0x320] ss:$16 sps:$4 sm:$0xff]   ;;  %v1897_v20 = vld [vmem:[%s2055_s6 + $0x26c] ss:$16 sps:$4 sm:$0xff]  }
  0x2c   : > { %1233 = vmatprep.subr.bf16.mxu1 %v1806_v22  ;;  %v1834_v41 = vld [vmem:[%s2055_s6 + $0x144] ss:$16 sps:$4 sm:$0xff]   ;;  %v1838_v43 = vld [vmem:[%s2055_s6 + $0x140] ss:$16 sps:$4 sm:$0xff]   ;;  %v1892_v21 = vld [vmem:[%s2055_s6 + $0x68] ss:$16 sps:$4 sm:$0xff]  }
  0x2d   : > { %v1836_v42 = vld [vmem:[%s2055_s6 + $0x344] ss:$16 sps:$4 sm:$0xff]   ;;  %v1839_v44 = vld [vmem:[%s2055_s6 + $0x340] ss:$16 sps:$4 sm:$0xff]   ;;  %v1895_v22 = vld [vmem:[%s2055_s6 + $0x268] ss:$16 sps:$4 sm:$0xff]  }
  0x2e   : > { %1193 = vmatpush1.bf16.msra.mxu0 %v1808_v23  ;;  %v1840_v45 = vld [vmem:[%s2055_s6 + $0x164] ss:$16 sps:$4 sm:$0xff]   ;;  %v1844_v50 = vld [vmem:[%s2055_s6 + $0x160] ss:$16 sps:$4 sm:$0xff]   ;;  %v1900_v23 = vld [vmem:[%s2055_s6 + $0x8c] ss:$16 sps:$4 sm:$0xff]  }
  0x2f   : > { %1234 = vmatpush1.bf16.msra.mxu1 %v1809_v24  ;;  %1194 = vmatprep.subr.bf16.mxu0 %v1810_v25  ;;  %v1842_v46 = vld [vmem:[%s2055_s6 + $0x364] ss:$16 sps:$4 sm:$0xff]   ;;  %v1845_v51 = vld [vmem:[%s2055_s6 + $0x360] ss:$16 sps:$4 sm:$0xff]   ;;  %v1903_v24 = vld [vmem:[%s2055_s6 + $0x28c] ss:$16 sps:$4 sm:$0xff]  }
  0x30   : > { %1235 = vmatprep.subr.bf16.mxu1 %v1812_v26  ;;  %v398_v47 = vld [vmem:[%s2050_s27] sm:$0xff]  ;;  %v1898_v25 = vld [vmem:[%s2055_s6 + $0x88] ss:$16 sps:$4 sm:$0xff]  }
  0x31   : > { %v2105_v48 = vcombine.high %v398_v47, %v398_v47  ;;  %v1846_v53 = vld [vmem:[%s2055_s6 + $0x184] ss:$16 sps:$4 sm:$0xff]   ;;  %v1850_v55 = vld [vmem:[%s2055_s6 + $0x180] ss:$16 sps:$4 sm:$0xff]   ;;  %v2129_v7 = vcombine.low %v398_v47, %v398_v47  ;;  %v1901_v26 = vld [vmem:[%s2055_s6 + $0x288] ss:$16 sps:$4 sm:$0xff]  }
  0x32   : > { %1195 = vmatpush1.bf16.msra.mxu0 %v1814_v27  ;;  %v1848_v54 = vld [vmem:[%s2055_s6 + $0x384] ss:$16 sps:$4 sm:$0xff]   ;;  %v1851_v56 = vld [vmem:[%s2055_s6 + $0x380] ss:$16 sps:$4 sm:$0xff]   ;;  %v1906_v27 = vld [vmem:[%s2055_s6 + $0xac] ss:$16 sps:$4 sm:$0xff]  }
  0x33   : > { %1236 = vmatpush1.bf16.msra.mxu1 %v1815_v28  ;;  %1196 = vmatprep.subr.bf16.mxu0 %v1816_v29  ;;  %v1852_v57 = vld [vmem:[%s2055_s6 + $0x1a4] ss:$16 sps:$4 sm:$0xff]   ;;  %v1856_v59 = vld [vmem:[%s2055_s6 + $0x1a0] ss:$16 sps:$4 sm:$0xff]   ;;  %v1909_v28 = vld [vmem:[%s2055_s6 + $0x2ac] ss:$16 sps:$4 sm:$0xff]  }
  0x34   : > { %1237 = vmatprep.subr.bf16.mxu1 %v1818_v30  ;;  %1214 = vmatprep.mubr.bf16.mxu0 %v2105_v48  ;;  %v1854_v58 = vld [vmem:[%s2055_s6 + $0x3a4] ss:$16 sps:$4 sm:$0xff]   ;;  %v1857_v60 = vld [vmem:[%s2055_s6 + $0x3a0] ss:$16 sps:$4 sm:$0xff]   ;;  %v1904_v29 = vld [vmem:[%s2055_s6 + $0xa8] ss:$16 sps:$4 sm:$0xff]  }
  0x35   : > { %v1858_v61 = vld [vmem:[%s2055_s6 + $0x1c4] ss:$16 sps:$4 sm:$0xff]   ;;  %v1862_v63 = vld [vmem:[%s2055_s6 + $0x1c0] ss:$16 sps:$4 sm:$0xff]   ;;  %v1907_v30 = vld [vmem:[%s2055_s6 + $0x2a8] ss:$16 sps:$4 sm:$0xff]  }
  0x36   : > { %1197 = vmatpush1.bf16.msra.mxu0 %v1820_v31  ;;  %v1860_v62 = vld [vmem:[%s2055_s6 + $0x3c4] ss:$16 sps:$4 sm:$0xff]   ;;  %v1863_v0 = vld [vmem:[%s2055_s6 + $0x3c0] ss:$16 sps:$4 sm:$0xff]   ;;  %v1912_v31 = vld [vmem:[%s2055_s6 + $0xcc] ss:$16 sps:$4 sm:$0xff]  }
  0x37   : > { %1238 = vmatpush1.bf16.msra.mxu1 %v1821_v32  ;;  %1198 = vmatprep.subr.bf16.mxu0 %v1822_v33  ;;  %v1864_v1 = vld [vmem:[%s2055_s6 + $0x1e4] ss:$16 sps:$4 sm:$0xff]   ;;  %v1868_v3 = vld [vmem:[%s2055_s6 + $0x1e0] ss:$16 sps:$4 sm:$0xff]   ;;  %v1915_v32 = vld [vmem:[%s2055_s6 + $0x2cc] ss:$16 sps:$4 sm:$0xff]  }
  0x38   : > { %1239 = vmatprep.subr.bf16.mxu1 %v1824_v34  ;;  %v1866_v2 = vld [vmem:[%s2055_s6 + $0x3e4] ss:$16 sps:$4 sm:$0xff]   ;;  %v1869_v4 = vld [vmem:[%s2055_s6 + $0x3e0] ss:$16 sps:$4 sm:$0xff]   ;;  %v1910_v33 = vld [vmem:[%s2055_s6 + $0xc8] ss:$16 sps:$4 sm:$0xff]  }
  0x39   : > { %v1913_v34 = vld [vmem:[%s2055_s6 + $0x2c8] ss:$16 sps:$4 sm:$0xff]   ;;  %v1936_v47 = vld [vmem:[%s2055_s6 + $0x14c] ss:$16 sps:$4 sm:$0xff]  }
  0x3a   : > { %1199 = vmatpush1.bf16.msra.mxu0 %v1826_v35  ;;  %v1918_v35 = vld [vmem:[%s2055_s6 + $0xec] ss:$16 sps:$4 sm:$0xff]  }
  0x3b   : > { %1240 = vmatpush1.bf16.msra.mxu1 %v1827_v36  ;;  %1200 = vmatprep.subr.bf16.mxu0 %v1828_v37  ;;  %v1921_v36 = vld [vmem:[%s2055_s6 + $0x2ec] ss:$16 sps:$4 sm:$0xff]   ;;  %v1916_v37 = vld [vmem:[%s2055_s6 + $0xe8] ss:$16 sps:$4 sm:$0xff]  }
  0x3c   : > { %1241 = vmatprep.subr.bf16.mxu1 %v1830_v38  ;;  %v1919_v38 = vld [vmem:[%s2055_s6 + $0x2e8] ss:$16 sps:$4 sm:$0xff]  }
  0x3e   : > { %1201 = vmatpush1.bf16.msra.mxu0 %v1832_v39  ;;  %v1924_v39 = vld [vmem:[%s2055_s6 + $0x10c] ss:$16 sps:$4 sm:$0xff]  }
  0x3f   : > { %1242 = vmatpush1.bf16.msra.mxu1 %v1833_v40  ;;  %1202 = vmatprep.subr.bf16.mxu0 %v1834_v41  ;;  %v1927_v40 = vld [vmem:[%s2055_s6 + $0x30c] ss:$16 sps:$4 sm:$0xff]   ;;  %v1922_v41 = vld [vmem:[%s2055_s6 + $0x108] ss:$16 sps:$4 sm:$0xff]  }
  0x40   : > { %1243 = vmatprep.subr.bf16.mxu1 %v1836_v42  ;;  %v1925_v42 = vld [vmem:[%s2055_s6 + $0x308] ss:$16 sps:$4 sm:$0xff]  }
  0x42   : > { %1203 = vmatpush1.bf16.msra.mxu0 %v1838_v43  ;;  %v1930_v43 = vld [vmem:[%s2055_s6 + $0x12c] ss:$16 sps:$4 sm:$0xff]  }
  0x43   : > { %1244 = vmatpush1.bf16.msra.mxu1 %v1839_v44  ;;  %1204 = vmatprep.subr.bf16.mxu0 %v1840_v45  ;;  %v1933_v44 = vld [vmem:[%s2055_s6 + $0x32c] ss:$16 sps:$4 sm:$0xff]   ;;  %v1928_v45 = vld [vmem:[%s2055_s6 + $0x128] ss:$16 sps:$4 sm:$0xff]  }
  0x44   : > { %1245 = vmatprep.subr.bf16.mxu1 %v1842_v46  ;;  %v1931_v46 = vld [vmem:[%s2055_s6 + $0x328] ss:$16 sps:$4 sm:$0xff]  }
  0x46   : > { %1205 = vmatpush1.bf16.msra.mxu0 %v1844_v50  ;;  %v1937_v50 = vld [vmem:[%s2055_s6 + $0x348] ss:$16 sps:$4 sm:$0xff]  }
  0x47   : > { %1246 = vmatpush1.bf16.msra.mxu1 %v1845_v51  ;;  %1206 = vmatprep.subr.bf16.mxu0 %v1846_v53  ;;  %v1942_v51 = vld [vmem:[%s2055_s6 + $0x16c] ss:$16 sps:$4 sm:$0xff]   ;;  %v1940_v53 = vld [vmem:[%s2055_s6 + $0x168] ss:$16 sps:$4 sm:$0xff]  }
  0x48   : > { %1247 = vmatprep.subr.bf16.mxu1 %v1848_v54  ;;  %v1943_v54 = vld [vmem:[%s2055_s6 + $0x368] ss:$16 sps:$4 sm:$0xff]  }
  0x4a   : > { %1207 = vmatpush1.bf16.msra.mxu0 %v1850_v55  ;;  %v1948_v55 = vld [vmem:[%s2055_s6 + $0x18c] ss:$16 sps:$4 sm:$0xff]  }
  0x4b   : > { %1248 = vmatpush1.bf16.msra.mxu1 %v1851_v56  ;;  %1208 = vmatprep.subr.bf16.mxu0 %v1852_v57  ;;  %v1951_v56 = vld [vmem:[%s2055_s6 + $0x38c] ss:$16 sps:$4 sm:$0xff]   ;;  %v1946_v57 = vld [vmem:[%s2055_s6 + $0x188] ss:$16 sps:$4 sm:$0xff]  }
  0x4c   : > { %1249 = vmatprep.subr.bf16.mxu1 %v1854_v58  ;;  %v1949_v58 = vld [vmem:[%s2055_s6 + $0x388] ss:$16 sps:$4 sm:$0xff]  }
  0x4e   : > { %1209 = vmatpush1.bf16.msra.mxu0 %v1856_v59  ;;  %v1954_v59 = vld [vmem:[%s2055_s6 + $0x1ac] ss:$16 sps:$4 sm:$0xff]  }
  0x4f   : > { %1250 = vmatpush1.bf16.msra.mxu1 %v1857_v60  ;;  %1210 = vmatprep.subr.bf16.mxu0 %v1858_v61  ;;  %v1957_v60 = vld [vmem:[%s2055_s6 + $0x3ac] ss:$16 sps:$4 sm:$0xff]   ;;  %v1952_v61 = vld [vmem:[%s2055_s6 + $0x1a8] ss:$16 sps:$4 sm:$0xff]  }
  0x50   : > { %1251 = vmatprep.subr.bf16.mxu1 %v1860_v62  ;;  %v1955_v62 = vld [vmem:[%s2055_s6 + $0x3a8] ss:$16 sps:$4 sm:$0xff]  }
  0x52   : > { %1211 = vmatpush1.bf16.msra.mxu0 %v1862_v63  ;;  %v1960_v63 = vld [vmem:[%s2055_s6 + $0x1cc] ss:$16 sps:$4 sm:$0xff]  }
  0x53   : > { %1252 = vmatpush1.bf16.msra.mxu1 %v1863_v0  ;;  %1212 = vmatprep.subr.bf16.mxu0 %v1864_v1  ;;  %v1963_v0 = vld [vmem:[%s2055_s6 + $0x3cc] ss:$16 sps:$4 sm:$0xff]   ;;  %v1958_v1 = vld [vmem:[%s2055_s6 + $0x1c8] ss:$16 sps:$4 sm:$0xff]  }
  0x54   : > { %1253 = vmatprep.subr.bf16.mxu1 %v1866_v2  ;;  %v1961_v2 = vld [vmem:[%s2055_s6 + $0x3c8] ss:$16 sps:$4 sm:$0xff]  }
  0x56   : > { %1213 = vmatpush1.bf16.msra.mxu0 %v1868_v3  ;;  %v1966_v3 = vld [vmem:[%s2055_s6 + $0x1ec] ss:$16 sps:$4 sm:$0xff]  }
  0x57   : > { %1254 = vmatpush1.bf16.msra.mxu1 %v1869_v4  ;;  %1264 = vmatprep.subr.bf16.mxu0 %v1876_v5  ;;  %v1969_v4 = vld [vmem:[%s2055_s6 + $0x3ec] ss:$16 sps:$4 sm:$0xff]   ;;  %v1964_v5 = vld [vmem:[%s2055_s6 + $0x1e8] ss:$16 sps:$4 sm:$0xff]  }
  0x58   : > { %1305 = vmatprep.subr.bf16.mxu1 %v1879_v6  ;;  %v1967_v6 = vld [vmem:[%s2055_s6 + $0x3e8] ss:$16 sps:$4 sm:$0xff]  }
  0x59   : > { %1215 = vmatmul.mubr.bf16.vlgmr.msra.gmra.mrb[0].mxu0 %v2129_v7 }
  0x5a   : > { %1256 = vmatmul.mubr.bf16.vlgmr.msra.gmra.mrb[0].mxu1 %v2131_v8  ;;  %1265 = vmatpush1.bf16.msra.mxu0 %v1874_v9 }
  0x5b   : > { %1306 = vmatpush1.bf16.msra.mxu1 %v1877_v10  ;;  %1266 = vmatprep.subr.bf16.mxu0 %v1882_v11  ;;  %v394_v10 = vld [vmem:[#allocation2] sm:$0xff] }
  0x5c   : > { %1307 = vmatprep.subr.bf16.mxu1 %v1885_v12  ;;  %1296 = vmatprep.mubr.bf16.mxu0 %v2105_v48  ;;  %v1939_v48 = vld [vmem:[%s2055_s6 + $0x34c] ss:$16 sps:$4 sm:$0xff]  }
  0x5d   : > { %1337 = vmatprep.mubr.bf16.mxu1 %v1610_v52  ;;  %v1945_v52 = vld [vmem:[%s2055_s6 + $0x36c] ss:$16 sps:$4 sm:$0xff]  }
  0x5e   : > { %1267 = vmatpush1.bf16.msra.mxu0 %v1880_v13 }
  0x5f   : > { %1308 = vmatpush1.bf16.msra.mxu1 %v1883_v14  ;;  %1268 = vmatprep.subr.bf16.mxu0 %v1888_v15  ;;  %v395_v14 = vld [vmem:[#allocation2 + $0x8] sm:$0xff] }
  0x60   : > { %1309 = vmatprep.subr.bf16.mxu1 %v1891_v16 }
  0x62   : > { %1269 = vmatpush1.bf16.msra.mxu0 %v1886_v17 }
  0x63   : > { %1310 = vmatpush1.bf16.msra.mxu1 %v1889_v18  ;;  %1270 = vmatprep.subr.bf16.mxu0 %v1894_v19 }
  0x64   : > { %1311 = vmatprep.subr.bf16.mxu1 %v1897_v20 }
  0x66   : > { %1271 = vmatpush1.bf16.msra.mxu0 %v1892_v21 }
  0x67   : > { %1312 = vmatpush1.bf16.msra.mxu1 %v1895_v22  ;;  %1272 = vmatprep.subr.bf16.mxu0 %v1900_v23 }
  0x68   : > { %1313 = vmatprep.subr.bf16.mxu1 %v1903_v24 }
  0x6a   : > { %1273 = vmatpush1.bf16.msra.mxu0 %v1898_v25 }
  0x6b   : > { %1314 = vmatpush1.bf16.msra.mxu1 %v1901_v26  ;;  %1274 = vmatprep.subr.bf16.mxu0 %v1906_v27  ;;  %v397_v26 = vld [vmem:[#allocation2 + $0x18] sm:$0xff] }
  0x6c   : > { %1315 = vmatprep.subr.bf16.mxu1 %v1909_v28 }
  0x6e   : > { %1275 = vmatpush1.bf16.msra.mxu0 %v1904_v29 }
  0x6f   : > { %1316 = vmatpush1.bf16.msra.mxu1 %v1907_v30  ;;  %1276 = vmatprep.subr.bf16.mxu0 %v1912_v31 }
  0x70   : > { %1317 = vmatprep.subr.bf16.mxu1 %v1915_v32 }
  0x72   : > { %1277 = vmatpush1.bf16.msra.mxu0 %v1910_v33 }
  0x73   : > { %1318 = vmatpush1.bf16.msra.mxu1 %v1913_v34  ;;  %1278 = vmatprep.subr.bf16.mxu0 %v1918_v35  ;;  %v1364_v35 = vlaneseq (!%p1739_p7) }
  0x74   : > { %1319 = vmatprep.subr.bf16.mxu1 %v1921_v36 }
  0x75   : > { %v1365_v36 = vshrl.u32 (!%p1739_p7), %v1364_v35, 7 }
  0x76   : > { %1279 = vmatpush1.bf16.msra.mxu0 %v1916_v37  ;;  %v1362_v37 = vld [vmem:[%s2236_s2] sm:$0xf] (!%p1739_p7) }
  0x77   : > { %1320 = vmatpush1.bf16.msra.mxu1 %v1919_v38  ;;  %1280 = vmatprep.subr.bf16.mxu0 %v1924_v39  ;;  %v1388_v38 = vld [vmem:[%s2237_s3] sm:$0xf] (!%p1739_p7)  ;;  %v1366_v39 = vsub.s32 (!%p1739_p7), 0, %v1365_v36 }
  0x78   : > { %1321 = vmatprep.subr.bf16.mxu1 %v1927_v40  ;;  %v1370_v40 = vsub.s32 (!%p1739_p7), 1, %v1365_v36 }
  0x7a   : > { %1281 = vmatpush1.bf16.msra.mxu0 %v1922_v41  ;;  %v1374_v41 = vsub.s32 (!%p1739_p7), 2, %v1365_v36 }
  0x7b   : > { %1322 = vmatpush1.bf16.msra.mxu1 %v1925_v42  ;;  %1282 = vmatprep.subr.bf16.mxu0 %v1930_v43  ;;  %v1378_v42 = vsub.s32 (!%p1739_p7), 3, %v1365_v36 }
  0x7c   : > { %1323 = vmatprep.subr.bf16.mxu1 %v1933_v44 }
  0x7e   : > { %1283 = vmatpush1.bf16.msra.mxu0 %v1928_v45  ;;  %v1367_v45 = vrot.slane (!%p1739_p7), %v1362_v37, %v1366_v39 }
  0x7f   : > { %1324 = vmatpush1.bf16.msra.mxu1 %v1931_v46  ;;  %1284 = vmatprep.subr.bf16.mxu0 %v1936_v47  ;;  %v1371_v46 = vrot.slane (!%p1739_p7), %v1362_v37, %v1370_v40  ;;  %v1393_v47 = vrot.slane (!%p1739_p7), %v1388_v38, %v1366_v39 }
  0x80   : > { %1325 = vmatprep.subr.bf16.mxu1 %v1939_v48  ;;  %v1397_v48 = vrot.slane (!%p1739_p7), %v1388_v38, %v1370_v40 }
  0x82   : > { %1285 = vmatpush1.bf16.msra.mxu0 %v1934_v49 }
  0x83   : > { %1326 = vmatpush1.bf16.msra.mxu1 %v1937_v50  ;;  %1286 = vmatprep.subr.bf16.mxu0 %v1942_v51  ;;  %v1375_v51 = vrot.slane (!%p1739_p7), %v1362_v37, %v1374_v41 }
  0x84   : > { %1327 = vmatprep.subr.bf16.mxu1 %v1945_v52  ;;  %v1379_v52 = vrot.slane (!%p1739_p7), %v1362_v37, %v1378_v42 }
  0x86   : > { %1287 = vmatpush1.bf16.msra.mxu0 %v1940_v53  ;;  %v1401_v53 = vrot.slane (!%p1739_p7), %v1388_v38, %v1374_v41 }
  0x87   : > { %1328 = vmatpush1.bf16.msra.mxu1 %v1943_v54  ;;  %1288 = vmatprep.subr.bf16.mxu0 %v1948_v55  ;;  %v1405_v54 = vrot.slane (!%p1739_p7), %v1388_v38, %v1378_v42 }
  0x88   : > { %1329 = vmatprep.subr.bf16.mxu1 %v1951_v56 }
  0x8a   : > { %1289 = vmatpush1.bf16.msra.mxu0 %v1946_v57  ;;  %v1414_v57 = vld [vmem:[%s2238_s4] sm:$0xff] (!%p1739_p7) }
  0x8b   : > { %1330 = vmatpush1.bf16.msra.mxu1 %v1949_v58  ;;  %1290 = vmatprep.subr.bf16.mxu0 %v1954_v59  ;;  %v1415_v58 = vld [vmem:[%s2238_s4 + $0x8] sm:$0xff] (!%p1739_p7) }
  0x8c   : > { %1331 = vmatprep.subr.bf16.mxu1 %v1957_v60 }
  0x8e   : > { %1291 = vmatpush1.bf16.msra.mxu0 %v1952_v61 }
  0x8f   : > { %1332 = vmatpush1.bf16.msra.mxu1 %v1955_v62  ;;  %1292 = vmatprep.subr.bf16.mxu0 %v1960_v63  ;;  %v1416_v63 = vld [vmem:[%s2238_s4 + $0x10] sm:$0xff] (!%p1739_p7) }
  0x90   : > { %1333 = vmatprep.subr.bf16.mxu1 %v1963_v0  ;;  %v1417_v0 = vld [vmem:[%s2238_s4 + $0x18] sm:$0xff] (!%p1739_p7) }
  0x92   : > { %1293 = vmatpush1.bf16.msra.mxu0 %v1958_v1 }
  0x93   : > { %1334 = vmatpush1.bf16.msra.mxu1 %v1961_v2  ;;  %1294 = vmatprep.subr.bf16.mxu0 %v1966_v3 }
  0x94   : > { %1335 = vmatprep.subr.bf16.mxu1 %v1969_v4 }
  0x96   : > { %1295 = vmatpush1.bf16.msra.mxu0 %v1964_v5 }
  0x97   : > { %1336 = vmatpush1.bf16.msra.mxu1 %v1967_v6 }
  0x99   : > { %1297 = vmatmul.mubr.bf16.vlgmr.msra.gmra.mrb[4].mxu0 %v2129_v7  ;;  %v396_v7 = vld [vmem:[#allocation2 + $0x10] sm:$0xff] }
  0x9a   : > { %1338 = vmatmul.mubr.bf16.vlgmr.msra.gmra.mrb[4].mxu1 %v2131_v8 }
 0x12c   : > { %v1216_v9 = vpop.f32.mrb[0].mxu0 }
 0x12d   : > { %v1257_v11 = vpop.f32.mrb[0].mxu1  ;;  %v1218_v13 = vpop.f32.mrb[1].mxu0 }
 0x12e   : > { %v1258_v12 = vadd.f32 %v1257_v11, %v1216_v9  ;;  %v1259_v15 = vpop.f32.mrb[1].mxu1  ;;  %v1220_v17 = vpop.f32.mrb[2].mxu0 }
 0x12f   : > { %v1260_v16 = vadd.f32 %v1259_v15, %v1218_v13  ;;  %v1261_v18 = vpop.f32.mrb[2].mxu1  ;;  %v1221_v20 = vpop.f32.mrb[3].mxu0 }
 0x130   : > { %v1346_v19 = vadd.f32 %v1258_v12, %v394_v10  ;;  %v1262_v21 = vpop.f32.mrb[3].mxu1 }
 0x131   : > { %v1347_v22 = vadd.f32 %v1260_v16, %v395_v14 }
 0x132   : > { %1350 = vst [vmem:[#allocation2] sm:$0xff] %v1346_v19 }
 0x133   : > { %1351 = vst [vmem:[#allocation2 + $0x8] sm:$0xff] %v1347_v22 }
 0x139   : > { %v1358_v43 = vld [vmem:[#allocation2] sm:$0xff] (!%p1739_p7) }
 0x13a   : > { %v1359_v44 = vld [vmem:[#allocation2 + $0x8] sm:$0xff] (!%p1739_p7)  ;;  %v1384_v55 = vmul.f32 (!%p1739_p7), %v1367_v45, %v1358_v43 }
 0x13b   : > { %v1385_v56 = vmul.f32 (!%p1739_p7), %v1371_v46, %v1359_v44 }
 0x13c   : > { %v1410_v61 = vadd.f32 (!%p1739_p7), %v1393_v47, %v1384_v55 }
 0x13d   : > { %v1411_v62 = vadd.f32 (!%p1739_p7), %v1397_v48, %v1385_v56 }
 0x13e   : > { %v1418_v3 = vadd.f32 (!%p1739_p7), %v1414_v57, %v1410_v61 }
 0x13f   : > { %v1419_v4 = vadd.f32 (!%p1739_p7), %v1415_v58, %v1411_v62 }
 0x140   : > { %v1422_v9 = vmax.f32 (!%p1739_p7), %v1418_v3, 0.0 }
 0x141   : > { %v1423_v10 = vmax.f32 (!%p1739_p7), %v1419_v4, 0.0 }
 0x143   : > { %v1747_v13 = vpack.c.bf16 (!%p1739_p7), %v1423_v10, %v1422_v9 }
 0x145   : > { %1442 = vst [vmem:[%s2239_s5] sm:$0xff] (!%p1739_p7), %v1747_v13 }
 0x16c   : > { %v1298_v23 = vpop.f32.mrb[4].mxu0 }
 0x16d   : > { %v1339_v24 = vpop.f32.mrb[4].mxu1  ;;  %v1300_v25 = vpop.f32.mrb[5].mxu0  ;;  %1357 = sbr.rel (%p1739_p7) target bundleno = 390 (0x186), region = 48 }
 0x16e   : > { %v1340_v8 = vadd.f32 %v1339_v24, %v1298_v23  ;;  %v1341_v27 = vpop.f32.mrb[5].mxu1  ;;  %v1302_v29 = vpop.f32.mrb[6].mxu0 }
 0x16f   : > { %v1342_v28 = vadd.f32 %v1341_v27, %v1300_v25  ;;  %v1343_v30 = vpop.f32.mrb[6].mxu1  ;;  %v1303_v32 = vpop.f32.mrb[7].mxu0 }
 0x170   : > { %v1348_v31 = vadd.f32 %v1340_v8, %v396_v7  ;;  %v1344_v33 = vpop.f32.mrb[7].mxu1 }
 0x171   : > { %v1349_v34 = vadd.f32 %v1342_v28, %v397_v26 }
 0x172   : > { %1352 = vst [vmem:[#allocation2 + $0x10] sm:$0xff] %v1348_v31 }
 0x173   : > { %1353 = vst [vmem:[#allocation2 + $0x18] sm:$0xff] %v1349_v34 }
 0x179   : > { %v1360_v49 = vld [vmem:[#allocation2 + $0x10] sm:$0xff] }
 0x17a   : > { %v1361_v50 = vld [vmem:[#allocation2 + $0x18] sm:$0xff]  ;;  %v1386_v59 = vmul.f32 %v1375_v51, %v1360_v49 }
 0x17b   : > { %v1387_v60 = vmul.f32 %v1379_v52, %v1361_v50 }
 0x17c   : > { %v1412_v1 = vadd.f32 %v1401_v53, %v1386_v59 }
 0x17d   : > { %v1413_v2 = vadd.f32 %v1405_v54, %v1387_v60 }
 0x17e   : > { %v1420_v5 = vadd.f32 %v1416_v63, %v1412_v1 }
 0x17f   : > { %v1421_v6 = vadd.f32 %v1417_v0, %v1413_v2 }
 0x180   : > { %v1424_v11 = vmax.f32 %v1420_v5, 0.0 }
 0x181   : > { %v1425_v12 = vmax.f32 %v1421_v6, 0.0 }
 0x183   : > { %v1748_v14 = vpack.c.bf16 %v1425_v12, %v1424_v11 }
 0x185   : > { %1443 = vst [vmem:[%s2239_s5 + $0x8] sm:$0xff] %v1748_v14 }
 0x186 PF: > { %s15_s20 = sadd.s32 1, %s1992_s20   ;;  %s2240_s18 = smov %s1988_s19 }
 0x187   : > { %p12_p8 = scmp.ge.s32.totalorder %s15_s20, 11   ;;  %s2241_s19 = smov %s2243_s21 }
 0x189   :  { %14 = sbr.rel (!%p12_p8) target bundleno = 2 (0x2), region = 90 }

// kernel: _lambda_.39
= control target key start
LH: loop header
LB: loop body
LE: loop exit
PB: predicated region body
PF: predicated region fallthrough
CT: control target
= control target key end

     0   :  { %s992_s1 = inlined_call_operand.vmem [shape: bf16[256,512], index: 1, kind: input, shape index: {}]   ;;  %s993_s0 = inlined_call_operand.vmem [shape: bf16[8,256], index: 0, kind: input, shape index: {}]   ;;  %s994_s2 = inlined_call_operand.vmem [shape: f32[1,512], index: 2, kind: input, shape index: {}]   ;;  %s995_s3 = inlined_call_operand.vmem [shape: f32[1,512], index: 3, kind: input, shape index: {}]   ;;  %s996_s4 = inlined_call_operand.vmem [shape: bf16[8,512], index: 4, kind: output, shape index: {}]  }
   0x1   :  { %v662_v0 = vld [vmem:[%s992_s1 + $0x4] ss:$16 sps:$4 sm:$0xff]   ;;  %v664_v1 = vld [vmem:[%s992_s1 + $0xc] ss:$16 sps:$4 sm:$0xff]   ;;  %v666_v2 = vld [vmem:[%s992_s1] ss:$16 sps:$4 sm:$0xff]  }
   0x2   :  { %421 = vmatprep.subr.bf16.mxu0 %v662_v0  ;;  %v667_v3 = vld [vmem:[%s992_s1 + $0x8] ss:$16 sps:$4 sm:$0xff]   ;;  %462 = vmatprep.subr.bf16.mxu1 %v664_v1  ;;  %v668_v4 = vld [vmem:[%s992_s1 + $0x24] ss:$16 sps:$4 sm:$0xff]   ;;  %v670_v5 = vld [vmem:[%s992_s1 + $0x2c] ss:$16 sps:$4 sm:$0xff]  }
   0x3   :  { %422 = vmatpush1.bf16.msra.mxu0 %v666_v2  ;;  %463 = vmatpush1.bf16.msra.mxu1 %v667_v3  ;;  %v672_v6 = vld [vmem:[%s992_s1 + $0x20] ss:$16 sps:$4 sm:$0xff]   ;;  %v673_v7 = vld [vmem:[%s992_s1 + $0x28] ss:$16 sps:$4 sm:$0xff]   ;;  %v674_v8 = vld [vmem:[%s992_s1 + $0x44] ss:$16 sps:$4 sm:$0xff]   ;;  %v520_v3 = vlaneseq }
   0x4   :  { %423 = vmatprep.subr.bf16.mxu0 %v668_v4  ;;  %464 = vmatprep.subr.bf16.mxu1 %v670_v5  ;;  %v676_v9 = vld [vmem:[%s992_s1 + $0x4c] ss:$16 sps:$4 sm:$0xff]   ;;  %v678_v10 = vld [vmem:[%s992_s1 + $0x40] ss:$16 sps:$4 sm:$0xff]   ;;  %v679_v11 = vld [vmem:[%s992_s1 + $0x48] ss:$16 sps:$4 sm:$0xff]  }
   0x5   :  { %v680_v12 = vld [vmem:[%s992_s1 + $0x64] ss:$16 sps:$4 sm:$0xff]   ;;  %v682_v13 = vld [vmem:[%s992_s1 + $0x6c] ss:$16 sps:$4 sm:$0xff]   ;;  %v684_v14 = vld [vmem:[%s992_s1 + $0x60] ss:$16 sps:$4 sm:$0xff]  }
   0x6   :  { %v685_v15 = vld [vmem:[%s992_s1 + $0x68] ss:$16 sps:$4 sm:$0xff]   ;;  %v686_v16 = vld [vmem:[%s992_s1 + $0x84] ss:$16 sps:$4 sm:$0xff]   ;;  %v688_v17 = vld [vmem:[%s992_s1 + $0x8c] ss:$16 sps:$4 sm:$0xff]  }
   0x7   :  { %424 = vmatpush1.bf16.msra.mxu0 %v672_v6  ;;  %465 = vmatpush1.bf16.msra.mxu1 %v673_v7  ;;  %v690_v18 = vld [vmem:[%s992_s1 + $0x80] ss:$16 sps:$4 sm:$0xff]   ;;  %v691_v19 = vld [vmem:[%s992_s1 + $0x88] ss:$16 sps:$4 sm:$0xff]   ;;  %v692_v20 = vld [vmem:[%s992_s1 + $0xa4] ss:$16 sps:$4 sm:$0xff]  }
   0x8   :  { %425 = vmatprep.subr.bf16.mxu0 %v674_v8  ;;  %466 = vmatprep.subr.bf16.mxu1 %v676_v9  ;;  %v694_v21 = vld [vmem:[%s992_s1 + $0xac] ss:$16 sps:$4 sm:$0xff]   ;;  %v696_v22 = vld [vmem:[%s992_s1 + $0xa0] ss:$16 sps:$4 sm:$0xff]   ;;  %v697_v23 = vld [vmem:[%s992_s1 + $0xa8] ss:$16 sps:$4 sm:$0xff]  }
   0x9   :  { %v698_v24 = vld [vmem:[%s992_s1 + $0xc4] ss:$16 sps:$4 sm:$0xff]   ;;  %v700_v25 = vld [vmem:[%s992_s1 + $0xcc] ss:$16 sps:$4 sm:$0xff]   ;;  %v702_v26 = vld [vmem:[%s992_s1 + $0xc0] ss:$16 sps:$4 sm:$0xff]  }
   0xa   :  { %v703_v27 = vld [vmem:[%s992_s1 + $0xc8] ss:$16 sps:$4 sm:$0xff]   ;;  %v704_v28 = vld [vmem:[%s992_s1 + $0xe4] ss:$16 sps:$4 sm:$0xff]   ;;  %v706_v29 = vld [vmem:[%s992_s1 + $0xec] ss:$16 sps:$4 sm:$0xff]  }
   0xb   :  { %426 = vmatpush1.bf16.msra.mxu0 %v678_v10  ;;  %467 = vmatpush1.bf16.msra.mxu1 %v679_v11  ;;  %v708_v30 = vld [vmem:[%s992_s1 + $0xe0] ss:$16 sps:$4 sm:$0xff]   ;;  %v709_v31 = vld [vmem:[%s992_s1 + $0xe8] ss:$16 sps:$4 sm:$0xff]   ;;  %v710_v32 = vld [vmem:[%s992_s1 + $0x104] ss:$16 sps:$4 sm:$0xff]  }
   0xc   :  { %427 = vmatprep.subr.bf16.mxu0 %v680_v12  ;;  %468 = vmatprep.subr.bf16.mxu1 %v682_v13  ;;  %v712_v33 = vld [vmem:[%s992_s1 + $0x10c] ss:$16 sps:$4 sm:$0xff]   ;;  %v714_v34 = vld [vmem:[%s992_s1 + $0x100] ss:$16 sps:$4 sm:$0xff]   ;;  %v715_v35 = vld [vmem:[%s992_s1 + $0x108] ss:$16 sps:$4 sm:$0xff]  }
   0xd   :  { %v716_v36 = vld [vmem:[%s992_s1 + $0x124] ss:$16 sps:$4 sm:$0xff]   ;;  %v718_v37 = vld [vmem:[%s992_s1 + $0x12c] ss:$16 sps:$4 sm:$0xff]   ;;  %v720_v38 = vld [vmem:[%s992_s1 + $0x120] ss:$16 sps:$4 sm:$0xff]  }
   0xe   :  { %v721_v39 = vld [vmem:[%s992_s1 + $0x128] ss:$16 sps:$4 sm:$0xff]   ;;  %v722_v40 = vld [vmem:[%s992_s1 + $0x144] ss:$16 sps:$4 sm:$0xff]   ;;  %v724_v41 = vld [vmem:[%s992_s1 + $0x14c] ss:$16 sps:$4 sm:$0xff]  }
   0xf   :  { %428 = vmatpush1.bf16.msra.mxu0 %v684_v14  ;;  %469 = vmatpush1.bf16.msra.mxu1 %v685_v15  ;;  %v726_v42 = vld [vmem:[%s992_s1 + $0x140] ss:$16 sps:$4 sm:$0xff]   ;;  %v727_v43 = vld [vmem:[%s992_s1 + $0x148] ss:$16 sps:$4 sm:$0xff]   ;;  %v728_v44 = vld [vmem:[%s992_s1 + $0x164] ss:$16 sps:$4 sm:$0xff]  }
  0x10   :  { %429 = vmatprep.subr.bf16.mxu0 %v686_v16  ;;  %470 = vmatprep.subr.bf16.mxu1 %v688_v17  ;;  %v730_v45 = vld [vmem:[%s992_s1 + $0x16c] ss:$16 sps:$4 sm:$0xff]   ;;  %v29_v46 = vld [vmem:[%s993_s0] sm:$0xff]  ;;  %v733_v49 = vld [vmem:[%s992_s1 + $0x168] ss:$16 sps:$4 sm:$0xff]   ;;  %v521_v4 = vshrl.u32 %v520_v3, 7 }
  0x11   :  { %v593_v47 = vcombine.high %v29_v46, %v29_v46  ;;  %v732_v48 = vld [vmem:[%s992_s1 + $0x160] ss:$16 sps:$4 sm:$0xff]   ;;  %v734_v50 = vld [vmem:[%s992_s1 + $0x184] ss:$16 sps:$4 sm:$0xff]   ;;  %v736_v51 = vld [vmem:[%s992_s1 + $0x18c] ss:$16 sps:$4 sm:$0xff]   ;;  %v592_v2 = vcombine.low %v29_v46, %v29_v46 }
  0x12   :  { %v738_v52 = vld [vmem:[%s992_s1 + $0x180] ss:$16 sps:$4 sm:$0xff]   ;;  %v739_v53 = vld [vmem:[%s992_s1 + $0x188] ss:$16 sps:$4 sm:$0xff]   ;;  %v740_v54 = vld [vmem:[%s992_s1 + $0x1a4] ss:$16 sps:$4 sm:$0xff]  }
  0x13   :  { %430 = vmatpush1.bf16.msra.mxu0 %v690_v18  ;;  %471 = vmatpush1.bf16.msra.mxu1 %v691_v19  ;;  %v742_v55 = vld [vmem:[%s992_s1 + $0x1ac] ss:$16 sps:$4 sm:$0xff]   ;;  %v744_v56 = vld [vmem:[%s992_s1 + $0x1a0] ss:$16 sps:$4 sm:$0xff]   ;;  %v745_v57 = vld [vmem:[%s992_s1 + $0x1a8] ss:$16 sps:$4 sm:$0xff]  }
  0x14   :  { %431 = vmatprep.subr.bf16.mxu0 %v692_v20  ;;  %472 = vmatprep.subr.bf16.mxu1 %v694_v21  ;;  %v746_v58 = vld [vmem:[%s992_s1 + $0x1c4] ss:$16 sps:$4 sm:$0xff]   ;;  %v748_v59 = vld [vmem:[%s992_s1 + $0x1cc] ss:$16 sps:$4 sm:$0xff]   ;;  %v750_v60 = vld [vmem:[%s992_s1 + $0x1c0] ss:$16 sps:$4 sm:$0xff]  }
  0x15   :  { %453 = vmatprep.mubr.bf16.mxu0 %v593_v47  ;;  %494 = vmatprep.mubr.bf16.mxu1 %v593_v47  ;;  %v751_v61 = vld [vmem:[%s992_s1 + $0x1c8] ss:$16 sps:$4 sm:$0xff]   ;;  %v752_v62 = vld [vmem:[%s992_s1 + $0x1e4] ss:$16 sps:$4 sm:$0xff]   ;;  %v754_v63 = vld [vmem:[%s992_s1 + $0x1ec] ss:$16 sps:$4 sm:$0xff]  }
  0x16   :  { %v756_v0 = vld [vmem:[%s992_s1 + $0x1e0] ss:$16 sps:$4 sm:$0xff]   ;;  %v757_v1 = vld [vmem:[%s992_s1 + $0x1e8] ss:$16 sps:$4 sm:$0xff]   ;;  %v522_v5 = vsub.s32 0, %v521_v4  ;;  %v530_v6 = vsub.s32 2, %v521_v4 }
  0x17   :  { %432 = vmatpush1.bf16.msra.mxu0 %v696_v22  ;;  %473 = vmatpush1.bf16.msra.mxu1 %v697_v23  ;;  %v518_v7 = vld [vmem:[%s994_s2] sm:$0xf]  ;;  %v526_v8 = vsub.s32 1, %v521_v4  ;;  %v534_v9 = vsub.s32 3, %v521_v4 }
  0x18   :  { %433 = vmatprep.subr.bf16.mxu0 %v698_v24  ;;  %474 = vmatprep.subr.bf16.mxu1 %v700_v25  ;;  %v544_v10 = vld [vmem:[%s995_s3] sm:$0xf]  ;;  %v523_v11 = vrot.slane %v518_v7, %v522_v5  ;;  %v531_v12 = vrot.slane %v518_v7, %v530_v6 }
  0x19   :  { %v527_v13 = vrot.slane %v518_v7, %v526_v8  ;;  %v535_v14 = vrot.slane %v518_v7, %v534_v9  ;;  %v549_v15 = vrot.slane %v544_v10, %v522_v5  ;;  %v557_v16 = vrot.slane %v544_v10, %v530_v6 }
  0x1a   :  { %v553_v19 = vrot.slane %v544_v10, %v526_v8  ;;  %v561_v20 = vrot.slane %v544_v10, %v534_v9 }
  0x1b   :  { %434 = vmatpush1.bf16.msra.mxu0 %v702_v26  ;;  %475 = vmatpush1.bf16.msra.mxu1 %v703_v27 }
  0x1c   :  { %435 = vmatprep.subr.bf16.mxu0 %v704_v28  ;;  %476 = vmatprep.subr.bf16.mxu1 %v706_v29 }
  0x1f   :  { %436 = vmatpush1.bf16.msra.mxu0 %v708_v30  ;;  %477 = vmatpush1.bf16.msra.mxu1 %v709_v31 }
  0x20   :  { %437 = vmatprep.subr.bf16.mxu0 %v710_v32  ;;  %478 = vmatprep.subr.bf16.mxu1 %v712_v33 }
  0x23   :  { %438 = vmatpush1.bf16.msra.mxu0 %v714_v34  ;;  %479 = vmatpush1.bf16.msra.mxu1 %v715_v35 }
  0x24   :  { %439 = vmatprep.subr.bf16.mxu0 %v716_v36  ;;  %480 = vmatprep.subr.bf16.mxu1 %v718_v37 }
  0x27   :  { %440 = vmatpush1.bf16.msra.mxu0 %v720_v38  ;;  %481 = vmatpush1.bf16.msra.mxu1 %v721_v39 }
  0x28   :  { %441 = vmatprep.subr.bf16.mxu0 %v722_v40  ;;  %482 = vmatprep.subr.bf16.mxu1 %v724_v41 }
  0x2b   :  { %442 = vmatpush1.bf16.msra.mxu0 %v726_v42  ;;  %483 = vmatpush1.bf16.msra.mxu1 %v727_v43 }
  0x2c   :  { %443 = vmatprep.subr.bf16.mxu0 %v728_v44  ;;  %484 = vmatprep.subr.bf16.mxu1 %v730_v45 }
  0x2f   :  { %444 = vmatpush1.bf16.msra.mxu0 %v732_v48  ;;  %485 = vmatpush1.bf16.msra.mxu1 %v733_v49 }
  0x30   :  { %445 = vmatprep.subr.bf16.mxu0 %v734_v50  ;;  %486 = vmatprep.subr.bf16.mxu1 %v736_v51 }
  0x33   :  { %446 = vmatpush1.bf16.msra.mxu0 %v738_v52  ;;  %487 = vmatpush1.bf16.msra.mxu1 %v739_v53 }
  0x34   :  { %447 = vmatprep.subr.bf16.mxu0 %v740_v54  ;;  %488 = vmatprep.subr.bf16.mxu1 %v742_v55 }
  0x37   :  { %448 = vmatpush1.bf16.msra.mxu0 %v744_v56  ;;  %489 = vmatpush1.bf16.msra.mxu1 %v745_v57 }
  0x38   :  { %449 = vmatprep.subr.bf16.mxu0 %v746_v58  ;;  %490 = vmatprep.subr.bf16.mxu1 %v748_v59 }
  0x3b   :  { %450 = vmatpush1.bf16.msra.mxu0 %v750_v60  ;;  %491 = vmatpush1.bf16.msra.mxu1 %v751_v61 }
  0x3c   :  { %451 = vmatprep.subr.bf16.mxu0 %v752_v62  ;;  %492 = vmatprep.subr.bf16.mxu1 %v754_v63 }
  0x3f   :  { %452 = vmatpush1.bf16.msra.mxu0 %v756_v0  ;;  %493 = vmatpush1.bf16.msra.mxu1 %v757_v1 }
  0x42   :  { %454 = vmatmul.mubr.bf16.vlgmr.msra.gmra.mrb[0].mxu0 %v592_v2  ;;  %495 = vmatmul.mubr.bf16.vlgmr.msra.gmra.mrb[0].mxu1 %v592_v2 }
 0x115   :  { %v455_v17 = vpop.f32.mrb[0].mxu0  ;;  %v496_v18 = vpop.f32.mrb[0].mxu1 }
 0x116   :  { %v540_v21 = vmul.f32 %v523_v11, %v455_v17  ;;  %v542_v22 = vmul.f32 %v531_v12, %v496_v18  ;;  %v457_v23 = vpop.f32.mrb[1].mxu0  ;;  %v498_v24 = vpop.f32.mrb[1].mxu1 }
 0x117   :  { %v541_v25 = vmul.f32 %v527_v13, %v457_v23  ;;  %v543_v26 = vmul.f32 %v535_v14, %v498_v24  ;;  %v459_v27 = vpop.f32.mrb[2].mxu0  ;;  %v500_v28 = vpop.f32.mrb[2].mxu1 }
 0x118   :  { %v566_v29 = vadd.f32 %v549_v15, %v540_v21  ;;  %v568_v30 = vadd.f32 %v557_v16, %v542_v22  ;;  %v460_v31 = vpop.f32.mrb[3].mxu0  ;;  %v501_v32 = vpop.f32.mrb[3].mxu1 }
 0x119   :  { %v567_v33 = vadd.f32 %v553_v19, %v541_v25  ;;  %v569_v34 = vadd.f32 %v561_v20, %v543_v26 }
 0x11b   :  { %v660_v35 = vpack.c.bf16 %v567_v33, %v566_v29  ;;  %v661_v36 = vpack.c.bf16 %v569_v34, %v568_v30 }
 0x11d   :  { %586 = vst [vmem:[%s996_s4] sm:$0xff] %v660_v35  ;;  %587 = vst [vmem:[%s996_s4 + $0x8] sm:$0xff] %v661_v36 }

// kernel: _lambda_.43
= control target key start
LH: loop header
LB: loop body
LE: loop exit
PB: predicated region body
PF: predicated region fallthrough
CT: control target
= control target key end

     0   :  { %v651_v39 = vmov 0.0   ;;  %vm652_vm0 = vmmov 0   ;;  %s810_s1 = inlined_call_operand.vmem [shape: bf16[512,128], index: 1, kind: input, shape index: {}]   ;;  %s811_s0 = inlined_call_operand.vmem [shape: bf16[8,512], index: 0, kind: input, shape index: {}]   ;;  %s812_s3 = inlined_call_operand.vmem [shape: bf16[128,128], index: 3, kind: input, shape index: {}]   ;;  %s813_s2 = inlined_call_operand.vmem [shape: f32[1,128], index: 2, kind: input, shape index: {}]   ;;  %s814_s4 = inlined_call_operand.vmem [shape: f32[8,128], index: 4, kind: output, shape index: {}]  }
   0x1   :  { %v607_v0 = vld [vmem:[%s810_s1 + $0x40] sm:$0xff]   ;;  %v611_v4 = vld [vmem:[%s810_s1 + $0x48] sm:$0xff]   ;;  %v615_v8 = vld [vmem:[%s810_s1 + $0x50] sm:$0xff]  }
   0x2   :  { %v608_v1 = vld [vmem:[%s810_s1 + $0xc0] sm:$0xff]   ;;  %532 = vmatprep.subr.bf16.mxu0 %v607_v0  ;;  %v612_v5 = vld [vmem:[%s810_s1 + $0xc8] sm:$0xff]   ;;  %v616_v9 = vld [vmem:[%s810_s1 + $0xd0] sm:$0xff]  }
   0x3   :  { %v609_v2 = vld [vmem:[%s810_s1] sm:$0xff]   ;;  %554 = vmatprep.subr.bf16.mxu1 %v608_v1  ;;  %v613_v6 = vld [vmem:[%s810_s1 + $0x8] sm:$0xff]   ;;  %v617_v10 = vld [vmem:[%s810_s1 + $0x10] sm:$0xff]  }
   0x4   :  { %v610_v3 = vld [vmem:[%s810_s1 + $0x80] sm:$0xff]   ;;  %533 = vmatpush3.bf16.msra.mxu0 %v609_v2  ;;  %v614_v7 = vld [vmem:[%s810_s1 + $0x88] sm:$0xff]   ;;  %v618_v11 = vld [vmem:[%s810_s1 + $0x90] sm:$0xff]  }
   0x5   :  { %555 = vmatpush3.bf16.msra.mxu1 %v610_v3  ;;  %534 = vmatprep.subr.bf16.mxu0 %v611_v4  ;;  %v619_v12 = vld [vmem:[%s810_s1 + $0x58] sm:$0xff]   ;;  %v623_v16 = vld [vmem:[%s810_s1 + $0x60] sm:$0xff]   ;;  %v627_v20 = vld [vmem:[%s810_s1 + $0x68] sm:$0xff]  }
   0x6   :  { %556 = vmatprep.subr.bf16.mxu1 %v612_v5  ;;  %v620_v13 = vld [vmem:[%s810_s1 + $0xd8] sm:$0xff]   ;;  %v624_v17 = vld [vmem:[%s810_s1 + $0xe0] sm:$0xff]   ;;  %v628_v21 = vld [vmem:[%s810_s1 + $0xe8] sm:$0xff]  }
   0x7   :  { %v621_v14 = vld [vmem:[%s810_s1 + $0x18] sm:$0xff]   ;;  %v625_v18 = vld [vmem:[%s810_s1 + $0x20] sm:$0xff]   ;;  %v629_v22 = vld [vmem:[%s810_s1 + $0x28] sm:$0xff]  }
   0x8   :  { %535 = vmatpush3.bf16.msra.mxu0 %v613_v6  ;;  %v622_v15 = vld [vmem:[%s810_s1 + $0x98] sm:$0xff]   ;;  %v626_v19 = vld [vmem:[%s810_s1 + $0xa0] sm:$0xff]   ;;  %v630_v23 = vld [vmem:[%s810_s1 + $0xa8] sm:$0xff]  }
   0x9   :  { %557 = vmatpush3.bf16.msra.mxu1 %v614_v7  ;;  %536 = vmatprep.subr.bf16.mxu0 %v615_v8  ;;  %v631_v24 = vld [vmem:[%s810_s1 + $0x70] sm:$0xff]   ;;  %v635_v28 = vld [vmem:[%s810_s1 + $0x78] sm:$0xff]   ;;  %v18_v32 = vld [vmem:[%s811_s0] sm:$0xff] }
   0xa   :  { %558 = vmatprep.subr.bf16.mxu1 %v616_v9  ;;  %v632_v25 = vld [vmem:[%s810_s1 + $0xf0] sm:$0xff]   ;;  %v636_v29 = vld [vmem:[%s810_s1 + $0xf8] sm:$0xff]   ;;  %v19_v33 = vld [vmem:[%s811_s0 + $0x8] sm:$0xff]  ;;  %v488_v34 = vcombine.low %v18_v32, %v18_v32  ;;  %v489_v35 = vcombine.high %v18_v32, %v18_v32 }
   0xb   :  { %v633_v26 = vld [vmem:[%s810_s1 + $0x30] sm:$0xff]   ;;  %v637_v30 = vld [vmem:[%s810_s1 + $0x38] sm:$0xff]   ;;  %v490_v36 = vcombine.low %v19_v33, %v19_v33  ;;  %v491_v37 = vcombine.high %v19_v33, %v19_v33  ;;  %v643_v38 = vld [vmem:[%s812_s3] sm:$0xff]  }
   0xc   :  { %537 = vmatpush3.bf16.msra.mxu0 %v617_v10  ;;  %v634_v27 = vld [vmem:[%s810_s1 + $0xb0] sm:$0xff]   ;;  %v638_v31 = vld [vmem:[%s810_s1 + $0xb8] sm:$0xff]   ;;  %329 = vmatprep.mubr.bf16.mxu0 %v489_v35  ;;  %v644_v40 = vld [vmem:[%s812_s3 + $0x8] sm:$0xff]  }
   0xd   :  { %559 = vmatpush3.bf16.msra.mxu1 %v618_v11  ;;  %538 = vmatprep.subr.bf16.mxu0 %v619_v12  ;;  %v645_v41 = vld [vmem:[%s812_s3 + $0x10] sm:$0xff]   ;;  %v646_v42 = vld [vmem:[%s812_s3 + $0x18] sm:$0xff]   ;;  %v647_v43 = vld [vmem:[%s812_s3 + $0x20] sm:$0xff]  }
   0xe   :  { %560 = vmatprep.subr.bf16.mxu1 %v620_v13  ;;  %369 = vmatprep.mubr.bf16.mxu1 %v491_v37  ;;  %v648_v44 = vld [vmem:[%s812_s3 + $0x28] sm:$0xff]   ;;  %v649_v45 = vld [vmem:[%s812_s3 + $0x30] sm:$0xff]   ;;  %v650_v46 = vld [vmem:[%s812_s3 + $0x38] sm:$0xff]  }
   0xf   :  { %v487_v49 = vld [vmem:[%s813_s2] ss:$0 sm:$0xff] }
  0x10   :  { %539 = vmatpush3.bf16.msra.mxu0 %v621_v14 }
  0x11   :  { %561 = vmatpush3.bf16.msra.mxu1 %v622_v15  ;;  %540 = vmatprep.subr.bf16.mxu0 %v623_v16 }
  0x12   :  { %562 = vmatprep.subr.bf16.mxu1 %v624_v17 }
  0x14   :  { %541 = vmatpush3.bf16.msra.mxu0 %v625_v18 }
  0x15   :  { %563 = vmatpush3.bf16.msra.mxu1 %v626_v19  ;;  %542 = vmatprep.subr.bf16.mxu0 %v627_v20 }
  0x16   :  { %564 = vmatprep.subr.bf16.mxu1 %v628_v21 }
  0x18   :  { %543 = vmatpush3.bf16.msra.mxu0 %v629_v22 }
  0x19   :  { %565 = vmatpush3.bf16.msra.mxu1 %v630_v23  ;;  %544 = vmatprep.subr.bf16.mxu0 %v631_v24 }
  0x1a   :  { %566 = vmatprep.subr.bf16.mxu1 %v632_v25 }
  0x1c   :  { %545 = vmatpush3.bf16.msra.mxu0 %v633_v26 }
  0x1d   :  { %567 = vmatpush3.bf16.msra.mxu1 %v634_v27  ;;  %546 = vmatprep.subr.bf16.mxu0 %v635_v28 }
  0x1e   :  { %568 = vmatprep.subr.bf16.mxu1 %v636_v29 }
  0x20   :  { %547 = vmatpush3.bf16.msra.mxu0 %v637_v30 }
  0x21   :  { %569 = vmatpush3.bf16.msra.mxu1 %v638_v31  ;;  %585 = vmatprep.subr.bf16.mxu0 %v651_v39 }
  0x23   :  { %330 = vmatmul.mubr.bf16.vlgmr.msra.gmra.mrb[0].mxu0 %v488_v34 }
  0x24   :  { %370 = vmatmul.mubr.bf16.vlgmr.msra.gmra.mrb[0].mxu1 %v490_v36  ;;  %586 = vmatpush3.bf16.msra.mxu0 %v643_v38 }
  0x25   :  { %587 = vmatprep.subr.bf16.mxu0 %v651_v39  ;;  %601 = vmatprep.mubr.msk.bf16.mxu0 %vm652_vm0, %v651_v39 }
  0x28   :  { %588 = vmatpush3.bf16.msra.mxu0 %v644_v40 }
  0x29   :  { %589 = vmatprep.subr.bf16.mxu0 %v651_v39 }
  0x2c   :  { %590 = vmatpush3.bf16.msra.mxu0 %v645_v41 }
  0x2d   :  { %591 = vmatprep.subr.bf16.mxu0 %v651_v39 }
  0x30   :  { %592 = vmatpush3.bf16.msra.mxu0 %v646_v42 }
  0x31   :  { %593 = vmatprep.subr.bf16.mxu0 %v651_v39 }
  0x34   :  { %594 = vmatpush3.bf16.msra.mxu0 %v647_v43 }
  0x35   :  { %595 = vmatprep.subr.bf16.mxu0 %v651_v39 }
  0x38   :  { %596 = vmatpush3.bf16.msra.mxu0 %v648_v44 }
  0x39   :  { %597 = vmatprep.subr.bf16.mxu0 %v651_v39 }
  0x3c   :  { %598 = vmatpush3.bf16.msra.mxu0 %v649_v45 }
  0x3d   :  { %599 = vmatprep.subr.bf16.mxu0 %v651_v39 }
  0x40   :  { %600 = vmatpush3.bf16.msra.mxu0 %v650_v46 }
  0xf6   :  { %v548_v47 = vpop.f32.mrb[0].mxu0 }
  0xf7   :  { %v570_v48 = vpop.f32.mrb[0].mxu1  ;;  %v549_v50 = vpop.f32.mrb[1].mxu0 }
  0xf8   :  { %v571_v51 = vpop.f32.mrb[1].mxu1  ;;  %v550_v52 = vadd.f32 %v549_v50, %v548_v47  ;;  %v551_v54 = vpop.f32.mrb[2].mxu0 }
  0xf9   :  { %v572_v53 = vadd.f32 %v571_v51, %v570_v48  ;;  %v573_v55 = vpop.f32.mrb[2].mxu1  ;;  %v552_v56 = vpop.f32.mrb[3].mxu0 }
  0xfa   :  { %v574_v57 = vpop.f32.mrb[3].mxu1  ;;  %v332_v58 = vadd.f32 %v550_v52, %v487_v49 }
  0xfc   :  { %v372_v59 = vadd.f32 %v572_v53, %v332_v58 }
  0xfe   :  { %v377_v60 = vpack.c.bf16 %v372_v59, %v372_v59 }
 0x100   :  { %602 = vmatmul.mubr.bf16.vlgmr.msra.gmra.mrb[4].mxu0 %v377_v60 }
 0x1d3   :  { %v476_v61 = vpop.f32.mrb[4].mxu0 }
 0x1d4   :  { %482 = vst [vmem:[%s814_s4] sm:$0xff] %v476_v61  ;;  %v603_v62 = vpop.f32.mrb[5].mxu0 }
 0x1d5   :  { %v479_v63 = vpop.f32.mrb[6].mxu0 }
 0x1d6   :  { %v604_v0 = vpop.f32.mrb[7].mxu0 }

// kernel: _lambda_.41
= control target key start
LH: loop header
LB: loop body
LE: loop exit
PB: predicated region body
PF: predicated region fallthrough
CT: control target
= control target key end

     0   :  { %s1927_s15 = smov 0   ;;  %s1929_s16 = smov 0   ;;  %s2124_s0 = inlined_call_operand.vmem [shape: bf16[8,4608], index: 0, kind: input, shape index: {}]   ;;  %s2125_s1 = inlined_call_operand.vmem [shape: bf16[4608,512], index: 1, kind: input, shape index: {}]   ;;  %s2126_s2 = inlined_call_operand.vmem [shape: f32[1,512], index: 2, kind: input, shape index: {}]   ;;  %s2127_s3 = inlined_call_operand.vmem [shape: f32[1,512], index: 3, kind: input, shape index: {}]   ;;  %s2128_s4 = inlined_call_operand.vmem [shape: bf16[8,512], index: 4, kind: output, shape index: {}]  }
   0x1   :  { %s1931_s17 = smov 0  }
   0x2 LB: > { %s26_s18 = sadd.s32 1, %s1895_s16  ;;  %p1507_p0 = scmp.ge.s32.totalorder %s1899_s17, 1  ;;  %s1899_s17 = sphi %s1931_s17, %s14_s17   ;;  %s1895_s16 = sphi %s1929_s16, %s2130_s16   ;;  %s1891_s15 = sphi %s1927_s15, %s2129_s15  }
   0x3   : > { %p27_p1 = scmp.ge.s32.totalorder %s26_s18, 9  ;;  %p229_p2 = scmp.lt.s32.totalorder %s1899_s17, 10 }
   0x5   : > { %s2132_s18 = smov (%p27_p1, %s26_s18), 0  ;;  %p230_p3 = pnand %p1507_p0, %p229_p2 }
   0x6   : > { %s1508_s19 = sshll.u32 (!%p230_p3), %s1891_s15, 2  ;;  %s1510_s20 = sshll.u32 (!%p230_p3), %s1891_s15, 6 }
   0x7   : > { %233 = sbr.rel (%p230_p3) target bundleno = 388 (0x184), region = 36  ;;  %p284_p4 = scmp.lt.s32.totalorder (!%p230_p3), %s1508_s19, 35 }
   0x8   : > { %p293_p5 = scmp.lt.s32.totalorder (!%p230_p3), %s1510_s20, 575  ;;  %p1513_p6 = scmp.ne.s32.totalorder (!%p230_p3), %s1891_s15, 0 }
   0xe   : > { %s2134_s19 = smov (!%p284_p4, %s1508_s19), 35  ;;  %s2136_s20 = smov (!%p293_p5, %s1510_s20), 575 }
   0xf   : > { %s1509_s21 = sshll.u32 %s2134_s19, 2  ;;  %s1653_s25 = sshll.u32 %s2136_s20, 4  ;;  %v1901_v0 = vmov (!%p1513_p6), 0.0  }
  0x10   : > { %s1952_s24 = scalar_lea.vmem %s2124_s0, %s1509_s21  ;;  %s1957_s28 = scalar_lea.vmem %s2125_s1, %s1653_s25  ;;  %327 = vst [vmem:[#allocation2] sm:$0xff] (!%p1513_p6), %v1901_v0  ;;  %328 = vst [vmem:[#allocation2 + $0x8] sm:$0xff] (!%p1513_p6), %v1901_v0 }
  0x11   : > { %326 = sbr.rel (%p1513_p6) target bundleno = 24 (0x18), region = 40  ;;  %329 = vst [vmem:[#allocation2 + $0x10] sm:$0xff] (!%p1513_p6), %v1901_v0  ;;  %330 = vst [vmem:[#allocation2 + $0x18] sm:$0xff] (!%p1513_p6), %v1901_v0 }
  0x18 PF: > { %v1681_v1 = vld [vmem:[%s1957_s28 + $0x4] ss:$16 sps:$4 sm:$0xff]   ;;  %v1685_v3 = vld [vmem:[%s1957_s28] ss:$16 sps:$4 sm:$0xff]   ;;  %v336_v49 = vld [vmem:[%s1952_s24 + $0x8] sm:$0xff]  ;;  %p1646_p7 = scmp.ne.s32.totalorder %s1891_s15, 8 }
  0x19   : > { %v1683_v2 = vld [vmem:[%s1957_s28 + $0x204] ss:$16 sps:$4 sm:$0xff]   ;;  %1119 = vmatprep.subr.bf16.mxu0 %v1681_v1  ;;  %v1686_v4 = vld [vmem:[%s1957_s28 + $0x200] ss:$16 sps:$4 sm:$0xff]   ;;  %v1517_v52 = vcombine.high %v336_v49, %v336_v49 }
  0x1a   : > { %1160 = vmatprep.subr.bf16.mxu1 %v1683_v2  ;;  %v1687_v5 = vld [vmem:[%s1957_s28 + $0x24] ss:$16 sps:$4 sm:$0xff]   ;;  %1120 = vmatpush1.bf16.msra.mxu0 %v1685_v3  ;;  %v1691_v7 = vld [vmem:[%s1957_s28 + $0x20] ss:$16 sps:$4 sm:$0xff]  }
  0x1b   : > { %1161 = vmatpush1.bf16.msra.mxu1 %v1686_v4  ;;  %v1689_v6 = vld [vmem:[%s1957_s28 + $0x224] ss:$16 sps:$4 sm:$0xff]   ;;  %1121 = vmatprep.subr.bf16.mxu0 %v1687_v5  ;;  %v1692_v8 = vld [vmem:[%s1957_s28 + $0x220] ss:$16 sps:$4 sm:$0xff]   ;;  %v1783_v5 = vld [vmem:[%s1957_s28 + $0xc] ss:$16 sps:$4 sm:$0xff]  }
  0x1c   : > { %1162 = vmatprep.subr.bf16.mxu1 %v1689_v6  ;;  %v1693_v9 = vld [vmem:[%s1957_s28 + $0x44] ss:$16 sps:$4 sm:$0xff]   ;;  %v1697_v11 = vld [vmem:[%s1957_s28 + $0x40] ss:$16 sps:$4 sm:$0xff]   ;;  %1192 = vmatprep.mubr.bf16.mxu1 %v1517_v52  ;;  %v1786_v6 = vld [vmem:[%s1957_s28 + $0x20c] ss:$16 sps:$4 sm:$0xff]  }
  0x1d   : > { %v1695_v10 = vld [vmem:[%s1957_s28 + $0x244] ss:$16 sps:$4 sm:$0xff]   ;;  %v1698_v12 = vld [vmem:[%s1957_s28 + $0x240] ss:$16 sps:$4 sm:$0xff]  }
  0x1e   : > { %1122 = vmatpush1.bf16.msra.mxu0 %v1691_v7  ;;  %v1699_v13 = vld [vmem:[%s1957_s28 + $0x64] ss:$16 sps:$4 sm:$0xff]   ;;  %v1703_v15 = vld [vmem:[%s1957_s28 + $0x60] ss:$16 sps:$4 sm:$0xff]  }
  0x1f   : > { %1163 = vmatpush1.bf16.msra.mxu1 %v1692_v8  ;;  %1123 = vmatprep.subr.bf16.mxu0 %v1693_v9  ;;  %v1701_v14 = vld [vmem:[%s1957_s28 + $0x264] ss:$16 sps:$4 sm:$0xff]   ;;  %v1704_v16 = vld [vmem:[%s1957_s28 + $0x260] ss:$16 sps:$4 sm:$0xff]   ;;  %v2033_v8 = vcombine.low %v336_v49, %v336_v49  ;;  %v1781_v9 = vld [vmem:[%s1957_s28 + $0x8] ss:$16 sps:$4 sm:$0xff]  }
  0x20   : > { %1164 = vmatprep.subr.bf16.mxu1 %v1695_v10  ;;  %v1705_v17 = vld [vmem:[%s1957_s28 + $0x84] ss:$16 sps:$4 sm:$0xff]   ;;  %v1709_v19 = vld [vmem:[%s1957_s28 + $0x80] ss:$16 sps:$4 sm:$0xff]   ;;  %v1784_v10 = vld [vmem:[%s1957_s28 + $0x208] ss:$16 sps:$4 sm:$0xff]  }
  0x21   : > { %v1707_v18 = vld [vmem:[%s1957_s28 + $0x284] ss:$16 sps:$4 sm:$0xff]   ;;  %v1710_v20 = vld [vmem:[%s1957_s28 + $0x280] ss:$16 sps:$4 sm:$0xff]   ;;  %v1841_v49 = vld [vmem:[%s1957_s28 + $0x148] ss:$16 sps:$4 sm:$0xff]  }
  0x22   : > { %1124 = vmatpush1.bf16.msra.mxu0 %v1697_v11  ;;  %v1711_v21 = vld [vmem:[%s1957_s28 + $0xa4] ss:$16 sps:$4 sm:$0xff]   ;;  %v1715_v23 = vld [vmem:[%s1957_s28 + $0xa0] ss:$16 sps:$4 sm:$0xff]   ;;  %v1789_v11 = vld [vmem:[%s1957_s28 + $0x2c] ss:$16 sps:$4 sm:$0xff]  }
  0x23   : > { %1165 = vmatpush1.bf16.msra.mxu1 %v1698_v12  ;;  %1125 = vmatprep.subr.bf16.mxu0 %v1699_v13  ;;  %v1713_v22 = vld [vmem:[%s1957_s28 + $0x2a4] ss:$16 sps:$4 sm:$0xff]   ;;  %v1716_v24 = vld [vmem:[%s1957_s28 + $0x2a0] ss:$16 sps:$4 sm:$0xff]   ;;  %v1792_v12 = vld [vmem:[%s1957_s28 + $0x22c] ss:$16 sps:$4 sm:$0xff]  }
  0x24   : > { %1166 = vmatprep.subr.bf16.mxu1 %v1701_v14  ;;  %v1717_v25 = vld [vmem:[%s1957_s28 + $0xc4] ss:$16 sps:$4 sm:$0xff]   ;;  %v1721_v27 = vld [vmem:[%s1957_s28 + $0xc0] ss:$16 sps:$4 sm:$0xff]   ;;  %v1787_v13 = vld [vmem:[%s1957_s28 + $0x28] ss:$16 sps:$4 sm:$0xff]  }
  0x25   : > { %v1719_v26 = vld [vmem:[%s1957_s28 + $0x2c4] ss:$16 sps:$4 sm:$0xff]   ;;  %v1722_v28 = vld [vmem:[%s1957_s28 + $0x2c0] ss:$16 sps:$4 sm:$0xff]   ;;  %v1790_v14 = vld [vmem:[%s1957_s28 + $0x228] ss:$16 sps:$4 sm:$0xff]  }
  0x26   : > { %1126 = vmatpush1.bf16.msra.mxu0 %v1703_v15  ;;  %v1723_v29 = vld [vmem:[%s1957_s28 + $0xe4] ss:$16 sps:$4 sm:$0xff]   ;;  %v1727_v31 = vld [vmem:[%s1957_s28 + $0xe0] ss:$16 sps:$4 sm:$0xff]   ;;  %v1795_v15 = vld [vmem:[%s1957_s28 + $0x4c] ss:$16 sps:$4 sm:$0xff]  }
  0x27   : > { %1167 = vmatpush1.bf16.msra.mxu1 %v1704_v16  ;;  %1127 = vmatprep.subr.bf16.mxu0 %v1705_v17  ;;  %v1725_v30 = vld [vmem:[%s1957_s28 + $0x2e4] ss:$16 sps:$4 sm:$0xff]   ;;  %v1728_v32 = vld [vmem:[%s1957_s28 + $0x2e0] ss:$16 sps:$4 sm:$0xff]   ;;  %v1798_v16 = vld [vmem:[%s1957_s28 + $0x24c] ss:$16 sps:$4 sm:$0xff]  }
  0x28   : > { %1168 = vmatprep.subr.bf16.mxu1 %v1707_v18  ;;  %v1729_v33 = vld [vmem:[%s1957_s28 + $0x104] ss:$16 sps:$4 sm:$0xff]   ;;  %v1733_v35 = vld [vmem:[%s1957_s28 + $0x100] ss:$16 sps:$4 sm:$0xff]   ;;  %v1793_v17 = vld [vmem:[%s1957_s28 + $0x48] ss:$16 sps:$4 sm:$0xff]  }
  0x29   : > { %v1731_v34 = vld [vmem:[%s1957_s28 + $0x304] ss:$16 sps:$4 sm:$0xff]   ;;  %v1734_v36 = vld [vmem:[%s1957_s28 + $0x300] ss:$16 sps:$4 sm:$0xff]   ;;  %v1796_v18 = vld [vmem:[%s1957_s28 + $0x248] ss:$16 sps:$4 sm:$0xff]  }
  0x2a   : > { %1128 = vmatpush1.bf16.msra.mxu0 %v1709_v19  ;;  %v1735_v37 = vld [vmem:[%s1957_s28 + $0x124] ss:$16 sps:$4 sm:$0xff]   ;;  %v1739_v39 = vld [vmem:[%s1957_s28 + $0x120] ss:$16 sps:$4 sm:$0xff]   ;;  %v1801_v19 = vld [vmem:[%s1957_s28 + $0x6c] ss:$16 sps:$4 sm:$0xff]  }
  0x2b   : > { %1169 = vmatpush1.bf16.msra.mxu1 %v1710_v20  ;;  %1129 = vmatprep.subr.bf16.mxu0 %v1711_v21  ;;  %v1737_v38 = vld [vmem:[%s1957_s28 + $0x324] ss:$16 sps:$4 sm:$0xff]   ;;  %v1740_v40 = vld [vmem:[%s1957_s28 + $0x320] ss:$16 sps:$4 sm:$0xff]   ;;  %v1804_v20 = vld [vmem:[%s1957_s28 + $0x26c] ss:$16 sps:$4 sm:$0xff]  }
  0x2c   : > { %1170 = vmatprep.subr.bf16.mxu1 %v1713_v22  ;;  %v1741_v41 = vld [vmem:[%s1957_s28 + $0x144] ss:$16 sps:$4 sm:$0xff]   ;;  %v1745_v43 = vld [vmem:[%s1957_s28 + $0x140] ss:$16 sps:$4 sm:$0xff]   ;;  %v1799_v21 = vld [vmem:[%s1957_s28 + $0x68] ss:$16 sps:$4 sm:$0xff]  }
  0x2d   : > { %v1743_v42 = vld [vmem:[%s1957_s28 + $0x344] ss:$16 sps:$4 sm:$0xff]   ;;  %v1746_v44 = vld [vmem:[%s1957_s28 + $0x340] ss:$16 sps:$4 sm:$0xff]   ;;  %v1802_v22 = vld [vmem:[%s1957_s28 + $0x268] ss:$16 sps:$4 sm:$0xff]  }
  0x2e   : > { %1130 = vmatpush1.bf16.msra.mxu0 %v1715_v23  ;;  %v1747_v45 = vld [vmem:[%s1957_s28 + $0x164] ss:$16 sps:$4 sm:$0xff]   ;;  %v1751_v50 = vld [vmem:[%s1957_s28 + $0x160] ss:$16 sps:$4 sm:$0xff]   ;;  %v1807_v23 = vld [vmem:[%s1957_s28 + $0x8c] ss:$16 sps:$4 sm:$0xff]  }
  0x2f   : > { %1171 = vmatpush1.bf16.msra.mxu1 %v1716_v24  ;;  %1131 = vmatprep.subr.bf16.mxu0 %v1717_v25  ;;  %v1749_v46 = vld [vmem:[%s1957_s28 + $0x364] ss:$16 sps:$4 sm:$0xff]   ;;  %v1752_v51 = vld [vmem:[%s1957_s28 + $0x360] ss:$16 sps:$4 sm:$0xff]   ;;  %v1810_v24 = vld [vmem:[%s1957_s28 + $0x28c] ss:$16 sps:$4 sm:$0xff]  }
  0x30   : > { %1172 = vmatprep.subr.bf16.mxu1 %v1719_v26  ;;  %v335_v47 = vld [vmem:[%s1952_s24] sm:$0xff]  ;;  %v1805_v25 = vld [vmem:[%s1957_s28 + $0x88] ss:$16 sps:$4 sm:$0xff]  }
  0x31   : > { %v2007_v48 = vcombine.high %v335_v47, %v335_v47  ;;  %v1753_v53 = vld [vmem:[%s1957_s28 + $0x184] ss:$16 sps:$4 sm:$0xff]   ;;  %v1757_v55 = vld [vmem:[%s1957_s28 + $0x180] ss:$16 sps:$4 sm:$0xff]   ;;  %v2031_v7 = vcombine.low %v335_v47, %v335_v47  ;;  %v1808_v26 = vld [vmem:[%s1957_s28 + $0x288] ss:$16 sps:$4 sm:$0xff]  }
  0x32   : > { %1132 = vmatpush1.bf16.msra.mxu0 %v1721_v27  ;;  %v1755_v54 = vld [vmem:[%s1957_s28 + $0x384] ss:$16 sps:$4 sm:$0xff]   ;;  %v1758_v56 = vld [vmem:[%s1957_s28 + $0x380] ss:$16 sps:$4 sm:$0xff]   ;;  %v1813_v27 = vld [vmem:[%s1957_s28 + $0xac] ss:$16 sps:$4 sm:$0xff]  }
  0x33   : > { %1173 = vmatpush1.bf16.msra.mxu1 %v1722_v28  ;;  %1133 = vmatprep.subr.bf16.mxu0 %v1723_v29  ;;  %v1759_v57 = vld [vmem:[%s1957_s28 + $0x1a4] ss:$16 sps:$4 sm:$0xff]   ;;  %v1763_v59 = vld [vmem:[%s1957_s28 + $0x1a0] ss:$16 sps:$4 sm:$0xff]   ;;  %v1816_v28 = vld [vmem:[%s1957_s28 + $0x2ac] ss:$16 sps:$4 sm:$0xff]  }
  0x34   : > { %1174 = vmatprep.subr.bf16.mxu1 %v1725_v30  ;;  %1151 = vmatprep.mubr.bf16.mxu0 %v2007_v48  ;;  %v1761_v58 = vld [vmem:[%s1957_s28 + $0x3a4] ss:$16 sps:$4 sm:$0xff]   ;;  %v1764_v60 = vld [vmem:[%s1957_s28 + $0x3a0] ss:$16 sps:$4 sm:$0xff]   ;;  %v1811_v29 = vld [vmem:[%s1957_s28 + $0xa8] ss:$16 sps:$4 sm:$0xff]  }
  0x35   : > { %v1765_v61 = vld [vmem:[%s1957_s28 + $0x1c4] ss:$16 sps:$4 sm:$0xff]   ;;  %v1769_v63 = vld [vmem:[%s1957_s28 + $0x1c0] ss:$16 sps:$4 sm:$0xff]   ;;  %v1814_v30 = vld [vmem:[%s1957_s28 + $0x2a8] ss:$16 sps:$4 sm:$0xff]  }
  0x36   : > { %1134 = vmatpush1.bf16.msra.mxu0 %v1727_v31  ;;  %v1767_v62 = vld [vmem:[%s1957_s28 + $0x3c4] ss:$16 sps:$4 sm:$0xff]   ;;  %v1770_v0 = vld [vmem:[%s1957_s28 + $0x3c0] ss:$16 sps:$4 sm:$0xff]   ;;  %v1819_v31 = vld [vmem:[%s1957_s28 + $0xcc] ss:$16 sps:$4 sm:$0xff]  }
  0x37   : > { %1175 = vmatpush1.bf16.msra.mxu1 %v1728_v32  ;;  %1135 = vmatprep.subr.bf16.mxu0 %v1729_v33  ;;  %v1771_v1 = vld [vmem:[%s1957_s28 + $0x1e4] ss:$16 sps:$4 sm:$0xff]   ;;  %v1775_v3 = vld [vmem:[%s1957_s28 + $0x1e0] ss:$16 sps:$4 sm:$0xff]   ;;  %v1822_v32 = vld [vmem:[%s1957_s28 + $0x2cc] ss:$16 sps:$4 sm:$0xff]  }
  0x38   : > { %1176 = vmatprep.subr.bf16.mxu1 %v1731_v34  ;;  %v1773_v2 = vld [vmem:[%s1957_s28 + $0x3e4] ss:$16 sps:$4 sm:$0xff]   ;;  %v1776_v4 = vld [vmem:[%s1957_s28 + $0x3e0] ss:$16 sps:$4 sm:$0xff]   ;;  %v1817_v33 = vld [vmem:[%s1957_s28 + $0xc8] ss:$16 sps:$4 sm:$0xff]  }
  0x39   : > { %v1820_v34 = vld [vmem:[%s1957_s28 + $0x2c8] ss:$16 sps:$4 sm:$0xff]   ;;  %v1843_v47 = vld [vmem:[%s1957_s28 + $0x14c] ss:$16 sps:$4 sm:$0xff]  }
  0x3a   : > { %1136 = vmatpush1.bf16.msra.mxu0 %v1733_v35  ;;  %v1825_v35 = vld [vmem:[%s1957_s28 + $0xec] ss:$16 sps:$4 sm:$0xff]  }
  0x3b   : > { %1177 = vmatpush1.bf16.msra.mxu1 %v1734_v36  ;;  %1137 = vmatprep.subr.bf16.mxu0 %v1735_v37  ;;  %v1828_v36 = vld [vmem:[%s1957_s28 + $0x2ec] ss:$16 sps:$4 sm:$0xff]   ;;  %v1823_v37 = vld [vmem:[%s1957_s28 + $0xe8] ss:$16 sps:$4 sm:$0xff]  }
  0x3c   : > { %1178 = vmatprep.subr.bf16.mxu1 %v1737_v38  ;;  %v1826_v38 = vld [vmem:[%s1957_s28 + $0x2e8] ss:$16 sps:$4 sm:$0xff]  }
  0x3e   : > { %1138 = vmatpush1.bf16.msra.mxu0 %v1739_v39  ;;  %v1831_v39 = vld [vmem:[%s1957_s28 + $0x10c] ss:$16 sps:$4 sm:$0xff]  }
  0x3f   : > { %1179 = vmatpush1.bf16.msra.mxu1 %v1740_v40  ;;  %1139 = vmatprep.subr.bf16.mxu0 %v1741_v41  ;;  %v1834_v40 = vld [vmem:[%s1957_s28 + $0x30c] ss:$16 sps:$4 sm:$0xff]   ;;  %v1829_v41 = vld [vmem:[%s1957_s28 + $0x108] ss:$16 sps:$4 sm:$0xff]  }
  0x40   : > { %1180 = vmatprep.subr.bf16.mxu1 %v1743_v42  ;;  %v1832_v42 = vld [vmem:[%s1957_s28 + $0x308] ss:$16 sps:$4 sm:$0xff]  }
  0x42   : > { %1140 = vmatpush1.bf16.msra.mxu0 %v1745_v43  ;;  %v1837_v43 = vld [vmem:[%s1957_s28 + $0x12c] ss:$16 sps:$4 sm:$0xff]  }
  0x43   : > { %1181 = vmatpush1.bf16.msra.mxu1 %v1746_v44  ;;  %1141 = vmatprep.subr.bf16.mxu0 %v1747_v45  ;;  %v1840_v44 = vld [vmem:[%s1957_s28 + $0x32c] ss:$16 sps:$4 sm:$0xff]   ;;  %v1835_v45 = vld [vmem:[%s1957_s28 + $0x128] ss:$16 sps:$4 sm:$0xff]  }
  0x44   : > { %1182 = vmatprep.subr.bf16.mxu1 %v1749_v46  ;;  %v1838_v46 = vld [vmem:[%s1957_s28 + $0x328] ss:$16 sps:$4 sm:$0xff]  }
  0x46   : > { %1142 = vmatpush1.bf16.msra.mxu0 %v1751_v50  ;;  %v1844_v50 = vld [vmem:[%s1957_s28 + $0x348] ss:$16 sps:$4 sm:$0xff]  }
  0x47   : > { %1183 = vmatpush1.bf16.msra.mxu1 %v1752_v51  ;;  %1143 = vmatprep.subr.bf16.mxu0 %v1753_v53  ;;  %v1849_v51 = vld [vmem:[%s1957_s28 + $0x16c] ss:$16 sps:$4 sm:$0xff]   ;;  %v1847_v53 = vld [vmem:[%s1957_s28 + $0x168] ss:$16 sps:$4 sm:$0xff]  }
  0x48   : > { %1184 = vmatprep.subr.bf16.mxu1 %v1755_v54  ;;  %v1850_v54 = vld [vmem:[%s1957_s28 + $0x368] ss:$16 sps:$4 sm:$0xff]  }
  0x4a   : > { %1144 = vmatpush1.bf16.msra.mxu0 %v1757_v55  ;;  %v1855_v55 = vld [vmem:[%s1957_s28 + $0x18c] ss:$16 sps:$4 sm:$0xff]  }
  0x4b   : > { %1185 = vmatpush1.bf16.msra.mxu1 %v1758_v56  ;;  %1145 = vmatprep.subr.bf16.mxu0 %v1759_v57  ;;  %v1858_v56 = vld [vmem:[%s1957_s28 + $0x38c] ss:$16 sps:$4 sm:$0xff]   ;;  %v1853_v57 = vld [vmem:[%s1957_s28 + $0x188] ss:$16 sps:$4 sm:$0xff]  }
  0x4c   : > { %1186 = vmatprep.subr.bf16.mxu1 %v1761_v58  ;;  %v1856_v58 = vld [vmem:[%s1957_s28 + $0x388] ss:$16 sps:$4 sm:$0xff]  }
  0x4e   : > { %1146 = vmatpush1.bf16.msra.mxu0 %v1763_v59  ;;  %v1861_v59 = vld [vmem:[%s1957_s28 + $0x1ac] ss:$16 sps:$4 sm:$0xff]  }
  0x4f   : > { %1187 = vmatpush1.bf16.msra.mxu1 %v1764_v60  ;;  %1147 = vmatprep.subr.bf16.mxu0 %v1765_v61  ;;  %v1864_v60 = vld [vmem:[%s1957_s28 + $0x3ac] ss:$16 sps:$4 sm:$0xff]   ;;  %v1859_v61 = vld [vmem:[%s1957_s28 + $0x1a8] ss:$16 sps:$4 sm:$0xff]  }
  0x50   : > { %1188 = vmatprep.subr.bf16.mxu1 %v1767_v62  ;;  %v1862_v62 = vld [vmem:[%s1957_s28 + $0x3a8] ss:$16 sps:$4 sm:$0xff]  }
  0x52   : > { %1148 = vmatpush1.bf16.msra.mxu0 %v1769_v63  ;;  %v1867_v63 = vld [vmem:[%s1957_s28 + $0x1cc] ss:$16 sps:$4 sm:$0xff]  }
  0x53   : > { %1189 = vmatpush1.bf16.msra.mxu1 %v1770_v0  ;;  %1149 = vmatprep.subr.bf16.mxu0 %v1771_v1  ;;  %v1870_v0 = vld [vmem:[%s1957_s28 + $0x3cc] ss:$16 sps:$4 sm:$0xff]   ;;  %v1865_v1 = vld [vmem:[%s1957_s28 + $0x1c8] ss:$16 sps:$4 sm:$0xff]  }
  0x54   : > { %1190 = vmatprep.subr.bf16.mxu1 %v1773_v2  ;;  %v1868_v2 = vld [vmem:[%s1957_s28 + $0x3c8] ss:$16 sps:$4 sm:$0xff]  }
  0x56   : > { %1150 = vmatpush1.bf16.msra.mxu0 %v1775_v3  ;;  %v1873_v3 = vld [vmem:[%s1957_s28 + $0x1ec] ss:$16 sps:$4 sm:$0xff]  }
  0x57   : > { %1191 = vmatpush1.bf16.msra.mxu1 %v1776_v4  ;;  %1201 = vmatprep.subr.bf16.mxu0 %v1783_v5  ;;  %v1876_v4 = vld [vmem:[%s1957_s28 + $0x3ec] ss:$16 sps:$4 sm:$0xff]   ;;  %v1871_v5 = vld [vmem:[%s1957_s28 + $0x1e8] ss:$16 sps:$4 sm:$0xff]  }
  0x58   : > { %1242 = vmatprep.subr.bf16.mxu1 %v1786_v6  ;;  %v1874_v6 = vld [vmem:[%s1957_s28 + $0x3e8] ss:$16 sps:$4 sm:$0xff]  }
  0x59   : > { %1152 = vmatmul.mubr.bf16.vlgmr.msra.gmra.mrb[0].mxu0 %v2031_v7 }
  0x5a   : > { %1193 = vmatmul.mubr.bf16.vlgmr.msra.gmra.mrb[0].mxu1 %v2033_v8  ;;  %1202 = vmatpush1.bf16.msra.mxu0 %v1781_v9 }
  0x5b   : > { %1243 = vmatpush1.bf16.msra.mxu1 %v1784_v10  ;;  %1203 = vmatprep.subr.bf16.mxu0 %v1789_v11  ;;  %v331_v10 = vld [vmem:[#allocation2] sm:$0xff] }
  0x5c   : > { %1244 = vmatprep.subr.bf16.mxu1 %v1792_v12  ;;  %1233 = vmatprep.mubr.bf16.mxu0 %v2007_v48  ;;  %v1846_v48 = vld [vmem:[%s1957_s28 + $0x34c] ss:$16 sps:$4 sm:$0xff]  }
  0x5d   : > { %1274 = vmatprep.mubr.bf16.mxu1 %v1517_v52  ;;  %v1852_v52 = vld [vmem:[%s1957_s28 + $0x36c] ss:$16 sps:$4 sm:$0xff]  }
  0x5e   : > { %1204 = vmatpush1.bf16.msra.mxu0 %v1787_v13 }
  0x5f   : > { %1245 = vmatpush1.bf16.msra.mxu1 %v1790_v14  ;;  %1205 = vmatprep.subr.bf16.mxu0 %v1795_v15  ;;  %v332_v14 = vld [vmem:[#allocation2 + $0x8] sm:$0xff] }
  0x60   : > { %1246 = vmatprep.subr.bf16.mxu1 %v1798_v16 }
  0x62   : > { %1206 = vmatpush1.bf16.msra.mxu0 %v1793_v17 }
  0x63   : > { %1247 = vmatpush1.bf16.msra.mxu1 %v1796_v18  ;;  %1207 = vmatprep.subr.bf16.mxu0 %v1801_v19 }
  0x64   : > { %1248 = vmatprep.subr.bf16.mxu1 %v1804_v20 }
  0x66   : > { %1208 = vmatpush1.bf16.msra.mxu0 %v1799_v21 }
  0x67   : > { %1249 = vmatpush1.bf16.msra.mxu1 %v1802_v22  ;;  %1209 = vmatprep.subr.bf16.mxu0 %v1807_v23 }
  0x68   : > { %1250 = vmatprep.subr.bf16.mxu1 %v1810_v24 }
  0x6a   : > { %1210 = vmatpush1.bf16.msra.mxu0 %v1805_v25 }
  0x6b   : > { %1251 = vmatpush1.bf16.msra.mxu1 %v1808_v26  ;;  %1211 = vmatprep.subr.bf16.mxu0 %v1813_v27  ;;  %v334_v26 = vld [vmem:[#allocation2 + $0x18] sm:$0xff] }
  0x6c   : > { %1252 = vmatprep.subr.bf16.mxu1 %v1816_v28 }
  0x6e   : > { %1212 = vmatpush1.bf16.msra.mxu0 %v1811_v29 }
  0x6f   : > { %1253 = vmatpush1.bf16.msra.mxu1 %v1814_v30  ;;  %1213 = vmatprep.subr.bf16.mxu0 %v1819_v31 }
  0x70   : > { %1254 = vmatprep.subr.bf16.mxu1 %v1822_v32 }
  0x72   : > { %1214 = vmatpush1.bf16.msra.mxu0 %v1817_v33 }
  0x73   : > { %1255 = vmatpush1.bf16.msra.mxu1 %v1820_v34  ;;  %1215 = vmatprep.subr.bf16.mxu0 %v1825_v35  ;;  %v1301_v35 = vlaneseq (!%p1646_p7) }
  0x74   : > { %1256 = vmatprep.subr.bf16.mxu1 %v1828_v36 }
  0x75   : > { %v1302_v36 = vshrl.u32 (!%p1646_p7), %v1301_v35, 7 }
  0x76   : > { %1216 = vmatpush1.bf16.msra.mxu0 %v1823_v37  ;;  %v1299_v37 = vld [vmem:[%s2126_s2] sm:$0xf] (!%p1646_p7) }
  0x77   : > { %1257 = vmatpush1.bf16.msra.mxu1 %v1826_v38  ;;  %1217 = vmatprep.subr.bf16.mxu0 %v1831_v39  ;;  %v1325_v38 = vld [vmem:[%s2127_s3] sm:$0xf] (!%p1646_p7)  ;;  %v1303_v39 = vsub.s32 (!%p1646_p7), 0, %v1302_v36 }
  0x78   : > { %1258 = vmatprep.subr.bf16.mxu1 %v1834_v40  ;;  %v1307_v40 = vsub.s32 (!%p1646_p7), 1, %v1302_v36 }
  0x7a   : > { %1218 = vmatpush1.bf16.msra.mxu0 %v1829_v41  ;;  %v1311_v41 = vsub.s32 (!%p1646_p7), 2, %v1302_v36 }
  0x7b   : > { %1259 = vmatpush1.bf16.msra.mxu1 %v1832_v42  ;;  %1219 = vmatprep.subr.bf16.mxu0 %v1837_v43  ;;  %v1315_v42 = vsub.s32 (!%p1646_p7), 3, %v1302_v36 }
  0x7c   : > { %1260 = vmatprep.subr.bf16.mxu1 %v1840_v44 }
  0x7e   : > { %1220 = vmatpush1.bf16.msra.mxu0 %v1835_v45  ;;  %v1304_v45 = vrot.slane (!%p1646_p7), %v1299_v37, %v1303_v39 }
  0x7f   : > { %1261 = vmatpush1.bf16.msra.mxu1 %v1838_v46  ;;  %1221 = vmatprep.subr.bf16.mxu0 %v1843_v47  ;;  %v1308_v46 = vrot.slane (!%p1646_p7), %v1299_v37, %v1307_v40  ;;  %v1330_v47 = vrot.slane (!%p1646_p7), %v1325_v38, %v1303_v39 }
  0x80   : > { %1262 = vmatprep.subr.bf16.mxu1 %v1846_v48  ;;  %v1334_v48 = vrot.slane (!%p1646_p7), %v1325_v38, %v1307_v40 }
  0x82   : > { %1222 = vmatpush1.bf16.msra.mxu0 %v1841_v49 }
  0x83   : > { %1263 = vmatpush1.bf16.msra.mxu1 %v1844_v50  ;;  %1223 = vmatprep.subr.bf16.mxu0 %v1849_v51  ;;  %v1312_v51 = vrot.slane (!%p1646_p7), %v1299_v37, %v1311_v41 }
  0x84   : > { %1264 = vmatprep.subr.bf16.mxu1 %v1852_v52  ;;  %v1316_v52 = vrot.slane (!%p1646_p7), %v1299_v37, %v1315_v42 }
  0x86   : > { %1224 = vmatpush1.bf16.msra.mxu0 %v1847_v53  ;;  %v1338_v53 = vrot.slane (!%p1646_p7), %v1325_v38, %v1311_v41 }
  0x87   : > { %1265 = vmatpush1.bf16.msra.mxu1 %v1850_v54  ;;  %1225 = vmatprep.subr.bf16.mxu0 %v1855_v55  ;;  %v1342_v54 = vrot.slane (!%p1646_p7), %v1325_v38, %v1315_v42 }
  0x88   : > { %1266 = vmatprep.subr.bf16.mxu1 %v1858_v56 }
  0x8a   : > { %1226 = vmatpush1.bf16.msra.mxu0 %v1853_v57 }
  0x8b   : > { %1267 = vmatpush1.bf16.msra.mxu1 %v1856_v58  ;;  %1227 = vmatprep.subr.bf16.mxu0 %v1861_v59 }
  0x8c   : > { %1268 = vmatprep.subr.bf16.mxu1 %v1864_v60 }
  0x8e   : > { %1228 = vmatpush1.bf16.msra.mxu0 %v1859_v61 }
  0x8f   : > { %1269 = vmatpush1.bf16.msra.mxu1 %v1862_v62  ;;  %1229 = vmatprep.subr.bf16.mxu0 %v1867_v63 }
  0x90   : > { %1270 = vmatprep.subr.bf16.mxu1 %v1870_v0 }
  0x92   : > { %1230 = vmatpush1.bf16.msra.mxu0 %v1865_v1 }
  0x93   : > { %1271 = vmatpush1.bf16.msra.mxu1 %v1868_v2  ;;  %1231 = vmatprep.subr.bf16.mxu0 %v1873_v3 }
  0x94   : > { %1272 = vmatprep.subr.bf16.mxu1 %v1876_v4 }
  0x96   : > { %1232 = vmatpush1.bf16.msra.mxu0 %v1871_v5 }
  0x97   : > { %1273 = vmatpush1.bf16.msra.mxu1 %v1874_v6 }
  0x99   : > { %1234 = vmatmul.mubr.bf16.vlgmr.msra.gmra.mrb[4].mxu0 %v2031_v7  ;;  %v333_v7 = vld [vmem:[#allocation2 + $0x10] sm:$0xff] }
  0x9a   : > { %1275 = vmatmul.mubr.bf16.vlgmr.msra.gmra.mrb[4].mxu1 %v2033_v8 }
 0x12c   : > { %v1153_v9 = vpop.f32.mrb[0].mxu0 }
 0x12d   : > { %v1194_v11 = vpop.f32.mrb[0].mxu1  ;;  %v1155_v13 = vpop.f32.mrb[1].mxu0 }
 0x12e   : > { %v1195_v12 = vadd.f32 %v1194_v11, %v1153_v9  ;;  %v1196_v15 = vpop.f32.mrb[1].mxu1  ;;  %v1157_v17 = vpop.f32.mrb[2].mxu0 }
 0x12f   : > { %v1197_v16 = vadd.f32 %v1196_v15, %v1155_v13  ;;  %v1198_v18 = vpop.f32.mrb[2].mxu1  ;;  %v1158_v20 = vpop.f32.mrb[3].mxu0 }
 0x130   : > { %v1283_v19 = vadd.f32 %v1195_v12, %v331_v10  ;;  %v1199_v21 = vpop.f32.mrb[3].mxu1 }
 0x131   : > { %v1284_v22 = vadd.f32 %v1197_v16, %v332_v14 }
 0x132   : > { %1287 = vst [vmem:[#allocation2] sm:$0xff] %v1283_v19 }
 0x133   : > { %1288 = vst [vmem:[#allocation2 + $0x8] sm:$0xff] %v1284_v22 }
 0x139   : > { %v1295_v43 = vld [vmem:[#allocation2] sm:$0xff] (!%p1646_p7) }
 0x13a   : > { %v1296_v44 = vld [vmem:[#allocation2 + $0x8] sm:$0xff] (!%p1646_p7)  ;;  %v1321_v55 = vmul.f32 (!%p1646_p7), %v1304_v45, %v1295_v43 }
 0x13b   : > { %v1322_v56 = vmul.f32 (!%p1646_p7), %v1308_v46, %v1296_v44 }
 0x13c   : > { %v1347_v59 = vadd.f32 (!%p1646_p7), %v1330_v47, %v1321_v55 }
 0x13d   : > { %v1348_v60 = vadd.f32 (!%p1646_p7), %v1334_v48, %v1322_v56 }
 0x13e   : > { %v1351_v63 = vmax.f32 (!%p1646_p7), %v1347_v59, 0.0 }
 0x13f   : > { %v1352_v0 = vmax.f32 (!%p1646_p7), %v1348_v60, 0.0 }
 0x141   : > { %v1654_v3 = vpack.c.bf16 (!%p1646_p7), %v1352_v0, %v1351_v63 }
 0x143   : > { %1371 = vst [vmem:[%s2128_s4] sm:$0xff] (!%p1646_p7), %v1654_v3 }
 0x16c   : > { %v1235_v23 = vpop.f32.mrb[4].mxu0 }
 0x16d   : > { %v1276_v24 = vpop.f32.mrb[4].mxu1  ;;  %v1237_v25 = vpop.f32.mrb[5].mxu0  ;;  %1294 = sbr.rel (%p1646_p7) target bundleno = 388 (0x184), region = 44 }
 0x16e   : > { %v1277_v8 = vadd.f32 %v1276_v24, %v1235_v23  ;;  %v1278_v27 = vpop.f32.mrb[5].mxu1  ;;  %v1239_v29 = vpop.f32.mrb[6].mxu0 }
 0x16f   : > { %v1279_v28 = vadd.f32 %v1278_v27, %v1237_v25  ;;  %v1280_v30 = vpop.f32.mrb[6].mxu1  ;;  %v1240_v32 = vpop.f32.mrb[7].mxu0 }
 0x170   : > { %v1285_v31 = vadd.f32 %v1277_v8, %v333_v7  ;;  %v1281_v33 = vpop.f32.mrb[7].mxu1 }
 0x171   : > { %v1286_v34 = vadd.f32 %v1279_v28, %v334_v26 }
 0x172   : > { %1289 = vst [vmem:[#allocation2 + $0x10] sm:$0xff] %v1285_v31 }
 0x173   : > { %1290 = vst [vmem:[#allocation2 + $0x18] sm:$0xff] %v1286_v34 }
 0x179   : > { %v1297_v49 = vld [vmem:[#allocation2 + $0x10] sm:$0xff] }
 0x17a   : > { %v1298_v50 = vld [vmem:[#allocation2 + $0x18] sm:$0xff]  ;;  %v1323_v57 = vmul.f32 %v1312_v51, %v1297_v49 }
 0x17b   : > { %v1324_v58 = vmul.f32 %v1316_v52, %v1298_v50 }
 0x17c   : > { %v1349_v61 = vadd.f32 %v1338_v53, %v1323_v57 }
 0x17d   : > { %v1350_v62 = vadd.f32 %v1342_v54, %v1324_v58 }
 0x17e   : > { %v1353_v1 = vmax.f32 %v1349_v61, 0.0 }
 0x17f   : > { %v1354_v2 = vmax.f32 %v1350_v62, 0.0 }
 0x181   : > { %v1655_v4 = vpack.c.bf16 %v1354_v2, %v1353_v1 }
 0x183   : > { %1372 = vst [vmem:[%s2128_s4 + $0x8] sm:$0xff] %v1655_v4 }
 0x184 PF: > { %s14_s17 = sadd.s32 1, %s1899_s17   ;;  %s2129_s15 = smov %s1895_s16 }
 0x185   : > { %p11_p8 = scmp.ge.s32.totalorder %s14_s17, 11   ;;  %s2130_s16 = smov %s2132_s18 }
 0x187   :  { %13 = sbr.rel (!%p11_p8) target bundleno = 2 (0x2), region = 83 }

</bundles_post_ra>
